<compile_context>
chip_gen: v7x
topology: tpu7x:2x2x1
jax: 0.10.0
libtpu: 0.0.40
codegen_flags: <defaults>
</compile_context>

<pallas_src>
import functools

import jax
import jax.numpy as jnp
import numpy as np
from jax.experimental import pallas as pl
from jax.experimental.pallas import tpu as pltpu

LEAKY_SLOPE = 0.2
GN_EPS = 1e-5
NUM_GROUPS = 2
KSIZE = 3


def _round_up(x, m):
    return ((x + m - 1) // m) * m


# ---------------------------------------------------------------------------
# In-kernel helpers (pure functions on loaded values; all shapes static).
# ---------------------------------------------------------------------------
def _conv3x3_taps(x, w_ref, wp, s_out, x_b=None, w_b_ref=None):
    """3x3 'same' conv over a flattened zero-padded buffer as 9 matmuls.

    x:     (S_pad, Cin)   zero-padded input, flattened row-major over (Hp, Wp)
    w_ref: (9, Cin, Cout) per-tap weights, tap index = kh*3 + kw
    Returns (s_out, Cout) f32.  Row r = i*wp + j is a valid output pixel for
    j < wp - 2.  Optionally accumulates a second (x_b, w_b) pair, which
    implements a channel-concat input as a split-weight sum.
    """
    acc = None
    for kh in range(KSIZE):
        for kw in range(KSIZE):
            t = kh * KSIZE + kw
            off = kh * wp + kw
            y = jnp.dot(x[off:off + s_out, :], w_ref[t],
                        preferred_element_type=jnp.float32)
            if x_b is not None:
                y = y + jnp.dot(x_b[off:off + s_out, :], w_b_ref[t],
                                preferred_element_type=jnp.float32)
            acc = y if acc is None else acc + y
    return acc


def _gn2_leaky(acc, bias, gamma, beta, valid, n_valid, c_out):
    """GroupNorm(2 groups) + LeakyReLU(0.2) on a (S, C) f32 conv result.

    Conv bias is folded into the moments and the final affine, so the epilogue
    is one FMA sweep + one select over the (S, C) tile.  `valid` is an (S, 1)
    0/1 mask selecting real output pixels (garbage columns excluded).
    """
    cg = c_out // NUM_GROUPS
    cnt = float(n_valid * cg)

    accm = acc * valid
    s1 = jnp.sum(accm, axis=0, keepdims=True)            # (1, C)  sum(y)
    s2 = jnp.sum(accm * accm, axis=0, keepdims=True)     # (1, C)  sum(y^2)
    # moments of (y + b) over valid rows, per channel
    s1b = s1 + n_valid * bias
    s2b = s2 + 2.0 * bias * s1 + n_valid * bias * bias

    cid = jax.lax.broadcasted_iota(jnp.int32, (1, c_out), 1)
    m0 = (cid < cg).astype(jnp.float32)                  # group-0 channel mask
    m1 = 1.0 - m0

    mean0 = jnp.sum(s1b * m0, axis=1, keepdims=True) / cnt
    mean1 = jnp.sum(s1b * m1, axis=1, keepdims=True) / cnt
    ex2_0 = jnp.sum(s2b * m0, axis=1, keepdims=True) / cnt
    ex2_1 = jnp.sum(s2b * m1, axis=1, keepdims=True) / cnt
    inv0 = jax.lax.rsqrt(ex2_0 - mean0 * mean0 + GN_EPS)
    inv1 = jax.lax.rsqrt(ex2_1 - mean1 * mean1 + GN_EPS)

    mean_c = mean0 * m0 + mean1 * m1                     # (1, C)
    inv_c = inv0 * m0 + inv1 * m1                        # (1, C)
    scale = inv_c * gamma                                # (1, C)
    shift = beta + (bias - mean_c) * scale               # (1, C)

    yn = acc * scale + shift      # == ((y + b) - mean) * inv * gamma + beta
    return jnp.where(yn > 0, yn, LEAKY_SLOPE * yn)


# ---------------------------------------------------------------------------
# Kernels
# ---------------------------------------------------------------------------
def _convsc_kernel(xpad_ref, w_ref, b_ref, g_ref, be_ref, valid_ref, o_ref,
                   *, wp, s_out, n_valid, c_out):
    """One ConvSC (stride 1): 9-tap conv + GroupNorm(2) + LeakyReLU, one sample."""
    acc = _conv3x3_taps(xpad_ref[0], w_ref, wp, s_out)
    y = _gn2_leaky(acc, b_ref[...], g_ref[...], be_ref[...],
                   valid_ref[...], n_valid, c_out)
    o_ref[0] = y.astype(o_ref.dtype)


def _dec_fused_kernel(in2_ref, skip1_ref, w2_ref, b2_ref, g2_ref, be2_ref,
                      w1a_ref, w1b_ref, b1_ref, g1_ref, be1_ref,
                      ro_w_ref, ro_b_ref, valid_ref,
                      yf_ref, m_ref, buf_ref,
                      *, wp, s_out, n_valid, c_hid, c_in):
    """Fused dec2 (transposed conv) + dec1 + both 1x1 readouts, one sample."""
    valid = valid_ref[...]                                    # (s_out, 1)

    # -- dec2: ConvTranspose(s=2) == 3x3 conv over the dilated+padded input --
    acc2 = _conv3x3_taps(in2_ref[0], w2_ref, wp, s_out)
    d2 = _gn2_leaky(acc2, b2_ref[...], g2_ref[...], be2_ref[...],
                    valid, n_valid, c_hid)                    # (s_out, C)

    # -- re-pad dec2 for dec1's conv: masked rows written at offset wp+1 into a
    #    zeroed flattened buffer reproduce the zero border exactly. --
    buf_ref[...] = jnp.zeros_like(buf_ref)
    buf_ref[pl.ds(wp + 1, s_out), :] = (d2 * valid).astype(buf_ref.dtype)

    # -- dec1: conv over cat([dec2, skip1], channel) as a split-weight sum --
    acc1 = _conv3x3_taps(buf_ref[...], w1a_ref, wp, s_out,
                         x_b=skip1_ref[0], w_b_ref=w1b_ref)
    d1 = _gn2_leaky(acc1, b1_ref[...], g1_ref[...], be1_ref[...],
                    valid, n_valid, c_hid)                    # (s_out, C)

    # -- 1x1 readouts, lane-dense: the s_out spatial axis sits in lanes --
    d1_t = jnp.transpose(d1)                                  # (C, s_out)
    ro = jnp.dot(ro_w_ref[...], d1_t,
                 preferred_element_type=jnp.float32) + ro_b_ref[...]
    yf_ref[0] = ro[:c_in, :]
    logit = ro[c_in:c_in + 1, :]
    m_ref[0] = 1.0 / (1.0 + jnp.exp(-logit))                  # sigmoid


# ---------------------------------------------------------------------------
# Wrapper-level (XLA glue on tiny tensors only: pad / dilate / concat / crop)
# ---------------------------------------------------------------------------
def _conv_w_to_taps(w_oihw):
    co, ci, kh, kw = w_oihw.shape
    return jnp.transpose(w_oihw, (2, 3, 1, 0)).reshape(kh * kw, ci, co)


def _convT_w_to_taps(w_iohw):
    # ConvTranspose2d(k=3, s=2, p=1, op=1) == regular 3x3 conv over the
    # zero-dilated, (1 top/left, 2 bottom/right)-padded input with the
    # spatially flipped, channel-swapped weight.
    w_eq = jnp.transpose(jnp.flip(w_iohw, axis=(2, 3)), (1, 0, 2, 3))
    return _conv_w_to_taps(w_eq)


def _valid_mask(h, w):
    wp = w + 2
    m = np.zeros((h * wp, 1), np.float32)
    m.reshape(h, wp, 1)[:, :w, :] = 1.0
    return jnp.asarray(m)


def _pad_border_flat(x_nhwc, s_pad):
    n, h, w, c = x_nhwc.shape
    xp = jnp.pad(x_nhwc, ((0, 0), (1, 1), (1, 1), (0, 0)))
    flat = xp.reshape(n, (h + 2) * (w + 2), c)
    return jnp.pad(flat, ((0, 0), (0, s_pad - flat.shape[1]), (0, 0)))


def _dilate_pad_flat(x_nhwc, s_pad):
    # zero-dilate by 2, pad (1 top/left, 2 bottom/right): (h, w) -> (2h+2, 2w+2)
    n, h, w, c = x_nhwc.shape
    cfg = ((0, 0, 0), (1, 2, 1), (1, 2, 1), (0, 0, 0))
    xp = jax.lax.pad(x_nhwc, jnp.zeros((), x_nhwc.dtype), cfg)
    hp, wp = xp.shape[1], xp.shape[2]
    flat = xp.reshape(n, hp * wp, c)
    return jnp.pad(flat, ((0, 0), (0, s_pad - flat.shape[1]), (0, 0)))


def decoder_shallow(hid_nchw, skip, params, c_in, c_hid):
    """DecoderShallow (unet=True).  hid: (N, 2C, H/2, W/2) NCHW,
    skip = [skip0 (N, 2C, H/2, W/2), skip1 (N, C, H, W)].
    Returns (Y_f (N, C_in, H, W), mask (N, 1, H, W)) in NCHW."""
    skip0_nchw, skip1_nchw = skip
    n, _, h2, w2 = hid_nchw.shape
    h, w = 2 * h2, 2 * w2
    c2 = 2 * c_hid
    bf16 = jnp.bfloat16

    # NCHW -> NHWC once at the boundary (tiny inputs); outputs come out NCHW
    # directly from the lane-dense kernel layout (no output transpose).
    hid = jnp.transpose(hid_nchw, (0, 2, 3, 1))
    skip0 = jnp.transpose(skip0_nchw, (0, 2, 3, 1))
    skip1 = jnp.transpose(skip1_nchw, (0, 2, 3, 1))

    w2p_s = w2 + 2                      # padded width at dec3 resolution
    s2_out = h2 * w2p_s
    s2_pad = _round_up((h2 + 2) * w2p_s + 2, 8)

    wp = w + 2                          # padded width at full resolution
    s_out = h * wp
    s_pad = _round_up((h + 2) * wp + 2, 8)

    # ---------------- stage 1: dec3 ----------------------------------------
    x3 = _pad_border_flat(hid, s2_pad).astype(bf16)            # (N, s2_pad, 2C)
    w3_taps = _conv_w_to_taps(params["w3"]).astype(bf16)       # (9, 2C, 2C)

    dec3_kernel = functools.partial(_convsc_kernel, wp=w2p_s, s_out=s2_out,
                                    n_valid=float(h2 * w2), c_out=c2)
    d3_flat = pl.pallas_call(
        dec3_kernel,
        out_shape=jax.ShapeDtypeStruct((n, s2_out, c2), bf16),
        grid=(n,),
        in_specs=[
            pl.BlockSpec((1, s2_pad, c2), lambda i: (i, 0, 0)),
            pl.BlockSpec((9, c2, c2), lambda i: (0, 0, 0)),
            pl.BlockSpec((1, c2), lambda i: (0, 0)),
            pl.BlockSpec((1, c2), lambda i: (0, 0)),
            pl.BlockSpec((1, c2), lambda i: (0, 0)),
            pl.BlockSpec((s2_out, 1), lambda i: (0, 0)),
        ],
        out_specs=pl.BlockSpec((1, s2_out, c2), lambda i: (i, 0, 0)),
        compiler_params=pltpu.CompilerParams(
            dimension_semantics=("parallel",)),
    )(x3, w3_taps, params["b3"], params["g3"], params["be3"],
      _valid_mask(h2, w2))

    # drop the 2 garbage columns per row -> (N, h2, w2, 2C)
    d3 = d3_flat.reshape(n, h2, w2p_s, c2)[:, :, :w2, :]

    # ---------------- stage 2: dec2 + dec1 + readouts (fused) ---------------
    x2 = jnp.concatenate([d3, skip0.astype(bf16)], axis=-1)    # (N, h2, w2, 4C)
    in2 = _dilate_pad_flat(x2, s_pad)                          # (N, s_pad, 4C)
    sk1 = _pad_border_flat(skip1, s_pad).astype(bf16)          # (N, s_pad, C)

    w2_taps = _convT_w_to_taps(params["w2t"]).astype(bf16)     # (9, 4C, C)
    w1_taps = _conv_w_to_taps(params["w1"])                    # (9, 2C, C)
    w1a = w1_taps[:, :c_hid, :].astype(bf16)                   # dec2 channels
    w1b = w1_taps[:, c_hid:, :].astype(bf16)                   # skip1 channels

    ro_w = jnp.concatenate([params["wf"], params["wm"]], axis=0)       # (C_in+1, C)
    ro_b = jnp.concatenate([params["bf"], params["bm"]], axis=0)[:, None]

    fused_kernel = functools.partial(_dec_fused_kernel, wp=wp, s_out=s_out,
                                     n_valid=float(h * w), c_hid=c_hid,
                                     c_in=c_in)
    yf_flat, m_flat = pl.pallas_call(
        fused_kernel,
        out_shape=(jax.ShapeDtypeStruct((n, c_in, s_out), jnp.float32),
                   jax.ShapeDtypeStruct((n, 1, s_out), jnp.float32)),
        grid=(n,),
        in_specs=[
            pl.BlockSpec((1, s_pad, 2 * c2), lambda i: (i, 0, 0)),     # in2
            pl.BlockSpec((1, s_pad, c_hid), lambda i: (i, 0, 0)),      # skip1
            pl.BlockSpec((9, 2 * c2, c_hid), lambda i: (0, 0, 0)),     # w2 taps
            pl.BlockSpec((1, c_hid), lambda i: (0, 0)),                # b2
            pl.BlockSpec((1, c_hid), lambda i: (0, 0)),                # g2
            pl.BlockSpec((1, c_hid), lambda i: (0, 0)),                # be2
            pl.BlockSpec((9, c_hid, c_hid), lambda i: (0, 0, 0)),      # w1a taps
            pl.BlockSpec((9, c_hid, c_hid), lambda i: (0, 0, 0)),      # w1b taps
            pl.BlockSpec((1, c_hid), lambda i: (0, 0)),                # b1
            pl.BlockSpec((1, c_hid), lambda i: (0, 0)),                # g1
            pl.BlockSpec((1, c_hid), lambda i: (0, 0)),                # be1
            pl.BlockSpec((c_in + 1, c_hid), lambda i: (0, 0)),         # readout W
            pl.BlockSpec((c_in + 1, 1), lambda i: (0, 0)),             # readout b
            pl.BlockSpec((s_out, 1), lambda i: (0, 0)),                # valid mask
        ],
        out_specs=(pl.BlockSpec((1, c_in, s_out), lambda i: (i, 0, 0)),
                   pl.BlockSpec((1, 1, s_out), lambda i: (i, 0, 0))),
        scratch_shapes=[pltpu.VMEM((s_pad, c_hid), bf16)],
        compiler_params=pltpu.CompilerParams(
            dimension_semantics=("parallel",)),
    )(in2, sk1, w2_taps, params["b2"], params["g2"], params["be2"],
      w1a, w1b, params["b1"], params["g1"], params["be1"],
      ro_w, ro_b, _valid_mask(h, w))

    # lane-dense (C, H*Wp) -> NCHW, cropping the 2 garbage columns per row.
    y_f = yf_flat.reshape(n, c_in, h, wp)[:, :, :, :w]
    mask = m_flat.reshape(n, 1, h, wp)[:, :, :, :w]
    return y_f, mask


# ---------------------------------------------------------------------------
# Parameter init (mimics PyTorch defaults: uniform +/- 1/sqrt(fan_in); GN affine
# gamma=1, beta=0).
# ---------------------------------------------------------------------------
def _uniform(key, shape, fan_in):
    bound = 1.0 / float(np.sqrt(fan_in))
    return jax.random.uniform(key, shape, jnp.float32, -bound, bound)


def init_decoder_shallow(key, c_in, c_hid):
    c2 = 2 * c_hid
    ks = jax.random.split(key, 10)
    return {
        # dec3: Conv2d(2C, 2C, 3, s=1, p=1) + GN(2, 2C)
        "w3": _uniform(ks[0], (c2, c2, 3, 3), c2 * 9),
        "b3": _uniform(ks[1], (1, c2), c2 * 9),
        "g3": jnp.ones((1, c2), jnp.float32),
        "be3": jnp.zeros((1, c2), jnp.float32),
        # dec2: ConvTranspose2d(4C, C, 3, s=2, p=1, op=1) + GN(2, C)
        "w2t": _uniform(ks[2], (2 * c2, c_hid, 3, 3), c_hid * 9),
        "b2": _uniform(ks[3], (1, c_hid), c_hid * 9),
        "g2": jnp.ones((1, c_hid), jnp.float32),
        "be2": jnp.zeros((1, c_hid), jnp.float32),
        # dec1: Conv2d(2C, C, 3, s=1, p=1) + GN(2, C)
        "w1": _uniform(ks[4], (c_hid, c2, 3, 3), c2 * 9),
        "b1": _uniform(ks[5], (1, c_hid), c2 * 9),
        "g1": jnp.ones((1, c_hid), jnp.float32),
        "be1": jnp.zeros((1, c_hid), jnp.float32),
        # readout_f: Conv2d(C, C_in, 1);  readout_m: Conv2d(C, 1, 1)
        "wf": _uniform(ks[6], (c_in, c_hid), c_hid),
        "bf": _uniform(ks[7], (c_in,), c_hid),
        "wm": _uniform(ks[8], (1, c_hid), c_hid),
        "bm": _uniform(ks[9], (1,), c_hid),
    }


if __name__ == "__main__":
    key = jax.random.PRNGKey(0)
    k_h, k_s0, k_s1, k_p = jax.random.split(key, 4)

    N, C_in, C_hid, H, W = 2, 4, 8, 16, 16
    H2, W2 = H // 2, W // 2

    hid = jax.random.normal(k_h, (N, 2 * C_hid, H2, W2), jnp.float32)
    skip0 = jax.random.normal(k_s0, (N, 2 * C_hid, H2, W2), jnp.float32)
    skip1 = jax.random.normal(k_s1, (N, C_hid, H, W), jnp.float32)

    params = init_decoder_shallow(k_p, C_in, C_hid)

    fwd = jax.jit(functools.partial(decoder_shallow, c_in=C_in, c_hid=C_hid))
    y_f, mask = fwd(hid, [skip0, skip1], params)
    jax.block_until_ready((y_f, mask))

    assert y_f.shape == (N, C_in, H, W)
    assert mask.shape == (N, 1, H, W)
    assert bool(jnp.all(jnp.isfinite(y_f)))
    assert bool(jnp.all((mask >= 0.0) & (mask <= 1.0)))
    print("KERNEL_OK")
</pallas_src>

<mosaic_0001>
module attributes {stable_mosaic.version = 11 : i64} {
  func.func @_convsc_kernel(%arg0: i32, %arg1: memref<1x104x16xbf16, #tpu.memory_space<vmem>>, %arg2: memref<9x16x16xbf16, #tpu.memory_space<vmem>>, %arg3: memref<1x16xf32, #tpu.memory_space<vmem>>, %arg4: memref<1x16xf32, #tpu.memory_space<vmem>>, %arg5: memref<1x16xf32, #tpu.memory_space<vmem>>, %arg6: memref<80x1xf32, #tpu.memory_space<vmem>>, %arg7: memref<1x80x16xbf16, #tpu.memory_space<vmem>>) attributes {dimension_semantics = [#tpu.dimension_semantics<parallel>], iteration_bounds = array<i64: 2>, scalar_prefetch = 0 : i64, scratch_operands = 0 : i64, tpu.core_type = #tpu.core_type<tc>, window_params = [{transform_indices = @transform_0, window_bounds = array<i64: 1, 104, 16>}, {pipeline_mode = #tpu.pipeline_mode<synchronous>, transform_indices = @transform_1, window_bounds = array<i64: 9, 16, 16>}, {pipeline_mode = #tpu.pipeline_mode<synchronous>, transform_indices = @transform_2, window_bounds = array<i64: 1, 16>}, {pipeline_mode = #tpu.pipeline_mode<synchronous>, transform_indices = @transform_3, window_bounds = array<i64: 1, 16>}, {pipeline_mode = #tpu.pipeline_mode<synchronous>, transform_indices = @transform_4, window_bounds = array<i64: 1, 16>}, {pipeline_mode = #tpu.pipeline_mode<synchronous>, transform_indices = @transform_5, window_bounds = array<i64: 80, 1>}, {transform_indices = @transform_6, window_bounds = array<i64: 1, 80, 16>}]} {
    %c0 = arith.constant 0 : index
    %c0_0 = arith.constant 0 : index
    %c0_1 = arith.constant 0 : index
    %0 = vector.load %arg1[%c0, %c0_0, %c0_1] : memref<1x104x16xbf16, #tpu.memory_space<vmem>>, vector<1x104x16xbf16>
    %1 = vector.shape_cast %0 : vector<1x104x16xbf16> to vector<104x16xbf16>
    %2 = vector.extract_strided_slice %1 {offsets = [0, 0], sizes = [80, 16], strides = [1, 1]} : vector<104x16xbf16> to vector<80x16xbf16>
    %c0_2 = arith.constant 0 : index
    %c0_3 = arith.constant 0 : index
    %c0_4 = arith.constant 0 : index
    %3 = vector.load %arg2[%c0_2, %c0_3, %c0_4] : memref<9x16x16xbf16, #tpu.memory_space<vmem>>, vector<1x16x16xbf16>
    %4 = vector.shape_cast %3 : vector<1x16x16xbf16> to vector<16x16xbf16>
    %cst = arith.constant dense<0.000000e+00> : vector<80x16xf32>
    %5 = tpu.matmul %2, %4, %cst {dimension_numbers = #tpu.dot_dimension_numbers<[1], [0], [0], [1], [0, 0, 1, 1], [], []>} : vector<80x16xbf16>, vector<16x16xbf16>, vector<80x16xf32> -> vector<80x16xf32>
    %6 = vector.extract_strided_slice %1 {offsets = [1, 0], sizes = [80, 16], strides = [1, 1]} : vector<104x16xbf16> to vector<80x16xbf16>
    %c1 = arith.constant 1 : index
    %c0_5 = arith.constant 0 : index
    %c0_6 = arith.constant 0 : index
    %7 = vector.load %arg2[%c1, %c0_5, %c0_6] : memref<9x16x16xbf16, #tpu.memory_space<vmem>>, vector<1x16x16xbf16>
    %8 = vector.shape_cast %7 : vector<1x16x16xbf16> to vector<16x16xbf16>
    %cst_7 = arith.constant dense<0.000000e+00> : vector<80x16xf32>
    %9 = tpu.matmul %6, %8, %cst_7 {dimension_numbers = #tpu.dot_dimension_numbers<[1], [0], [0], [1], [0, 0, 1, 1], [], []>} : vector<80x16xbf16>, vector<16x16xbf16>, vector<80x16xf32> -> vector<80x16xf32>
    %10 = arith.addf %5, %9 : vector<80x16xf32>
    %11 = vector.extract_strided_slice %1 {offsets = [2, 0], sizes = [80, 16], strides = [1, 1]} : vector<104x16xbf16> to vector<80x16xbf16>
    %c2 = arith.constant 2 : index
    %c0_8 = arith.constant 0 : index
    %c0_9 = arith.constant 0 : index
    %12 = vector.load %arg2[%c2, %c0_8, %c0_9] : memref<9x16x16xbf16, #tpu.memory_space<vmem>>, vector<1x16x16xbf16>
    %13 = vector.shape_cast %12 : vector<1x16x16xbf16> to vector<16x16xbf16>
    %cst_10 = arith.constant dense<0.000000e+00> : vector<80x16xf32>
    %14 = tpu.matmul %11, %13, %cst_10 {dimension_numbers = #tpu.dot_dimension_numbers<[1], [0], [0], [1], [0, 0, 1, 1], [], []>} : vector<80x16xbf16>, vector<16x16xbf16>, vector<80x16xf32> -> vector<80x16xf32>
    %15 = arith.addf %10, %14 : vector<80x16xf32>
    %16 = vector.extract_strided_slice %1 {offsets = [10, 0], sizes = [80, 16], strides = [1, 1]} : vector<104x16xbf16> to vector<80x16xbf16>
    %c3 = arith.constant 3 : index
    %c0_11 = arith.constant 0 : index
    %c0_12 = arith.constant 0 : index
    %17 = vector.load %arg2[%c3, %c0_11, %c0_12] : memref<9x16x16xbf16, #tpu.memory_space<vmem>>, vector<1x16x16xbf16>
    %18 = vector.shape_cast %17 : vector<1x16x16xbf16> to vector<16x16xbf16>
    %cst_13 = arith.constant dense<0.000000e+00> : vector<80x16xf32>
    %19 = tpu.matmul %16, %18, %cst_13 {dimension_numbers = #tpu.dot_dimension_numbers<[1], [0], [0], [1], [0, 0, 1, 1], [], []>} : vector<80x16xbf16>, vector<16x16xbf16>, vector<80x16xf32> -> vector<80x16xf32>
    %20 = arith.addf %15, %19 : vector<80x16xf32>
    %21 = vector.extract_strided_slice %1 {offsets = [11, 0], sizes = [80, 16], strides = [1, 1]} : vector<104x16xbf16> to vector<80x16xbf16>
    %c4 = arith.constant 4 : index
    %c0_14 = arith.constant 0 : index
    %c0_15 = arith.constant 0 : index
    %22 = vector.load %arg2[%c4, %c0_14, %c0_15] : memref<9x16x16xbf16, #tpu.memory_space<vmem>>, vector<1x16x16xbf16>
    %23 = vector.shape_cast %22 : vector<1x16x16xbf16> to vector<16x16xbf16>
    %cst_16 = arith.constant dense<0.000000e+00> : vector<80x16xf32>
    %24 = tpu.matmul %21, %23, %cst_16 {dimension_numbers = #tpu.dot_dimension_numbers<[1], [0], [0], [1], [0, 0, 1, 1], [], []>} : vector<80x16xbf16>, vector<16x16xbf16>, vector<80x16xf32> -> vector<80x16xf32>
    %25 = arith.addf %20, %24 : vector<80x16xf32>
    %26 = vector.extract_strided_slice %1 {offsets = [12, 0], sizes = [80, 16], strides = [1, 1]} : vector<104x16xbf16> to vector<80x16xbf16>
    %c5 = arith.constant 5 : index
    %c0_17 = arith.constant 0 : index
    %c0_18 = arith.constant 0 : index
    %27 = vector.load %arg2[%c5, %c0_17, %c0_18] : memref<9x16x16xbf16, #tpu.memory_space<vmem>>, vector<1x16x16xbf16>
    %28 = vector.shape_cast %27 : vector<1x16x16xbf16> to vector<16x16xbf16>
    %cst_19 = arith.constant dense<0.000000e+00> : vector<80x16xf32>
    %29 = tpu.matmul %26, %28, %cst_19 {dimension_numbers = #tpu.dot_dimension_numbers<[1], [0], [0], [1], [0, 0, 1, 1], [], []>} : vector<80x16xbf16>, vector<16x16xbf16>, vector<80x16xf32> -> vector<80x16xf32>
    %30 = arith.addf %25, %29 : vector<80x16xf32>
    %31 = vector.extract_strided_slice %1 {offsets = [20, 0], sizes = [80, 16], strides = [1, 1]} : vector<104x16xbf16> to vector<80x16xbf16>
    %c6 = arith.constant 6 : index
    %c0_20 = arith.constant 0 : index
    %c0_21 = arith.constant 0 : index
    %32 = vector.load %arg2[%c6, %c0_20, %c0_21] : memref<9x16x16xbf16, #tpu.memory_space<vmem>>, vector<1x16x16xbf16>
    %33 = vector.shape_cast %32 : vector<1x16x16xbf16> to vector<16x16xbf16>
    %cst_22 = arith.constant dense<0.000000e+00> : vector<80x16xf32>
    %34 = tpu.matmul %31, %33, %cst_22 {dimension_numbers = #tpu.dot_dimension_numbers<[1], [0], [0], [1], [0, 0, 1, 1], [], []>} : vector<80x16xbf16>, vector<16x16xbf16>, vector<80x16xf32> -> vector<80x16xf32>
    %35 = arith.addf %30, %34 : vector<80x16xf32>
    %36 = vector.extract_strided_slice %1 {offsets = [21, 0], sizes = [80, 16], strides = [1, 1]} : vector<104x16xbf16> to vector<80x16xbf16>
    %c7 = arith.constant 7 : index
    %c0_23 = arith.constant 0 : index
    %c0_24 = arith.constant 0 : index
    %37 = vector.load %arg2[%c7, %c0_23, %c0_24] : memref<9x16x16xbf16, #tpu.memory_space<vmem>>, vector<1x16x16xbf16>
    %38 = vector.shape_cast %37 : vector<1x16x16xbf16> to vector<16x16xbf16>
    %cst_25 = arith.constant dense<0.000000e+00> : vector<80x16xf32>
    %39 = tpu.matmul %36, %38, %cst_25 {dimension_numbers = #tpu.dot_dimension_numbers<[1], [0], [0], [1], [0, 0, 1, 1], [], []>} : vector<80x16xbf16>, vector<16x16xbf16>, vector<80x16xf32> -> vector<80x16xf32>
    %40 = arith.addf %35, %39 : vector<80x16xf32>
    %41 = vector.extract_strided_slice %1 {offsets = [22, 0], sizes = [80, 16], strides = [1, 1]} : vector<104x16xbf16> to vector<80x16xbf16>
    %c8 = arith.constant 8 : index
    %c0_26 = arith.constant 0 : index
    %c0_27 = arith.constant 0 : index
    %42 = vector.load %arg2[%c8, %c0_26, %c0_27] : memref<9x16x16xbf16, #tpu.memory_space<vmem>>, vector<1x16x16xbf16>
    %43 = vector.shape_cast %42 : vector<1x16x16xbf16> to vector<16x16xbf16>
    %cst_28 = arith.constant dense<0.000000e+00> : vector<80x16xf32>
    %44 = tpu.matmul %41, %43, %cst_28 {dimension_numbers = #tpu.dot_dimension_numbers<[1], [0], [0], [1], [0, 0, 1, 1], [], []>} : vector<80x16xbf16>, vector<16x16xbf16>, vector<80x16xf32> -> vector<80x16xf32>
    %45 = arith.addf %40, %44 : vector<80x16xf32>
    %c0_29 = arith.constant 0 : index
    %c0_30 = arith.constant 0 : index
    %46 = vector.load %arg3[%c0_29, %c0_30] : memref<1x16xf32, #tpu.memory_space<vmem>>, vector<1x16xf32>
    %c0_31 = arith.constant 0 : index
    %c0_32 = arith.constant 0 : index
    %47 = vector.load %arg4[%c0_31, %c0_32] : memref<1x16xf32, #tpu.memory_space<vmem>>, vector<1x16xf32>
    %c0_33 = arith.constant 0 : index
    %c0_34 = arith.constant 0 : index
    %48 = vector.load %arg5[%c0_33, %c0_34] : memref<1x16xf32, #tpu.memory_space<vmem>>, vector<1x16xf32>
    %c0_35 = arith.constant 0 : index
    %c0_36 = arith.constant 0 : index
    %49 = vector.load %arg6[%c0_35, %c0_36] : memref<80x1xf32, #tpu.memory_space<vmem>>, vector<80x1xf32>
    %50 = vector.broadcast %49 : vector<80x1xf32> to vector<80x16xf32>
    %51 = arith.mulf %45, %50 : vector<80x16xf32>
    %cst_37 = arith.constant dense<0.000000e+00> : vector<16xf32>
    %52 = vector.multi_reduction <add>, %51, %cst_37 [0] : vector<80x16xf32> to vector<16xf32>
    %53 = vector.shape_cast %52 : vector<16xf32> to vector<1x16xf32>
    %54 = arith.mulf %51, %51 : vector<80x16xf32>
    %cst_38 = arith.constant dense<0.000000e+00> : vector<16xf32>
    %55 = vector.multi_reduction <add>, %54, %cst_38 [0] : vector<80x16xf32> to vector<16xf32>
    %56 = vector.shape_cast %55 : vector<16xf32> to vector<1x16xf32>
    %cst_39 = arith.constant 6.400000e+01 : f32
    %57 = vector.broadcast %cst_39 : f32 to vector<1x16xf32>
    %58 = arith.mulf %57, %46 : vector<1x16xf32>
    %59 = arith.addf %53, %58 : vector<1x16xf32>
    %cst_40 = arith.constant 2.000000e+00 : f32
    %60 = vector.broadcast %cst_40 : f32 to vector<1x16xf32>
    %61 = arith.mulf %60, %46 : vector<1x16xf32>
    %62 = arith.mulf %61, %53 : vector<1x16xf32>
    %63 = arith.addf %56, %62 : vector<1x16xf32>
    %cst_41 = arith.constant 6.400000e+01 : f32
    %64 = vector.broadcast %cst_41 : f32 to vector<1x16xf32>
    %65 = arith.mulf %64, %46 : vector<1x16xf32>
    %66 = arith.mulf %65, %46 : vector<1x16xf32>
    %67 = arith.addf %63, %66 : vector<1x16xf32>
    %68 = tpu.iota {dimensions = array<i32: 1>} : vector<1x16xi32>
    %c8_i32 = arith.constant 8 : i32
    %69 = vector.broadcast %c8_i32 : i32 to vector<1x16xi32>
    %70 = arith.cmpi slt, %68, %69 : vector<1x16xi32>
    %71 = arith.extui %70 : vector<1x16xi1> to vector<1x16xi32>
    %72 = arith.sitofp %71 : vector<1x16xi32> to vector<1x16xf32>
    %cst_42 = arith.constant 1.000000e+00 : f32
    %73 = vector.broadcast %cst_42 : f32 to vector<1x16xf32>
    %74 = arith.subf %73, %72 : vector<1x16xf32>
    %75 = arith.mulf %59, %72 : vector<1x16xf32>
    %cst_43 = arith.constant dense<0.000000e+00> : vector<1xf32>
    %76 = vector.multi_reduction <add>, %75, %cst_43 [1] : vector<1x16xf32> to vector<1xf32>
    %77 = vector.shape_cast %76 : vector<1xf32> to vector<1x1xf32>
    %cst_44 = arith.constant 5.120000e+02 : f32
    %78 = vector.broadcast %cst_44 : f32 to vector<1x1xf32>
    %79 = arith.divf %77, %78 : vector<1x1xf32>
    %80 = arith.mulf %59, %74 : vector<1x16xf32>
    %cst_45 = arith.constant dense<0.000000e+00> : vector<1xf32>
    %81 = vector.multi_reduction <add>, %80, %cst_45 [1] : vector<1x16xf32> to vector<1xf32>
    %82 = vector.shape_cast %81 : vector<1xf32> to vector<1x1xf32>
    %cst_46 = arith.constant 5.120000e+02 : f32
    %83 = vector.broadcast %cst_46 : f32 to vector<1x1xf32>
    %84 = arith.divf %82, %83 : vector<1x1xf32>
    %85 = arith.mulf %67, %72 : vector<1x16xf32>
    %cst_47 = arith.constant dense<0.000000e+00> : vector<1xf32>
    %86 = vector.multi_reduction <add>, %85, %cst_47 [1] : vector<1x16xf32> to vector<1xf32>
    %87 = vector.shape_cast %86 : vector<1xf32> to vector<1x1xf32>
    %cst_48 = arith.constant 5.120000e+02 : f32
    %88 = vector.broadcast %cst_48 : f32 to vector<1x1xf32>
    %89 = arith.divf %87, %88 : vector<1x1xf32>
    %90 = arith.mulf %67, %74 : vector<1x16xf32>
    %cst_49 = arith.constant dense<0.000000e+00> : vector<1xf32>
    %91 = vector.multi_reduction <add>, %90, %cst_49 [1] : vector<1x16xf32> to vector<1xf32>
    %92 = vector.shape_cast %91 : vector<1xf32> to vector<1x1xf32>
    %cst_50 = arith.constant 5.120000e+02 : f32
    %93 = vector.broadcast %cst_50 : f32 to vector<1x1xf32>
    %94 = arith.divf %92, %93 : vector<1x1xf32>
    %95 = arith.mulf %79, %79 : vector<1x1xf32>
    %96 = arith.subf %89, %95 : vector<1x1xf32>
    %cst_51 = arith.constant 9.99999974E-6 : f32
    %97 = vector.broadcast %cst_51 : f32 to vector<1x1xf32>
    %98 = arith.addf %96, %97 : vector<1x1xf32>
    %99 = math.rsqrt %98 : vector<1x1xf32>
    %100 = arith.mulf %84, %84 : vector<1x1xf32>
    %101 = arith.subf %94, %100 : vector<1x1xf32>
    %cst_52 = arith.constant 9.99999974E-6 : f32
    %102 = vector.broadcast %cst_52 : f32 to vector<1x1xf32>
    %103 = arith.addf %101, %102 : vector<1x1xf32>
    %104 = math.rsqrt %103 : vector<1x1xf32>
    %105 = vector.broadcast %79 : vector<1x1xf32> to vector<1x16xf32>
    %106 = arith.mulf %105, %72 : vector<1x16xf32>
    %107 = vector.broadcast %84 : vector<1x1xf32> to vector<1x16xf32>
    %108 = arith.mulf %107, %74 : vector<1x16xf32>
    %109 = arith.addf %106, %108 : vector<1x16xf32>
    %110 = vector.broadcast %99 : vector<1x1xf32> to vector<1x16xf32>
    %111 = arith.mulf %110, %72 : vector<1x16xf32>
    %112 = vector.broadcast %104 : vector<1x1xf32> to vector<1x16xf32>
    %113 = arith.mulf %112, %74 : vector<1x16xf32>
    %114 = arith.addf %111, %113 : vector<1x16xf32>
    %115 = arith.mulf %114, %47 : vector<1x16xf32>
    %116 = arith.subf %46, %109 : vector<1x16xf32>
    %117 = arith.mulf %116, %115 : vector<1x16xf32>
    %118 = arith.addf %48, %117 : vector<1x16xf32>
    %119 = vector.broadcast %115 : vector<1x16xf32> to vector<80x16xf32>
    %120 = arith.mulf %45, %119 : vector<80x16xf32>
    %121 = vector.broadcast %118 : vector<1x16xf32> to vector<80x16xf32>
    %122 = arith.addf %120, %121 : vector<80x16xf32>
    %cst_53 = arith.constant 0.000000e+00 : f32
    %123 = vector.broadcast %cst_53 : f32 to vector<80x16xf32>
    %124 = arith.cmpf ogt, %122, %123 : vector<80x16xf32>
    %cst_54 = arith.constant 2.000000e-01 : f32
    %125 = vector.broadcast %cst_54 : f32 to vector<80x16xf32>
    %126 = arith.mulf %125, %122 : vector<80x16xf32>
    %127 = arith.select %124, %122, %126 : vector<80x16xi1>, vector<80x16xf32>
    %128 = arith.truncf %127 : vector<80x16xf32> to vector<80x16xbf16>
    %c0_55 = arith.constant 0 : index
    %c0_56 = arith.constant 0 : index
    %c0_57 = arith.constant 0 : index
    %129 = vector.load %arg7[%c0_55, %c0_56, %c0_57] : memref<1x80x16xbf16, #tpu.memory_space<vmem>>, vector<1x80x16xbf16>
    %130 = vector.shape_cast %129 : vector<1x80x16xbf16> to vector<80x16xbf16>
    %131 = vector.shape_cast %128 : vector<80x16xbf16> to vector<1x80x16xbf16>
    tpu.vector_store %arg7[%c0_55, %c0_56, %c0_57], %131 {strides = array<i32>} : memref<1x80x16xbf16, #tpu.memory_space<vmem>>, vector<1x80x16xbf16>,
    return
  }
  func.func @transform_0(%arg0: i32) -> (i32, i32, i32) {
    %c0_i32 = arith.constant 0 : i32
    %c0_i32_0 = arith.constant 0 : i32
    %c0_i32_1 = arith.constant 0 : i32
    return %arg0, %c0_i32, %c0_i32_0 : i32, i32, i32
  }
  func.func @transform_1(%arg0: i32) -> (i32, i32, i32) {
    %c0_i32 = arith.constant 0 : i32
    %c0_i32_0 = arith.constant 0 : i32
    %c0_i32_1 = arith.constant 0 : i32
    %c0_i32_2 = arith.constant 0 : i32
    return %c0_i32, %c0_i32_0, %c0_i32_1 : i32, i32, i32
  }
  func.func @transform_2(%arg0: i32) -> (i32, i32) {
    %c0_i32 = arith.constant 0 : i32
    %c0_i32_0 = arith.constant 0 : i32
    %c0_i32_1 = arith.constant 0 : i32
    return %c0_i32, %c0_i32_0 : i32, i32
  }
  func.func @transform_3(%arg0: i32) -> (i32, i32) {
    %c0_i32 = arith.constant 0 : i32
    %c0_i32_0 = arith.constant 0 : i32
    %c0_i32_1 = arith.constant 0 : i32
    return %c0_i32, %c0_i32_0 : i32, i32
  }
  func.func @transform_4(%arg0: i32) -> (i32, i32) {
    %c0_i32 = arith.constant 0 : i32
    %c0_i32_0 = arith.constant 0 : i32
    %c0_i32_1 = arith.constant 0 : i32
    return %c0_i32, %c0_i32_0 : i32, i32
  }
  func.func @transform_5(%arg0: i32) -> (i32, i32) {
    %c0_i32 = arith.constant 0 : i32
    %c0_i32_0 = arith.constant 0 : i32
    %c0_i32_1 = arith.constant 0 : i32
    return %c0_i32, %c0_i32_0 : i32, i32
  }
  func.func @transform_6(%arg0: i32) -> (i32, i32, i32) {
    %c0_i32 = arith.constant 0 : i32
    %c0_i32_0 = arith.constant 0 : i32
    %c0_i32_1 = arith.constant 0 : i32
    return %arg0, %c0_i32, %c0_i32_0 : i32, i32, i32
  }
}

module attributes {stable_mosaic.version = 11 : i64} {
  func.func @_dec_fused_kernel(%arg0: i32, %arg1: memref<1x328x32xbf16, #tpu.memory_space<vmem>>, %arg2: memref<1x328x8xbf16, #tpu.memory_space<vmem>>, %arg3: memref<9x32x8xbf16, #tpu.memory_space<vmem>>, %arg4: memref<1x8xf32, #tpu.memory_space<vmem>>, %arg5: memref<1x8xf32, #tpu.memory_space<vmem>>, %arg6: memref<1x8xf32, #tpu.memory_space<vmem>>, %arg7: memref<9x8x8xbf16, #tpu.memory_space<vmem>>, %arg8: memref<9x8x8xbf16, #tpu.memory_space<vmem>>, %arg9: memref<1x8xf32, #tpu.memory_space<vmem>>, %arg10: memref<1x8xf32, #tpu.memory_space<vmem>>, %arg11: memref<1x8xf32, #tpu.memory_space<vmem>>, %arg12: memref<5x8xf32, #tpu.memory_space<vmem>>, %arg13: memref<5x1xf32, #tpu.memory_space<vmem>>, %arg14: memref<288x1xf32, #tpu.memory_space<vmem>>, %arg15: memref<1x4x288xf32, #tpu.memory_space<vmem>>, %arg16: memref<1x1x288xf32, #tpu.memory_space<vmem>>, %arg17: memref<328x8xbf16, #tpu.memory_space<vmem>>) attributes {dimension_semantics = [#tpu.dimension_semantics<parallel>], iteration_bounds = array<i64: 2>, scalar_prefetch = 0 : i64, scratch_operands = 1 : i64, tpu.core_type = #tpu.core_type<tc>, window_params = [{transform_indices = @transform_0, window_bounds = array<i64: 1, 328, 32>}, {transform_indices = @transform_1, window_bounds = array<i64: 1, 328, 8>}, {pipeline_mode = #tpu.pipeline_mode<synchronous>, transform_indices = @transform_2, window_bounds = array<i64: 9, 32, 8>}, {pipeline_mode = #tpu.pipeline_mode<synchronous>, transform_indices = @transform_3, window_bounds = array<i64: 1, 8>}, {pipeline_mode = #tpu.pipeline_mode<synchronous>, transform_indices = @transform_4, window_bounds = array<i64: 1, 8>}, {pipeline_mode = #tpu.pipeline_mode<synchronous>, transform_indices = @transform_5, window_bounds = array<i64: 1, 8>}, {pipeline_mode = #tpu.pipeline_mode<synchronous>, transform_indices = @transform_6, window_bounds = array<i64: 9, 8, 8>}, {pipeline_mode = #tpu.pipeline_mode<synchronous>, transform_indices = @transform_7, window_bounds = array<i64: 9, 8, 8>}, {pipeline_mode = #tpu.pipeline_mode<synchronous>, transform_indices = @transform_8, window_bounds = array<i64: 1, 8>}, {pipeline_mode = #tpu.pipeline_mode<synchronous>, transform_indices = @transform_9, window_bounds = array<i64: 1, 8>}, {pipeline_mode = #tpu.pipeline_mode<synchronous>, transform_indices = @transform_10, window_bounds = array<i64: 1, 8>}, {pipeline_mode = #tpu.pipeline_mode<synchronous>, transform_indices = @transform_11, window_bounds = array<i64: 5, 8>}, {pipeline_mode = #tpu.pipeline_mode<synchronous>, transform_indices = @transform_12, window_bounds = array<i64: 5, 1>}, {pipeline_mode = #tpu.pipeline_mode<synchronous>, transform_indices = @transform_13, window_bounds = array<i64: 288, 1>}, {transform_indices = @transform_14, window_bounds = array<i64: 1, 4, 288>}, {transform_indices = @transform_15, window_bounds = array<i64: 1, 1, 288>}]} {
    %c0 = arith.constant 0 : index
    %c0_0 = arith.constant 0 : index
    %0 = vector.load %arg14[%c0, %c0_0] : memref<288x1xf32, #tpu.memory_space<vmem>>, vector<288x1xf32>
    %c0_1 = arith.constant 0 : index
    %c0_2 = arith.constant 0 : index
    %c0_3 = arith.constant 0 : index
    %1 = vector.load %arg1[%c0_1, %c0_2, %c0_3] : memref<1x328x32xbf16, #tpu.memory_space<vmem>>, vector<1x328x32xbf16>
    %2 = vector.shape_cast %1 : vector<1x328x32xbf16> to vector<328x32xbf16>
    %3 = vector.extract_strided_slice %2 {offsets = [0, 0], sizes = [288, 32], strides = [1, 1]} : vector<328x32xbf16> to vector<288x32xbf16>
    %c0_4 = arith.constant 0 : index
    %c0_5 = arith.constant 0 : index
    %c0_6 = arith.constant 0 : index
    %4 = vector.load %arg3[%c0_4, %c0_5, %c0_6] : memref<9x32x8xbf16, #tpu.memory_space<vmem>>, vector<1x32x8xbf16>
    %5 = vector.shape_cast %4 : vector<1x32x8xbf16> to vector<32x8xbf16>
    %cst = arith.constant dense<0.000000e+00> : vector<288x8xf32>
    %6 = tpu.matmul %3, %5, %cst {dimension_numbers = #tpu.dot_dimension_numbers<[1], [0], [0], [1], [0, 0, 1, 1], [], []>} : vector<288x32xbf16>, vector<32x8xbf16>, vector<288x8xf32> -> vector<288x8xf32>
    %7 = vector.extract_strided_slice %2 {offsets = [1, 0], sizes = [288, 32], strides = [1, 1]} : vector<328x32xbf16> to vector<288x32xbf16>
    %c1 = arith.constant 1 : index
    %c0_7 = arith.constant 0 : index
    %c0_8 = arith.constant 0 : index
    %8 = vector.load %arg3[%c1, %c0_7, %c0_8] : memref<9x32x8xbf16, #tpu.memory_space<vmem>>, vector<1x32x8xbf16>
    %9 = vector.shape_cast %8 : vector<1x32x8xbf16> to vector<32x8xbf16>
    %cst_9 = arith.constant dense<0.000000e+00> : vector<288x8xf32>
    %10 = tpu.matmul %7, %9, %cst_9 {dimension_numbers = #tpu.dot_dimension_numbers<[1], [0], [0], [1], [0, 0, 1, 1], [], []>} : vector<288x32xbf16>, vector<32x8xbf16>, vector<288x8xf32> -> vector<288x8xf32>
    %11 = arith.addf %6, %10 : vector<288x8xf32>
    %12 = vector.extract_strided_slice %2 {offsets = [2, 0], sizes = [288, 32], strides = [1, 1]} : vector<328x32xbf16> to vector<288x32xbf16>
    %c2 = arith.constant 2 : index
    %c0_10 = arith.constant 0 : index
    %c0_11 = arith.constant 0 : index
    %13 = vector.load %arg3[%c2, %c0_10, %c0_11] : memref<9x32x8xbf16, #tpu.memory_space<vmem>>, vector<1x32x8xbf16>
    %14 = vector.shape_cast %13 : vector<1x32x8xbf16> to vector<32x8xbf16>
    %cst_12 = arith.constant dense<0.000000e+00> : vector<288x8xf32>
    %15 = tpu.matmul %12, %14, %cst_12 {dimension_numbers = #tpu.dot_dimension_numbers<[1], [0], [0], [1], [0, 0, 1, 1], [], []>} : vector<288x32xbf16>, vector<32x8xbf16>, vector<288x8xf32> -> vector<288x8xf32>
    %16 = arith.addf %11, %15 : vector<288x8xf32>
    %17 = vector.extract_strided_slice %2 {offsets = [18, 0], sizes = [288, 32], strides = [1, 1]} : vector<328x32xbf16> to vector<288x32xbf16>
    %c3 = arith.constant 3 : index
    %c0_13 = arith.constant 0 : index
    %c0_14 = arith.constant 0 : index
    %18 = vector.load %arg3[%c3, %c0_13, %c0_14] : memref<9x32x8xbf16, #tpu.memory_space<vmem>>, vector<1x32x8xbf16>
    %19 = vector.shape_cast %18 : vector<1x32x8xbf16> to vector<32x8xbf16>
    %cst_15 = arith.constant dense<0.000000e+00> : vector<288x8xf32>
    %20 = tpu.matmul %17, %19, %cst_15 {dimension_numbers = #tpu.dot_dimension_numbers<[1], [0], [0], [1], [0, 0, 1, 1], [], []>} : vector<288x32xbf16>, vector<32x8xbf16>, vector<288x8xf32> -> vector<288x8xf32>
    %21 = arith.addf %16, %20 : vector<288x8xf32>
    %22 = vector.extract_strided_slice %2 {offsets = [19, 0], sizes = [288, 32], strides = [1, 1]} : vector<328x32xbf16> to vector<288x32xbf16>
    %c4 = arith.constant 4 : index
    %c0_16 = arith.constant 0 : index
    %c0_17 = arith.constant 0 : index
    %23 = vector.load %arg3[%c4, %c0_16, %c0_17] : memref<9x32x8xbf16, #tpu.memory_space<vmem>>, vector<1x32x8xbf16>
    %24 = vector.shape_cast %23 : vector<1x32x8xbf16> to vector<32x8xbf16>
    %cst_18 = arith.constant dense<0.000000e+00> : vector<288x8xf32>
    %25 = tpu.matmul %22, %24, %cst_18 {dimension_numbers = #tpu.dot_dimension_numbers<[1], [0], [0], [1], [0, 0, 1, 1], [], []>} : vector<288x32xbf16>, vector<32x8xbf16>, vector<288x8xf32> -> vector<288x8xf32>
    %26 = arith.addf %21, %25 : vector<288x8xf32>
    %27 = vector.extract_strided_slice %2 {offsets = [20, 0], sizes = [288, 32], strides = [1, 1]} : vector<328x32xbf16> to vector<288x32xbf16>
    %c5 = arith.constant 5 : index
    %c0_19 = arith.constant 0 : index
    %c0_20 = arith.constant 0 : index
    %28 = vector.load %arg3[%c5, %c0_19, %c0_20] : memref<9x32x8xbf16, #tpu.memory_space<vmem>>, vector<1x32x8xbf16>
    %29 = vector.shape_cast %28 : vector<1x32x8xbf16> to vector<32x8xbf16>
    %cst_21 = arith.constant dense<0.000000e+00> : vector<288x8xf32>
    %30 = tpu.matmul %27, %29, %cst_21 {dimension_numbers = #tpu.dot_dimension_numbers<[1], [0], [0], [1], [0, 0, 1, 1], [], []>} : vector<288x32xbf16>, vector<32x8xbf16>, vector<288x8xf32> -> vector<288x8xf32>
    %31 = arith.addf %26, %30 : vector<288x8xf32>
    %32 = vector.extract_strided_slice %2 {offsets = [36, 0], sizes = [288, 32], strides = [1, 1]} : vector<328x32xbf16> to vector<288x32xbf16>
    %c6 = arith.constant 6 : index
    %c0_22 = arith.constant 0 : index
    %c0_23 = arith.constant 0 : index
    %33 = vector.load %arg3[%c6, %c0_22, %c0_23] : memref<9x32x8xbf16, #tpu.memory_space<vmem>>, vector<1x32x8xbf16>
    %34 = vector.shape_cast %33 : vector<1x32x8xbf16> to vector<32x8xbf16>
    %cst_24 = arith.constant dense<0.000000e+00> : vector<288x8xf32>
    %35 = tpu.matmul %32, %34, %cst_24 {dimension_numbers = #tpu.dot_dimension_numbers<[1], [0], [0], [1], [0, 0, 1, 1], [], []>} : vector<288x32xbf16>, vector<32x8xbf16>, vector<288x8xf32> -> vector<288x8xf32>
    %36 = arith.addf %31, %35 : vector<288x8xf32>
    %37 = vector.extract_strided_slice %2 {offsets = [37, 0], sizes = [288, 32], strides = [1, 1]} : vector<328x32xbf16> to vector<288x32xbf16>
    %c7 = arith.constant 7 : index
    %c0_25 = arith.constant 0 : index
    %c0_26 = arith.constant 0 : index
    %38 = vector.load %arg3[%c7, %c0_25, %c0_26] : memref<9x32x8xbf16, #tpu.memory_space<vmem>>, vector<1x32x8xbf16>
    %39 = vector.shape_cast %38 : vector<1x32x8xbf16> to vector<32x8xbf16>
    %cst_27 = arith.constant dense<0.000000e+00> : vector<288x8xf32>
    %40 = tpu.matmul %37, %39, %cst_27 {dimension_numbers = #tpu.dot_dimension_numbers<[1], [0], [0], [1], [0, 0, 1, 1], [], []>} : vector<288x32xbf16>, vector<32x8xbf16>, vector<288x8xf32> -> vector<288x8xf32>
    %41 = arith.addf %36, %40 : vector<288x8xf32>
    %42 = vector.extract_strided_slice %2 {offsets = [38, 0], sizes = [288, 32], strides = [1, 1]} : vector<328x32xbf16> to vector<288x32xbf16>
    %c8 = arith.constant 8 : index
    %c0_28 = arith.constant 0 : index
    %c0_29 = arith.constant 0 : index
    %43 = vector.load %arg3[%c8, %c0_28, %c0_29] : memref<9x32x8xbf16, #tpu.memory_space<vmem>>, vector<1x32x8xbf16>
    %44 = vector.shape_cast %43 : vector<1x32x8xbf16> to vector<32x8xbf16>
    %cst_30 = arith.constant dense<0.000000e+00> : vector<288x8xf32>
    %45 = tpu.matmul %42, %44, %cst_30 {dimension_numbers = #tpu.dot_dimension_numbers<[1], [0], [0], [1], [0, 0, 1, 1], [], []>} : vector<288x32xbf16>, vector<32x8xbf16>, vector<288x8xf32> -> vector<288x8xf32>
    %46 = arith.addf %41, %45 : vector<288x8xf32>
    %c0_31 = arith.constant 0 : index
    %c0_32 = arith.constant 0 : index
    %47 = vector.load %arg4[%c0_31, %c0_32] : memref<1x8xf32, #tpu.memory_space<vmem>>, vector<1x8xf32>
    %c0_33 = arith.constant 0 : index
    %c0_34 = arith.constant 0 : index
    %48 = vector.load %arg5[%c0_33, %c0_34] : memref<1x8xf32, #tpu.memory_space<vmem>>, vector<1x8xf32>
    %c0_35 = arith.constant 0 : index
    %c0_36 = arith.constant 0 : index
    %49 = vector.load %arg6[%c0_35, %c0_36] : memref<1x8xf32, #tpu.memory_space<vmem>>, vector<1x8xf32>
    %50 = vector.broadcast %0 : vector<288x1xf32> to vector<288x8xf32>
    %51 = arith.mulf %46, %50 : vector<288x8xf32>
    %cst_37 = arith.constant dense<0.000000e+00> : vector<8xf32>
    %52 = vector.multi_reduction <add>, %51, %cst_37 [0] : vector<288x8xf32> to vector<8xf32>
    %53 = vector.shape_cast %52 : vector<8xf32> to vector<1x8xf32>
    %54 = arith.mulf %51, %51 : vector<288x8xf32>
    %cst_38 = arith.constant dense<0.000000e+00> : vector<8xf32>
    %55 = vector.multi_reduction <add>, %54, %cst_38 [0] : vector<288x8xf32> to vector<8xf32>
    %56 = vector.shape_cast %55 : vector<8xf32> to vector<1x8xf32>
    %cst_39 = arith.constant 2.560000e+02 : f32
    %57 = vector.broadcast %cst_39 : f32 to vector<1x8xf32>
    %58 = arith.mulf %57, %47 : vector<1x8xf32>
    %59 = arith.addf %53, %58 : vector<1x8xf32>
    %cst_40 = arith.constant 2.000000e+00 : f32
    %60 = vector.broadcast %cst_40 : f32 to vector<1x8xf32>
    %61 = arith.mulf %60, %47 : vector<1x8xf32>
    %62 = arith.mulf %61, %53 : vector<1x8xf32>
    %63 = arith.addf %56, %62 : vector<1x8xf32>
    %cst_41 = arith.constant 2.560000e+02 : f32
    %64 = vector.broadcast %cst_41 : f32 to vector<1x8xf32>
    %65 = arith.mulf %64, %47 : vector<1x8xf32>
    %66 = arith.mulf %65, %47 : vector<1x8xf32>
    %67 = arith.addf %63, %66 : vector<1x8xf32>
    %68 = tpu.iota {dimensions = array<i32: 1>} : vector<1x8xi32>
    %c4_i32 = arith.constant 4 : i32
    %69 = vector.broadcast %c4_i32 : i32 to vector<1x8xi32>
    %70 = arith.cmpi slt, %68, %69 : vector<1x8xi32>
    %71 = arith.extui %70 : vector<1x8xi1> to vector<1x8xi32>
    %72 = arith.sitofp %71 : vector<1x8xi32> to vector<1x8xf32>
    %cst_42 = arith.constant 1.000000e+00 : f32
    %73 = vector.broadcast %cst_42 : f32 to vector<1x8xf32>
    %74 = arith.subf %73, %72 : vector<1x8xf32>
    %75 = arith.mulf %59, %72 : vector<1x8xf32>
    %cst_43 = arith.constant dense<0.000000e+00> : vector<1xf32>
    %76 = vector.multi_reduction <add>, %75, %cst_43 [1] : vector<1x8xf32> to vector<1xf32>
    %77 = vector.shape_cast %76 : vector<1xf32> to vector<1x1xf32>
    %cst_44 = arith.constant 1.024000e+03 : f32
    %78 = vector.broadcast %cst_44 : f32 to vector<1x1xf32>
    %79 = arith.divf %77, %78 : vector<1x1xf32>
    %80 = arith.mulf %59, %74 : vector<1x8xf32>
    %cst_45 = arith.constant dense<0.000000e+00> : vector<1xf32>
    %81 = vector.multi_reduction <add>, %80, %cst_45 [1] : vector<1x8xf32> to vector<1xf32>
    %82 = vector.shape_cast %81 : vector<1xf32> to vector<1x1xf32>
    %cst_46 = arith.constant 1.024000e+03 : f32
    %83 = vector.broadcast %cst_46 : f32 to vector<1x1xf32>
    %84 = arith.divf %82, %83 : vector<1x1xf32>
    %85 = arith.mulf %67, %72 : vector<1x8xf32>
    %cst_47 = arith.constant dense<0.000000e+00> : vector<1xf32>
    %86 = vector.multi_reduction <add>, %85, %cst_47 [1] : vector<1x8xf32> to vector<1xf32>
    %87 = vector.shape_cast %86 : vector<1xf32> to vector<1x1xf32>
    %cst_48 = arith.constant 1.024000e+03 : f32
    %88 = vector.broadcast %cst_48 : f32 to vector<1x1xf32>
    %89 = arith.divf %87, %88 : vector<1x1xf32>
    %90 = arith.mulf %67, %74 : vector<1x8xf32>
    %cst_49 = arith.constant dense<0.000000e+00> : vector<1xf32>
    %91 = vector.multi_reduction <add>, %90, %cst_49 [1] : vector<1x8xf32> to vector<1xf32>
    %92 = vector.shape_cast %91 : vector<1xf32> to vector<1x1xf32>
    %cst_50 = arith.constant 1.024000e+03 : f32
    %93 = vector.broadcast %cst_50 : f32 to vector<1x1xf32>
    %94 = arith.divf %92, %93 : vector<1x1xf32>
    %95 = arith.mulf %79, %79 : vector<1x1xf32>
    %96 = arith.subf %89, %95 : vector<1x1xf32>
    %cst_51 = arith.constant 9.99999974E-6 : f32
    %97 = vector.broadcast %cst_51 : f32 to vector<1x1xf32>
    %98 = arith.addf %96, %97 : vector<1x1xf32>
    %99 = math.rsqrt %98 : vector<1x1xf32>
    %100 = arith.mulf %84, %84 : vector<1x1xf32>
    %101 = arith.subf %94, %100 : vector<1x1xf32>
    %cst_52 = arith.constant 9.99999974E-6 : f32
    %102 = vector.broadcast %cst_52 : f32 to vector<1x1xf32>
    %103 = arith.addf %101, %102 : vector<1x1xf32>
    %104 = math.rsqrt %103 : vector<1x1xf32>
    %105 = vector.broadcast %79 : vector<1x1xf32> to vector<1x8xf32>
    %106 = arith.mulf %105, %72 : vector<1x8xf32>
    %107 = vector.broadcast %84 : vector<1x1xf32> to vector<1x8xf32>
    %108 = arith.mulf %107, %74 : vector<1x8xf32>
    %109 = arith.addf %106, %108 : vector<1x8xf32>
    %110 = vector.broadcast %99 : vector<1x1xf32> to vector<1x8xf32>
    %111 = arith.mulf %110, %72 : vector<1x8xf32>
    %112 = vector.broadcast %104 : vector<1x1xf32> to vector<1x8xf32>
    %113 = arith.mulf %112, %74 : vector<1x8xf32>
    %114 = arith.addf %111, %113 : vector<1x8xf32>
    %115 = arith.mulf %114, %48 : vector<1x8xf32>
    %116 = arith.subf %47, %109 : vector<1x8xf32>
    %117 = arith.mulf %116, %115 : vector<1x8xf32>
    %118 = arith.addf %49, %117 : vector<1x8xf32>
    %119 = vector.broadcast %115 : vector<1x8xf32> to vector<288x8xf32>
    %120 = arith.mulf %46, %119 : vector<288x8xf32>
    %121 = vector.broadcast %118 : vector<1x8xf32> to vector<288x8xf32>
    %122 = arith.addf %120, %121 : vector<288x8xf32>
    %cst_53 = arith.constant 0.000000e+00 : f32
    %123 = vector.broadcast %cst_53 : f32 to vector<288x8xf32>
    %124 = arith.cmpf ogt, %122, %123 : vector<288x8xf32>
    %cst_54 = arith.constant 2.000000e-01 : f32
    %125 = vector.broadcast %cst_54 : f32 to vector<288x8xf32>
    %126 = arith.mulf %125, %122 : vector<288x8xf32>
    %127 = arith.select %124, %122, %126 : vector<288x8xi1>, vector<288x8xf32>
    %cst_55 = arith.constant 0.000000e+00 : bf16
    %128 = vector.broadcast %cst_55 : bf16 to vector<328x8xbf16>
    %c0_56 = arith.constant 0 : index
    %c0_57 = arith.constant 0 : index
    %129 = vector.load %arg17[%c0_56, %c0_57] : memref<328x8xbf16, #tpu.memory_space<vmem>>, vector<328x8xbf16>
    tpu.vector_store %arg17[%c0_56, %c0_57], %128 {strides = array<i32>} : memref<328x8xbf16, #tpu.memory_space<vmem>>, vector<328x8xbf16>,
    %130 = vector.broadcast %0 : vector<288x1xf32> to vector<288x8xf32>
    %131 = arith.mulf %127, %130 : vector<288x8xf32>
    %132 = arith.truncf %131 : vector<288x8xf32> to vector<288x8xbf16>
    %c19 = arith.constant 19 : index
    %c0_58 = arith.constant 0 : index
    %133 = vector.load %arg17[%c19, %c0_58] : memref<328x8xbf16, #tpu.memory_space<vmem>>, vector<288x8xbf16>
    tpu.vector_store %arg17[%c19, %c0_58], %132 {strides = array<i32>} : memref<328x8xbf16, #tpu.memory_space<vmem>>, vector<288x8xbf16>,
    %c0_59 = arith.constant 0 : index
    %c0_60 = arith.constant 0 : index
    %134 = vector.load %arg17[%c0_59, %c0_60] : memref<328x8xbf16, #tpu.memory_space<vmem>>, vector<328x8xbf16>
    %c0_61 = arith.constant 0 : index
    %c0_62 = arith.constant 0 : index
    %c0_63 = arith.constant 0 : index
    %135 = vector.load %arg2[%c0_61, %c0_62, %c0_63] : memref<1x328x8xbf16, #tpu.memory_space<vmem>>, vector<1x328x8xbf16>
    %136 = vector.shape_cast %135 : vector<1x328x8xbf16> to vector<328x8xbf16>
    %137 = vector.extract_strided_slice %134 {offsets = [0, 0], sizes = [288, 8], strides = [1, 1]} : vector<328x8xbf16> to vector<288x8xbf16>
    %c0_64 = arith.constant 0 : index
    %c0_65 = arith.constant 0 : index
    %c0_66 = arith.constant 0 : index
    %138 = vector.load %arg7[%c0_64, %c0_65, %c0_66] : memref<9x8x8xbf16, #tpu.memory_space<vmem>>, vector<1x8x8xbf16>
    %139 = vector.shape_cast %138 : vector<1x8x8xbf16> to vector<8x8xbf16>
    %cst_67 = arith.constant dense<0.000000e+00> : vector<288x8xf32>
    %140 = tpu.matmul %137, %139, %cst_67 {dimension_numbers = #tpu.dot_dimension_numbers<[1], [0], [0], [1], [0, 0, 1, 1], [], []>} : vector<288x8xbf16>, vector<8x8xbf16>, vector<288x8xf32> -> vector<288x8xf32>
    %141 = vector.extract_strided_slice %136 {offsets = [0, 0], sizes = [288, 8], strides = [1, 1]} : vector<328x8xbf16> to vector<288x8xbf16>
    %c0_68 = arith.constant 0 : index
    %c0_69 = arith.constant 0 : index
    %c0_70 = arith.constant 0 : index
    %142 = vector.load %arg8[%c0_68, %c0_69, %c0_70] : memref<9x8x8xbf16, #tpu.memory_space<vmem>>, vector<1x8x8xbf16>
    %143 = vector.shape_cast %142 : vector<1x8x8xbf16> to vector<8x8xbf16>
    %cst_71 = arith.constant dense<0.000000e+00> : vector<288x8xf32>
    %144 = tpu.matmul %141, %143, %cst_71 {dimension_numbers = #tpu.dot_dimension_numbers<[1], [0], [0], [1], [0, 0, 1, 1], [], []>} : vector<288x8xbf16>, vector<8x8xbf16>, vector<288x8xf32> -> vector<288x8xf32>
    %145 = arith.addf %140, %144 : vector<288x8xf32>
    %146 = vector.extract_strided_slice %134 {offsets = [1, 0], sizes = [288, 8], strides = [1, 1]} : vector<328x8xbf16> to vector<288x8xbf16>
    %c1_72 = arith.constant 1 : index
    %c0_73 = arith.constant 0 : index
    %c0_74 = arith.constant 0 : index
    %147 = vector.load %arg7[%c1_72, %c0_73, %c0_74] : memref<9x8x8xbf16, #tpu.memory_space<vmem>>, vector<1x8x8xbf16>
    %148 = vector.shape_cast %147 : vector<1x8x8xbf16> to vector<8x8xbf16>
    %cst_75 = arith.constant dense<0.000000e+00> : vector<288x8xf32>
    %149 = tpu.matmul %146, %148, %cst_75 {dimension_numbers = #tpu.dot_dimension_numbers<[1], [0], [0], [1], [0, 0, 1, 1], [], []>} : vector<288x8xbf16>, vector<8x8xbf16>, vector<288x8xf32> -> vector<288x8xf32>
    %150 = vector.extract_strided_slice %136 {offsets = [1, 0], sizes = [288, 8], strides = [1, 1]} : vector<328x8xbf16> to vector<288x8xbf16>
    %c1_76 = arith.constant 1 : index
    %c0_77 = arith.constant 0 : index
    %c0_78 = arith.constant 0 : index
    %151 = vector.load %arg8[%c1_76, %c0_77, %c0_78] : memref<9x8x8xbf16, #tpu.memory_space<vmem>>, vector<1x8x8xbf16>
    %152 = vector.shape_cast %151 : vector<1x8x8xbf16> to vector<8x8xbf16>
    %cst_79 = arith.constant dense<0.000000e+00> : vector<288x8xf32>
    %153 = tpu.matmul %150, %152, %cst_79 {dimension_numbers = #tpu.dot_dimension_numbers<[1], [0], [0], [1], [0, 0, 1, 1], [], []>} : vector<288x8xbf16>, vector<8x8xbf16>, vector<288x8xf32> -> vector<288x8xf32>
    %154 = arith.addf %149, %153 : vector<288x8xf32>
    %155 = arith.addf %145, %154 : vector<288x8xf32>
    %156 = vector.extract_strided_slice %134 {offsets = [2, 0], sizes = [288, 8], strides = [1, 1]} : vector<328x8xbf16> to vector<288x8xbf16>
    %c2_80 = arith.constant 2 : index
    %c0_81 = arith.constant 0 : index
    %c0_82 = arith.constant 0 : index
    %157 = vector.load %arg7[%c2_80, %c0_81, %c0_82] : memref<9x8x8xbf16, #tpu.memory_space<vmem>>, vector<1x8x8xbf16>
    %158 = vector.shape_cast %157 : vector<1x8x8xbf16> to vector<8x8xbf16>
    %cst_83 = arith.constant dense<0.000000e+00> : vector<288x8xf32>
    %159 = tpu.matmul %156, %158, %cst_83 {dimension_numbers = #tpu.dot_dimension_numbers<[1], [0], [0], [1], [0, 0, 1, 1], [], []>} : vector<288x8xbf16>, vector<8x8xbf16>, vector<288x8xf32> -> vector<288x8xf32>
    %160 = vector.extract_strided_slice %136 {offsets = [2, 0], sizes = [288, 8], strides = [1, 1]} : vector<328x8xbf16> to vector<288x8xbf16>
    %c2_84 = arith.constant 2 : index
    %c0_85 = arith.constant 0 : index
    %c0_86 = arith.constant 0 : index
    %161 = vector.load %arg8[%c2_84, %c0_85, %c0_86] : memref<9x8x8xbf16, #tpu.memory_space<vmem>>, vector<1x8x8xbf16>
    %162 = vector.shape_cast %161 : vector<1x8x8xbf16> to vector<8x8xbf16>
    %cst_87 = arith.constant dense<0.000000e+00> : vector<288x8xf32>
    %163 = tpu.matmul %160, %162, %cst_87 {dimension_numbers = #tpu.dot_dimension_numbers<[1], [0], [0], [1], [0, 0, 1, 1], [], []>} : vector<288x8xbf16>, vector<8x8xbf16>, vector<288x8xf32> -> vector<288x8xf32>
    %164 = arith.addf %159, %163 : vector<288x8xf32>
    %165 = arith.addf %155, %164 : vector<288x8xf32>
    %166 = vector.extract_strided_slice %134 {offsets = [18, 0], sizes = [288, 8], strides = [1, 1]} : vector<328x8xbf16> to vector<288x8xbf16>
    %c3_88 = arith.constant 3 : index
    %c0_89 = arith.constant 0 : index
    %c0_90 = arith.constant 0 : index
    %167 = vector.load %arg7[%c3_88, %c0_89, %c0_90] : memref<9x8x8xbf16, #tpu.memory_space<vmem>>, vector<1x8x8xbf16>
    %168 = vector.shape_cast %167 : vector<1x8x8xbf16> to vector<8x8xbf16>
    %cst_91 = arith.constant dense<0.000000e+00> : vector<288x8xf32>
    %169 = tpu.matmul %166, %168, %cst_91 {dimension_numbers = #tpu.dot_dimension_numbers<[1], [0], [0], [1], [0, 0, 1, 1], [], []>} : vector<288x8xbf16>, vector<8x8xbf16>, vector<288x8xf32> -> vector<288x8xf32>
    %170 = vector.extract_strided_slice %136 {offsets = [18, 0], sizes = [288, 8], strides = [1, 1]} : vector<328x8xbf16> to vector<288x8xbf16>
    %c3_92 = arith.constant 3 : index
    %c0_93 = arith.constant 0 : index
    %c0_94 = arith.constant 0 : index
    %171 = vector.load %arg8[%c3_92, %c0_93, %c0_94] : memref<9x8x8xbf16, #tpu.memory_space<vmem>>, vector<1x8x8xbf16>
    %172 = vector.shape_cast %171 : vector<1x8x8xbf16> to vector<8x8xbf16>
    %cst_95 = arith.constant dense<0.000000e+00> : vector<288x8xf32>
    %173 = tpu.matmul %170, %172, %cst_95 {dimension_numbers = #tpu.dot_dimension_numbers<[1], [0], [0], [1], [0, 0, 1, 1], [], []>} : vector<288x8xbf16>, vector<8x8xbf16>, vector<288x8xf32> -> vector<288x8xf32>
    %174 = arith.addf %169, %173 : vector<288x8xf32>
    %175 = arith.addf %165, %174 : vector<288x8xf32>
    %176 = vector.extract_strided_slice %134 {offsets = [19, 0], sizes = [288, 8], strides = [1, 1]} : vector<328x8xbf16> to vector<288x8xbf16>
    %c4_96 = arith.constant 4 : index
    %c0_97 = arith.constant 0 : index
    %c0_98 = arith.constant 0 : index
    %177 = vector.load %arg7[%c4_96, %c0_97, %c0_98] : memref<9x8x8xbf16, #tpu.memory_space<vmem>>, vector<1x8x8xbf16>
    %178 = vector.shape_cast %177 : vector<1x8x8xbf16> to vector<8x8xbf16>
    %cst_99 = arith.constant dense<0.000000e+00> : vector<288x8xf32>
    %179 = tpu.matmul %176, %178, %cst_99 {dimension_numbers = #tpu.dot_dimension_numbers<[1], [0], [0], [1], [0, 0, 1, 1], [], []>} : vector<288x8xbf16>, vector<8x8xbf16>, vector<288x8xf32> -> vector<288x8xf32>
    %180 = vector.extract_strided_slice %136 {offsets = [19, 0], sizes = [288, 8], strides = [1, 1]} : vector<328x8xbf16> to vector<288x8xbf16>
    %c4_100 = arith.constant 4 : index
    %c0_101 = arith.constant 0 : index
    %c0_102 = arith.constant 0 : index
    %181 = vector.load %arg8[%c4_100, %c0_101, %c0_102] : memref<9x8x8xbf16, #tpu.memory_space<vmem>>, vector<1x8x8xbf16>
    %182 = vector.shape_cast %181 : vector<1x8x8xbf16> to vector<8x8xbf16>
    %cst_103 = arith.constant dense<0.000000e+00> : vector<288x8xf32>
    %183 = tpu.matmul %180, %182, %cst_103 {dimension_numbers = #tpu.dot_dimension_numbers<[1], [0], [0], [1], [0, 0, 1, 1], [], []>} : vector<288x8xbf16>, vector<8x8xbf16>, vector<288x8xf32> -> vector<288x8xf32>
    %184 = arith.addf %179, %183 : vector<288x8xf32>
    %185 = arith.addf %175, %184 : vector<288x8xf32>
    %186 = vector.extract_strided_slice %134 {offsets = [20, 0], sizes = [288, 8], strides = [1, 1]} : vector<328x8xbf16> to vector<288x8xbf16>
    %c5_104 = arith.constant 5 : index
    %c0_105 = arith.constant 0 : index
    %c0_106 = arith.constant 0 : index
    %187 = vector.load %arg7[%c5_104, %c0_105, %c0_106] : memref<9x8x8xbf16, #tpu.memory_space<vmem>>, vector<1x8x8xbf16>
    %188 = vector.shape_cast %187 : vector<1x8x8xbf16> to vector<8x8xbf16>
    %cst_107 = arith.constant dense<0.000000e+00> : vector<288x8xf32>
    %189 = tpu.matmul %186, %188, %cst_107 {dimension_numbers = #tpu.dot_dimension_numbers<[1], [0], [0], [1], [0, 0, 1, 1], [], []>} : vector<288x8xbf16>, vector<8x8xbf16>, vector<288x8xf32> -> vector<288x8xf32>
    %190 = vector.extract_strided_slice %136 {offsets = [20, 0], sizes = [288, 8], strides = [1, 1]} : vector<328x8xbf16> to vector<288x8xbf16>
    %c5_108 = arith.constant 5 : index
    %c0_109 = arith.constant 0 : index
    %c0_110 = arith.constant 0 : index
    %191 = vector.load %arg8[%c5_108, %c0_109, %c0_110] : memref<9x8x8xbf16, #tpu.memory_space<vmem>>, vector<1x8x8xbf16>
    %192 = vector.shape_cast %191 : vector<1x8x8xbf16> to vector<8x8xbf16>
    %cst_111 = arith.constant dense<0.000000e+00> : vector<288x8xf32>
    %193 = tpu.matmul %190, %192, %cst_111 {dimension_numbers = #tpu.dot_dimension_numbers<[1], [0], [0], [1], [0, 0, 1, 1], [], []>} : vector<288x8xbf16>, vector<8x8xbf16>, vector<288x8xf32> -> vector<288x8xf32>
    %194 = arith.addf %189, %193 : vector<288x8xf32>
    %195 = arith.addf %185, %194 : vector<288x8xf32>
    %196 = vector.extract_strided_slice %134 {offsets = [36, 0], sizes = [288, 8], strides = [1, 1]} : vector<328x8xbf16> to vector<288x8xbf16>
    %c6_112 = arith.constant 6 : index
    %c0_113 = arith.constant 0 : index
    %c0_114 = arith.constant 0 : index
    %197 = vector.load %arg7[%c6_112, %c0_113, %c0_114] : memref<9x8x8xbf16, #tpu.memory_space<vmem>>, vector<1x8x8xbf16>
    %198 = vector.shape_cast %197 : vector<1x8x8xbf16> to vector<8x8xbf16>
    %cst_115 = arith.constant dense<0.000000e+00> : vector<288x8xf32>
    %199 = tpu.matmul %196, %198, %cst_115 {dimension_numbers = #tpu.dot_dimension_numbers<[1], [0], [0], [1], [0, 0, 1, 1], [], []>} : vector<288x8xbf16>, vector<8x8xbf16>, vector<288x8xf32> -> vector<288x8xf32>
    %200 = vector.extract_strided_slice %136 {offsets = [36, 0], sizes = [288, 8], strides = [1, 1]} : vector<328x8xbf16> to vector<288x8xbf16>
    %c6_116 = arith.constant 6 : index
    %c0_117 = arith.constant 0 : index
    %c0_118 = arith.constant 0 : index
    %201 = vector.load %arg8[%c6_116, %c0_117, %c0_118] : memref<9x8x8xbf16, #tpu.memory_space<vmem>>, vector<1x8x8xbf16>
    %202 = vector.shape_cast %201 : vector<1x8x8xbf16> to vector<8x8xbf16>
    %cst_119 = arith.constant dense<0.000000e+00> : vector<288x8xf32>
    %203 = tpu.matmul %200, %202, %cst_119 {dimension_numbers = #tpu.dot_dimension_numbers<[1], [0], [0], [1], [0, 0, 1, 1], [], []>} : vector<288x8xbf16>, vector<8x8xbf16>, vector<288x8xf32> -> vector<288x8xf32>
    %204 = arith.addf %199, %203 : vector<288x8xf32>
    %205 = arith.addf %195, %204 : vector<288x8xf32>
    %206 = vector.extract_strided_slice %134 {offsets = [37, 0], sizes = [288, 8], strides = [1, 1]} : vector<328x8xbf16> to vector<288x8xbf16>
    %c7_120 = arith.constant 7 : index
    %c0_121 = arith.constant 0 : index
    %c0_122 = arith.constant 0 : index
    %207 = vector.load %arg7[%c7_120, %c0_121, %c0_122] : memref<9x8x8xbf16, #tpu.memory_space<vmem>>, vector<1x8x8xbf16>
    %208 = vector.shape_cast %207 : vector<1x8x8xbf16> to vector<8x8xbf16>
    %cst_123 = arith.constant dense<0.000000e+00> : vector<288x8xf32>
    %209 = tpu.matmul %206, %208, %cst_123 {dimension_numbers = #tpu.dot_dimension_numbers<[1], [0], [0], [1], [0, 0, 1, 1], [], []>} : vector<288x8xbf16>, vector<8x8xbf16>, vector<288x8xf32> -> vector<288x8xf32>
    %210 = vector.extract_strided_slice %136 {offsets = [37, 0], sizes = [288, 8], strides = [1, 1]} : vector<328x8xbf16> to vector<288x8xbf16>
    %c7_124 = arith.constant 7 : index
    %c0_125 = arith.constant 0 : index
    %c0_126 = arith.constant 0 : index
    %211 = vector.load %arg8[%c7_124, %c0_125, %c0_126] : memref<9x8x8xbf16, #tpu.memory_space<vmem>>, vector<1x8x8xbf16>
    %212 = vector.shape_cast %211 : vector<1x8x8xbf16> to vector<8x8xbf16>
    %cst_127 = arith.constant dense<0.000000e+00> : vector<288x8xf32>
    %213 = tpu.matmul %210, %212, %cst_127 {dimension_numbers = #tpu.dot_dimension_numbers<[1], [0], [0], [1], [0, 0, 1, 1], [], []>} : vector<288x8xbf16>, vector<8x8xbf16>, vector<288x8xf32> -> vector<288x8xf32>
    %214 = arith.addf %209, %213 : vector<288x8xf32>
    %215 = arith.addf %205, %214 : vector<288x8xf32>
    %216 = vector.extract_strided_slice %134 {offsets = [38, 0], sizes = [288, 8], strides = [1, 1]} : vector<328x8xbf16> to vector<288x8xbf16>
    %c8_128 = arith.constant 8 : index
    %c0_129 = arith.constant 0 : index
    %c0_130 = arith.constant 0 : index
    %217 = vector.load %arg7[%c8_128, %c0_129, %c0_130] : memref<9x8x8xbf16, #tpu.memory_space<vmem>>, vector<1x8x8xbf16>
    %218 = vector.shape_cast %217 : vector<1x8x8xbf16> to vector<8x8xbf16>
    %cst_131 = arith.constant dense<0.000000e+00> : vector<288x8xf32>
    %219 = tpu.matmul %216, %218, %cst_131 {dimension_numbers = #tpu.dot_dimension_numbers<[1], [0], [0], [1], [0, 0, 1, 1], [], []>} : vector<288x8xbf16>, vector<8x8xbf16>, vector<288x8xf32> -> vector<288x8xf32>
    %220 = vector.extract_strided_slice %136 {offsets = [38, 0], sizes = [288, 8], strides = [1, 1]} : vector<328x8xbf16> to vector<288x8xbf16>
    %c8_132 = arith.constant 8 : index
    %c0_133 = arith.constant 0 : index
    %c0_134 = arith.constant 0 : index
    %221 = vector.load %arg8[%c8_132, %c0_133, %c0_134] : memref<9x8x8xbf16, #tpu.memory_space<vmem>>, vector<1x8x8xbf16>
    %222 = vector.shape_cast %221 : vector<1x8x8xbf16> to vector<8x8xbf16>
    %cst_135 = arith.constant dense<0.000000e+00> : vector<288x8xf32>
    %223 = tpu.matmul %220, %222, %cst_135 {dimension_numbers = #tpu.dot_dimension_numbers<[1], [0], [0], [1], [0, 0, 1, 1], [], []>} : vector<288x8xbf16>, vector<8x8xbf16>, vector<288x8xf32> -> vector<288x8xf32>
    %224 = arith.addf %219, %223 : vector<288x8xf32>
    %225 = arith.addf %215, %224 : vector<288x8xf32>
    %c0_136 = arith.constant 0 : index
    %c0_137 = arith.constant 0 : index
    %226 = vector.load %arg9[%c0_136, %c0_137] : memref<1x8xf32, #tpu.memory_space<vmem>>, vector<1x8xf32>
    %c0_138 = arith.constant 0 : index
    %c0_139 = arith.constant 0 : index
    %227 = vector.load %arg10[%c0_138, %c0_139] : memref<1x8xf32, #tpu.memory_space<vmem>>, vector<1x8xf32>
    %c0_140 = arith.constant 0 : index
    %c0_141 = arith.constant 0 : index
    %228 = vector.load %arg11[%c0_140, %c0_141] : memref<1x8xf32, #tpu.memory_space<vmem>>, vector<1x8xf32>
    %229 = vector.broadcast %0 : vector<288x1xf32> to vector<288x8xf32>
    %230 = arith.mulf %225, %229 : vector<288x8xf32>
    %cst_142 = arith.constant dense<0.000000e+00> : vector<8xf32>
    %231 = vector.multi_reduction <add>, %230, %cst_142 [0] : vector<288x8xf32> to vector<8xf32>
    %232 = vector.shape_cast %231 : vector<8xf32> to vector<1x8xf32>
    %233 = arith.mulf %230, %230 : vector<288x8xf32>
    %cst_143 = arith.constant dense<0.000000e+00> : vector<8xf32>
    %234 = vector.multi_reduction <add>, %233, %cst_143 [0] : vector<288x8xf32> to vector<8xf32>
    %235 = vector.shape_cast %234 : vector<8xf32> to vector<1x8xf32>
    %cst_144 = arith.constant 2.560000e+02 : f32
    %236 = vector.broadcast %cst_144 : f32 to vector<1x8xf32>
    %237 = arith.mulf %236, %226 : vector<1x8xf32>
    %238 = arith.addf %232, %237 : vector<1x8xf32>
    %cst_145 = arith.constant 2.000000e+00 : f32
    %239 = vector.broadcast %cst_145 : f32 to vector<1x8xf32>
    %240 = arith.mulf %239, %226 : vector<1x8xf32>
    %241 = arith.mulf %240, %232 : vector<1x8xf32>
    %242 = arith.addf %235, %241 : vector<1x8xf32>
    %cst_146 = arith.constant 2.560000e+02 : f32
    %243 = vector.broadcast %cst_146 : f32 to vector<1x8xf32>
    %244 = arith.mulf %243, %226 : vector<1x8xf32>
    %245 = arith.mulf %244, %226 : vector<1x8xf32>
    %246 = arith.addf %242, %245 : vector<1x8xf32>
    %247 = tpu.iota {dimensions = array<i32: 1>} : vector<1x8xi32>
    %c4_i32_147 = arith.constant 4 : i32
    %248 = vector.broadcast %c4_i32_147 : i32 to vector<1x8xi32>
    %249 = arith.cmpi slt, %247, %248 : vector<1x8xi32>
    %250 = arith.extui %249 : vector<1x8xi1> to vector<1x8xi32>
    %251 = arith.sitofp %250 : vector<1x8xi32> to vector<1x8xf32>
    %cst_148 = arith.constant 1.000000e+00 : f32
    %252 = vector.broadcast %cst_148 : f32 to vector<1x8xf32>
    %253 = arith.subf %252, %251 : vector<1x8xf32>
    %254 = arith.mulf %238, %251 : vector<1x8xf32>
    %cst_149 = arith.constant dense<0.000000e+00> : vector<1xf32>
    %255 = vector.multi_reduction <add>, %254, %cst_149 [1] : vector<1x8xf32> to vector<1xf32>
    %256 = vector.shape_cast %255 : vector<1xf32> to vector<1x1xf32>
    %cst_150 = arith.constant 1.024000e+03 : f32
    %257 = vector.broadcast %cst_150 : f32 to vector<1x1xf32>
    %258 = arith.divf %256, %257 : vector<1x1xf32>
    %259 = arith.mulf %238, %253 : vector<1x8xf32>
    %cst_151 = arith.constant dense<0.000000e+00> : vector<1xf32>
    %260 = vector.multi_reduction <add>, %259, %cst_151 [1] : vector<1x8xf32> to vector<1xf32>
    %261 = vector.shape_cast %260 : vector<1xf32> to vector<1x1xf32>
    %cst_152 = arith.constant 1.024000e+03 : f32
    %262 = vector.broadcast %cst_152 : f32 to vector<1x1xf32>
    %263 = arith.divf %261, %262 : vector<1x1xf32>
    %264 = arith.mulf %246, %251 : vector<1x8xf32>
    %cst_153 = arith.constant dense<0.000000e+00> : vector<1xf32>
    %265 = vector.multi_reduction <add>, %264, %cst_153 [1] : vector<1x8xf32> to vector<1xf32>
    %266 = vector.shape_cast %265 : vector<1xf32> to vector<1x1xf32>
    %cst_154 = arith.constant 1.024000e+03 : f32
    %267 = vector.broadcast %cst_154 : f32 to vector<1x1xf32>
    %268 = arith.divf %266, %267 : vector<1x1xf32>
    %269 = arith.mulf %246, %253 : vector<1x8xf32>
    %cst_155 = arith.constant dense<0.000000e+00> : vector<1xf32>
    %270 = vector.multi_reduction <add>, %269, %cst_155 [1] : vector<1x8xf32> to vector<1xf32>
    %271 = vector.shape_cast %270 : vector<1xf32> to vector<1x1xf32>
    %cst_156 = arith.constant 1.024000e+03 : f32
    %272 = vector.broadcast %cst_156 : f32 to vector<1x1xf32>
    %273 = arith.divf %271, %272 : vector<1x1xf32>
    %274 = arith.mulf %258, %258 : vector<1x1xf32>
    %275 = arith.subf %268, %274 : vector<1x1xf32>
    %cst_157 = arith.constant 9.99999974E-6 : f32
    %276 = vector.broadcast %cst_157 : f32 to vector<1x1xf32>
    %277 = arith.addf %275, %276 : vector<1x1xf32>
    %278 = math.rsqrt %277 : vector<1x1xf32>
    %279 = arith.mulf %263, %263 : vector<1x1xf32>
    %280 = arith.subf %273, %279 : vector<1x1xf32>
    %cst_158 = arith.constant 9.99999974E-6 : f32
    %281 = vector.broadcast %cst_158 : f32 to vector<1x1xf32>
    %282 = arith.addf %280, %281 : vector<1x1xf32>
    %283 = math.rsqrt %282 : vector<1x1xf32>
    %284 = vector.broadcast %258 : vector<1x1xf32> to vector<1x8xf32>
    %285 = arith.mulf %284, %251 : vector<1x8xf32>
    %286 = vector.broadcast %263 : vector<1x1xf32> to vector<1x8xf32>
    %287 = arith.mulf %286, %253 : vector<1x8xf32>
    %288 = arith.addf %285, %287 : vector<1x8xf32>
    %289 = vector.broadcast %278 : vector<1x1xf32> to vector<1x8xf32>
    %290 = arith.mulf %289, %251 : vector<1x8xf32>
    %291 = vector.broadcast %283 : vector<1x1xf32> to vector<1x8xf32>
    %292 = arith.mulf %291, %253 : vector<1x8xf32>
    %293 = arith.addf %290, %292 : vector<1x8xf32>
    %294 = arith.mulf %293, %227 : vector<1x8xf32>
    %295 = arith.subf %226, %288 : vector<1x8xf32>
    %296 = arith.mulf %295, %294 : vector<1x8xf32>
    %297 = arith.addf %228, %296 : vector<1x8xf32>
    %298 = vector.broadcast %294 : vector<1x8xf32> to vector<288x8xf32>
    %299 = arith.mulf %225, %298 : vector<288x8xf32>
    %300 = vector.broadcast %297 : vector<1x8xf32> to vector<288x8xf32>
    %301 = arith.addf %299, %300 : vector<288x8xf32>
    %cst_159 = arith.constant 0.000000e+00 : f32
    %302 = vector.broadcast %cst_159 : f32 to vector<288x8xf32>
    %303 = arith.cmpf ogt, %301, %302 : vector<288x8xf32>
    %cst_160 = arith.constant 2.000000e-01 : f32
    %304 = vector.broadcast %cst_160 : f32 to vector<288x8xf32>
    %305 = arith.mulf %304, %301 : vector<288x8xf32>
    %306 = arith.select %303, %301, %305 : vector<288x8xi1>, vector<288x8xf32>
    %307 = tpu.transpose %306, [1, 0] : vector<288x8xf32> -> vector<8x288xf32>
    %c0_161 = arith.constant 0 : index
    %c0_162 = arith.constant 0 : index
    %308 = vector.load %arg12[%c0_161, %c0_162] : memref<5x8xf32, #tpu.memory_space<vmem>>, vector<5x8xf32>
    %cst_163 = arith.constant dense<0.000000e+00> : vector<5x288xf32>
    %309 = tpu.matmul %308, %307, %cst_163 {dimension_numbers = #tpu.dot_dimension_numbers<[1], [0], [0], [1], [0, 0, 1, 1], [], []>} : vector<5x8xf32>, vector<8x288xf32>, vector<5x288xf32> -> vector<5x288xf32>
    %c0_164 = arith.constant 0 : index
    %c0_165 = arith.constant 0 : index
    %310 = vector.load %arg13[%c0_164, %c0_165] : memref<5x1xf32, #tpu.memory_space<vmem>>, vector<5x1xf32>
    %311 = vector.broadcast %310 : vector<5x1xf32> to vector<5x288xf32>
    %312 = arith.addf %309, %311 : vector<5x288xf32>
    %313 = vector.extract_strided_slice %312 {offsets = [0, 0], sizes = [4, 288], strides = [1, 1]} : vector<5x288xf32> to vector<4x288xf32>
    %c0_166 = arith.constant 0 : index
    %c0_167 = arith.constant 0 : index
    %c0_168 = arith.constant 0 : index
    %314 = vector.load %arg15[%c0_166, %c0_167, %c0_168] : memref<1x4x288xf32, #tpu.memory_space<vmem>>, vector<1x4x288xf32>
    %315 = vector.shape_cast %314 : vector<1x4x288xf32> to vector<4x288xf32>
    %316 = vector.shape_cast %313 : vector<4x288xf32> to vector<1x4x288xf32>
    tpu.vector_store %arg15[%c0_166, %c0_167, %c0_168], %316 {strides = array<i32>} : memref<1x4x288xf32, #tpu.memory_space<vmem>>, vector<1x4x288xf32>,
    %317 = vector.extract_strided_slice %312 {offsets = [4, 0], sizes = [1, 288], strides = [1, 1]} : vector<5x288xf32> to vector<1x288xf32>
    %cst_169 = arith.constant 0.000000e+00 : f32
    %318 = vector.broadcast %cst_169 : f32 to vector<1x288xf32>
    %319 = arith.subf %318, %317 : vector<1x288xf32>
    %320 = math.exp %319 : vector<1x288xf32>
    %cst_170 = arith.constant 1.000000e+00 : f32
    %321 = vector.broadcast %cst_170 : f32 to vector<1x288xf32>
    %322 = arith.addf %321, %320 : vector<1x288xf32>
    %cst_171 = arith.constant 1.000000e+00 : f32
    %323 = vector.broadcast %cst_171 : f32 to vector<1x288xf32>
    %324 = arith.divf %323, %322 : vector<1x288xf32>
    %c0_172 = arith.constant 0 : index
    %c0_173 = arith.constant 0 : index
    %c0_174 = arith.constant 0 : index
    %325 = vector.load %arg16[%c0_172, %c0_173, %c0_174] : memref<1x1x288xf32, #tpu.memory_space<vmem>>, vector<1x1x288xf32>
    %326 = vector.shape_cast %325 : vector<1x1x288xf32> to vector<1x288xf32>
    %327 = vector.shape_cast %324 : vector<1x288xf32> to vector<1x1x288xf32>
    tpu.vector_store %arg16[%c0_172, %c0_173, %c0_174], %327 {strides = array<i32>} : memref<1x1x288xf32, #tpu.memory_space<vmem>>, vector<1x1x288xf32>,
    return
  }
  func.func @transform_0(%arg0: i32) -> (i32, i32, i32) {
    %c0_i32 = arith.constant 0 : i32
    %c0_i32_0 = arith.constant 0 : i32
    %c0_i32_1 = arith.constant 0 : i32
    return %arg0, %c0_i32, %c0_i32_0 : i32, i32, i32
  }
  func.func @transform_1(%arg0: i32) -> (i32, i32, i32) {
    %c0_i32 = arith.constant 0 : i32
    %c0_i32_0 = arith.constant 0 : i32
    %c0_i32_1 = arith.constant 0 : i32
    return %arg0, %c0_i32, %c0_i32_0 : i32, i32, i32
  }
  func.func @transform_2(%arg0: i32) -> (i32, i32, i32) {
    %c0_i32 = arith.constant 0 : i32
    %c0_i32_0 = arith.constant 0 : i32
    %c0_i32_1 = arith.constant 0 : i32
    %c0_i32_2 = arith.constant 0 : i32
    return %c0_i32, %c0_i32_0, %c0_i32_1 : i32, i32, i32
  }
  func.func @transform_3(%arg0: i32) -> (i32, i32) {
    %c0_i32 = arith.constant 0 : i32
    %c0_i32_0 = arith.constant 0 : i32
    %c0_i32_1 = arith.constant 0 : i32
    return %c0_i32, %c0_i32_0 : i32, i32
  }
  func.func @transform_4(%arg0: i32) -> (i32, i32) {
    %c0_i32 = arith.constant 0 : i32
    %c0_i32_0 = arith.constant 0 : i32
    %c0_i32_1 = arith.constant 0 : i32
    return %c0_i32, %c0_i32_0 : i32, i32
  }
  func.func @transform_5(%arg0: i32) -> (i32, i32) {
    %c0_i32 = arith.constant 0 : i32
    %c0_i32_0 = arith.constant 0 : i32
    %c0_i32_1 = arith.constant 0 : i32
    return %c0_i32, %c0_i32_0 : i32, i32
  }
  func.func @transform_6(%arg0: i32) -> (i32, i32, i32) {
    %c0_i32 = arith.constant 0 : i32
    %c0_i32_0 = arith.constant 0 : i32
    %c0_i32_1 = arith.constant 0 : i32
    %c0_i32_2 = arith.constant 0 : i32
    return %c0_i32, %c0_i32_0, %c0_i32_1 : i32, i32, i32
  }
  func.func @transform_7(%arg0: i32) -> (i32, i32, i32) {
    %c0_i32 = arith.constant 0 : i32
    %c0_i32_0 = arith.constant 0 : i32
    %c0_i32_1 = arith.constant 0 : i32
    %c0_i32_2 = arith.constant 0 : i32
    return %c0_i32, %c0_i32_0, %c0_i32_1 : i32, i32, i32
  }
  func.func @transform_8(%arg0: i32) -> (i32, i32) {
    %c0_i32 = arith.constant 0 : i32
    %c0_i32_0 = arith.constant 0 : i32
    %c0_i32_1 = arith.constant 0 : i32
    return %c0_i32, %c0_i32_0 : i32, i32
  }
  func.func @transform_9(%arg0: i32) -> (i32, i32) {
    %c0_i32 = arith.constant 0 : i32
    %c0_i32_0 = arith.constant 0 : i32
    %c0_i32_1 = arith.constant 0 : i32
    return %c0_i32, %c0_i32_0 : i32, i32
  }
  func.func @transform_10(%arg0: i32) -> (i32, i32) {
    %c0_i32 = arith.constant 0 : i32
    %c0_i32_0 = arith.constant 0 : i32
    %c0_i32_1 = arith.constant 0 : i32
    return %c0_i32, %c0_i32_0 : i32, i32
  }
  func.func @transform_11(%arg0: i32) -> (i32, i32) {
    %c0_i32 = arith.constant 0 : i32
    %c0_i32_0 = arith.constant 0 : i32
    %c0_i32_1 = arith.constant 0 : i32
    return %c0_i32, %c0_i32_0 : i32, i32
  }
  func.func @transform_12(%arg0: i32) -> (i32, i32) {
    %c0_i32 = arith.constant 0 : i32
    %c0_i32_0 = arith.constant 0 : i32
    %c0_i32_1 = arith.constant 0 : i32
    return %c0_i32, %c0_i32_0 : i32, i32
  }
  func.func @transform_13(%arg0: i32) -> (i32, i32) {
    %c0_i32 = arith.constant 0 : i32
    %c0_i32_0 = arith.constant 0 : i32
    %c0_i32_1 = arith.constant 0 : i32
    return %c0_i32, %c0_i32_0 : i32, i32
  }
  func.func @transform_14(%arg0: i32) -> (i32, i32, i32) {
    %c0_i32 = arith.constant 0 : i32
    %c0_i32_0 = arith.constant 0 : i32
    %c0_i32_1 = arith.constant 0 : i32
    return %arg0, %c0_i32, %c0_i32_0 : i32, i32, i32
  }
  func.func @transform_15(%arg0: i32) -> (i32, i32, i32) {
    %c0_i32 = arith.constant 0 : i32
    %c0_i32_0 = arith.constant 0 : i32
    %c0_i32_1 = arith.constant 0 : i32
    return %arg0, %c0_i32, %c0_i32_0 : i32, i32, i32
  }
}

</mosaic_0001>

<bundles_post_ra>
// kernel: decoder_shallow.2
= control target key start
LH: loop header
LB: loop body
LE: loop exit
PB: predicated region body
PF: predicated region fallthrough
CT: control target
= control target key end

     0   :  { %s2393_s21 = smov 0   ;;  %s2940_s0 = inlined_call_operand.vmem [shape: bf16[2,104,16], index: 0, kind: input, shape index: {}]   ;;  %s2941_s1 = inlined_call_operand.vmem [shape: bf16[9,16,16], index: 1, kind: input, shape index: {}]   ;;  %s2942_s2 = inlined_call_operand.vmem [shape: f32[1,16], index: 2, kind: input, shape index: {}]   ;;  %s2943_s3 = inlined_call_operand.vmem [shape: f32[1,16], index: 3, kind: input, shape index: {}]   ;;  %s2944_s4 = inlined_call_operand.vmem [shape: f32[1,16], index: 4, kind: input, shape index: {}]   ;;  %s2945_s5 = inlined_call_operand.vmem [shape: f32[80,1], index: 5, kind: input, shape index: {}]   ;;  %s2946_s6 = inlined_call_operand.vmem [shape: bf16[2,80,16], index: 6, kind: output, shape index: {}]  }
   0x1 LB: > { %s1787_s22 = sadd.s32 4294967295, %s2353_s21   ;;  %p1791_p0 = scmp.ge.s32.totalorder %s2353_s21, 1  ;;  %s2353_s21 = sphi %s2393_s21, %s16_s21  }
   0x2   : > { %p212_p1 = scmp.lt.s32.totalorder %s2353_s21, 3 }
   0x4   : > { %p213_p2 = pnand %p1791_p0, %p212_p1 }
   0x5   : > { %v2404_v0 = vld [vmem:[%s2941_s1 + $0x20] sm:$0xff] (!%p213_p2)   ;;  %v2355_v1 = vmov (!%p213_p2), 0.0   ;;  %v2321_v2 = vld [vmem:[%s2941_s1 + $0x8] sm:$0xff] (!%p213_p2)   ;;  %vm2356_vm0 = vmmov (!%p213_p2), 0   ;;  %p242_p3 = scmp.lt.s32.totalorder (!%p213_p2), %s1787_s22, 1  ;;  %vm350_vm3 = vcmask (!%p213_p2), 130048  }
   0x6   : > { %216 = sbr.rel (%p213_p2) target bundleno = 639 (0x27f), region = 44  ;;  %2043 = vmatprep.subr.bf16.mxu0 (!%p213_p2), %v2355_v1  ;;  %1955 = vmatprep.subr.bf16.mxu1 (!%p213_p2), %v2355_v1  ;;  %vm299_vm1 = vsmask.f32 (!%p213_p2), 7424  ;;  %vm776_vm2 = vsmask.f32 (!%p213_p2), 6400  ;;  %v2327_v35 = vld [vmem:[%s2941_s1 + $0x28] sm:$0xff] (!%p213_p2)  }
   0x7   : > { %2044 = vmatpush3.bf16.msra.mxu0 (!%p213_p2), %v2404_v0  ;;  %1957 = vmatprep.mubr.msk.bf16.mxu1 (!%p213_p2), %vm2356_vm0, %v2355_v1  ;;  %v2328_v37 = vld [vmem:[%s2941_s1] sm:$0xff] (!%p213_p2)   ;;  %vm937_vm4 = vcmask (!%p213_p2), 1045504   ;;  %vm531_vm5 = vcmask (!%p213_p2), 1046528   ;;  %vm1178_vm6 = vsmask.f32 (!%p213_p2), 5376  ;;  %vm1319_vm7 = vcmask (!%p213_p2), 1044480  }
   0x8   : > { %1956 = vmatpush3.bf16.msra.mxu1 (!%p213_p2), %v2321_v2  ;;  %2045 = vmatprep.mubr.msk.bf16.mxu0 (!%p213_p2), %vm2356_vm0, %v2355_v1  ;;  %vm1582_vm9 = vcmask (!%p213_p2), 122880   ;;  %vm1721_vm10 = vcmask (!%p213_p2), 125952  }
   0x9   : > { %2065 = vmatprep.subr.bf16.mxu0 (!%p213_p2), %v2355_v1  ;;  %1977 = vmatprep.subr.bf16.mxu1 (!%p213_p2), %v2355_v1 }
   0xd   : > { %s2948_s22 = smov (!%p242_p3, %s1787_s22), 1 }
   0xe   : > { %s2305_s27 = smul.u32 52, %s2948_s22 }
  0x10   : > { %s2424_s30 = scalar_lea.vmem %s2940_s0, %s2305_s27  ;;  %s2306_s27 = smul.u32 40, %s2948_s22 }
  0x11   : > { %v253_v3 = vld [vmem:[%s2424_s30] sm:$0xf]  ;;  %v254_v4 = vld [vmem:[%s2424_s30 + $0x4] sm:$0xf]  ;;  %v255_v5 = vld [vmem:[%s2424_s30 + $0x8] sm:$0xf] }
  0x12   : > { %v256_v6 = vld [vmem:[%s2424_s30 + $0xc] sm:$0xf]  ;;  %v2430_v7 = vcombine.low %v253_v3, %v254_v4  ;;  %v257_v8 = vld [vmem:[%s2424_s30 + $0x10] sm:$0xf]  ;;  %v258_v9 = vld [vmem:[%s2424_s30 + $0x14] sm:$0xf]  ;;  %v2434_v10 = vcombine.low %v254_v4, %v255_v5  ;;  %s251_s29 = scalar_lea.vmem %s2946_s6, %s2306_s27 }
  0x13   : > { %v2436_v11 = vcombine.low %v255_v5, %v256_v6  ;;  %v2438_v12 = vcombine.low %v257_v8, %v258_v9  ;;  %v2440_v13 = vcombine.low %v256_v6, %v257_v8  ;;  %v259_v21 = vld [vmem:[%s2424_s30 + $0x18] sm:$0xf]  ;;  %v260_v25 = vld [vmem:[%s2424_s30 + $0x1c] sm:$0xf]  ;;  %v261_v33 = vld [vmem:[%s2424_s30 + $0x20] sm:$0xf] }
  0x14   : > { %v301_v14 = vshrl.u32 %v2430_v7, 16  ;;  %v303_v15 = vshll.u32 %v2430_v7, 16  ;;  %v778_v16 = vshrl.u32 %v2434_v10, 16  ;;  %v781_v17 = vshll.u32 %v2434_v10, 16  ;;  %v2479_v46 = vld [vmem:[%s2424_s30 + $0x24] sm:$0xf] }
  0x15   : > { %v308_v18 = vshll.u32 %v2436_v11, 16  ;;  %v786_v19 = vshrl.u32 %v2440_v13, 16  ;;  %v789_v20 = vshll.u32 %v2440_v13, 16  ;;  %v312_v31 = vshrl.u32 %v2436_v11, 16  ;;  %v263_v63 = vld [vmem:[%s2424_s30 + $0x28] sm:$0xf] }
  0x16   : > { %v305_v22 = vrot.slane %v303_v15, 1  ;;  %v780_v23 = vrot.slane %v778_v16, 1  ;;  %v783_v24 = vrot.slane %v781_v17, 2  ;;  %v316_v32 = vshll.u32 %v2438_v12, 16  ;;  %v264_v2 = vld [vmem:[%s2424_s30 + $0x2c] sm:$0xf] }
  0x17   : > { %v310_v26 = vrot.slane %v308_v18, 1  ;;  %v788_v27 = vrot.slane %v786_v19, 1  ;;  %v791_v28 = vrot.slane %v789_v20, 2  ;;  %v2463_v38 = vcombine.low %v258_v9, %v259_v21  ;;  %v2507_v5 = vld [vmem:[%s2424_s30 + $0x30] ss:$0 sps:$4 sm:$0xff]  }
  0x18   : > { %v306_v29 = vor.u32 %v305_v22, %v301_v14  ;;  %v784_v30 = vor.u32 %v783_v24, %v780_v23  ;;  %v2467_v40 = vcombine.low %v259_v21, %v260_v25  ;;  %v2469_v41 = vcombine.low %v260_v25, %v261_v33 }
  0x19   : > { %v792_v34 = vor.u32 %v791_v28, %v788_v27  ;;  %v314_v42 = vor.u32 %v312_v31, %v310_v26  ;;  %v318_v43 = vrot.slane %v316_v32, 1  ;;  %v795_v44 = vshrl.u32 %v2463_v38, 16 }
  0x1a   : > { %v311_v36 = vsel %vm299_vm1, %v306_v29, %v310_v26  ;;  %v798_v45 = vshll.u32 %v2463_v38, 16  ;;  %v804_v47 = vshrl.u32 %v2469_v41, 16  ;;  %v807_v48 = vshll.u32 %v2469_v41, 16 }
  0x1b   : > { %1958 = vmatmul.mubr.msk.bf16.vlgmr.msra.gmra.mrb[0].mxu1 %vm350_vm3, %v311_v36  ;;  %v793_v39 = vsel %vm776_vm2, %v784_v30, %v792_v34  ;;  %v797_v49 = vrot.slane %v795_v44, 1  ;;  %v320_v51 = vshrl.u32 %v2438_v12, 16  ;;  %v324_v52 = vshll.u32 %v2467_v40, 16 }
  0x1c   : > { %2046 = vmatmul.mubr.msk.bf16.vlgmr.msra.gmra.mrb[0].mxu0 %vm350_vm3, %v793_v39  ;;  %1961 = vmatprep.mubr.msk.bf16.mxu1 %vm2356_vm0, %v2355_v1  ;;  %v800_v50 = vrot.slane %v798_v45, 2  ;;  %v319_v53 = vsel %vm299_vm1, %v314_v42, %v318_v43  ;;  %v2489_v55 = vcombine.low %v261_v33, %v2479_v46  ;;  %v806_v56 = vrot.slane %v804_v47, 1 }
  0x1d   : > { %2066 = vmatpush3.bf16.msra.mxu0 %v2327_v35  ;;  %2049 = vmatprep.mubr.msk.bf16.mxu0 %vm2356_vm0, %v2355_v1  ;;  %v809_v57 = vrot.slane %v807_v48, 2  ;;  %v322_v59 = vor.u32 %v320_v51, %v318_v43  ;;  %v326_v60 = vrot.slane %v324_v52, 1  ;;  %v328_v61 = vshrl.u32 %v2467_v40, 16 }
  0x1e   : > { %1978 = vmatpush3.bf16.msra.mxu1 %v2328_v37  ;;  %2087 = vmatprep.subr.bf16.mxu0 %v2355_v1  ;;  %v801_v54 = vor.u32 %v800_v50, %v797_v49  ;;  %v332_v62 = vshll.u32 %v2489_v55, 16  ;;  %v2504_v4 = vcombine.low %v263_v63, %v264_v2  ;;  %v1180_v6 = vrot.slane %v308_v18, 3 }
  0x1f   : > { %1999 = vmatprep.subr.bf16.mxu1 %v2355_v1  ;;  %v2502_v3 = vor.u32 %v809_v57, %v806_v56  ;;  %v1179_v8 = vrot.slane %v312_v31, 2  ;;  %v1183_v9 = vrot.slane %v316_v32, 3  ;;  %v532_v14 = vrot.slane %v2430_v7, 1 }
  0x20   : > { %v802_v58 = vsel %vm776_vm2, %v792_v34, %v801_v54  ;;  %v327_v15 = vsel %vm299_vm1, %v322_v59, %v326_v60  ;;  %v1182_v16 = vrot.slane %v320_v51, 2  ;;  %v938_v17 = vrot.slane %v2434_v10, 2 }
  0x21   : > { %v533_v19 = vrot.slane %v2436_v11, 1  ;;  %v330_v20 = vor.u32 %v328_v61, %v326_v60  ;;  %v334_v21 = vrot.slane %v332_v62, 1  ;;  %v535_v22 = vrot.slane %v2438_v12, 1 }
  0x22   : > { %v537_v23 = vrot.slane %v2467_v40, 1  ;;  %v811_v18 = vsel %vm776_vm2, %v801_v54, %v2502_v3  ;;  %v1067_v25 = vrot.slane %v2504_v4, 2  ;;  %v1069_v26 = vrot.slane %v2507_v5, 2  ;;  %v2333_v54 = vld [vmem:[%s2941_s1 + $0x30] sm:$0xff]  }
  0x23   : > { %1962 = vmatmul.mubr.msk.bf16.gmra.mrb[4].mxu1 %vm350_vm3, %v319_v53  ;;  %v2520_v24 = vsel %vm531_vm5, %v532_v14, %v533_v19  ;;  %v939_v27 = vrot.slane %v2440_v13, 2  ;;  %v2526_v28 = vsel %vm531_vm5, %v533_v19, %v535_v22  ;;  %v336_v30 = vshrl.u32 %v2489_v55, 16 }
  0x24   : > { %2050 = vmatmul.mubr.msk.bf16.gmra.mrb[4].mxu0 %vm350_vm3, %v802_v58  ;;  %1965 = vmatprep.mubr.msk.bf16.mxu1 %vm2356_vm0, %v2355_v1  ;;  %v2531_v29 = vsel %vm531_vm5, %v535_v22, %v537_v23  ;;  %v2538_v31 = vsel %vm937_vm4, %v1067_v25, %v1069_v26  ;;  %v1181_v32 = vor.u32 %v1180_v6, %v1179_v8  ;;  %v1186_v35 = vrot.slane %v328_v61, 2 }
  0x25   : > { %2053 = vmatprep.mubr.msk.bf16.mxu0 %vm2356_vm0, %v2355_v1  ;;  %v1184_v33 = vor.u32 %v1183_v9, %v1182_v16  ;;  %v2543_v34 = vcombine.low %v263_v63, %v263_v63  ;;  %v1187_v36 = vrot.slane %v324_v52, 3  ;;  %v658_v37 = vrot.slane %v2434_v10, 1 }
  0x26   : > { %v659_v42 = vrot.slane %v2440_v13, 1  ;;  %v1190_v43 = vrot.slane %v336_v30, 2  ;;  %v1191_v44 = vrot.slane %v332_v62, 3  ;;  %v661_v47 = vrot.slane %v2463_v38, 1 }
  0x27   : > { %v2549_v39 = vsel %vm1178_vm6, %v1181_v32, %v1184_v33  ;;  %v1188_v45 = vor.u32 %v1187_v36, %v1186_v35  ;;  %v2554_v48 = vcombine.low %v2479_v46, %v263_v63  ;;  %v663_v50 = vrot.slane %v2469_v41, 1 }
  0x28   : > { %v2557_v49 = vsel %vm531_vm5, %v658_v37, %v659_v42  ;;  %v2559_v10 = vor.u32 %v1191_v44, %v1190_v43  ;;  %v335_v51 = vsel %vm299_vm1, %v330_v20, %v334_v21  ;;  %v340_v52 = vshll.u32 %v2543_v34, 16  ;;  %v2337_v37 = vld [vmem:[%s2941_s1 + $0x10] sm:$0xff]  }
  0x29   : > { %v2565_v13 = vsel %vm1178_vm6, %v1184_v33, %v1188_v45  ;;  %v2568_v53 = vsel %vm531_vm5, %v659_v42, %v661_v47  ;;  %v940_v46 = vsel %vm937_vm4, %v938_v17, %v939_v27  ;;  %v2574_v56 = vcombine.low %v264_v2, %v264_v2 }
  0x2a   : > { %v2578_v57 = vsel %vm1178_vm6, %v1188_v45, %v2559_v10  ;;  %v2581_v58 = vsel %vm531_vm5, %v661_v47, %v663_v50  ;;  %v665_v59 = vrot.slane %v2554_v48, 1  ;;  %v1320_v60 = vrot.slane %v2436_v11, 3  ;;  %v1438_v47 = vld [vmem:[%s2945_s5] sm:$0xff] }
  0x2b   : > { %1966 = vmatmul.mubr.msk.bf16.gmra.mrb[8].mxu1 %vm350_vm3, %v327_v15  ;;  %v1321_v61 = vrot.slane %v2438_v12, 3  ;;  %v667_v62 = vrot.slane %v2574_v56, 1  ;;  %v338_v63 = vor.u32 %v336_v30, %v334_v21  ;;  %v342_v2 = vrot.slane %v340_v52, 1  ;;  %v1439_v52 = vld [vmem:[%s2945_s5 + $0x8] sm:$0xff] }
  0x2c   : > { %2054 = vmatmul.mubr.msk.bf16.gmra.mrb[8].mxu0 %vm350_vm3, %v811_v18  ;;  %1969 = vmatprep.mubr.msk.bf16.mxu1 %vm2356_vm0, %v2355_v1  ;;  %v2592_v6 = vsel %vm531_vm5, %v663_v50, %v665_v59  ;;  %v1323_v8 = vrot.slane %v2467_v40, 3  ;;  %v941_v9 = vrot.slane %v2463_v38, 2  ;;  %v813_v15 = vshrl.u32 %v2554_v48, 16 }
  0x2d   : > { %2067 = vmatprep.mubr.msk.bf16.mxu0 %vm2356_vm0, %v2355_v1  ;;  %v2599_v14 = vsel %vm1319_vm7, %v1320_v60, %v1321_v61  ;;  %v2604_v16 = vsel %vm531_vm5, %v665_v59, %v667_v62  ;;  %v816_v19 = vshll.u32 %v2554_v48, 16  ;;  %v343_v38 = vsel %vm299_vm1, %v338_v63, %v342_v2  ;;  %v1443_v59 = vld [vmem:[%s2945_s5 + $0x28] sm:$0xff]  ;;  %v1444_v62 = vld [vmem:[%s2945_s5 + $0x30] sm:$0xff]  ;;  %v1445_v63 = vld [vmem:[%s2945_s5 + $0x38] sm:$0xff] }
  0x2e   : > { %v2609_v17 = vsel %vm1319_vm7, %v1321_v61, %v1323_v8  ;;  %v815_v20 = vrot.slane %v813_v15, 1  ;;  %v942_v22 = vsel %vm937_vm4, %v939_v27, %v941_v9  ;;  %v943_v30 = vrot.slane %v2469_v41, 2 }
  0x2f   : > { %v818_v21 = vrot.slane %v816_v19, 2  ;;  %v822_v32 = vshrl.u32 %v2574_v56, 16  ;;  %v825_v27 = vshll.u32 %v2574_v56, 16  ;;  %v945_v41 = vrot.slane %v2554_v48, 2  ;;  %v1440_v48 = vld [vmem:[%s2945_s5 + $0x10] sm:$0xff] }
  0x30   : > { %v944_v36 = vsel %vm937_vm4, %v941_v9, %v943_v30  ;;  %v1327_v43 = vrot.slane %v2504_v4, 3  ;;  %v1329_v44 = vrot.slane %v2507_v5, 3  ;;  %v947_v50 = vrot.slane %v2574_v56, 2  ;;  %v1442_v56 = vld [vmem:[%s2945_s5 + $0x20] sm:$0xff]  ;;  %v2339_v9 = vld [vmem:[%s2941_s1 + $0x38] sm:$0xff]  }
  0x31   : > { %v819_v18 = vor.u32 %v818_v21, %v815_v20  ;;  %v824_v33 = vrot.slane %v822_v32, 1  ;;  %v827_v35 = vrot.slane %v825_v27, 2  ;;  %v946_v45 = vsel %vm937_vm4, %v943_v30, %v945_v41  ;;  %v2340_v21 = vld [vmem:[%s2941_s1 + $0x18] sm:$0xff]  }
  0x32   : > { %v1060_v60 = vrot.slane %v2436_v11, 2  ;;  %v1061_v61 = vrot.slane %v2438_v12, 2  ;;  %v1063_v15 = vrot.slane %v2467_v40, 2  ;;  %v1065_v20 = vrot.slane %v2489_v55, 2 }
  0x33   : > { %1970 = vmatmul.mubr.msk.bf16.gmra.mrb[12].mxu1 %vm350_vm3, %v335_v51  ;;  %v2620_v26 = vsel %vm776_vm2, %v2502_v3, %v819_v18  ;;  %v828_v42 = vor.u32 %v827_v35, %v824_v33  ;;  %v2357_v51 = vmov 0   ;;  %v1204_v30 = vshrl.u32 %v2507_v5, 16 }
  0x34   : > { %2068 = vmatmul.mubr.msk.bf16.vlgmr.msra.gmra.mrb[0].mxu0 %vm350_vm3, %v940_v46  ;;  %1973 = vmatprep.mubr.msk.bf16.mxu1 %vm2356_vm0, %v2355_v1  ;;  %v1441_v46 = vld [vmem:[%s2945_s5 + $0x18] sm:$0xff]  ;;  %v1062_v2 = vsel %vm937_vm4, %v1060_v60, %v1061_v61  ;;  %v1064_v19 = vsel %vm937_vm4, %v1061_v61, %v1063_v15  ;;  %v1207_v32 = vshll.u32 %v2507_v5, 16  ;;  %v1325_v5 = vrot.slane %v2489_v55, 3 }
  0x35   : > { %2088 = vmatpush3.bf16.msra.mxu0 %v2333_v54  ;;  %2071 = vmatprep.mubr.msk.bf16.mxu0 %vm2356_vm0, %v2355_v1  ;;  %v2634_v3 = vsel %vm776_vm2, %v819_v18, %v828_v42  ;;  %v948_v54 = vsel %vm937_vm4, %v945_v41, %v947_v50 }
  0x36   : > { %2109 = vmatprep.subr.bf16.mxu0 %v2355_v1  ;;  %2318 = vset.pattern.permute.xlu0 %v2357_v51  ;;  %v1209_v33 = vrot.slane %v1207_v32, 3 }
  0x37   : > { %1450 = vperm.xlu0 %2318, %v1438_v47   ;;  %2319 = vset.pattern.permute.xlu1 %v2357_v51 }
  0x38   : > { %1460 = vperm.xlu1 %2319, %v1440_v48  }
  0x3b   : > { %1974 = vmatmul.mubr.msk.bf16.gmra.mrb[16].mxu1 %vm350_vm3, %v343_v38  ;;  %1455 = vperm.xlu0 %2318, %v1439_v52   ;;  %v1066_v38 = vsel %vm937_vm4, %v1063_v15, %v1065_v20 }
  0x3c   : > { %2072 = vmatmul.mubr.msk.bf16.gmra.mrb[4].mxu0 %vm350_vm3, %v942_v22  ;;  %1979 = vmatprep.mubr.msk.bf16.mxu1 %vm2356_vm0, %v2355_v1  ;;  %v1068_v22 = vsel %vm937_vm4, %v1065_v20, %v1067_v25 }
  0x3d   : > { %2075 = vmatprep.mubr.msk.bf16.mxu0 %vm2356_vm0, %v2355_v1  ;;  %1465 = vperm.xlu1 %2319, %v1441_v46  }
  0x3f   : > { %1470 = vperm.xlu0 %2318, %v1442_v56  }
  0x41   : > { %1475 = vperm.xlu1 %2319, %v1443_v59  }
  0x43   : > { %1980 = vmatmul.mubr.msk.bf16.vlgmr.msra.gmra.mrb[0].mxu1 %vm350_vm3, %v2430_v7  ;;  %v2648_v7 = vsel %vm1319_vm7, %v1327_v43, %v1329_v44  ;;  %1480 = vperm.xlu0 %2318, %v1444_v62  }
  0x44   : > { %2076 = vmatmul.mubr.msk.bf16.gmra.mrb[8].mxu0 %vm350_vm3, %v944_v36  ;;  %1983 = vmatprep.mubr.msk.bf16.mxu1 %vm2356_vm0, %v2355_v1 }
  0x45   : > { %2079 = vmatprep.mubr.msk.bf16.mxu0 %vm2356_vm0, %v2355_v1  ;;  %2000 = vmatpush3.bf16.msra.mxu1 %v2337_v37 }
  0x46   : > { %2021 = vmatprep.subr.bf16.mxu1 %v2355_v1  ;;  %1485 = vperm.xlu1 %2319, %v1445_v63  }
  0x4b   : > { %1984 = vmatmul.mubr.msk.bf16.gmra.mrb[4].mxu1 %vm350_vm3, %v2436_v11  ;;  %v1446_v11 = vld [vmem:[%s2945_s5 + $0x40] sm:$0xff] }
  0x4c   : > { %2080 = vmatmul.mubr.msk.bf16.gmra.mrb[12].mxu0 %vm350_vm3, %v946_v45  ;;  %1987 = vmatprep.mubr.msk.bf16.mxu1 %vm2356_vm0, %v2355_v1 }
  0x4d   : > { %2083 = vmatprep.mubr.msk.bf16.mxu0 %vm2356_vm0, %v2355_v1  ;;  %1490 = vperm.xlu0 %2318, %v1446_v11  }
  0x53   : > { %1988 = vmatmul.mubr.msk.bf16.gmra.mrb[8].mxu1 %vm350_vm3, %v2438_v12  ;;  %v1447_v12 = vld [vmem:[%s2945_s5 + $0x48] sm:$0xff] }
  0x54   : > { %2084 = vmatmul.mubr.msk.bf16.gmra.mrb[16].mxu0 %vm350_vm3, %v948_v54  ;;  %1991 = vmatprep.mubr.msk.bf16.mxu1 %vm2356_vm0, %v2355_v1 }
  0x55   : > { %2089 = vmatprep.mubr.msk.bf16.mxu0 %vm2356_vm0, %v2355_v1  ;;  %1495 = vperm.xlu1 %2319, %v1447_v12  }
  0x5b   : > { %1992 = vmatmul.mubr.msk.bf16.gmra.mrb[12].mxu1 %vm350_vm3, %v2467_v40 }
  0x5c   : > { %2090 = vmatmul.mubr.msk.bf16.vlgmr.msra.gmra.mrb[0].mxu0 %vm350_vm3, %v1062_v2  ;;  %1995 = vmatprep.mubr.msk.bf16.mxu1 %vm2356_vm0, %v2355_v1 }
  0x5d   : > { %2110 = vmatpush3.bf16.msra.mxu0 %v2339_v9  ;;  %2093 = vmatprep.mubr.msk.bf16.mxu0 %vm2356_vm0, %v2355_v1 }
  0x5e   : > { %2131 = vmatprep.subr.bf16.mxu0 %v2355_v1 }
  0x63   : > { %1996 = vmatmul.mubr.msk.bf16.gmra.mrb[16].mxu1 %vm350_vm3, %v2489_v55 }
  0x64   : > { %2094 = vmatmul.mubr.msk.bf16.gmra.mrb[4].mxu0 %vm350_vm3, %v1064_v19  ;;  %2001 = vmatprep.mubr.msk.bf16.mxu1 %vm2356_vm0, %v2355_v1 }
  0x65   : > { %2097 = vmatprep.mubr.msk.bf16.mxu0 %vm2356_vm0, %v2355_v1 }
  0x6b   : > { %2002 = vmatmul.mubr.msk.bf16.vlgmr.msra.gmra.mrb[0].mxu1 %vm350_vm3, %v2520_v24  ;;  %v539_v24 = vrot.slane %v2489_v55, 1 }
  0x6c   : > { %2098 = vmatmul.mubr.msk.bf16.gmra.mrb[8].mxu0 %vm350_vm3, %v1066_v38  ;;  %2005 = vmatprep.mubr.msk.bf16.mxu1 %vm2356_vm0, %v2355_v1 }
  0x6d   : > { %2101 = vmatprep.mubr.msk.bf16.mxu0 %vm2356_vm0, %v2355_v1  ;;  %2022 = vmatpush3.bf16.msra.mxu1 %v2340_v21  ;;  %v540_v25 = vsel %vm531_vm5, %v537_v23, %v539_v24 }
  0x6e   : > { %2153 = vmatprep.subr.bf16.mxu1 %v2355_v1 }
  0x73   : > { %2006 = vmatmul.mubr.msk.bf16.gmra.mrb[4].mxu1 %vm350_vm3, %v2526_v28  ;;  %v2342_v28 = vld [vmem:[%s2941_s1 + $0x40] sm:$0xff]  }
  0x74   : > { %2102 = vmatmul.mubr.msk.bf16.gmra.mrb[12].mxu0 %vm350_vm3, %v1068_v22  ;;  %2009 = vmatprep.mubr.msk.bf16.mxu1 %vm2356_vm0, %v2355_v1 }
  0x75   : > { %2105 = vmatprep.mubr.msk.bf16.mxu0 %vm2356_vm0, %v2355_v1 }
  0x7b   : > { %2010 = vmatmul.mubr.msk.bf16.gmra.mrb[8].mxu1 %vm350_vm3, %v2531_v29  ;;  %v541_v29 = vrot.slane %v2543_v34, 1  ;;  %v1198_v34 = vshll.u32 %v2504_v4, 16 }
  0x7c   : > { %2106 = vmatmul.mubr.msk.bf16.gmra.mrb[16].mxu0 %vm350_vm3, %v2538_v31  ;;  %2013 = vmatprep.mubr.msk.bf16.mxu1 %vm2356_vm0, %v2355_v1  ;;  %v1195_v31 = vshrl.u32 %v2504_v4, 16 }
  0x7d   : > { %2111 = vmatprep.mubr.msk.bf16.mxu0 %vm2356_vm0, %v2355_v1  ;;  %v542_v23 = vsel %vm531_vm5, %v539_v24, %v541_v29  ;;  %v1200_v18 = vrot.slane %v1198_v34, 3 }
  0x83   : > { %2014 = vmatmul.mubr.msk.bf16.gmra.mrb[12].mxu1 %vm350_vm3, %v540_v25 }
  0x84   : > { %2112 = vmatmul.mubr.msk.bf16.vlgmr.msra.gmra.mrb[0].mxu0 %vm350_vm3, %v2549_v39  ;;  %2017 = vmatprep.mubr.msk.bf16.mxu1 %vm2356_vm0, %v2355_v1  ;;  %v1197_v39 = vrot.slane %v1195_v31, 2 }
  0x85   : > { %2132 = vmatpush3.bf16.msra.mxu0 %v2342_v28  ;;  %2115 = vmatprep.mubr.msk.bf16.mxu0 %vm2356_vm0, %v2355_v1 }
  0x8b   : > { %2018 = vmatmul.mubr.msk.bf16.gmra.mrb[16].mxu1 %vm350_vm3, %v542_v23 }
  0x8c   : > { %2116 = vmatmul.mubr.msk.bf16.gmra.mrb[4].mxu0 %vm350_vm3, %v2565_v13  ;;  %2023 = vmatprep.mubr.msk.bf16.mxu1 %vm2356_vm0, %v2355_v1  ;;  %v1201_v13 = vor.u32 %v1200_v18, %v1197_v39 }
  0x8d   : > { %2119 = vmatprep.mubr.msk.bf16.mxu0 %vm2356_vm0, %v2355_v1 }
  0x8e   : > { %v1202_v27 = vsel %vm1178_vm6, %v2559_v10, %v1201_v13  ;;  %v1326_v10 = vsel %vm1319_vm7, %v1323_v8, %v1325_v5 }
  0x93   : > { %2024 = vmatmul.mubr.msk.bf16.vlgmr.msra.gmra.mrb[0].mxu1 %vm350_vm3, %v2557_v49  ;;  %v1206_v49 = vrot.slane %v1204_v30, 2 }
  0x94   : > { %2120 = vmatmul.mubr.msk.bf16.gmra.mrb[8].mxu0 %vm350_vm3, %v2578_v57  ;;  %2027 = vmatprep.mubr.msk.bf16.mxu1 %vm2356_vm0, %v2355_v1 }
  0x95   : > { %2123 = vmatprep.mubr.msk.bf16.mxu0 %vm2356_vm0, %v2355_v1  ;;  %2154 = vmatpush3.bf16.msra.mxu1 %v2404_v0  ;;  %v1210_v0 = vor.u32 %v1209_v33, %v1206_v49 }
  0x97   : > { %v1211_v57 = vsel %vm1178_vm6, %v1201_v13, %v1210_v0 }
  0x9b   : > { %2028 = vmatmul.mubr.msk.bf16.gmra.mrb[4].mxu1 %vm350_vm3, %v2568_v53  ;;  %v1328_v53 = vsel %vm1319_vm7, %v1325_v5, %v1327_v43 }
  0x9c   : > { %2124 = vmatmul.mubr.msk.bf16.gmra.mrb[12].mxu0 %vm350_vm3, %v1202_v27  ;;  %2031 = vmatprep.mubr.msk.bf16.mxu1 %vm2356_vm0, %v2355_v1 }
  0x9d   : > { %2127 = vmatprep.mubr.msk.bf16.mxu0 %vm2356_vm0, %v2355_v1 }
  0xa3   : > { %2032 = vmatmul.mubr.msk.bf16.gmra.mrb[8].mxu1 %vm350_vm3, %v2581_v58 }
  0xa4   : > { %2128 = vmatmul.mubr.msk.bf16.gmra.mrb[16].mxu0 %vm350_vm3, %v1211_v57  ;;  %2035 = vmatprep.mubr.msk.bf16.mxu1 %vm2356_vm0, %v2355_v1 }
  0xa5   : > { %2133 = vmatprep.mubr.msk.bf16.mxu0 %vm2356_vm0, %v2355_v1 }
  0xab   : > { %2036 = vmatmul.mubr.msk.bf16.gmra.mrb[12].mxu1 %vm350_vm3, %v2592_v6 }
  0xac   : > { %2134 = vmatmul.mubr.msk.bf16.vlgmr.msra.gmra.mrb[0].mxu0 %vm350_vm3, %v2599_v14  ;;  %2039 = vmatprep.mubr.msk.bf16.mxu1 %vm2356_vm0, %v2355_v1 }
  0xad   : > { %2137 = vmatprep.mubr.msk.bf16.mxu0 %vm2356_vm0, %v2355_v1 }
  0xb3   : > { %2040 = vmatmul.mubr.msk.bf16.gmra.mrb[16].mxu1 %vm350_vm3, %v2604_v16 }
  0xb4   : > { %2138 = vmatmul.mubr.msk.bf16.gmra.mrb[4].mxu0 %vm350_vm3, %v2609_v17  ;;  %2057 = vmatprep.mubr.msk.bf16.mxu1 %vm2356_vm0, %v2355_v1 }
  0xb5   : > { %2141 = vmatprep.mubr.msk.bf16.mxu0 %vm2356_vm0, %v2355_v1 }
  0xb6   : > { %v1451_v37 = vpop.permute.xlu0 %1450 }
  0xb7   : > { %v1461_v47 = vpop.permute.xlu1 %1460 }
  0xba   : > { %v1456_v45 = vpop.permute.xlu0 %1455 }
  0xbb   : > { %2058 = vmatmul.mubr.msk.bf16.vlgmr.msra.gmra.mrb[12].mxu1 %vm350_vm3, %v2620_v26 }
  0xbc   : > { %2142 = vmatmul.mubr.msk.bf16.gmra.mrb[8].mxu0 %vm350_vm3, %v1326_v10  ;;  %2061 = vmatprep.mubr.msk.bf16.mxu1 %vm2356_vm0, %v2355_v1  ;;  %v1466_v63 = vpop.permute.xlu1 %1465 }
  0xbd   : > { %2145 = vmatprep.mubr.msk.bf16.mxu0 %vm2356_vm0, %v2355_v1 }
  0xbe   : > { %v1471_v9 = vpop.permute.xlu0 %1470 }
  0xc0   : > { %v1476_v33 = vpop.permute.xlu1 %1475 }
  0xc3   : > { %2062 = vmatmul.mubr.msk.bf16.gmra.mrb[16].mxu1 %vm350_vm3, %v2634_v3 }
  0xc4   : > { %2146 = vmatmul.mubr.msk.bf16.gmra.mrb[12].mxu0 %vm350_vm3, %v1328_v53 }
  0xc5   : > { %2149 = vmatprep.mubr.msk.bf16.mxu0 %vm2356_vm0, %v2355_v1 }
  0xcc   : > { %2150 = vmatmul.mubr.msk.bf16.gmra.mrb[16].mxu0 %vm350_vm3, %v2648_v7 }
 0x166   : > { %v724_v40 = vpop.f32.mrb[0].mxu1 }
 0x167   : > { %v2025_v55 = vpop.f32.mrb[1].mxu1 }
 0x168   : > { %v727_v58 = vpop.f32.mrb[2].mxu1 }
 0x169   : > { %v2026_v6 = vpop.f32.mrb[3].mxu1 }
 0x16e   : > { %v732_v8 = vpop.f32.mrb[4].mxu1 }
 0x16f   : > { %v2029_v14 = vpop.f32.mrb[5].mxu1 }
 0x170   : > { %v735_v4 = vpop.f32.mrb[6].mxu1 }
 0x171   : > { %v2030_v16 = vpop.f32.mrb[7].mxu1 }
 0x176   : > { %v740_v17 = vpop.f32.mrb[8].mxu1 }
 0x177   : > { %v2033_v26 = vpop.f32.mrb[9].mxu1 }
 0x178   : > { %v743_v35 = vpop.f32.mrb[10].mxu1 }
 0x179   : > { %v2034_v36 = vpop.f32.mrb[11].mxu1 }
 0x17f   : > { %v1386_v42 = vpop.f32.mrb[0].mxu0 }
 0x180   : > { %v2841_v3 = vadd.f32 %v1386_v42, %v724_v40  ;;  %v2135_v41 = vpop.f32.mrb[1].mxu0  ;;  %v1481_v40 = vpop.permute.xlu0 %1480 }
 0x181   : > { %v1389_v43 = vpop.f32.mrb[2].mxu0 }
 0x182   : > { %v2843_v44 = vadd.f32 %v1389_v43, %v727_v58  ;;  %v2136_v7 = vpop.f32.mrb[3].mxu0  ;;  %v1498_v46 = vmul.f32 %v2841_v3, %v1451_v37 }
 0x184   : > { %v1499_v50 = vmul.f32 %v2843_v44, %v1456_v45  ;;  %v1533_v62 = vmul.f32 %v1498_v46, %v1498_v46  ;;  %v1508_v38 = vsel %vm350_vm3, %v1498_v46, 0.0 }
 0x186   : > { %v1534_v61 = vmul.f32 %v1499_v50, %v1499_v50  ;;  %v1509_v2 = vsel %vm350_vm3, %v1499_v50, 0.0  ;;  %v1543_v23 = vsel %vm350_vm3, %v1533_v62, 0.0 }
 0x187   : > { %v1394_v48 = vpop.f32.mrb[4].mxu0  ;;  %v1510_v29 = vadd.f32 %v1509_v2, %v1508_v38 }
 0x188   : > { %v2846_v51 = vadd.f32 %v1394_v48, %v732_v8  ;;  %v2139_v52 = vpop.f32.mrb[5].mxu0  ;;  %v1544_v21 = vsel %vm350_vm3, %v1534_v61, 0.0  ;;  %v1486_v48 = vpop.permute.xlu1 %1485 }
 0x189   : > { %v1397_v54 = vpop.f32.mrb[6].mxu0  ;;  %v1545_v27 = vadd.f32 %v1544_v21, %v1543_v23 }
 0x18a   : > { %v1500_v56 = vmul.f32 %v2846_v51, %v1461_v47  ;;  %v2850_v59 = vadd.f32 %v1397_v54, %v735_v4  ;;  %v2140_v60 = vpop.f32.mrb[7].mxu0 }
 0x18c   : > { %v1535_v11 = vmul.f32 %v1500_v56, %v1500_v56  ;;  %v1501_v12 = vmul.f32 %v2850_v59, %v1466_v63  ;;  %v1511_v22 = vsel %vm350_vm3, %v1500_v56, 0.0 }
 0x18d   : > { %v1512_v49 = vadd.f32 %v1511_v22, %v1510_v29  ;;  %v1496_v29 = vpop.permute.xlu1 %1495 }
 0x18e   : > { %v909_v15 = vpop.f32.mrb[12].mxu1  ;;  %v1546_v39 = vsel %vm350_vm3, %v1535_v11, 0.0  ;;  %v1536_v18 = vmul.f32 %v1501_v12, %v1501_v12  ;;  %v1513_v0 = vsel %vm350_vm3, %v1501_v12, 0.0 }
 0x18f   : > { %v1402_v19 = vpop.f32.mrb[8].mxu0  ;;  %v2059_v20 = vpop.f32.mrb[13].mxu1  ;;  %v1547_v10 = vadd.f32 %v1546_v39, %v1545_v27  ;;  %v1514_v6 = vadd.f32 %v1513_v0, %v1512_v49 }
 0x190   : > { %v2857_v24 = vadd.f32 %v1402_v19, %v740_v17  ;;  %v2143_v25 = vpop.f32.mrb[9].mxu0  ;;  %v912_v28 = vpop.f32.mrb[14].mxu1  ;;  %v1548_v53 = vsel %vm350_vm3, %v1536_v18, 0.0 }
 0x191   : > { %v1405_v31 = vpop.f32.mrb[10].mxu0  ;;  %v2060_v34 = vpop.f32.mrb[15].mxu1  ;;  %v1549_v36 = vadd.f32 %v1548_v53, %v1547_v10 }
 0x192   : > { %v1502_v13 = vmul.f32 %v2857_v24, %v1471_v9  ;;  %v2862_v30 = vadd.f32 %v1405_v31, %v743_v35  ;;  %v2144_v32 = vpop.f32.mrb[11].mxu0  ;;  %v1491_v19 = vpop.permute.xlu0 %1490 }
 0x193   : > { %v1575_v32 = vlaneseq }
 0x194   : > { %v1537_v57 = vmul.f32 %v1502_v13, %v1502_v13  ;;  %v1503_v5 = vmul.f32 %v2862_v30, %v1476_v33  ;;  %v1515_v55 = vsel %vm350_vm3, %v1502_v13, 0.0 }
 0x195   : > { %v1516_v37 = vadd.f32 %v1515_v55, %v1514_v6 }
 0x196   : > { %v917_v58 = vpop.f32.mrb[16].mxu1  ;;  %v1550_v4 = vsel %vm350_vm3, %v1537_v57, 0.0  ;;  %v1538_v16 = vmul.f32 %v1503_v5, %v1503_v5  ;;  %v1517_v43 = vsel %vm350_vm3, %v1503_v5, 0.0 }
 0x197   : > { %v1410_v8 = vpop.f32.mrb[12].mxu0  ;;  %v2063_v14 = vpop.f32.mrb[17].mxu1  ;;  %v1551_v50 = vadd.f32 %v1550_v4, %v1549_v36  ;;  %v1518_v60 = vadd.f32 %v1517_v43, %v1516_v37 }
 0x198   : > { %v2869_v17 = vadd.f32 %v1410_v8, %v909_v15  ;;  %v2147_v26 = vpop.f32.mrb[13].mxu0  ;;  %v920_v35 = vpop.f32.mrb[18].mxu1  ;;  %v1552_v52 = vsel %vm350_vm3, %v1538_v16, 0.0  ;;  %v1435_v14 = vld [vmem:[%s2942_s2] sm:$0x1] }
 0x199   : > { %v1413_v42 = vpop.f32.mrb[14].mxu0  ;;  %v2064_v41 = vpop.f32.mrb[19].mxu1  ;;  %v1553_v63 = vadd.f32 %v1552_v52, %v1551_v50  ;;  %v1568_v36 = vmul.f32 64.0, %v1435_v14 }
 0x19a   : > { %v1504_v7 = vmul.f32 %v2869_v17, %v1481_v40  ;;  %v2873_v45 = vadd.f32 %v1413_v42, %v912_v28  ;;  %v2148_v47 = vpop.f32.mrb[15].mxu0  ;;  %v1576_v40 = vand.u32 127, %v1575_v32  ;;  %v1570_v42 = vmul.f32 2.0, %v1435_v14 }
 0x19b   : > { %v1573_v52 = vmul.f32 %v1568_v36, %v1435_v14 }
 0x19c   : > { %v1519_v46 = vsel %vm350_vm3, %v1504_v7, 0.0  ;;  %v1539_v54 = vmul.f32 %v1504_v7, %v1504_v7  ;;  %v1505_v56 = vmul.f32 %v2873_v45, %v1486_v48  ;;  %vm1577_vm8 = vcmp.lt.s32.totalorder %v1576_v40, 8 }
 0x19d   : > { %v1520_v2 = vadd.f32 %v1519_v46, %v1518_v60  ;;  %v1878_v26 = vsel %vm1577_vm8, 1.0, %v2355_v1 }
 0x19e   : > { %v1554_v61 = vsel %vm350_vm3, %v1539_v54, 0.0  ;;  %v1540_v62 = vmul.f32 %v1505_v56, %v1505_v56  ;;  %v1521_v11 = vsel %vm350_vm3, %v1505_v56, 0.0  ;;  %v1580_v43 = vsub.f32 1.0, %v1878_v26 }
 0x19f   : > { %v1418_v9 = vpop.f32.mrb[16].mxu0  ;;  %v1555_v20 = vadd.f32 %v1554_v61, %v1553_v63  ;;  %v1522_v23 = vadd.f32 %v1521_v11, %v1520_v2 }
 0x1a0   : > { %v2880_v12 = vadd.f32 %v1418_v9, %v917_v58  ;;  %v2151_v15 = vpop.f32.mrb[17].mxu0  ;;  %v1556_v21 = vsel %vm350_vm3, %v1540_v62, 0.0 }
 0x1a1   : > { %v1421_v38 = vpop.f32.mrb[18].mxu0  ;;  %v1557_v18 = vadd.f32 %v1556_v21, %v1555_v20 }
 0x1a2   : > { %v1506_v22 = vmul.f32 %v2880_v12, %v1491_v19  ;;  %v2884_v25 = vadd.f32 %v1421_v38, %v920_v35  ;;  %v2152_v28 = vpop.f32.mrb[19].mxu0 }
 0x1a4   : > { %v1523_v31 = vsel %vm350_vm3, %v1506_v22, 0.0  ;;  %v1541_v34 = vmul.f32 %v1506_v22, %v1506_v22  ;;  %v1507_v39 = vmul.f32 %v2884_v25, %v1496_v29 }
 0x1a5   : > { %v1524_v13 = vadd.f32 %v1523_v31, %v1522_v23 }
 0x1a6   : > { %v1558_v27 = vsel %vm350_vm3, %v1541_v34, 0.0  ;;  %v1525_v49 = vsel %vm350_vm3, %v1507_v39, 0.0  ;;  %v1542_v33 = vmul.f32 %v1507_v39, %v1507_v39 }
 0x1a7   : > { %v1559_v0 = vadd.f32 %v1558_v27, %v1557_v18  ;;  %v1526_v57 = vadd.f32 %v1525_v49, %v1524_v13 }
 0x1a8   : > { %v1560_v5 = vsel %vm350_vm3, %v1542_v33, 0.0  ;;  %v1622_v33 = vshrl.u32 %v1575_v32, 7 }
 0x1a9   : > { %v1527_v10 = vrot.slane %v1526_v57, 4  ;;  %v1561_v53 = vadd.f32 %v1560_v5, %v1559_v0 }
 0x1aa   : > { %v1623_v40 = vsub.s32 0, %v1622_v33 }
 0x1ab   : > { %v1528_v55 = vadd.f32 %v1527_v10, %v1526_v57  ;;  %v1562_v58 = vrot.slane %v1561_v53, 4 }
 0x1ad   : > { %v1529_v6 = vrot.slane %v1528_v55, 2  ;;  %v1563_v8 = vadd.f32 %v1562_v58, %v1561_v53  ;;  %v1436_v53 = vld [vmem:[%s2943_s3] sm:$0x1] }
 0x1af   : > { %v1564_v4 = vrot.slane %v1563_v8, 2  ;;  %v1530_v16 = vadd.f32 %v1529_v6, %v1528_v55 }
 0x1b1   : > { %v1531_v35 = vrot.slane %v1530_v16, 1  ;;  %v1565_v37 = vadd.f32 %v1564_v4, %v1563_v8  ;;  %v1437_v8 = vld [vmem:[%s2944_s4] sm:$0x1] }
 0x1b3   : > { %v1532_v41 = vadd.f32 %v1531_v35, %v1530_v16  ;;  %v1566_v7 = vrot.slane %v1565_v37, 1 }
 0x1b5   : > { %v1569_v47 = vadd.f32 %v1568_v36, %v1532_v41  ;;  %v1567_v48 = vadd.f32 %v1566_v7, %v1565_v37  ;;  %v1571_v50 = vmul.f32 %v1570_v42, %v1532_v41 }
 0x1b7   : > { %v1588_v46 = vmul.f32 %v1580_v43, %v1569_v47  ;;  %v1581_v54 = vmul.f32 %v1878_v26, %v1569_v47  ;;  %v1572_v56 = vadd.f32 %v1571_v50, %v1567_v48 }
 0x1b9   : > { %v1589_v60 = vsel %vm1582_vm9, %v1588_v46, 0.0  ;;  %v1583_v61 = vsel %vm1582_vm9, %v1581_v54, 0.0  ;;  %v1574_v62 = vadd.f32 %v1573_v52, %v1572_v56 }
 0x1ba   : > { %1590 = vadd.xlane.f32.xlu1 %v1589_v60  ;;  %1584 = vadd.xlane.f32.xlu0 %v1583_v61 }
 0x1bb   : > { %v1593_v1 = vmul.f32 %v1878_v26, %v1574_v62  ;;  %v1598_v2 = vmul.f32 %v1580_v43, %v1574_v62 }
 0x1bd   : > { %v1594_v63 = vsel %vm1582_vm9, %v1593_v1, 0.0  ;;  %v1599_v9 = vsel %vm1582_vm9, %v1598_v2, 0.0 }
 0x1be   : > { %1595 = vadd.xlane.f32.xlu0 %v1594_v63 }
 0x1c2   : > { %1600 = vadd.xlane.f32.xlu0 %v1599_v9 }
 0x247   : > { %v1585_v11 = vpop.xlane.xlu0 %1584  ;;  %v1591_v19 = vpop.xlane.xlu1 %1590 }
 0x248   : > { %v1587_v15 = vmul.f32 0.001953125, %v1585_v11  ;;  %v1592_v38 = vmul.f32 0.001953125, %v1591_v19 }
 0x24a   : > { %v1603_v21 = vmul.f32 %v1587_v15, %v1587_v15  ;;  %v1607_v23 = vmul.f32 %v1592_v38, %v1592_v38  ;;  %v1612_v13 = vmul.f32 %v1592_v38, %v1580_v43  ;;  %v1611_v27 = vmul.f32 %v1878_v26, %v1587_v15 }
 0x24b   : > { %v1596_v20 = vpop.xlane.xlu0 %1595 }
 0x24c   : > { %v1597_v22 = vmul.f32 0.001953125, %v1596_v20  ;;  %v1613_v57 = vadd.f32 %v1612_v13, %v1611_v27 }
 0x24e   : > { %v1604_v28 = vsub.f32 %v1597_v22, %v1603_v21  ;;  %v1618_v58 = vsub.f32 %v1435_v14, %v1613_v57 }
 0x24f   : > { %v1601_v29 = vpop.xlane.xlu0 %1600 }
 0x250   : > { %v1605_v31 = vadd.f32 1e-05, %v1604_v28  ;;  %v1602_v34 = vmul.f32 0.001953125, %v1601_v29 }
 0x252   : > { %v1608_v39 = vsub.f32 %v1602_v34, %v1607_v23  ;;  %2343 = vrsqrt.f32 %v1605_v31 }
 0x254   : > { %v1609_v18 = vadd.f32 1e-05, %v1608_v39 }
 0x256   : > { %2345 = vrsqrt.f32 %v1609_v18 }
 0x25c   : > { %v2344_v49 = vpop.eup %2343 }
 0x25d   : > { %v1614_v5 = vmul.f32 %v2344_v49, %v1878_v26 }
 0x260   : > { %v2346_v0 = vpop.eup %2345 }
 0x261   : > { %v1615_v10 = vmul.f32 %v2346_v0, %v1580_v43 }
 0x263   : > { %v1616_v55 = vadd.f32 %v1615_v10, %v1614_v5 }
 0x265   : > { %v1617_v6 = vmul.f32 %v1616_v55, %v1436_v53 }
 0x267   : > { %v1619_v4 = vmul.f32 %v1618_v58, %v1617_v6  ;;  %v1624_v16 = vrot.slane %v1617_v6, %v1623_v40 }
 0x269   : > { %v1620_v35 = vadd.f32 %v1619_v4, %v1437_v8  ;;  %v1625_v32 = vmul.f32 %v2841_v3, %v1624_v16  ;;  %v1626_v26 = vmul.f32 %v2843_v44, %v1624_v16  ;;  %v1627_v36 = vmul.f32 %v2846_v51, %v1624_v16 }
 0x26a   : > { %v1628_v37 = vmul.f32 %v2850_v59, %v1624_v16  ;;  %v1629_v42 = vmul.f32 %v2857_v24, %v1624_v16  ;;  %v1630_v14 = vmul.f32 %v2862_v30, %v1624_v16  ;;  %v1631_v43 = vmul.f32 %v2869_v17, %v1624_v16 }
 0x26b   : > { %v1639_v41 = vrot.slane %v1620_v35, %v1623_v40  ;;  %v1632_v7 = vmul.f32 %v2873_v45, %v1624_v16  ;;  %v1633_v47 = vmul.f32 %v2880_v12, %v1624_v16  ;;  %v1634_v48 = vmul.f32 %v2884_v25, %v1624_v16 }
 0x26d   : > { %v1641_v3 = vadd.f32 %v1639_v41, %v1625_v32  ;;  %v1642_v50 = vadd.f32 %v1639_v41, %v1626_v26  ;;  %v1643_v44 = vadd.f32 %v1639_v41, %v1627_v36  ;;  %v1644_v51 = vadd.f32 %v1639_v41, %v1628_v37 }
 0x26e   : > { %v1645_v59 = vadd.f32 %v1639_v41, %v1629_v42  ;;  %v1646_v52 = vadd.f32 %v1639_v41, %v1630_v14  ;;  %v1647_v24 = vadd.f32 %v1639_v41, %v1631_v43  ;;  %v1648_v46 = vadd.f32 %v1639_v41, %v1632_v7 }
 0x26f   : > { %v1649_v30 = vadd.f32 %v1639_v41, %v1633_v47  ;;  %v1650_v54 = vadd.f32 %v1639_v41, %v1634_v48  ;;  %vm1651_vm11 = vcmp.gt.f32.partialorder %v1641_v3, 0.0  ;;  %vm1652_vm12 = vcmp.gt.f32.partialorder %v1642_v50, 0.0 }
 0x270   : > { %vm1653_vm13 = vcmp.gt.f32.partialorder %v1643_v44, 0.0  ;;  %vm1654_vm14 = vcmp.gt.f32.partialorder %v1644_v51, 0.0  ;;  %vm1655_vm15 = vcmp.gt.f32.partialorder %v1645_v59, 0.0  ;;  %vm1656_vm0 = vcmp.gt.f32.partialorder %v1646_v52, 0.0 }
 0x271   : > { %vm1657_vm1 = vcmp.gt.f32.partialorder %v1647_v24, 0.0  ;;  %vm1658_vm2 = vcmp.gt.f32.partialorder %v1648_v46, 0.0  ;;  %vm1659_vm3 = vcmp.gt.f32.partialorder %v1649_v30, 0.0  ;;  %vm1660_vm4 = vcmp.gt.f32.partialorder %v1650_v54, 0.0 }
 0x272   : > { %v1661_v17 = vmul.f32 0.2, %v1641_v3  ;;  %v1662_v45 = vmul.f32 0.2, %v1642_v50  ;;  %v1663_v12 = vmul.f32 0.2, %v1643_v44 }
 0x273   : > { %v1664_v25 = vmul.f32 0.2, %v1644_v51  ;;  %v1665_v56 = vmul.f32 0.2, %v1645_v59  ;;  %v1666_v60 = vmul.f32 0.2, %v1646_v52 }
 0x274   : > { %v1667_v61 = vmul.f32 0.2, %v1647_v24  ;;  %v1668_v62 = vmul.f32 0.2, %v1648_v46  ;;  %v1669_v1 = vmul.f32 0.2, %v1649_v30  ;;  %v1671_v63 = vsel %vm1651_vm11, %v1641_v3, %v1661_v17 }
 0x275   : > { %v1670_v2 = vmul.f32 0.2, %v1650_v54  ;;  %v1672_v9 = vsel %vm1652_vm12, %v1642_v50, %v1662_v45  ;;  %v1673_v11 = vsel %vm1653_vm13, %v1643_v44, %v1663_v12  ;;  %v1674_v15 = vsel %vm1654_vm14, %v1644_v51, %v1664_v25 }
 0x276   : > { %v1675_v19 = vsel %vm1655_vm15, %v1645_v59, %v1665_v56  ;;  %v1676_v20 = vsel %vm1656_vm0, %v1646_v52, %v1666_v60  ;;  %v1677_v38 = vsel %vm1657_vm1, %v1647_v24, %v1667_v61  ;;  %v1678_v21 = vsel %vm1658_vm2, %v1648_v46, %v1668_v62 }
 0x277   : > { %v1679_v22 = vsel %vm1659_vm3, %v1649_v30, %v1669_v1  ;;  %v1680_v28 = vsel %vm1660_vm4, %v1650_v54, %v1670_v2  ;;  %v1891_v29 = vpack.c.bf16 %v1671_v63, %v1671_v63  ;;  %v1892_v23 = vpack.c.bf16 %v1672_v9, %v1672_v9 }
 0x278   : > { %v1893_v31 = vpack.c.bf16 %v1673_v11, %v1673_v11  ;;  %v1894_v34 = vpack.c.bf16 %v1674_v15, %v1674_v15  ;;  %v1895_v39 = vpack.c.bf16 %v1675_v19, %v1675_v19  ;;  %v1896_v18 = vpack.c.bf16 %v1676_v20, %v1676_v20 }
 0x279   : > { %v1897_v13 = vpack.c.bf16 %v1677_v38, %v1677_v38  ;;  %v1898_v27 = vpack.c.bf16 %v1678_v21, %v1678_v21  ;;  %v1899_v49 = vpack.c.bf16 %v1679_v22, %v1679_v22  ;;  %v1900_v33 = vpack.c.bf16 %v1680_v28, %v1680_v28  ;;  %1722 = vst.msk [vmem:[%s251_s29] sm:$0xf] %vm1721_vm10, %v1891_v29 }
 0x27a   : > { %1723 = vst.msk [vmem:[%s251_s29 + $0x4] sm:$0xf] %vm1721_vm10, %v1892_v23  ;;  %1724 = vst.msk [vmem:[%s251_s29 + $0x8] sm:$0xf] %vm1721_vm10, %v1893_v31 }
 0x27b   : > { %1725 = vst.msk [vmem:[%s251_s29 + $0xc] sm:$0xf] %vm1721_vm10, %v1894_v34  ;;  %1726 = vst.msk [vmem:[%s251_s29 + $0x10] sm:$0xf] %vm1721_vm10, %v1895_v39 }
 0x27c   : > { %1727 = vst.msk [vmem:[%s251_s29 + $0x14] sm:$0xf] %vm1721_vm10, %v1896_v18  ;;  %1728 = vst.msk [vmem:[%s251_s29 + $0x18] sm:$0xf] %vm1721_vm10, %v1897_v13 }
 0x27d   : > { %1729 = vst.msk [vmem:[%s251_s29 + $0x1c] sm:$0xf] %vm1721_vm10, %v1898_v27  ;;  %1730 = vst.msk [vmem:[%s251_s29 + $0x20] sm:$0xf] %vm1721_vm10, %v1899_v49 }
 0x27e   : > { %1731 = vst.msk [vmem:[%s251_s29 + $0x24] sm:$0xf] %vm1721_vm10, %v1900_v33 }
 0x27f PF: > { %s16_s21 = sadd.s32 1, %s2353_s21  }
 0x280   : > { %p13_p4 = scmp.ge.s32.totalorder %s16_s21, 4  }
 0x282   :  { %15 = sbr.rel (!%p13_p4) target bundleno = 1 (0x1), region = 82 }

// kernel: decoder_shallow.3
= control target key start
LH: loop header
LB: loop body
LE: loop exit
PB: predicated region body
PF: predicated region fallthrough
CT: control target
= control target key end

     0   :  { %s14781_s18 = smov 0   ;;  %s19059_s0 = inlined_call_operand.vmem [shape: bf16[2,328,32], index: 0, kind: input, shape index: {}]   ;;  %s19060_s1 = inlined_call_operand.vmem [shape: bf16[2,328,8], index: 1, kind: input, shape index: {}]   ;;  %s19061_s2 = inlined_call_operand.vmem [shape: bf16[9,32,8], index: 2, kind: input, shape index: {}]   ;;  %s19062_s3 = inlined_call_operand.vmem [shape: f32[1,8], index: 3, kind: input, shape index: {}]   ;;  %s19063_s4 = inlined_call_operand.vmem [shape: f32[1,8], index: 4, kind: input, shape index: {}]   ;;  %s19064_s5 = inlined_call_operand.vmem [shape: f32[1,8], index: 5, kind: input, shape index: {}]   ;;  %s19065_s6 = inlined_call_operand.vmem [shape: bf16[9,8,8], index: 6, kind: input, shape index: {}]   ;;  %s19066_s7 = inlined_call_operand.vmem [shape: bf16[9,8,8], index: 7, kind: input, shape index: {}]   ;;  %s19067_s8 = inlined_call_operand.vmem [shape: f32[1,8], index: 8, kind: input, shape index: {}]   ;;  %s19068_s9 = inlined_call_operand.vmem [shape: f32[1,8], index: 9, kind: input, shape index: {}]   ;;  %s19069_s10 = inlined_call_operand.vmem [shape: f32[1,8], index: 10, kind: input, shape index: {}]   ;;  %s19070_s11 = inlined_call_operand.vmem [shape: f32[5,8], index: 11, kind: input, shape index: {}]   ;;  %s19071_s12 = inlined_call_operand.vmem [shape: f32[5,1], index: 12, kind: input, shape index: {}]   ;;  %s19072_s13 = inlined_call_operand.vmem [shape: f32[288,1], index: 13, kind: input, shape index: {}]   ;;  %s19073_s14 = inlined_call_operand.vmem [shape: f32[2,4,288], index: 14, kind: output, shape index: {0}]   ;;  %s19074_s15 = inlined_call_operand.vmem [shape: f32[2,1,288], index: 15, kind: output, shape index: {1}]  }
   0x1 LB: > { %s11158_s19 = sadd.s32 4294967295, %s14694_s18   ;;  %p11162_p0 = scmp.ge.s32.totalorder %s14694_s18, 1  ;;  %s14694_s18 = sphi %s14781_s18, %s26_s18  }
   0x2   : > { %p450_p1 = scmp.lt.s32.totalorder %s14694_s18, 3 }
   0x4   : > { %p451_p2 = pnand %p11162_p0, %p450_p1 }
   0x6   : > { %454 = sbr.rel (%p451_p2) target bundleno = 2925 (0xb6d), region = 76 }
   0xd   : > { %v14508_v0 = vld [vmem:[%s19061_s2 + $0x10] sm:$0xff]   ;;  %p507_p3 = scmp.lt.s32.totalorder %s11158_s19, 1  ;;  %v14509_v1 = vld [vmem:[%s19061_s2 + $0x18] sm:$0xff]   ;;  %v14514_v2 = vld [vmem:[%s19061_s2] sm:$0xff]   ;;  %vm19170_vm0 = vsmask.f32 7424 }
   0xe   : > { %12461 = vmatprep.subr.bf16.mxu0 %v14508_v0  ;;  %vm867_vm1 = vcmask 261120   ;;  %v14524_v29 = vld [vmem:[%s19061_s2 + $0x8] sm:$0xff]   ;;  %v14880_v37 = vld [vmem:[%s19061_s2 + $0x20] sm:$0xff]   ;;  %vm19173_vm2 = vcmask 1046528   ;;  %vm19169_vm3 = vsmask.f32 6400 }
   0xf   : > { %s20484_s19 = smov (!%p507_p3, %s11158_s19), 1  ;;  %12462 = vmatpush3.bf16.msra.mxu0 %v14508_v0  ;;  %vm19168_vm4 = vcmask 1045504   ;;  %vm19167_vm5 = vsmask.f32 5376  ;;  %vm19166_vm6 = vcmask 1044480   ;;  %vm19174_vm7 = vcmask 60416  }
  0x10   : > { %12463 = vmatprep.subr.bf16.mxu0 %v14509_v1  ;;  %s14490_s24 = smul.u32 164, %s20484_s19  ;;  %vm19171_vm8 = vcmask 64512   ;;  %vm19172_vm9 = vcmask 1043456   ;;  %vm19165_vm11 = vcmask 57344  }
  0x11   : > { %s14491_s30 = smul.u32 12, %s20484_s19 }
  0x12   : > { %s14806_s29 = scalar_lea.vmem %s19059_s0, %s14490_s24  ;;  %s15730_s23 = scalar_lea.vmem %s19060_s1, %s14490_s24 }
  0x13   : > { %12464 = vmatpush3.bf16.msra.mxu0 %v14509_v1  ;;  %v14809_v3 = vld [vmem:[%s14806_s29] sm:$0xff]   ;;  %v14812_v4 = vld [vmem:[%s14806_s29 + $0x8] sm:$0xff]   ;;  %v14815_v5 = vld [vmem:[%s14806_s29 + $0x10] sm:$0xff]  }
  0x14   : > { %12501 = vmatprep.subr.bf16.mxu0 %v14514_v2  ;;  %v708_v6 = vshrl.u32 %v14809_v3, 16  ;;  %v710_v7 = vshll.u32 %v14809_v3, 16  ;;  %v19076_v8 = vshll.u32 %v14812_v4, 16  ;;  %v19075_v9 = vshrl.u32 %v14812_v4, 16  ;;  %v14825_v11 = vld [vmem:[%s14806_s29 + $0x18] sm:$0xff]   ;;  %v14831_v13 = vld [vmem:[%s14806_s29 + $0x20] sm:$0xff]  }
  0x15   : > { %v14822_v10 = vshll.u32 %v14815_v5, 16  ;;  %v14828_v12 = vshrl.u32 %v14815_v5, 16  ;;  %v14836_v16 = vld [vmem:[%s14806_s29 + $0x28] sm:$0xff]   ;;  %v14840_v18 = vshll.u32 %v14825_v11, 16  ;;  %v14845_v21 = vshll.u32 %v14831_v13, 16  ;;  %v14868_v32 = vld [vmem:[%s14806_s29 + $0x30] sm:$0xff]  }
  0x16   : > { %v712_v14 = vrot.slane %v710_v7, 1  ;;  %v717_v15 = vrot.slane %v19076_v8, 1  ;;  %19330 = vst [vmem:[#allocation3_spill] sm:$0xff] %v14836_v16  ;;  %v14850_v24 = vshrl.u32 %v14825_v11, 16  ;;  %v14855_v27 = vshrl.u32 %v14831_v13, 16  ;;  %19331 = vst [vmem:[#allocation4_spill] sm:$0xff] %v14868_v32 }
  0x17   : > { %v725_v17 = vrot.slane %v14822_v10, 1  ;;  %v733_v23 = vrot.slane %v14840_v18, 1  ;;  %v14858_v28 = vshll.u32 %v14836_v16, 16  ;;  %v741_v31 = vrot.slane %v14845_v21, 1  ;;  %v14875_v36 = vld [vmem:[%s14806_s29 + $0x38] sm:$0xff]   ;;  %v14900_v45 = vld [vmem:[%s14806_s29 + $0x40] sm:$0xff]  }
  0x18   : > { %v713_v19 = vor.u32 %v712_v14, %v708_v6  ;;  %v721_v20 = vor.u32 %v19075_v9, %v717_v15  ;;  %19332 = vst [vmem:[#allocation5_spill] sm:$0xff] %v14875_v36  ;;  %v14883_v38 = vshll.u32 %v14868_v32, 16  ;;  %v14887_v40 = vshrl.u32 %v14836_v16, 16  ;;  %19333 = vst [vmem:[#allocation6_spill] sm:$0xff] %v14900_v45  ;;  %v14907_v49 = vld [vmem:[%s14806_s29 + $0x48] sm:$0xff]   ;;  %v14924_v56 = vld [vmem:[%s14806_s29 + $0x50] sm:$0xff]  }
  0x19   : > { %v729_v22 = vor.u32 %v14828_v12, %v725_v17  ;;  %v737_v33 = vor.u32 %v14850_v24, %v733_v23  ;;  %v745_v34 = vor.u32 %v14855_v27, %v741_v31  ;;  %v749_v35 = vrot.slane %v14858_v28, 1  ;;  %19334 = vst [vmem:[#allocation7_spill] sm:$0xff] %v14907_v49  ;;  %19335 = vst [vmem:[#allocation8_spill] sm:$0xff] %v14924_v56  ;;  %v14927_v57 = vld [vmem:[%s14806_s29 + $0x58] sm:$0xff]   ;;  %v14952_v14 = vld [vmem:[%s14806_s29 + $0x60] sm:$0xff]  }
  0x1a   : > { %v718_v25 = vsel %vm19170_vm0, %v713_v19, %v717_v15  ;;  %v726_v26 = vsel %vm19170_vm0, %v721_v20, %v725_v17  ;;  %v14891_v42 = vshrl.u32 %v14868_v32, 16  ;;  %v14894_v43 = vshll.u32 %v14875_v36, 16  ;;  %19336 = vst [vmem:[#allocation9_spill] sm:$0xff] %v14927_v57  ;;  %19337 = vst [vmem:[#allocation10_spill] sm:$0xff] %v14952_v14  ;;  %v14959_v20 = vld [vmem:[%s14806_s29 + $0x68] sm:$0xff]  }
  0x1b   : > { %12465 = vmatprep.mubr.msk.bf16.mxu0 %vm867_vm1, %v718_v25  ;;  %v734_v30 = vsel %vm19170_vm0, %v729_v22, %v733_v23  ;;  %v742_v39 = vsel %vm19170_vm0, %v737_v33, %v741_v31  ;;  %v750_v41 = vsel %vm19170_vm0, %v745_v34, %v749_v35  ;;  %v757_v44 = vrot.slane %v14883_v38, 1  ;;  %19338 = vst [vmem:[#allocation11_spill] sm:$0xff] %v14959_v20  ;;  %v14978_v33 = vld [vmem:[%s14806_s29 + $0x70] sm:$0xff]  }
  0x1c   : > { %12466 = vmatmul.mubr.msk.bf16.vlgmr.msra.gmra.mrb[0].mxu0 %vm867_vm1, %v726_v26  ;;  %v753_v46 = vor.u32 %v14887_v40, %v749_v35  ;;  %v765_v48 = vrot.slane %v14894_v43, 1  ;;  %v14910_v50 = vshll.u32 %v14900_v45, 16  ;;  %v14914_v52 = vshrl.u32 %v14875_v36, 16 }
  0x1d   : > { %12469 = vmatprep.mubr.msk.bf16.mxu0 %vm867_vm1, %v734_v30  ;;  %12502 = vmatpush3.bf16.msra.mxu0 %v14514_v2  ;;  %v761_v47 = vor.u32 %v14891_v42, %v757_v44  ;;  %v14917_v53 = vshrl.u32 %v14900_v45, 16  ;;  %v14921_v55 = vshll.u32 %v14907_v49, 16  ;;  %v14936_v62 = vshrl.u32 %v14907_v49, 16 }
  0x1e   : > { %12503 = vmatprep.subr.bf16.mxu0 %v14524_v29  ;;  %v758_v51 = vsel %vm19170_vm0, %v753_v46, %v757_v44  ;;  %v773_v58 = vrot.slane %v14910_v50, 1  ;;  %v769_v59 = vor.u32 %v14914_v52, %v765_v48  ;;  %v14939_v63 = vshll.u32 %v14924_v56, 16 }
  0x1f   : > { %v766_v54 = vsel %vm19170_vm0, %v761_v47, %v765_v48  ;;  %v781_v61 = vrot.slane %v14921_v55, 1  ;;  %v14942_v0 = vshrl.u32 %v14924_v56, 16  ;;  %v14945_v1 = vshll.u32 %v14927_v57, 16 }
  0x20   : > { %v777_v60 = vor.u32 %v14917_v53, %v773_v58  ;;  %v774_v2 = vsel %vm19170_vm0, %v769_v59, %v773_v58  ;;  %v789_v7 = vrot.slane %v14939_v63, 1  ;;  %v14962_v22 = vshll.u32 %v14952_v14, 16  ;;  %v15004_v59 = vld [vmem:[%s14806_s29 + $0x80] sm:$0xff]  }
  0x21   : > { %12504 = vmatpush3.bf16.msra.mxu0 %v14524_v29  ;;  %v785_v15 = vor.u32 %v14936_v62, %v781_v61  ;;  %v797_v19 = vrot.slane %v14945_v1, 1  ;;  %v14966_v25 = vshrl.u32 %v14927_v57, 16  ;;  %v14970_v29 = vshrl.u32 %v14952_v14, 16 }
  0x22   : > { %12541 = vmatprep.subr.bf16.mxu0 %v14880_v37  ;;  %v782_v6 = vsel %vm19170_vm0, %v777_v60, %v781_v61  ;;  %v793_v17 = vor.u32 %v14942_v0, %v789_v7  ;;  %v14973_v30 = vshll.u32 %v14959_v20, 16  ;;  %v805_v31 = vrot.slane %v14962_v22, 1 }
  0x23   : > { %v790_v23 = vsel %vm19170_vm0, %v785_v15, %v789_v7  ;;  %v801_v34 = vor.u32 %v14966_v25, %v797_v19  ;;  %v14988_v44 = vshll.u32 %v14978_v33, 16  ;;  %v14992_v47 = vshrl.u32 %v14959_v20, 16 }
  0x24   : > { %12470 = vmatmul.mubr.msk.bf16.gmra.mrb[4].mxu0 %vm867_vm1, %v742_v39  ;;  %v798_v26 = vsel %vm19170_vm0, %v793_v17, %v797_v19  ;;  %v809_v35 = vor.u32 %v14970_v29, %v805_v31  ;;  %v813_v39 = vrot.slane %v14973_v30, 1  ;;  %v15014_v7 = vshll.u32 %v15004_v59, 16 }
  0x25   : > { %12473 = vmatprep.mubr.msk.bf16.mxu0 %vm867_vm1, %v750_v41  ;;  %v14985_v41 = vld [vmem:[%s14806_s29 + $0x78] sm:$0xff]   ;;  %v806_v46 = vsel %vm19170_vm0, %v801_v34, %v805_v31  ;;  %v821_v58 = vrot.slane %v14988_v44, 1  ;;  %v15028_v31 = vld [vmem:[%s14806_s29 + $0x90] sm:$0xf] }
  0x26   : > { %v814_v48 = vsel %vm19170_vm0, %v809_v35, %v813_v39  ;;  %v817_v60 = vor.u32 %v14992_v47, %v813_v39  ;;  %v15018_v17 = vshrl.u32 %v14985_v41, 16  ;;  %v837_v34 = vrot.slane %v15014_v7, 1 }
  0x27   : > { %v15036_v39 = vcombine.low %v15028_v31, %v15028_v31 }
  0x28   : > { %v822_v15 = vsel %vm19170_vm0, %v817_v60, %v821_v58 }
  0x2c   : > { %12474 = vmatmul.mubr.msk.bf16.gmra.mrb[8].mxu0 %vm867_vm1, %v758_v51  ;;  %v14996_v51 = vshrl.u32 %v14978_v33, 16 }
  0x2d   : > { %12477 = vmatprep.mubr.msk.bf16.mxu0 %vm867_vm1, %v766_v54  ;;  %v14999_v54 = vshll.u32 %v14985_v41, 16 }
  0x2e   : > { %v825_v61 = vor.u32 %v14996_v51, %v821_v58 }
  0x34   : > { %12478 = vmatmul.mubr.msk.bf16.gmra.mrb[12].mxu0 %vm867_vm1, %v774_v2  ;;  %v829_v2 = vrot.slane %v14999_v54, 1 }
  0x35   : > { %12481 = vmatprep.mubr.msk.bf16.mxu0 %vm867_vm1, %v782_v6  ;;  %v15011_v6 = vld [vmem:[%s14806_s29 + $0x88] sm:$0xff]  }
  0x36   : > { %19339 = vst [vmem:[#allocation12_spill] sm:$0xff] %v15011_v6  ;;  %v830_v19 = vsel %vm19170_vm0, %v825_v61, %v829_v2  ;;  %v833_v35 = vor.u32 %v15018_v17, %v829_v2  ;;  %v15042_v60 = vshrl.u32 %v15011_v6, 16  ;;  %v851_v61 = vshll.u32 %v15036_v39, 16 }
  0x38   : > { %v838_v58 = vsel %vm19170_vm0, %v833_v35, %v837_v34  ;;  %v1331_v35 = vrot.slane %v14812_v4, 1 }
  0x3c   : > { %12482 = vmatmul.mubr.msk.bf16.gmra.mrb[16].mxu0 %vm867_vm1, %v790_v23  ;;  %v15022_v23 = vshrl.u32 %v15004_v59, 16 }
  0x3d   : > { %12485 = vmatprep.mubr.msk.bf16.mxu0 %vm867_vm1, %v798_v26  ;;  %v15025_v26 = vshll.u32 %v15011_v6, 16 }
  0x44   : > { %12486 = vmatmul.mubr.msk.bf16.gmra.mrb[20].mxu0 %vm867_vm1, %v806_v46  ;;  %v841_v46 = vor.u32 %v15022_v23, %v837_v34  ;;  %v14533_v34 = vld [vmem:[%s19061_s2 + $0x28] sm:$0xff]  }
  0x45   : > { %12489 = vmatprep.mubr.msk.bf16.mxu0 %vm867_vm1, %v814_v48  ;;  %v845_v48 = vrot.slane %v15025_v26, 1 }
  0x47   : > { %v849_v2 = vor.u32 %v15042_v60, %v845_v48 }
  0x4c   : > { %12490 = vmatmul.mubr.msk.bf16.gmra.mrb[24].mxu0 %vm867_vm1, %v822_v15  ;;  %v846_v15 = vsel %vm19170_vm0, %v841_v46, %v845_v48  ;;  %v1333_v48 = vrot.slane %v14815_v5, 1 }
  0x4d   : > { %12493 = vmatprep.mubr.msk.bf16.mxu0 %vm867_vm1, %v830_v19  ;;  %v853_v19 = vrot.slane %v851_v61, 1 }
  0x4e   : > { %v1334_v61 = vsel %vm19173_vm2, %v1331_v35, %v1333_v48 }
  0x4f   : > { %v854_v9 = vsel %vm19170_vm0, %v849_v2, %v853_v19  ;;  %v1337_v2 = vrot.slane %v14831_v13, 1  ;;  %v1339_v19 = vrot.slane %v14836_v16, 1 }
  0x54   : > { %12494 = vmatmul.mubr.msk.bf16.gmra.mrb[28].mxu0 %vm867_vm1, %v838_v58  ;;  %v1335_v58 = vrot.slane %v14825_v11, 1 }
  0x55   : > { %12497 = vmatprep.mubr.msk.bf16.mxu0 %vm867_vm1, %v846_v15 }
  0x56   : > { %v1336_v15 = vsel %vm19173_vm2, %v1333_v48, %v1335_v58 }
  0x5c   : > { %12498 = vmatmul.mubr.msk.bf16.gmra.mrb[32].mxu0 %vm867_vm1, %v854_v9  ;;  %v14534_v9 = vld [vmem:[%s19061_s2 + $0x30] sm:$0xff]  }
  0x5d   : > { %12505 = vmatprep.mubr.msk.bf16.mxu0 %vm867_vm1, %v14809_v3 }
  0x64   : > { %12506 = vmatmul.mubr.msk.bf16.vlgmr.msra.gmra.mrb[0].mxu0 %vm867_vm1, %v14812_v4 }
  0x65   : > { %12509 = vmatprep.mubr.msk.bf16.mxu0 %vm867_vm1, %v14815_v5  ;;  %12542 = vmatpush3.bf16.msra.mxu0 %v14880_v37  ;;  %v1330_v37 = vrot.slane %v14809_v3, 1  ;;  %v14535_v3 = vld [vmem:[%s19061_s2 + $0x38] sm:$0xff]  }
  0x66   : > { %12543 = vmatprep.subr.bf16.mxu0 %v14533_v34 }
  0x67   : > { %v1332_v46 = vsel %vm19173_vm2, %v1330_v37, %v1331_v35  ;;  %v1338_v37 = vsel %vm19173_vm2, %v1335_v58, %v1337_v2  ;;  %v1340_v35 = vsel %vm19173_vm2, %v1337_v2, %v1339_v19  ;;  %v1345_v58 = vrot.slane %v14900_v45, 1 }
  0x69   : > { %12544 = vmatpush3.bf16.msra.mxu0 %v14533_v34  ;;  %v14536_v34 = vld [vmem:[%s19061_s2 + $0x40] sm:$0xff]  }
  0x6a   : > { %12581 = vmatprep.subr.bf16.mxu0 %v14534_v9 }
  0x6c   : > { %12510 = vmatmul.mubr.msk.bf16.gmra.mrb[4].mxu0 %vm867_vm1, %v14825_v11 }
  0x6d   : > { %12513 = vmatprep.mubr.msk.bf16.mxu0 %vm867_vm1, %v14831_v13 }
  0x74   : > { %12514 = vmatmul.mubr.msk.bf16.gmra.mrb[8].mxu0 %vm867_vm1, %v14836_v16 }
  0x75   : > { %12517 = vmatprep.mubr.msk.bf16.mxu0 %vm867_vm1, %v14868_v32 }
  0x7c   : > { %12518 = vmatmul.mubr.msk.bf16.gmra.mrb[12].mxu0 %vm867_vm1, %v14875_v36 }
  0x7d   : > { %12521 = vmatprep.mubr.msk.bf16.mxu0 %vm867_vm1, %v14900_v45 }
  0x84   : > { %12522 = vmatmul.mubr.msk.bf16.gmra.mrb[16].mxu0 %vm867_vm1, %v14907_v49 }
  0x85   : > { %12525 = vmatprep.mubr.msk.bf16.mxu0 %vm867_vm1, %v14924_v56 }
  0x8c   : > { %12526 = vmatmul.mubr.msk.bf16.gmra.mrb[20].mxu0 %vm867_vm1, %v14927_v57 }
  0x8d   : > { %12529 = vmatprep.mubr.msk.bf16.mxu0 %vm867_vm1, %v14952_v14 }
  0x94   : > { %12530 = vmatmul.mubr.msk.bf16.gmra.mrb[24].mxu0 %vm867_vm1, %v14959_v20 }
  0x95   : > { %12533 = vmatprep.mubr.msk.bf16.mxu0 %vm867_vm1, %v14978_v33 }
  0x9c   : > { %12534 = vmatmul.mubr.msk.bf16.gmra.mrb[28].mxu0 %vm867_vm1, %v14985_v41 }
  0x9d   : > { %12537 = vmatprep.mubr.msk.bf16.mxu0 %vm867_vm1, %v15004_v59 }
  0xa4   : > { %12538 = vmatmul.mubr.msk.bf16.gmra.mrb[32].mxu0 %vm867_vm1, %v15011_v6 }
  0xa5   : > { %12545 = vmatprep.mubr.msk.bf16.mxu0 %vm867_vm1, %v1332_v46  ;;  %v1341_v46 = vrot.slane %v14868_v32, 1 }
  0xa7   : > { %v1342_v48 = vsel %vm19173_vm2, %v1339_v19, %v1341_v46  ;;  %v1349_v19 = vrot.slane %v14924_v56, 1 }
  0xac   : > { %12546 = vmatmul.mubr.msk.bf16.vlgmr.msra.gmra.mrb[0].mxu0 %vm867_vm1, %v1334_v61 }
  0xad   : > { %12549 = vmatprep.mubr.msk.bf16.mxu0 %vm867_vm1, %v1336_v15  ;;  %12582 = vmatpush3.bf16.msra.mxu0 %v14534_v9  ;;  %v1343_v9 = vrot.slane %v14875_v36, 1 }
  0xae   : > { %12583 = vmatprep.subr.bf16.mxu0 %v14535_v3 }
  0xaf   : > { %v1344_v8 = vsel %vm19173_vm2, %v1341_v46, %v1343_v9  ;;  %v1346_v2 = vsel %vm19173_vm2, %v1343_v9, %v1345_v58  ;;  %v1351_v46 = vrot.slane %v14927_v57, 1  ;;  %v1353_v9 = vrot.slane %v14952_v14, 1 }
  0xb1   : > { %12584 = vmatpush3.bf16.msra.mxu0 %v14535_v3  ;;  %v1347_v3 = vrot.slane %v14907_v49, 1  ;;  %v1352_v32 = vsel %vm19173_vm2, %v1349_v19, %v1351_v46  ;;  %v1354_v49 = vsel %vm19173_vm2, %v1351_v46, %v1353_v9  ;;  %v1361_v46 = vrot.slane %v15004_v59, 1 }
  0xb2   : > { %12621 = vmatprep.subr.bf16.mxu0 %v14536_v34 }
  0xb3   : > { %v1348_v16 = vsel %vm19173_vm2, %v1345_v58, %v1347_v3  ;;  %v1350_v36 = vsel %vm19173_vm2, %v1347_v3, %v1349_v19  ;;  %v1355_v58 = vrot.slane %v14959_v20, 1  ;;  %v1357_v3 = vrot.slane %v14978_v33, 1 }
  0xb4   : > { %12550 = vmatmul.mubr.msk.bf16.gmra.mrb[4].mxu0 %vm867_vm1, %v1338_v37  ;;  %v1359_v19 = vrot.slane %v14985_v41, 1 }
  0xb5   : > { %12553 = vmatprep.mubr.msk.bf16.mxu0 %vm867_vm1, %v1340_v35  ;;  %v1356_v45 = vsel %vm19173_vm2, %v1353_v9, %v1355_v58  ;;  %v1358_v57 = vsel %vm19173_vm2, %v1355_v58, %v1357_v3  ;;  %v1363_v9 = vrot.slane %v15011_v6, 1  ;;  %v1365_v58 = vrot.slane %v15036_v39, 1  ;;  %v14537_v6 = vld [vmem:[%s19061_s2 + $0x48] sm:$0xff]   ;;  %v14539_v39 = vld [vmem:[%s19061_s2 + $0x50] sm:$0xff]  }
  0xb6   : > { %v1360_v56 = vsel %vm19173_vm2, %v1357_v3, %v1359_v19  ;;  %v1362_v20 = vsel %vm19173_vm2, %v1359_v19, %v1361_v46 }
  0xb7   : > { %v1364_v14 = vsel %vm19173_vm2, %v1361_v46, %v1363_v9  ;;  %v1366_v3 = vsel %vm19173_vm2, %v1363_v9, %v1365_v58  ;;  %v1909_v46 = vrot.slane %v14855_v27, 1 }
  0xbc   : > { %12554 = vmatmul.mubr.msk.bf16.gmra.mrb[8].mxu0 %vm867_vm1, %v1342_v48 }
  0xbd   : > { %12557 = vmatprep.mubr.msk.bf16.mxu0 %vm867_vm1, %v1344_v8 }
  0xc4   : > { %12558 = vmatmul.mubr.msk.bf16.gmra.mrb[12].mxu0 %vm867_vm1, %v1346_v2 }
  0xc5   : > { %12561 = vmatprep.mubr.msk.bf16.mxu0 %vm867_vm1, %v1348_v16 }
  0xcc   : > { %12562 = vmatmul.mubr.msk.bf16.gmra.mrb[16].mxu0 %vm867_vm1, %v1350_v36 }
  0xcd   : > { %12565 = vmatprep.mubr.msk.bf16.mxu0 %vm867_vm1, %v1352_v32 }
  0xd4   : > { %12566 = vmatmul.mubr.msk.bf16.gmra.mrb[20].mxu0 %vm867_vm1, %v1354_v49 }
  0xd5   : > { %12569 = vmatprep.mubr.msk.bf16.mxu0 %vm867_vm1, %v1356_v45 }
  0xdc   : > { %12570 = vmatmul.mubr.msk.bf16.gmra.mrb[24].mxu0 %vm867_vm1, %v1358_v57 }
  0xdd   : > { %12573 = vmatprep.mubr.msk.bf16.mxu0 %vm867_vm1, %v1360_v56 }
  0xe4   : > { %12574 = vmatmul.mubr.msk.bf16.gmra.mrb[28].mxu0 %vm867_vm1, %v1362_v20 }
  0xe5   : > { %12577 = vmatprep.mubr.msk.bf16.mxu0 %vm867_vm1, %v1364_v14 }
  0xec   : > { %12578 = vmatmul.mubr.msk.bf16.gmra.mrb[32].mxu0 %vm867_vm1, %v1366_v3 }
  0xed   : > { %12585 = vmatprep.mubr.msk.bf16.mxu0 %vm867_vm1, %v1334_v61 }
  0xf4   : > { %12586 = vmatmul.mubr.msk.bf16.vlgmr.msra.gmra.mrb[0].mxu0 %vm867_vm1, %v1336_v15 }
  0xf5   : > { %12589 = vmatprep.mubr.msk.bf16.mxu0 %vm867_vm1, %v1338_v37  ;;  %12622 = vmatpush3.bf16.msra.mxu0 %v14536_v34 }
  0xf6   : > { %12623 = vmatprep.subr.bf16.mxu0 %v14537_v6 }
  0xf9   : > { %12624 = vmatpush3.bf16.msra.mxu0 %v14537_v6  ;;  %v600_v6 = vld [vmem:[%s14806_s29 + $0x94] sm:$0xf] }
  0xfa   : > { %12661 = vmatprep.subr.bf16.mxu0 %v14539_v39  ;;  %v15176_v61 = vcombine.low %v15028_v31, %v600_v6  ;;  %v1913_v6 = vrot.slane %v14887_v40, 1 }
  0xfc   : > { %12590 = vmatmul.mubr.msk.bf16.gmra.mrb[4].mxu0 %vm867_vm1, %v1340_v35 }
  0xfd   : > { %12593 = vmatprep.mubr.msk.bf16.mxu0 %vm867_vm1, %v1342_v48  ;;  %v1905_v48 = vrot.slane %v14850_v24, 1 }
 0x104   : > { %12594 = vmatmul.mubr.msk.bf16.gmra.mrb[8].mxu0 %vm867_vm1, %v1344_v8  ;;  %v1657_v8 = vrot.slane %v15176_v61, 1 }
 0x105   : > { %12597 = vmatprep.mubr.msk.bf16.mxu0 %vm867_vm1, %v1346_v2  ;;  %v1906_v2 = vrot.slane %v14840_v18, 2 }
 0x10c   : > { %12598 = vmatmul.mubr.msk.bf16.gmra.mrb[12].mxu0 %vm867_vm1, %v1348_v16  ;;  %v15182_v16 = vld [vmem:[%s14806_s29 + $0x98] sm:$0xf] }
 0x10d   : > { %12601 = vmatprep.mubr.msk.bf16.mxu0 %vm867_vm1, %v1350_v36 }
 0x114   : > { %12602 = vmatmul.mubr.msk.bf16.gmra.mrb[16].mxu0 %vm867_vm1, %v1352_v32  ;;  %v19340_v32 = vshll.u32 %v14812_v4, 16 }
 0x115   : > { %12605 = vmatprep.mubr.msk.bf16.mxu0 %vm867_vm1, %v1354_v49  ;;  %v1658_v49 = vsel %vm19173_vm2, %v1363_v9, %v1657_v8  ;;  %v1910_v9 = vrot.slane %v14845_v21, 2 }
 0x116   : > { %v1899_v36 = vrot.slane %v19340_v32, 2 }
 0x117   : > { %v1911_v58 = vor.u32 %v1910_v9, %v1909_v46  ;;  %v1929_v9 = vrot.slane %v14936_v62, 1 }
 0x11c   : > { %12606 = vmatmul.mubr.msk.bf16.gmra.mrb[20].mxu0 %vm867_vm1, %v1356_v45  ;;  %v15188_v45 = vcombine.low %v15182_v16, %v15182_v16 }
 0x11d   : > { %12609 = vmatprep.mubr.msk.bf16.mxu0 %vm867_vm1, %v1358_v57  ;;  %v19341_v57 = vshrl.u32 %v14812_v4, 16 }
 0x11e   : > { %v1659_v15 = vrot.slane %v15188_v45, 1 }
 0x11f   : > { %v1898_v31 = vrot.slane %v19341_v57, 1  ;;  %v14540_v57 = vld [vmem:[%s19061_s2 + $0x58] sm:$0xff]  }
 0x120   : > { %v1660_v35 = vsel %vm19173_vm2, %v1657_v8, %v1659_v15  ;;  %v1914_v8 = vrot.slane %v14858_v28, 2 }
 0x121   : > { %v1900_v34 = vor.u32 %v1899_v36, %v1898_v31  ;;  %v1917_v36 = vrot.slane %v14891_v42, 1 }
 0x122   : > { %v1915_v31 = vor.u32 %v1914_v8, %v1913_v6  ;;  %v1934_v6 = vrot.slane %v14939_v63, 2 }
 0x124   : > { %12610 = vmatmul.mubr.msk.bf16.gmra.mrb[24].mxu0 %vm867_vm1, %v1360_v56  ;;  %v1901_v56 = vrot.slane %v14828_v12, 1  ;;  %v1916_v15 = vsel %vm19169_vm3, %v1911_v58, %v1915_v31 }
 0x125   : > { %12613 = vmatprep.mubr.msk.bf16.mxu0 %vm867_vm1, %v1362_v20  ;;  %v1902_v20 = vrot.slane %v14822_v10, 2 }
 0x127   : > { %v1903_v37 = vor.u32 %v1902_v20, %v1901_v56  ;;  %v15220_v20 = vld [vmem:[%s19061_s2 + $0x60] sm:$0xff]  }
 0x129   : > { %v1904_v19 = vsel %vm19169_vm3, %v1900_v34, %v1903_v37  ;;  %v1921_v34 = vrot.slane %v14914_v52, 1 }
 0x12c   : > { %12614 = vmatmul.mubr.msk.bf16.gmra.mrb[28].mxu0 %vm867_vm1, %v1364_v14  ;;  %v1907_v14 = vor.u32 %v1906_v2, %v1905_v48  ;;  %v1925_v48 = vrot.slane %v14917_v53, 1 }
 0x12d   : > { %12617 = vmatprep.mubr.msk.bf16.mxu0 %vm867_vm1, %v1658_v49  ;;  %v1918_v49 = vrot.slane %v14883_v38, 2 }
 0x12e   : > { %v1908_v3 = vsel %vm19169_vm3, %v1903_v37, %v1907_v14  ;;  %v1912_v32 = vsel %vm19169_vm3, %v1907_v14, %v1911_v58  ;;  %v1922_v37 = vrot.slane %v14894_v43, 2  ;;  %v1930_v14 = vrot.slane %v14921_v55, 2 }
 0x12f   : > { %v1919_v56 = vor.u32 %v1918_v49, %v1917_v36  ;;  %v1937_v49 = vrot.slane %v14966_v25, 1 }
 0x130   : > { %v1923_v2 = vor.u32 %v1922_v37, %v1921_v34  ;;  %v1931_v8 = vor.u32 %v1930_v14, %v1929_v9 }
 0x132   : > { %v1924_v46 = vsel %vm19169_vm3, %v1919_v56, %v1923_v2 }
 0x134   : > { %12618 = vmatmul.mubr.msk.bf16.gmra.mrb[32].mxu0 %vm867_vm1, %v1660_v35  ;;  %v1920_v35 = vsel %vm19169_vm3, %v1915_v31, %v1919_v56  ;;  %v1941_v56 = vrot.slane %v14970_v29, 1 }
 0x135   : > { %12625 = vmatprep.mubr.msk.bf16.mxu0 %vm867_vm1, %v1904_v19 }
 0x13c   : > { %12626 = vmatmul.mubr.msk.bf16.vlgmr.msra.gmra.mrb[0].mxu0 %vm867_vm1, %v1908_v3  ;;  %v1933_v3 = vrot.slane %v14942_v0, 1 }
 0x13d   : > { %12629 = vmatprep.mubr.msk.bf16.mxu0 %vm867_vm1, %v1912_v32  ;;  %12662 = vmatpush3.bf16.msra.mxu0 %v14539_v39  ;;  %v1926_v39 = vrot.slane %v14910_v50, 2 }
 0x13e   : > { %12663 = vmatprep.subr.bf16.mxu0 %v14540_v57  ;;  %v1935_v32 = vor.u32 %v1934_v6, %v1933_v3  ;;  %v1953_v3 = vrot.slane %v15018_v17, 1  ;;  %v1954_v6 = vrot.slane %v14999_v54, 2 }
 0x13f   : > { %v1927_v19 = vor.u32 %v1926_v39, %v1925_v48  ;;  %v1945_v48 = vrot.slane %v14992_v47, 1  ;;  %v1946_v39 = vrot.slane %v14973_v30, 2 }
 0x140   : > { %v1936_v31 = vsel %vm19169_vm3, %v1931_v8, %v1935_v32 }
 0x141   : > { %12664 = vmatpush3.bf16.msra.mxu0 %v14540_v57  ;;  %v1928_v58 = vsel %vm19169_vm3, %v1923_v2, %v1927_v19  ;;  %v1932_v36 = vsel %vm19169_vm3, %v1927_v19, %v1931_v8  ;;  %v1938_v57 = vrot.slane %v14945_v1, 2  ;;  %v1949_v19 = vrot.slane %v14996_v51, 1 }
 0x142   : > { %12701 = vmatprep.subr.bf16.mxu0 %v15220_v20  ;;  %v1947_v9 = vor.u32 %v1946_v39, %v1945_v48 }
 0x143   : > { %v1939_v34 = vor.u32 %v1938_v57, %v1937_v49  ;;  %v1955_v49 = vor.u32 %v1954_v6, %v1953_v3 }
 0x144   : > { %12630 = vmatmul.mubr.msk.bf16.gmra.mrb[4].mxu0 %vm867_vm1, %v1916_v15  ;;  %v1942_v15 = vrot.slane %v14962_v22, 2 }
 0x145   : > { %12633 = vmatprep.mubr.msk.bf16.mxu0 %vm867_vm1, %v1920_v35  ;;  %v1940_v35 = vsel %vm19169_vm3, %v1935_v32, %v1939_v34  ;;  %v1957_v32 = vrot.slane %v15022_v23, 1 }
 0x146   : > { %v1943_v37 = vor.u32 %v1942_v15, %v1941_v56  ;;  %v1969_v56 = vshll.u32 %v15176_v61, 16 }
 0x148   : > { %v1944_v2 = vsel %vm19169_vm3, %v1939_v34, %v1943_v37  ;;  %v1961_v34 = vrot.slane %v15042_v60, 1  ;;  %v1971_v39 = vrot.slane %v1969_v56, 2 }
 0x14c   : > { %12634 = vmatmul.mubr.msk.bf16.gmra.mrb[8].mxu0 %vm867_vm1, %v1924_v46  ;;  %v1950_v46 = vrot.slane %v14988_v44, 2 }
 0x14d   : > { %12637 = vmatprep.mubr.msk.bf16.mxu0 %vm867_vm1, %v1928_v58  ;;  %v1948_v58 = vsel %vm19169_vm3, %v1943_v37, %v1947_v9  ;;  %v1962_v37 = vrot.slane %v15025_v26, 2 }
 0x14e   : > { %v1951_v14 = vor.u32 %v1950_v46, %v1949_v19  ;;  %v1975_v19 = vshrl.u32 %v15188_v45, 16  ;;  %v1978_v46 = vshll.u32 %v15188_v45, 16 }
 0x150   : > { %v1952_v8 = vsel %vm19169_vm3, %v1947_v9, %v1951_v14  ;;  %v1956_v15 = vsel %vm19169_vm3, %v1951_v14, %v1955_v49  ;;  %v1980_v3 = vrot.slane %v1978_v46, 2  ;;  %v19344_v46 = vld [vmem:[#allocation5_spill] sm:$0xff] }
 0x154   : > { %12638 = vmatmul.mubr.msk.bf16.gmra.mrb[12].mxu0 %vm867_vm1, %v1932_v36  ;;  %v1958_v36 = vrot.slane %v15014_v7, 2 }
 0x155   : > { %12641 = vmatprep.mubr.msk.bf16.mxu0 %vm867_vm1, %v1936_v31  ;;  %v1966_v31 = vshrl.u32 %v15176_v61, 16 }
 0x156   : > { %v1959_v57 = vor.u32 %v1958_v36, %v1957_v32  ;;  %v2268_v32 = vrot.slane %v14812_v4, 2  ;;  %v2269_v36 = vrot.slane %v14815_v5, 2  ;;  %v14542_v4 = vld [vmem:[%s19061_s2 + $0x68] sm:$0xff]  }
 0x157   : > { %v1968_v48 = vrot.slane %v1966_v31, 1  ;;  %v19342_v5 = vld [vmem:[#allocation3_spill] sm:$0xff] }
 0x159   : > { %v1972_v9 = vor.u32 %v1971_v39, %v1968_v48  ;;  %v2275_v48 = vrot.slane %v19342_v5, 2  ;;  %v19343_v39 = vld [vmem:[#allocation4_spill] sm:$0xff] }
 0x15c   : > { %12642 = vmatmul.mubr.msk.bf16.gmra.mrb[16].mxu0 %vm867_vm1, %v1940_v35  ;;  %v1960_v35 = vsel %vm19169_vm3, %v1955_v49, %v1959_v57 }
 0x15d   : > { %12645 = vmatprep.mubr.msk.bf16.mxu0 %vm867_vm1, %v1944_v2  ;;  %v1963_v2 = vor.u32 %v1962_v37, %v1961_v34  ;;  %v2273_v34 = vrot.slane %v14831_v13, 2  ;;  %v14543_v13 = vld [vmem:[%s19061_s2 + $0x70] sm:$0xff]  }
 0x15f   : > { %v1964_v14 = vsel %vm19169_vm3, %v1959_v57, %v1963_v2  ;;  %v1973_v6 = vsel %vm19169_vm3, %v1963_v2, %v1972_v9  ;;  %v2271_v57 = vrot.slane %v14825_v11, 2  ;;  %v2277_v11 = vrot.slane %v19343_v39, 2 }
 0x160   : > { %v2276_v2 = vsel %vm19168_vm4, %v2273_v34, %v2275_v48 }
 0x161   : > { %v2272_v37 = vsel %vm19168_vm4, %v2269_v36, %v2271_v57 }
 0x164   : > { %12646 = vmatmul.mubr.msk.bf16.gmra.mrb[20].mxu0 %vm867_vm1, %v1948_v58  ;;  %v1977_v58 = vrot.slane %v1975_v19, 1  ;;  %v2278_v19 = vsel %vm19168_vm4, %v2275_v48, %v2277_v11 }
 0x165   : > { %12649 = vmatprep.mubr.msk.bf16.mxu0 %vm867_vm1, %v1952_v8 }
 0x166   : > { %v1981_v8 = vor.u32 %v1980_v3, %v1977_v58 }
 0x168   : > { %v1982_v49 = vsel %vm19169_vm3, %v1972_v9, %v1981_v8  ;;  %v2279_v9 = vrot.slane %v19344_v46, 2 }
 0x16a   : > { %v2280_v58 = vsel %vm19168_vm4, %v2277_v11, %v2279_v9  ;;  %v19350_v11 = vld [vmem:[#allocation11_spill] sm:$0xff] }
 0x16b   : > { %v2291_v46 = vrot.slane %v19350_v11, 2  ;;  %v14544_v11 = vld [vmem:[%s19061_s2 + $0x78] sm:$0xff]  }
 0x16c   : > { %12650 = vmatmul.mubr.msk.bf16.gmra.mrb[24].mxu0 %vm867_vm1, %v1956_v15  ;;  %v2270_v15 = vsel %vm19168_vm4, %v2268_v32, %v2269_v36  ;;  %v19347_v32 = vld [vmem:[#allocation8_spill] sm:$0xff] }
 0x16d   : > { %12653 = vmatprep.mubr.msk.bf16.mxu0 %vm867_vm1, %v1960_v35  ;;  %v2274_v35 = vsel %vm19168_vm4, %v2271_v57, %v2273_v34  ;;  %v2285_v36 = vrot.slane %v19347_v32, 2  ;;  %v19348_v57 = vld [vmem:[#allocation9_spill] sm:$0xff] }
 0x16e   : > { %v2287_v34 = vrot.slane %v19348_v57, 2 }
 0x170   : > { %v2288_v48 = vsel %vm19168_vm4, %v2285_v36, %v2287_v34 }
 0x174   : > { %12654 = vmatmul.mubr.msk.bf16.gmra.mrb[28].mxu0 %vm867_vm1, %v1964_v14 }
 0x175   : > { %12657 = vmatprep.mubr.msk.bf16.mxu0 %vm867_vm1, %v1973_v6  ;;  %v19346_v6 = vld [vmem:[#allocation7_spill] sm:$0xff] }
 0x176   : > { %v2283_v8 = vrot.slane %v19346_v6, 2  ;;  %v2295_v6 = vrot.slane %v14985_v41, 2  ;;  %v2303_v41 = vrot.slane %v15188_v45, 2  ;;  %v15357_v45 = vld [vmem:[%s19061_s2 + $0x80] sm:$0xff]  }
 0x17c   : > { %12658 = vmatmul.mubr.msk.bf16.gmra.mrb[32].mxu0 %vm867_vm1, %v1982_v49 }
 0x17d   : > { %12665 = vmatprep.mubr.msk.bf16.mxu0 %vm867_vm1, %v2270_v15  ;;  %v2286_v15 = vsel %vm19168_vm4, %v2283_v8, %v2285_v36 }
 0x184   : > { %12666 = vmatmul.mubr.msk.bf16.vlgmr.msra.gmra.mrb[0].mxu0 %vm867_vm1, %v2272_v37 }
 0x185   : > { %12669 = vmatprep.mubr.msk.bf16.mxu0 %vm867_vm1, %v2274_v35  ;;  %12702 = vmatpush3.bf16.msra.mxu0 %v15220_v20  ;;  %v19345_v20 = vld [vmem:[#allocation6_spill] sm:$0xff] }
 0x186   : > { %12703 = vmatprep.subr.bf16.mxu0 %v14542_v4  ;;  %v2281_v14 = vrot.slane %v19345_v20, 2 }
 0x188   : > { %v2282_v3 = vsel %vm19168_vm4, %v2279_v9, %v2281_v14  ;;  %v2284_v49 = vsel %vm19168_vm4, %v2281_v14, %v2283_v8  ;;  %v2293_v9 = vrot.slane %v14978_v33, 2  ;;  %v2297_v8 = vrot.slane %v15004_v59, 2  ;;  %v19351_v33 = vld [vmem:[#allocation12_spill] sm:$0xff] }
 0x189   : > { %12704 = vmatpush3.bf16.msra.mxu0 %v14542_v4  ;;  %v19349_v4 = vld [vmem:[#allocation10_spill] sm:$0xff]  ;;  %v2299_v57 = vrot.slane %v19351_v33, 2  ;;  %v2837_v33 = vrot.slane %v14822_v10, 3 }
 0x18a   : > { %12741 = vmatprep.subr.bf16.mxu0 %v14543_v13  ;;  %v2289_v5 = vrot.slane %v19349_v4, 2  ;;  %v2294_v14 = vsel %vm19168_vm4, %v2291_v46, %v2293_v9  ;;  %v2296_v32 = vsel %vm19168_vm4, %v2293_v9, %v2295_v6  ;;  %v2298_v36 = vsel %vm19168_vm4, %v2295_v6, %v2297_v8  ;;  %v536_v9 = vld [vmem:[%s19072_s13 + $0x48] sm:$0xff]  ;;  %v539_v6 = vld [vmem:[%s19072_s13 + $0x60] sm:$0xff] }
 0x18b   : > { %v2300_v4 = vsel %vm19168_vm4, %v2297_v8, %v2299_v57 }
 0x18c   : > { %12670 = vmatmul.mubr.msk.bf16.gmra.mrb[4].mxu0 %vm867_vm1, %v2276_v2  ;;  %v2290_v39 = vsel %vm19168_vm4, %v2287_v34, %v2289_v5  ;;  %v2292_v20 = vsel %vm19168_vm4, %v2289_v5, %v2291_v46  ;;  %v2301_v34 = vrot.slane %v15176_v61, 2 }
 0x18d   : > { %12673 = vmatprep.mubr.msk.bf16.mxu0 %vm867_vm1, %v2278_v19 }
 0x18e   : > { %v15340_v5 = vsel %vm19168_vm4, %v2299_v57, %v2301_v34  ;;  %v2304_v59 = vsel %vm19168_vm4, %v2301_v34, %v2303_v41  ;;  %v2839_v57 = vrot.slane %v14850_v24, 2  ;;  %v540_v41 = vld [vmem:[%s19072_s13 + $0x68] sm:$0xff] }
 0x194   : > { %12674 = vmatmul.mubr.msk.bf16.gmra.mrb[8].mxu0 %vm867_vm1, %v2280_v58 }
 0x195   : > { %12677 = vmatprep.mubr.msk.bf16.mxu0 %vm867_vm1, %v2282_v3 }
 0x19c   : > { %12678 = vmatmul.mubr.msk.bf16.gmra.mrb[12].mxu0 %vm867_vm1, %v2284_v49 }
 0x19d   : > { %12681 = vmatprep.mubr.msk.bf16.mxu0 %vm867_vm1, %v2286_v15 }
 0x1a4   : > { %12682 = vmatmul.mubr.msk.bf16.gmra.mrb[16].mxu0 %vm867_vm1, %v2288_v48 }
 0x1a5   : > { %12685 = vmatprep.mubr.msk.bf16.mxu0 %vm867_vm1, %v2290_v39 }
 0x1ac   : > { %12686 = vmatmul.mubr.msk.bf16.gmra.mrb[20].mxu0 %vm867_vm1, %v2292_v20 }
 0x1ad   : > { %12689 = vmatprep.mubr.msk.bf16.mxu0 %vm867_vm1, %v2294_v14 }
 0x1b4   : > { %12690 = vmatmul.mubr.msk.bf16.gmra.mrb[24].mxu0 %vm867_vm1, %v2296_v32 }
 0x1b5   : > { %12693 = vmatprep.mubr.msk.bf16.mxu0 %vm867_vm1, %v2298_v36 }
 0x1bc   : > { %12694 = vmatmul.mubr.msk.bf16.gmra.mrb[28].mxu0 %vm867_vm1, %v2300_v4 }
 0x1bd   : > { %12697 = vmatprep.mubr.msk.bf16.mxu0 %vm867_vm1, %v15340_v5 }
 0x1c4   : > { %12698 = vmatmul.mubr.msk.bf16.gmra.mrb[32].mxu0 %vm867_vm1, %v2304_v59 }
 0x1c5   : > { %12705 = vmatprep.mubr.msk.bf16.mxu0 %vm867_vm1, %v2272_v37  ;;  %v527_v37 = vld [vmem:[%s19072_s13] sm:$0xff] }
 0x1cc   : > { %12706 = vmatmul.mubr.msk.bf16.vlgmr.msra.gmra.mrb[0].mxu0 %vm867_vm1, %v2274_v35  ;;  %v14696_v35 = vmov 0  }
 0x1cd   : > { %12709 = vmatprep.mubr.msk.bf16.mxu0 %vm867_vm1, %v2276_v2  ;;  %12742 = vmatpush3.bf16.msra.mxu0 %v14543_v13  ;;  %v529_v13 = vld [vmem:[%s19072_s13 + $0x10] sm:$0xff]  ;;  %v528_v2 = vld [vmem:[%s19072_s13 + $0x8] sm:$0xff]  ;;  %4178 = vst.msk [vmem:[#allocation2 + $0x8] sm:$0xf] %vm19174_vm7, %v14696_v35  ;;  %4176 = vst.msk [vmem:[#allocation2] sm:$0xf] %vm19174_vm7, %v14696_v35 }
 0x1ce   : > { %12743 = vmatprep.subr.bf16.mxu0 %v14544_v11  ;;  %14506 = vset.pattern.permute.xlu0 %v14696_v35  ;;  %4177 = vst.msk [vmem:[#allocation2 + $0x4] sm:$0xf] %vm19174_vm7, %v14696_v35  ;;  %4179 = vst.msk [vmem:[#allocation2 + $0xc] sm:$0xf] %vm19174_vm7, %v14696_v35 }
 0x1cf   : > { %3527 = vperm.xlu0 %14506, %v527_v37   ;;  %14507 = vset.pattern.permute.xlu1 %v14696_v35  ;;  %v2844_v37 = vrot.slane %v14845_v21, 3  ;;  %4180 = vst.msk [vmem:[#allocation2 + $0x10] sm:$0xf] %vm19174_vm7, %v14696_v35  ;;  %4181 = vst.msk [vmem:[#allocation2 + $0x14] sm:$0xf] %vm19174_vm7, %v14696_v35 }
 0x1d0   : > { %3537 = vperm.xlu1 %14507, %v529_v13   ;;  %4182 = vst.msk [vmem:[#allocation2 + $0x18] sm:$0xf] %vm19174_vm7, %v14696_v35  ;;  %4183 = vst.msk [vmem:[#allocation2 + $0x1c] sm:$0xf] %vm19174_vm7, %v14696_v35 }
 0x1d1   : > { %12744 = vmatpush3.bf16.msra.mxu0 %v14544_v11  ;;  %v2843_v11 = vrot.slane %v14855_v27, 2  ;;  %v545_v27 = vld [vmem:[%s19072_s13 + $0x90] sm:$0xff]  ;;  %4184 = vst.msk [vmem:[#allocation2 + $0x20] sm:$0xf] %vm19174_vm7, %v14696_v35  ;;  %4185 = vst.msk [vmem:[#allocation2 + $0x24] sm:$0xf] %vm19174_vm7, %v14696_v35 }
 0x1d2   : > { %12781 = vmatprep.subr.bf16.mxu0 %v15357_v45  ;;  %4186 = vst.msk [vmem:[#allocation2 + $0x28] sm:$0xf] %vm19174_vm7, %v14696_v35  ;;  %4187 = vst.msk [vmem:[#allocation2 + $0x2c] sm:$0xf] %vm19174_vm7, %v14696_v35 }
 0x1d3   : > { %3532 = vperm.xlu0 %14506, %v528_v2   ;;  %v2847_v2 = vrot.slane %v14887_v40, 2  ;;  %v2845_v21 = vor.u32 %v2844_v37, %v2843_v11  ;;  %v547_v40 = vld [vmem:[%s19072_s13 + $0xa0] sm:$0xff]  ;;  %v556_v11 = vld [vmem:[%s19072_s13 + $0xe8] sm:$0xff]  ;;  %4188 = vst.msk [vmem:[#allocation2 + $0x30] sm:$0xf] %vm19174_vm7, %v14696_v35 }
 0x1d4   : > { %12710 = vmatmul.mubr.msk.bf16.gmra.mrb[4].mxu0 %vm867_vm1, %v2278_v19  ;;  %v530_v19 = vld [vmem:[%s19072_s13 + $0x18] sm:$0xff]  ;;  %4189 = vst.msk [vmem:[#allocation2 + $0x34] sm:$0xf] %vm19174_vm7, %v14696_v35  ;;  %4190 = vst.msk [vmem:[#allocation2 + $0x38] sm:$0xf] %vm19174_vm7, %v14696_v35 }
 0x1d5   : > { %12713 = vmatprep.mubr.msk.bf16.mxu0 %vm867_vm1, %v2280_v58  ;;  %v531_v58 = vld [vmem:[%s19072_s13 + $0x20] sm:$0xff]  ;;  %3542 = vperm.xlu1 %14507, %v530_v19   ;;  %v2848_v19 = vrot.slane %v14858_v28, 3  ;;  %v546_v28 = vld [vmem:[%s19072_s13 + $0x98] sm:$0xff]  ;;  %4191 = vst.msk [vmem:[#allocation2 + $0x3c] sm:$0xf] %vm19174_vm7, %v14696_v35 }
 0x1d6   : > { %4192 = vst.msk [vmem:[#allocation2 + $0x40] sm:$0xf] %vm19174_vm7, %v14696_v35  ;;  %4193 = vst.msk [vmem:[#allocation2 + $0x44] sm:$0xf] %vm19174_vm7, %v14696_v35 }
 0x1d7   : > { %3547 = vperm.xlu0 %14506, %v531_v58   ;;  %v544_v58 = vld [vmem:[%s19072_s13 + $0x88] sm:$0xff]  ;;  %4194 = vst.msk [vmem:[#allocation2 + $0x48] sm:$0xf] %vm19174_vm7, %v14696_v35  ;;  %4195 = vst.msk [vmem:[#allocation2 + $0x4c] sm:$0xf] %vm19174_vm7, %v14696_v35 }
 0x1d8   : > { %4196 = vst.msk [vmem:[#allocation2 + $0x50] sm:$0xf] %vm19174_vm7, %v14696_v35  ;;  %4197 = vst.msk [vmem:[#allocation2 + $0x54] sm:$0xf] %vm19174_vm7, %v14696_v35 }
 0x1d9   : > { %4198 = vst.msk [vmem:[#allocation2 + $0x58] sm:$0xf] %vm19174_vm7, %v14696_v35  ;;  %4199 = vst.msk [vmem:[#allocation2 + $0x5c] sm:$0xf] %vm19174_vm7, %v14696_v35 }
 0x1da   : > { %4200 = vst.msk [vmem:[#allocation2 + $0x60] sm:$0xf] %vm19174_vm7, %v14696_v35  ;;  %4201 = vst.msk [vmem:[#allocation2 + $0x64] sm:$0xf] %vm19174_vm7, %v14696_v35 }
 0x1db   : > { %4202 = vst.msk [vmem:[#allocation2 + $0x68] sm:$0xf] %vm19174_vm7, %v14696_v35  ;;  %4203 = vst.msk [vmem:[#allocation2 + $0x6c] sm:$0xf] %vm19174_vm7, %v14696_v35 }
 0x1dc   : > { %12714 = vmatmul.mubr.msk.bf16.gmra.mrb[8].mxu0 %vm867_vm1, %v2282_v3  ;;  %v532_v3 = vld [vmem:[%s19072_s13 + $0x28] sm:$0xff]  ;;  %4204 = vst.msk [vmem:[#allocation2 + $0x70] sm:$0xf] %vm19174_vm7, %v14696_v35  ;;  %4205 = vst.msk [vmem:[#allocation2 + $0x74] sm:$0xf] %vm19174_vm7, %v14696_v35 }
 0x1dd   : > { %12717 = vmatprep.mubr.msk.bf16.mxu0 %vm867_vm1, %v2284_v49  ;;  %v533_v49 = vld [vmem:[%s19072_s13 + $0x30] sm:$0xff]  ;;  %3552 = vperm.xlu1 %14507, %v532_v3   ;;  %v2849_v3 = vor.u32 %v2848_v19, %v2847_v2  ;;  %v2875_v2 = vrot.slane %v14970_v29, 2  ;;  %v2876_v19 = vrot.slane %v14962_v22, 3  ;;  %4206 = vst.msk [vmem:[#allocation2 + $0x78] sm:$0xf] %vm19174_vm7, %v14696_v35 }
 0x1de   : > { %3557 = vperm.xlu0 %14506, %v533_v49   ;;  %v561_v29 = vld [vmem:[%s19072_s13 + $0x110] sm:$0xff]  ;;  %4207 = vst.msk [vmem:[#allocation2 + $0x7c] sm:$0xf] %vm19174_vm7, %v14696_v35  ;;  %4208 = vst.msk [vmem:[#allocation2 + $0x80] sm:$0xf] %vm19174_vm7, %v14696_v35 }
 0x1df   : > { %v2877_v22 = vor.u32 %v2876_v19, %v2875_v2  ;;  %v14621_v19 = vld [vmem:[%s14806_s29 + $0x40] sm:$0xff]   ;;  %4209 = vst.msk [vmem:[#allocation2 + $0x84] sm:$0xf] %vm19174_vm7, %v14696_v35  ;;  %4210 = vst.msk [vmem:[#allocation2 + $0x88] sm:$0xf] %vm19174_vm7, %v14696_v35 }
 0x1e0   : > { %4211 = vst.msk [vmem:[#allocation2 + $0x8c] sm:$0xf] %vm19174_vm7, %v14696_v35  ;;  %4212 = vst.msk [vmem:[#allocation2 + $0x90] sm:$0xf] %vm19174_vm7, %v14696_v35 }
 0x1e1   : > { %4213 = vst.msk [vmem:[#allocation2 + $0x94] sm:$0xf] %vm19174_vm7, %v14696_v35  ;;  %4214 = vst.msk [vmem:[#allocation2 + $0x98] sm:$0xf] %vm19174_vm7, %v14696_v35 }
 0x1e2   : > { %4215 = vst.msk [vmem:[#allocation2 + $0x9c] sm:$0xf] %vm19174_vm7, %v14696_v35  ;;  %4216 = vst.msk [vmem:[#allocation2 + $0xa0] sm:$0xf] %vm19174_vm7, %v14696_v35  ;;  %v11551_v35 = vld [vmem:[%s19066_s7 + $0x8] sm:$0xf] }
 0x1e3   : > { %14476 = vmatprep.subr.msk.bf16.mxu1 %vm19172_vm9, %v11551_v35 }
 0x1e4   : > { %12718 = vmatmul.mubr.msk.bf16.gmra.mrb[12].mxu0 %vm867_vm1, %v2286_v15  ;;  %v602_v15 = vld [vmem:[%s14806_s29 + $0x9c] sm:$0xf] }
 0x1e5   : > { %12721 = vmatprep.mubr.msk.bf16.mxu0 %vm867_vm1, %v2288_v48  ;;  %v534_v48 = vld [vmem:[%s19072_s13 + $0x38] sm:$0xff]  ;;  %v15401_v46 = vcombine.low %v15182_v16, %v602_v15  ;;  %v2851_v15 = vrot.slane %v14891_v42, 2  ;;  %v548_v42 = vld [vmem:[%s19072_s13 + $0xa8] sm:$0xff] }
 0x1e6   : > { %3562 = vperm.xlu1 %14507, %v534_v48   ;;  %v538_v16 = vld [vmem:[%s19072_s13 + $0x58] sm:$0xff]  ;;  %v2852_v48 = vrot.slane %v14883_v38, 3  ;;  %v549_v38 = vld [vmem:[%s19072_s13 + $0xb0] sm:$0xff] }
 0x1ea   : > { %3572 = vperm.xlu1 %14507, %v536_v9   ;;  %v2855_v9 = vrot.slane %v14914_v52, 2  ;;  %v2853_v52 = vor.u32 %v2852_v48, %v2851_v15  ;;  %v2887_v48 = vrot.slane %v15018_v17, 2  ;;  %v2896_v17 = vrot.slane %v15025_v26, 3 }
 0x1ec   : > { %12722 = vmatmul.mubr.msk.bf16.gmra.mrb[16].mxu0 %vm867_vm1, %v2290_v39  ;;  %v535_v39 = vld [vmem:[%s19072_s13 + $0x40] sm:$0xff] }
 0x1ed   : > { %12725 = vmatprep.mubr.msk.bf16.mxu0 %vm867_vm1, %v2292_v20  ;;  %3567 = vperm.xlu0 %14506, %v535_v39   ;;  %v537_v20 = vld [vmem:[%s19072_s13 + $0x50] sm:$0xff]  ;;  %v2850_v39 = vsel %vm19167_vm5, %v2845_v21, %v2849_v3 }
 0x1ee   : > { %3582 = vperm.xlu1 %14507, %v538_v16   ;;  %v550_v16 = vld [vmem:[%s19072_s13 + $0xb8] sm:$0xff] }
 0x1f1   : > { %3577 = vperm.xlu0 %14506, %v537_v20   ;;  %v2856_v20 = vrot.slane %v14894_v43, 3 }
 0x1f2   : > { %3592 = vperm.xlu1 %14507, %v540_v41   ;;  %v552_v41 = vld [vmem:[%s19072_s13 + $0xc8] sm:$0xff] }
 0x1f3   : > { %v2857_v43 = vor.u32 %v2856_v20, %v2855_v9 }
 0x1f4   : > { %12726 = vmatmul.mubr.msk.bf16.gmra.mrb[20].mxu0 %vm867_vm1, %v2294_v14  ;;  %v2595_v14 = vrot.slane %v15401_v46, 2 }
 0x1f5   : > { %12729 = vmatprep.mubr.msk.bf16.mxu0 %vm867_vm1, %v2296_v32  ;;  %v15420_v32 = vld [vmem:[%s14806_s29 + $0xa0] ss:$0 sps:$4 sm:$0xff]   ;;  %3587 = vperm.xlu0 %14506, %v539_v6  }
 0x1f6   : > { %v2596_v8 = vsel %vm19168_vm4, %v2301_v34, %v2595_v14  ;;  %v541_v34 = vld [vmem:[%s19072_s13 + $0x70] sm:$0xff]  ;;  %v2597_v10 = vrot.slane %v15420_v32, 2  ;;  %v551_v6 = vld [vmem:[%s19072_s13 + $0xc0] sm:$0xff] }
 0x1f8   : > { %v2598_v59 = vsel %vm19168_vm4, %v2595_v14, %v2597_v10  ;;  %v14548_v14 = vld [vmem:[%s19061_s2 + $0x88] sm:$0xff]  }
 0x1f9   : > { %3597 = vperm.xlu0 %14506, %v541_v34  }
 0x1fc   : > { %12730 = vmatmul.mubr.msk.bf16.gmra.mrb[24].mxu0 %vm867_vm1, %v2298_v36  ;;  %v2836_v36 = vrot.slane %v14828_v12, 2 }
 0x1fd   : > { %12733 = vmatprep.mubr.msk.bf16.mxu0 %vm867_vm1, %v2300_v4  ;;  %v2840_v4 = vrot.slane %v14840_v18, 3  ;;  %v542_v18 = vld [vmem:[%s19072_s13 + $0x78] sm:$0xff] }
 0x1fe   : > { %v2838_v12 = vor.u32 %v2837_v33, %v2836_v36  ;;  %3602 = vperm.xlu1 %14507, %v542_v18   ;;  %v2859_v36 = vrot.slane %v14917_v53, 2  ;;  %v2860_v33 = vrot.slane %v14910_v50, 3  ;;  %v553_v53 = vld [vmem:[%s19072_s13 + $0xd0] sm:$0xff] }
 0x1ff   : > { %v2841_v24 = vor.u32 %v2840_v4, %v2839_v57  ;;  %v2863_v57 = vrot.slane %v14936_v62, 2  ;;  %v2864_v4 = vrot.slane %v14921_v55, 3  ;;  %v554_v55 = vld [vmem:[%s19072_s13 + $0xd8] sm:$0xff]  ;;  %v555_v62 = vld [vmem:[%s19072_s13 + $0xe0] sm:$0xff] }
 0x200   : > { %v2861_v50 = vor.u32 %v2860_v33, %v2859_v36  ;;  %v2913_v33 = vshrl.u32 %v15420_v32, 16 }
 0x201   : > { %v2842_v13 = vsel %vm19167_vm5, %v2838_v12, %v2841_v24  ;;  %v2846_v49 = vsel %vm19167_vm5, %v2841_v24, %v2845_v21  ;;  %v2865_v34 = vor.u32 %v2864_v4, %v2863_v57  ;;  %v2867_v12 = vrot.slane %v14942_v0, 2  ;;  %v557_v0 = vld [vmem:[%s19072_s13 + $0xf0] sm:$0xff] }
 0x202   : > { %3612 = vperm.xlu1 %14507, %v544_v58   ;;  %v2862_v10 = vsel %vm19167_vm5, %v2857_v43, %v2861_v50  ;;  %v2868_v24 = vrot.slane %v14939_v63, 3  ;;  %v2880_v21 = vrot.slane %v14973_v30, 3  ;;  %v562_v30 = vld [vmem:[%s19072_s13 + $0x118] sm:$0xff] }
 0x203   : > { %v2866_v18 = vsel %vm19167_vm5, %v2861_v50, %v2865_v34  ;;  %v14615_v50 = vld [vmem:[%s14806_s29 + $0x10] sm:$0xff]  }
 0x204   : > { %12734 = vmatmul.mubr.msk.bf16.gmra.mrb[28].mxu0 %vm867_vm1, %v15340_v5  ;;  %v543_v5 = vld [vmem:[%s19072_s13 + $0x80] sm:$0xff]  ;;  %v2869_v63 = vor.u32 %v2868_v24, %v2867_v12 }
 0x205   : > { %12737 = vmatprep.mubr.msk.bf16.mxu0 %vm867_vm1, %v2596_v8  ;;  %3607 = vperm.xlu0 %14506, %v543_v5   ;;  %v2854_v8 = vsel %vm19167_vm5, %v2849_v3, %v2853_v52  ;;  %v2871_v5 = vrot.slane %v14966_v25, 2  ;;  %v559_v25 = vld [vmem:[%s19072_s13 + $0x100] sm:$0xff]  ;;  %v560_v3 = vld [vmem:[%s19072_s13 + $0x108] sm:$0xff] }
 0x206   : > { %3622 = vperm.xlu1 %14507, %v546_v28   ;;  %v14617_v24 = vld [vmem:[%s14806_s29 + $0x20] sm:$0xff]  }
 0x209   : > { %3617 = vperm.xlu0 %14506, %v545_v27   ;;  %v2879_v27 = vrot.slane %v14992_v47, 2 }
 0x20a   : > { %3632 = vperm.xlu1 %14507, %v548_v42   ;;  %v2891_v42 = vrot.slane %v15022_v23, 2 }
 0x20b   : > { %v2881_v28 = vor.u32 %v2880_v21, %v2879_v27  ;;  %v14622_v27 = vld [vmem:[%s14806_s29 + $0x48] sm:$0xff]  }
 0x20c   : > { %12738 = vmatmul.mubr.msk.bf16.gmra.mrb[32].mxu0 %vm867_vm1, %v2598_v59  ;;  %v2872_v59 = vrot.slane %v14945_v1, 3  ;;  %v558_v1 = vld [vmem:[%s19072_s13 + $0xf8] sm:$0xff]  ;;  %v3219_v21 = vrot.slane %v14622_v27, 3 }
 0x20d   : > { %12745 = vmatprep.mubr.msk.bf16.mxu0 %vm867_vm1, %v2842_v13  ;;  %3627 = vperm.xlu0 %14506, %v547_v40   ;;  %v2870_v13 = vsel %vm19167_vm5, %v2865_v34, %v2869_v63  ;;  %v2883_v40 = vrot.slane %v14996_v51, 2  ;;  %v2882_v15 = vsel %vm19167_vm5, %v2877_v22, %v2881_v28  ;;  %v2892_v51 = vrot.slane %v15014_v7, 3 }
 0x20e   : > { %3642 = vperm.xlu1 %14507, %v550_v16   ;;  %v2873_v37 = vor.u32 %v2872_v59, %v2871_v5  ;;  %v2907_v16 = vshll.u32 %v15401_v46, 16  ;;  %v2899_v7 = vrot.slane %v1966_v31, 2  ;;  %v3206_v34 = vrot.slane %v14615_v50, 3  ;;  %v14618_v5 = vld [vmem:[%s14806_s29 + $0x28] sm:$0xff]  }
 0x20f   : > { %v3211_v59 = vrot.slane %v14618_v5, 3  ;;  %v6409_v50 = vsel %vm19172_vm9, %v11551_v35, 0 }
 0x210   : > { %v2874_v58 = vsel %vm19167_vm5, %v2869_v63, %v2873_v37  ;;  %v2878_v47 = vsel %vm19167_vm5, %v2873_v37, %v2877_v22  ;;  %v14619_v63 = vld [vmem:[%s14806_s29 + $0x30] sm:$0xff]   ;;  %12974 = vmatpush3.bf16.msra.mxu1 %v6409_v50 }
 0x211   : > { %3637 = vperm.xlu0 %14506, %v549_v38   ;;  %v2895_v38 = vrot.slane %v15042_v60, 2  ;;  %v2900_v60 = vrot.slane %v1969_v56, 3  ;;  %v2915_v56 = vrot.slane %v2913_v33, 2  ;;  %v3213_v37 = vrot.slane %v14619_v63, 3  ;;  %v14623_v22 = vld [vmem:[%s14806_s29 + $0x50] sm:$0xff]  }
 0x212   : > { %3652 = vperm.xlu1 %14507, %v552_v41   ;;  %v3241_v33 = vrot.slane %v15420_v32, 3 }
 0x213   : > { %v2901_v36 = vor.u32 %v2900_v60, %v2899_v7 }
 0x214   : > { %12746 = vmatmul.mubr.msk.bf16.vlgmr.msra.gmra.mrb[0].mxu0 %vm867_vm1, %v2846_v49  ;;  %v2884_v49 = vrot.slane %v14988_v44, 3 }
 0x215   : > { %12749 = vmatprep.mubr.msk.bf16.mxu0 %vm867_vm1, %v2850_v39  ;;  %12782 = vmatpush3.bf16.msra.mxu0 %v15357_v45  ;;  %v2858_v45 = vsel %vm19167_vm5, %v2853_v52, %v2857_v43  ;;  %v2888_v39 = vrot.slane %v14999_v54, 3  ;;  %v2893_v54 = vor.u32 %v2892_v51, %v2891_v42  ;;  %v2897_v52 = vor.u32 %v2896_v17, %v2895_v38  ;;  %v14627_v42 = vld [vmem:[%s14806_s29 + $0x70] sm:$0xff]  }
 0x216   : > { %12783 = vmatprep.subr.bf16.mxu0 %v14548_v14  ;;  %3647 = vperm.xlu0 %14506, %v551_v6   ;;  %v2885_v9 = vor.u32 %v2884_v49, %v2883_v40  ;;  %v2904_v43 = vshrl.u32 %v15401_v46, 16  ;;  %v3229_v51 = vrot.slane %v14627_v42, 3 }
 0x217   : > { %3662 = vperm.xlu1 %14507, %v554_v55   ;;  %v2889_v20 = vor.u32 %v2888_v39, %v2887_v48  ;;  %v2898_v26 = vsel %vm19167_vm5, %v2893_v54, %v2897_v52  ;;  %v2902_v31 = vsel %vm19167_vm5, %v2897_v52, %v2901_v36  ;;  %v14616_v55 = vld [vmem:[%s14806_s29 + $0x18] sm:$0xff]   ;;  %v14626_v39 = vld [vmem:[%s14806_s29 + $0x68] sm:$0xff]   ;;  %v14629_v52 = vld [vmem:[%s14806_s29 + $0x80] sm:$0xff]  }
 0x218   : > { %v2906_v6 = vrot.slane %v2904_v43, 2  ;;  %v3233_v43 = vrot.slane %v14629_v52, 3 }
 0x219   : > { %12784 = vmatpush3.bf16.msra.mxu0 %v14548_v14  ;;  %v2886_v14 = vsel %vm19167_vm5, %v2881_v28, %v2885_v9  ;;  %v2890_v44 = vsel %vm19167_vm5, %v2885_v9, %v2889_v20  ;;  %v2894_v23 = vsel %vm19167_vm5, %v2889_v20, %v2893_v54  ;;  %v3221_v28 = vrot.slane %v14623_v22, 3 }
 0x21a   : > { %3657 = vperm.xlu0 %14506, %v553_v53   ;;  %v3227_v9 = vrot.slane %v14626_v39, 3 }
 0x21b   : > { %3672 = vperm.xlu1 %14507, %v556_v11   ;;  %v3222_v40 = vsel %vm19166_vm6, %v3219_v21, %v3221_v28 }
 0x21c   : > { %12750 = vmatmul.mubr.msk.bf16.gmra.mrb[4].mxu0 %vm867_vm1, %v2854_v8  ;;  %v2909_v8 = vrot.slane %v2907_v16, 3  ;;  %v3230_v17 = vsel %vm19166_vm6, %v3227_v9, %v3229_v51  ;;  %v14630_v16 = vld [vmem:[%s14806_s29 + $0x88] sm:$0xff]  }
 0x21d   : > { %12753 = vmatprep.mubr.msk.bf16.mxu0 %vm867_vm1, %v2858_v45  ;;  %v2916_v45 = vshll.u32 %v15420_v32, 16 }
 0x21e   : > { %3667 = vperm.xlu0 %14506, %v555_v62   ;;  %v2910_v57 = vor.u32 %v2909_v8, %v2906_v6  ;;  %v3207_v62 = vrot.slane %v14616_v55, 3  ;;  %v3239_v6 = vrot.slane %v15401_v46, 3 }
 0x21f   : > { %3682 = vperm.xlu1 %14507, %v558_v1   ;;  %v2918_v4 = vrot.slane %v2916_v45, 3  ;;  %v14620_v1 = vld [vmem:[%s14806_s29 + $0x38] sm:$0xff]  }
 0x220   : > { %v2911_v41 = vsel %vm19167_vm5, %v2901_v36, %v2910_v57  ;;  %v3208_v12 = vsel %vm19166_vm6, %v3206_v34, %v3207_v62  ;;  %v3242_v45 = vsel %vm19166_vm6, %v3239_v6, %v3241_v33 }
 0x221   : > { %v2919_v53 = vor.u32 %v2918_v4, %v2915_v56 }
 0x222   : > { %3677 = vperm.xlu0 %14506, %v557_v0  }
 0x223   : > { %3692 = vperm.xlu1 %14507, %v560_v3  }
 0x224   : > { %12754 = vmatmul.mubr.msk.bf16.gmra.mrb[8].mxu0 %vm867_vm1, %v2862_v10  ;;  %v2920_v10 = vsel %vm19167_vm5, %v2910_v57, %v2919_v53  ;;  %v14550_v53 = vld [vmem:[%s15730_s23 + $0x8] sm:$0xff]  }
 0x225   : > { %12757 = vmatprep.mubr.msk.bf16.mxu0 %vm867_vm1, %v2866_v18  ;;  %v3209_v18 = vrot.slane %v14617_v24, 3 }
 0x226   : > { %3687 = vperm.xlu0 %14506, %v559_v25   ;;  %v3215_v25 = vrot.slane %v14620_v1, 3 }
 0x227   : > { %3702 = vperm.xlu1 %14507, %v562_v30   ;;  %v3210_v11 = vsel %vm19166_vm6, %v3207_v62, %v3209_v18  ;;  %v3212_v0 = vsel %vm19166_vm6, %v3209_v18, %v3211_v59  ;;  %v14624_v30 = vld [vmem:[%s14806_s29 + $0x58] sm:$0xff]   ;;  %v15747_v62 = vld [vmem:[%s15730_s23 + $0x10] sm:$0xff]  }
 0x228   : > { %v3216_v2 = vsel %vm19166_vm6, %v3213_v37, %v3215_v25 }
 0x22a   : > { %3697 = vperm.xlu0 %14506, %v561_v29  }
 0x22c   : > { %12758 = vmatmul.mubr.msk.bf16.gmra.mrb[12].mxu0 %vm867_vm1, %v2870_v13  ;;  %v3214_v13 = vsel %vm19166_vm6, %v3211_v59, %v3213_v37 }
 0x22d   : > { %12761 = vmatprep.mubr.msk.bf16.mxu0 %vm867_vm1, %v2874_v58  ;;  %v3217_v58 = vrot.slane %v14621_v19, 3 }
 0x22f   : > { %v3218_v3 = vsel %vm19166_vm6, %v3215_v25, %v3217_v58  ;;  %v3220_v29 = vsel %vm19166_vm6, %v3217_v58, %v3219_v21 }
 0x234   : > { %12762 = vmatmul.mubr.msk.bf16.gmra.mrb[16].mxu0 %vm867_vm1, %v2878_v47  ;;  %v3223_v47 = vrot.slane %v14624_v30, 3 }
 0x235   : > { %12765 = vmatprep.mubr.msk.bf16.mxu0 %vm867_vm1, %v2882_v15  ;;  %v14625_v15 = vld [vmem:[%s14806_s29 + $0x60] sm:$0xff]  }
 0x236   : > { %v3224_v49 = vsel %vm19166_vm6, %v3221_v28, %v3223_v47  ;;  %v3225_v48 = vrot.slane %v14625_v15, 3 }
 0x238   : > { %v3226_v20 = vsel %vm19166_vm6, %v3223_v47, %v3225_v48 }
 0x23c   : > { %12766 = vmatmul.mubr.msk.bf16.gmra.mrb[20].mxu0 %vm867_vm1, %v2886_v14  ;;  %v3228_v14 = vsel %vm19166_vm6, %v3225_v48, %v3227_v9 }
 0x23d   : > { %12769 = vmatprep.mubr.msk.bf16.mxu0 %vm867_vm1, %v2890_v44  ;;  %v14628_v44 = vld [vmem:[%s14806_s29 + $0x78] sm:$0xff]   ;;  %s14492_s29 = smul.u32 3, %s20484_s19 }
 0x23e   : > { %v3231_v38 = vrot.slane %v14628_v44, 3 }
 0x23f   : > { %s525_s22 = scalar_lea.vmem %s19074_s15, %s14492_s29 }
 0x240   : > { %v3232_v54 = vsel %vm19166_vm6, %v3229_v51, %v3231_v38  ;;  %v3234_v7 = vsel %vm19166_vm6, %v3231_v38, %v3233_v43 }
 0x244   : > { %12770 = vmatmul.mubr.msk.bf16.gmra.mrb[24].mxu0 %vm867_vm1, %v2894_v23  ;;  %v3235_v23 = vrot.slane %v14630_v16, 3 }
 0x245   : > { %12773 = vmatprep.mubr.msk.bf16.mxu0 %vm867_vm1, %v2898_v26  ;;  %v3237_v26 = vrot.slane %v15176_v61, 3 }
 0x246   : > { %v3236_v60 = vsel %vm19166_vm6, %v3233_v43, %v3235_v23 }
 0x247   : > { %v3238_v8 = vsel %vm19166_vm6, %v3235_v23, %v3237_v26  ;;  %v3240_v36 = vsel %vm19166_vm6, %v3237_v26, %v3239_v6 }
 0x24c   : > { %12774 = vmatmul.mubr.msk.bf16.gmra.mrb[28].mxu0 %vm867_vm1, %v2902_v31  ;;  %v4889_v31 = vld [vmem:[%s19066_s7] sm:$0xf] }
 0x24d   : > { %12777 = vmatprep.mubr.msk.bf16.mxu0 %vm867_vm1, %v2911_v41  ;;  %14472 = vmatprep.subr.msk.bf16.mxu0 %vm19172_vm9, %v4889_v31  ;;  %v5036_v4 = vsel %vm19172_vm9, %v4889_v31, 0  ;;  %v14549_v41 = vld [vmem:[%s15730_s23] sm:$0xff]  }
 0x24e   : > { %v15714_v61 = vpop.permute.xlu0 %3527  ;;  %v6317_v55 = vrot.slane %v14549_v41, 1 }
 0x24f   : > { %19352 = vst [vmem:[#allocation3_spill] sm:$0xff] %v15714_v61  ;;  %v15716_v46 = vpop.permute.xlu1 %3537 }
 0x250   : > { %19353 = vst [vmem:[#allocation4_spill] sm:$0xff] %v15716_v46 }
 0x252   : > { %v15718_v32 = vpop.permute.xlu0 %3532 }
 0x253   : > { %19354 = vst [vmem:[#allocation5_spill] sm:$0xff] %v15718_v32 }
 0x254   : > { %12778 = vmatmul.mubr.msk.bf16.gmra.mrb[32].mxu0 %vm867_vm1, %v2920_v10  ;;  %v15720_v57 = vpop.permute.xlu1 %3542  ;;  %v6318_v10 = vrot.slane %v14550_v53, 1 }
 0x255   : > { %12785 = vmatprep.mubr.msk.bf16.mxu0 %vm867_vm1, %v3208_v12  ;;  %19355 = vst [vmem:[#allocation6_spill] sm:$0xff] %v15720_v57  ;;  %v19087_v12 = vrot.slane %v15747_v62, 1 }
 0x256   : > { %v15735_v56 = vpop.permute.xlu0 %3547  ;;  %v6319_v24 = vsel %vm19173_vm2, %v6317_v55, %v6318_v10 }
 0x257   : > { %19356 = vst [vmem:[#allocation7_spill] sm:$0xff] %v15735_v56  ;;  %12975 = vmatprep.mubr.msk.bf16.mxu1 %vm19171_vm8, %v6319_v24  ;;  %v15760_v5 = vsel %vm19173_vm2, %v6318_v10, %v19087_v12 }
 0x258   : > { %19359 = vst [vmem:[#allocation10_spill] sm:$0xff] %v15760_v5  ;;  %12976 = vmatmul.mubr.msk.bf16.vlgmr.msra.gmra.mrb[0].mxu1 %vm19171_vm8, %v15760_v5 }
 0x25c   : > { %12786 = vmatmul.mubr.msk.bf16.vlgmr.msra.gmra.mrb[0].mxu0 %vm867_vm1, %v3210_v11  ;;  %v15743_v34 = vpop.permute.xlu1 %3552 }
 0x25d   : > { %12789 = vmatprep.mubr.msk.bf16.mxu0 %vm867_vm1, %v3212_v0  ;;  %12822 = vmatpush3.bf16.msra.mxu0 %v5036_v4  ;;  %19357 = vst [vmem:[#allocation8_spill] sm:$0xff] %v15743_v34  ;;  %v15754_v18 = vpop.permute.xlu0 %3557 }
 0x25e   : > { %19358 = vst [vmem:[#allocation9_spill] sm:$0xff] %v15754_v18 }
 0x264   : > { %12790 = vmatmul.mubr.msk.bf16.gmra.mrb[4].mxu0 %vm867_vm1, %v3214_v13 }
 0x265   : > { %12793 = vmatprep.mubr.msk.bf16.mxu0 %vm867_vm1, %v3216_v2  ;;  %v15764_v59 = vpop.permute.xlu1 %3562 }
 0x266   : > { %19360 = vst [vmem:[#allocation11_spill] sm:$0xff] %v15764_v59 }
 0x269   : > { %v15768_v0 = vpop.permute.xlu1 %3572 }
 0x26a   : > { %19362 = vst [vmem:[#allocation13_spill] sm:$0xff] %v15768_v0 }
 0x26c   : > { %12794 = vmatmul.mubr.msk.bf16.gmra.mrb[8].mxu0 %vm867_vm1, %v3218_v3  ;;  %v15766_v11 = vpop.permute.xlu0 %3567 }
 0x26d   : > { %12797 = vmatprep.mubr.msk.bf16.mxu0 %vm867_vm1, %v3220_v29  ;;  %19361 = vst [vmem:[#allocation12_spill] sm:$0xff] %v15766_v11  ;;  %v15772_v37 = vpop.permute.xlu1 %3582 }
 0x26e   : > { %19364 = vst [vmem:[#allocation15_spill] sm:$0xff] %v15772_v37 }
 0x270   : > { %v15770_v63 = vpop.permute.xlu0 %3577 }
 0x271   : > { %19363 = vst [vmem:[#allocation14_spill] sm:$0xff] %v15770_v63  ;;  %v15780_v2 = vpop.permute.xlu1 %3592 }
 0x272   : > { %19366 = vst [vmem:[#allocation17_spill] sm:$0xff] %v15780_v2 }
 0x274   : > { %12798 = vmatmul.mubr.msk.bf16.gmra.mrb[12].mxu0 %vm867_vm1, %v3222_v40  ;;  %v15774_v1 = vpop.permute.xlu0 %3587 }
 0x275   : > { %12801 = vmatprep.mubr.msk.bf16.mxu0 %vm867_vm1, %v3224_v49  ;;  %19365 = vst [vmem:[#allocation16_spill] sm:$0xff] %v15774_v1 }
 0x278   : > { %v15794_v28 = vpop.permute.xlu0 %3597 }
 0x279   : > { %19367 = vst [vmem:[#allocation18_spill] sm:$0xff] %v15794_v28 }
 0x27c   : > { %12802 = vmatmul.mubr.msk.bf16.gmra.mrb[16].mxu0 %vm867_vm1, %v3226_v20 }
 0x27d   : > { %12805 = vmatprep.mubr.msk.bf16.mxu0 %vm867_vm1, %v3228_v14  ;;  %v15798_v48 = vpop.permute.xlu1 %3602 }
 0x27e   : > { %19368 = vst [vmem:[#allocation19_spill] sm:$0xff] %v15798_v48 }
 0x281   : > { %v15825_v4 = vpop.permute.xlu1 %3612 }
 0x282   : > { %19370 = vst [vmem:[#allocation21_spill] sm:$0xff] %v15825_v4 }
 0x284   : > { %12806 = vmatmul.mubr.msk.bf16.gmra.mrb[20].mxu0 %vm867_vm1, %v3230_v17  ;;  %v15817_v26 = vpop.permute.xlu0 %3607 }
 0x285   : > { %12809 = vmatprep.mubr.msk.bf16.mxu0 %vm867_vm1, %v3232_v54  ;;  %19369 = vst [vmem:[#allocation20_spill] sm:$0xff] %v15817_v26 }
 0x28c   : > { %12810 = vmatmul.mubr.msk.bf16.gmra.mrb[24].mxu0 %vm867_vm1, %v3234_v7 }
 0x28d   : > { %12813 = vmatprep.mubr.msk.bf16.mxu0 %vm867_vm1, %v3236_v60 }
 0x294   : > { %12814 = vmatmul.mubr.msk.bf16.gmra.mrb[28].mxu0 %vm867_vm1, %v3238_v8 }
 0x295   : > { %12817 = vmatprep.mubr.msk.bf16.mxu0 %vm867_vm1, %v3240_v36 }
 0x29c   : > { %12818 = vmatmul.mubr.msk.bf16.gmra.mrb[32].mxu0 %vm867_vm1, %v3242_v45 }
 0x29d   : > { %12823 = vmatprep.mubr.msk.bf16.mxu0 %vm19171_vm8, %v14549_v41 }
 0x2a4   : > { %12824 = vmatmul.mubr.msk.bf16.vlgmr.msra.gmra.mrb[36].mxu0 %vm19171_vm8, %v14550_v53 }
 0x2a5   : > { %12827 = vmatprep.mubr.msk.bf16.mxu0 %vm19171_vm8, %v15747_v62 }
 0x32f   : > { %v15776_v25 = vpop.f32.mrb[0].mxu0 }
 0x330   : > { %v15778_v13 = vpop.f32.mrb[1].mxu0  ;;  %v3707_v19 = vmul.f32 %v15776_v25, %v15716_v46 }
 0x331   : > { %v3705_v58 = vmul.f32 %v15714_v61, %v15778_v13  ;;  %v15786_v27 = vpop.f32.mrb[2].mxu0 }
 0x332   : > { %v15788_v21 = vpop.f32.mrb[3].mxu0  ;;  %v3708_v29 = vmul.f32 %v15786_v27, %v15720_v57  ;;  %v3821_v30 = vmul.f32 %v3707_v19, %v3707_v19  ;;  %v3745_v39 = vsel %vm19171_vm8, %v3707_v19, 0.0 }
 0x333   : > { %v3819_v3 = vmul.f32 %v3705_v58, %v3705_v58  ;;  %v3706_v22 = vmul.f32 %v15718_v32, %v15788_v21  ;;  %v3742_v47 = vsel %vm19171_vm8, %v3705_v58, 0.0 }
 0x334   : > { %v3822_v20 = vmul.f32 %v3708_v29, %v3708_v29  ;;  %v3858_v17 = vsel %vm19171_vm8, %v3821_v30, 0.0  ;;  %v3747_v54 = vsel %vm19171_vm8, %v3708_v29, 0.0 }
 0x335   : > { %v3743_v40 = vsel %vm19171_vm8, %v3706_v22, 0.0  ;;  %v3820_v49 = vmul.f32 %v3706_v22, %v3706_v22  ;;  %v3855_v9 = vsel %vm19171_vm8, %v3819_v3, 0.0 }
 0x336   : > { %v3744_v15 = vadd.f32 %v3743_v40, %v3742_v47  ;;  %v3860_v6 = vsel %vm19171_vm8, %v3822_v20, 0.0  ;;  %v15835_v47 = vpop.permute.xlu0 %3617 }
 0x337   : > { %v3856_v14 = vsel %vm19171_vm8, %v3820_v49, 0.0  ;;  %v15803_v42 = vpop.f32.mrb[4].mxu0  ;;  %19371 = vst [vmem:[#allocation22_spill] sm:$0xff] %v15835_v47 }
 0x338   : > { %v3746_v51 = vadd.f32 %v3745_v39, %v3744_v15  ;;  %v3857_v44 = vadd.f32 %v3856_v14, %v3855_v9  ;;  %v15805_v38 = vpop.f32.mrb[5].mxu0  ;;  %v3711_v23 = vmul.f32 %v15803_v42, %v15754_v18 }
 0x339   : > { %v3709_v52 = vmul.f32 %v15735_v56, %v15805_v38  ;;  %v15811_v43 = vpop.f32.mrb[6].mxu0 }
 0x33a   : > { %v3859_v16 = vadd.f32 %v3858_v17, %v3857_v44  ;;  %v3748_v7 = vadd.f32 %v3747_v54, %v3746_v51  ;;  %v15815_v60 = vpop.f32.mrb[7].mxu0  ;;  %v3712_v35 = vmul.f32 %v15811_v43, %v15764_v59  ;;  %v3825_v50 = vmul.f32 %v3711_v23, %v3711_v23  ;;  %v15847_v44 = vpop.permute.xlu1 %3622 }
 0x33b   : > { %v3749_v8 = vsel %vm19171_vm8, %v3709_v52, 0.0  ;;  %v3823_v36 = vmul.f32 %v3709_v52, %v3709_v52  ;;  %v3710_v33 = vmul.f32 %v15743_v34, %v15815_v60  ;;  %v3753_v19 = vsel %vm19171_vm8, %v3711_v23, 0.0  ;;  %19372 = vst [vmem:[#allocation23_spill] sm:$0xff] %v15847_v44 }
 0x33c   : > { %v3750_v45 = vadd.f32 %v3749_v8, %v3748_v7  ;;  %v3861_v31 = vadd.f32 %v3860_v6, %v3859_v16  ;;  %v3826_v3 = vmul.f32 %v3712_v35, %v3712_v35  ;;  %v3755_v40 = vsel %vm19171_vm8, %v3712_v35, 0.0 }
 0x33d   : > { %v3862_v41 = vsel %vm19171_vm8, %v3823_v36, 0.0  ;;  %v3751_v53 = vsel %vm19171_vm8, %v3710_v33, 0.0  ;;  %v3824_v24 = vmul.f32 %v3710_v33, %v3710_v33  ;;  %v3866_v9 = vsel %vm19171_vm8, %v3825_v50, 0.0 }
 0x33e   : > { %v3863_v55 = vadd.f32 %v3862_v41, %v3861_v31  ;;  %v3752_v10 = vadd.f32 %v3751_v53, %v3750_v45  ;;  %v3868_v23 = vsel %vm19171_vm8, %v3826_v3, 0.0  ;;  %v15857_v41 = vpop.permute.xlu0 %3627 }
 0x33f   : > { %v15830_v58 = vpop.f32.mrb[8].mxu0  ;;  %v3864_v22 = vsel %vm19171_vm8, %v3824_v24, 0.0  ;;  %19373 = vst [vmem:[#allocation24_spill] sm:$0xff] %v15857_v41 }
 0x340   : > { %v3754_v29 = vadd.f32 %v3753_v19, %v3752_v10  ;;  %v15833_v30 = vpop.f32.mrb[9].mxu0  ;;  %v3865_v49 = vadd.f32 %v3864_v22, %v3863_v55  ;;  %v3715_v20 = vmul.f32 %v15830_v58, %v15770_v63 }
 0x341   : > { %v3713_v15 = vmul.f32 %v15766_v11, %v15833_v30  ;;  %v15840_v39 = vpop.f32.mrb[10].mxu0 }
 0x342   : > { %v3756_v14 = vadd.f32 %v3755_v40, %v3754_v29  ;;  %v15845_v51 = vpop.f32.mrb[11].mxu0  ;;  %v3867_v17 = vadd.f32 %v3866_v9, %v3865_v49  ;;  %v3716_v6 = vmul.f32 %v15840_v39, %v15772_v37  ;;  %v3829_v31 = vmul.f32 %v3715_v20, %v3715_v20  ;;  %v15865_v29 = vpop.permute.xlu1 %3632 }
 0x343   : > { %v3757_v54 = vsel %vm19171_vm8, %v3713_v15, 0.0  ;;  %v3827_v52 = vmul.f32 %v3713_v15, %v3713_v15  ;;  %v3714_v16 = vmul.f32 %v15768_v0, %v15845_v51  ;;  %v3761_v53 = vsel %vm19171_vm8, %v3715_v20, 0.0  ;;  %19374 = vst [vmem:[#allocation25_spill] sm:$0xff] %v15865_v29 }
 0x344   : > { %v3758_v7 = vadd.f32 %v3757_v54, %v3756_v14  ;;  %v3869_v8 = vadd.f32 %v3868_v23, %v3867_v17  ;;  %v3830_v24 = vmul.f32 %v3716_v6, %v3716_v6  ;;  %v3763_v22 = vsel %vm19171_vm8, %v3716_v6, 0.0 }
 0x345   : > { %v3870_v36 = vsel %vm19171_vm8, %v3827_v52, 0.0  ;;  %v3759_v33 = vsel %vm19171_vm8, %v3714_v16, 0.0  ;;  %v3828_v45 = vmul.f32 %v3714_v16, %v3714_v16  ;;  %v3874_v9 = vsel %vm19171_vm8, %v3829_v31, 0.0 }
 0x346   : > { %v3760_v35 = vadd.f32 %v3759_v33, %v3758_v7  ;;  %v3871_v50 = vadd.f32 %v3870_v36, %v3869_v8  ;;  %v3876_v7 = vsel %vm19171_vm8, %v3830_v24, 0.0  ;;  %v15883_v36 = vpop.permute.xlu0 %3637 }
 0x347   : > { %v3872_v55 = vsel %vm19171_vm8, %v3828_v45, 0.0  ;;  %v15861_v10 = vpop.f32.mrb[12].mxu0  ;;  %19375 = vst [vmem:[#allocation26_spill] sm:$0xff] %v15883_v36 }
 0x348   : > { %v3762_v19 = vadd.f32 %v3761_v53, %v3760_v35  ;;  %v15863_v3 = vpop.f32.mrb[13].mxu0  ;;  %v3873_v40 = vadd.f32 %v3872_v55, %v3871_v50  ;;  %v3719_v20 = vmul.f32 %v15861_v10, %v15794_v28  ;;  %v15887_v55 = vpop.permute.xlu1 %3642 }
 0x349   : > { %v3717_v49 = vmul.f32 %v15774_v1, %v15863_v3  ;;  %v15870_v15 = vpop.f32.mrb[14].mxu0  ;;  %19376 = vst [vmem:[#allocation27_spill] sm:$0xff] %v15887_v55 }
 0x34a   : > { %v3764_v14 = vadd.f32 %v3763_v22, %v3762_v19  ;;  %v15875_v17 = vpop.f32.mrb[15].mxu0  ;;  %v3875_v54 = vadd.f32 %v3874_v9, %v3873_v40  ;;  %v3720_v8 = vmul.f32 %v15870_v15, %v15798_v48  ;;  %v3833_v53 = vmul.f32 %v3719_v20, %v3719_v20 }
 0x34b   : > { %v3765_v52 = vsel %vm19171_vm8, %v3717_v49, 0.0  ;;  %v3831_v16 = vmul.f32 %v3717_v49, %v3717_v49  ;;  %v3718_v23 = vmul.f32 %v15780_v2, %v15875_v17  ;;  %v3769_v19 = vsel %vm19171_vm8, %v3719_v20, 0.0 }
 0x34c   : > { %v3766_v6 = vadd.f32 %v3765_v52, %v3764_v14  ;;  %v3877_v33 = vadd.f32 %v3876_v7, %v3875_v54  ;;  %v3834_v49 = vmul.f32 %v3720_v8, %v3720_v8  ;;  %v3771_v54 = vsel %vm19171_vm8, %v3720_v8, 0.0 }
 0x34d   : > { %v3878_v45 = vsel %vm19171_vm8, %v3831_v16, 0.0  ;;  %v3767_v31 = vsel %vm19171_vm8, %v3718_v23, 0.0  ;;  %v3832_v35 = vmul.f32 %v3718_v23, %v3718_v23  ;;  %v3882_v7 = vsel %vm19171_vm8, %v3833_v53, 0.0 }
 0x34e   : > { %v3768_v50 = vadd.f32 %v3767_v31, %v3766_v6  ;;  %v3879_v22 = vadd.f32 %v3878_v45, %v3877_v33  ;;  %v15905_v45 = vpop.permute.xlu0 %3647 }
 0x34f   : > { %v3880_v24 = vsel %vm19171_vm8, %v3832_v35, 0.0  ;;  %v15891_v40 = vpop.f32.mrb[16].mxu0  ;;  %19377 = vst [vmem:[#allocation28_spill] sm:$0xff] %v15905_v45 }
 0x350   : > { %v3770_v9 = vadd.f32 %v3769_v19, %v3768_v50  ;;  %v15893_v14 = vpop.f32.mrb[17].mxu0  ;;  %v3881_v52 = vadd.f32 %v3880_v24, %v3879_v22  ;;  %v3723_v20 = vmul.f32 %v15891_v40, %v15835_v47  ;;  %v3884_v19 = vsel %vm19171_vm8, %v3834_v49, 0.0  ;;  %v15913_v24 = vpop.permute.xlu1 %3652 }
 0x351   : > { %v3721_v16 = vmul.f32 %v15817_v26, %v15893_v14  ;;  %v15898_v23 = vpop.f32.mrb[18].mxu0  ;;  %19378 = vst [vmem:[#allocation29_spill] sm:$0xff] %v15913_v24 }
 0x352   : > { %v3772_v6 = vadd.f32 %v3771_v54, %v3770_v9  ;;  %v15903_v33 = vpop.f32.mrb[19].mxu0  ;;  %v3883_v31 = vadd.f32 %v3882_v7, %v3881_v52  ;;  %v3724_v53 = vmul.f32 %v15898_v23, %v15847_v44  ;;  %v3837_v7 = vmul.f32 %v3723_v20, %v3723_v20  ;;  %v15923_v26 = vpop.permute.xlu0 %3657 }
 0x353   : > { %v3773_v35 = vsel %vm19171_vm8, %v3721_v16, 0.0  ;;  %v3835_v8 = vmul.f32 %v3721_v16, %v3721_v16  ;;  %v3722_v50 = vmul.f32 %v15825_v4, %v15903_v33  ;;  %v3777_v16 = vsel %vm19171_vm8, %v3723_v20, 0.0  ;;  %19379 = vst [vmem:[#allocation30_spill] sm:$0xff] %v15923_v26 }
 0x354   : > { %v3774_v22 = vadd.f32 %v3773_v35, %v3772_v6  ;;  %v3885_v9 = vadd.f32 %v3884_v19, %v3883_v31  ;;  %v3838_v6 = vmul.f32 %v3724_v53, %v3724_v53  ;;  %v3779_v31 = vsel %vm19171_vm8, %v3724_v53, 0.0 }
 0x355   : > { %v3886_v54 = vsel %vm19171_vm8, %v3835_v8, 0.0  ;;  %v3775_v12 = vsel %vm19171_vm8, %v3722_v50, 0.0  ;;  %v3836_v52 = vmul.f32 %v3722_v50, %v3722_v50  ;;  %v3890_v20 = vsel %vm19171_vm8, %v3837_v7, 0.0 }
 0x356   : > { %v3776_v5 = vadd.f32 %v3775_v12, %v3774_v22  ;;  %v3887_v47 = vadd.f32 %v3886_v54, %v3885_v9 }
 0x357   : > { %v3888_v4 = vsel %vm19171_vm8, %v3836_v52, 0.0  ;;  %v15919_v49 = vpop.f32.mrb[20].mxu0 }
 0x358   : > { %v3778_v35 = vadd.f32 %v3777_v16, %v3776_v5  ;;  %v15921_v44 = vpop.f32.mrb[21].mxu0  ;;  %v3889_v8 = vadd.f32 %v3888_v4, %v3887_v47  ;;  %v3727_v19 = vmul.f32 %v15919_v49, %v15883_v36  ;;  %v15935_v5 = vpop.permute.xlu1 %3662  ;;  %v3892_v47 = vsel %vm19171_vm8, %v3838_v6, 0.0 }
 0x359   : > { %v3725_v50 = vmul.f32 %v15857_v41, %v15921_v44  ;;  %v15928_v12 = vpop.f32.mrb[22].mxu0  ;;  %19380 = vst [vmem:[#allocation31_spill] sm:$0xff] %v15935_v5 }
 0x35a   : > { %v3780_v22 = vadd.f32 %v3779_v31, %v3778_v35  ;;  %v15933_v9 = vpop.f32.mrb[23].mxu0  ;;  %v3891_v54 = vadd.f32 %v3890_v20, %v3889_v8  ;;  %v3728_v7 = vmul.f32 %v15928_v12, %v15887_v55  ;;  %v3841_v48 = vmul.f32 %v3727_v19, %v3727_v19  ;;  %v15945_v20 = vpop.permute.xlu0 %3667 }
 0x35b   : > { %v3781_v52 = vsel %vm19171_vm8, %v3725_v50, 0.0  ;;  %v3839_v53 = vmul.f32 %v3725_v50, %v3725_v50  ;;  %v3726_v4 = vmul.f32 %v15865_v29, %v15933_v9  ;;  %19381 = vst [vmem:[#allocation32_spill] sm:$0xff] %v15945_v20  ;;  %v3785_v50 = vsel %vm19171_vm8, %v3727_v19, 0.0 }
 0x35c   : > { %v3782_v16 = vadd.f32 %v3781_v52, %v3780_v22  ;;  %v3893_v41 = vadd.f32 %v3892_v47, %v3891_v54  ;;  %v3842_v22 = vmul.f32 %v3728_v7, %v3728_v7  ;;  %v15953_v54 = vpop.permute.xlu1 %3672 }
 0x35d   : > { %v3894_v35 = vsel %vm19171_vm8, %v3839_v53, 0.0  ;;  %v3783_v31 = vsel %vm19171_vm8, %v3726_v4, 0.0  ;;  %v3840_v36 = vmul.f32 %v3726_v4, %v3726_v4  ;;  %19382 = vst [vmem:[#allocation33_spill] sm:$0xff] %v15953_v54  ;;  %v3787_v53 = vsel %vm19171_vm8, %v3728_v7, 0.0 }
 0x35e   : > { %v3784_v8 = vadd.f32 %v3783_v31, %v3782_v16  ;;  %v3895_v28 = vadd.f32 %v3894_v35, %v3893_v41  ;;  %v3898_v41 = vsel %vm19171_vm8, %v3841_v48, 0.0  ;;  %v15971_v48 = vpop.permute.xlu0 %3677 }
 0x35f   : > { %v3896_v29 = vsel %vm19171_vm8, %v3840_v36, 0.0  ;;  %v15949_v6 = vpop.f32.mrb[24].mxu0  ;;  %19383 = vst [vmem:[#allocation34_spill] sm:$0xff] %v15971_v48 }
 0x360   : > { %v3786_v52 = vadd.f32 %v3785_v50, %v3784_v8  ;;  %v15951_v55 = vpop.f32.mrb[25].mxu0  ;;  %v3897_v4 = vadd.f32 %v3896_v29, %v3895_v28  ;;  %v3731_v36 = vmul.f32 %v15949_v6, %v15923_v26  ;;  %v3900_v29 = vsel %vm19171_vm8, %v3842_v22, 0.0 }
 0x361   : > { %v3729_v47 = vmul.f32 %v15905_v45, %v15951_v55  ;;  %v15958_v16 = vpop.f32.mrb[26].mxu0 }
 0x362   : > { %v3788_v19 = vadd.f32 %v3787_v53, %v3786_v52  ;;  %v15963_v35 = vpop.f32.mrb[27].mxu0  ;;  %v3899_v31 = vadd.f32 %v3898_v41, %v3897_v4  ;;  %v3732_v45 = vmul.f32 %v15958_v16, %v15935_v5  ;;  %v3845_v41 = vmul.f32 %v3731_v36, %v3731_v36 }
 0x363   : > { %v3789_v8 = vsel %vm19171_vm8, %v3729_v47, 0.0  ;;  %v3843_v50 = vmul.f32 %v3729_v47, %v3729_v47  ;;  %v3730_v28 = vmul.f32 %v15913_v24, %v15963_v35  ;;  %v15975_v47 = vpop.permute.xlu1 %3682  ;;  %v3793_v24 = vsel %vm19171_vm8, %v3731_v36, 0.0 }
 0x364   : > { %v3790_v7 = vadd.f32 %v3789_v8, %v3788_v19  ;;  %v3901_v2 = vadd.f32 %v3900_v29, %v3899_v31  ;;  %19384 = vst [vmem:[#allocation35_spill] sm:$0xff] %v15975_v47  ;;  %v3846_v8 = vmul.f32 %v3732_v45, %v3732_v45  ;;  %v3795_v31 = vsel %vm19171_vm8, %v3732_v45, 0.0 }
 0x365   : > { %v3902_v52 = vsel %vm19171_vm8, %v3843_v50, 0.0  ;;  %v3791_v53 = vsel %vm19171_vm8, %v3730_v28, 0.0  ;;  %v3844_v4 = vmul.f32 %v3730_v28, %v3730_v28 }
 0x366   : > { %v3792_v26 = vadd.f32 %v3791_v53, %v3790_v7  ;;  %v3903_v1 = vadd.f32 %v3902_v52, %v3901_v2  ;;  %v3906_v7 = vsel %vm19171_vm8, %v3845_v41, 0.0  ;;  %v15993_v53 = vpop.permute.xlu0 %3687 }
 0x367   : > { %v3904_v22 = vsel %vm19171_vm8, %v3844_v4, 0.0  ;;  %v15979_v19 = vpop.f32.mrb[28].mxu0  ;;  %19385 = vst [vmem:[#allocation36_spill] sm:$0xff] %v15993_v53  ;;  %v3908_v4 = vsel %vm19171_vm8, %v3846_v8, 0.0 }
 0x368   : > { %v3794_v5 = vadd.f32 %v3793_v24, %v3792_v26  ;;  %v15981_v37 = vpop.f32.mrb[29].mxu0  ;;  %v3905_v50 = vadd.f32 %v3904_v22, %v3903_v1  ;;  %v3735_v2 = vmul.f32 %v15979_v19, %v15971_v48 }
 0x369   : > { %v3733_v28 = vmul.f32 %v15945_v20, %v15981_v37  ;;  %v15986_v29 = vpop.f32.mrb[30].mxu0  ;;  %v16001_v20 = vpop.permute.xlu1 %3692 }
 0x36a   : > { %v3796_v36 = vadd.f32 %v3795_v31, %v3794_v5  ;;  %v15991_v52 = vpop.f32.mrb[31].mxu0  ;;  %v3907_v26 = vadd.f32 %v3906_v7, %v3905_v50  ;;  %v3736_v41 = vmul.f32 %v15986_v29, %v15975_v47  ;;  %19386 = vst [vmem:[#allocation37_spill] sm:$0xff] %v16001_v20  ;;  %v3849_v7 = vmul.f32 %v3735_v2, %v3735_v2  ;;  %v16011_v11 = vpop.permute.xlu0 %3697 }
 0x36b   : > { %v3797_v24 = vsel %vm19171_vm8, %v3733_v28, 0.0  ;;  %v3847_v45 = vmul.f32 %v3733_v28, %v3733_v28  ;;  %v3734_v1 = vmul.f32 %v15953_v54, %v15991_v52  ;;  %v3801_v28 = vsel %vm19171_vm8, %v3735_v2, 0.0  ;;  %19387 = vst [vmem:[#allocation38_spill] sm:$0xff] %v16011_v11 }
 0x36c   : > { %v3798_v22 = vadd.f32 %v3797_v24, %v3796_v36  ;;  %v3909_v5 = vadd.f32 %v3908_v4, %v3907_v26  ;;  %v3850_v36 = vmul.f32 %v3736_v41, %v3736_v41  ;;  %v3803_v26 = vsel %vm19171_vm8, %v3736_v41, 0.0 }
 0x36d   : > { %v3910_v31 = vsel %vm19171_vm8, %v3847_v45, 0.0  ;;  %v3799_v48 = vsel %vm19171_vm8, %v3734_v1, 0.0  ;;  %v3848_v50 = vmul.f32 %v3734_v1, %v3734_v1  ;;  %v3914_v2 = vsel %vm19171_vm8, %v3849_v7, 0.0 }
 0x36e   : > { %v3800_v63 = vadd.f32 %v3799_v48, %v3798_v22  ;;  %v3911_v0 = vadd.f32 %v3910_v31, %v3909_v5 }
 0x36f   : > { %v3912_v54 = vsel %vm19171_vm8, %v3848_v50, 0.0  ;;  %v16007_v8 = vpop.f32.mrb[32].mxu0 }
 0x370   : > { %v3802_v24 = vadd.f32 %v3801_v28, %v3800_v63  ;;  %v16009_v47 = vpop.f32.mrb[33].mxu0  ;;  %v3913_v45 = vadd.f32 %v3912_v54, %v3911_v0  ;;  %v3739_v4 = vmul.f32 %v16007_v8, %v16011_v11  ;;  %v16023_v63 = vpop.permute.xlu1 %3702  ;;  %v3916_v54 = vsel %vm19171_vm8, %v3850_v36, 0.0 }
 0x371   : > { %v3737_v1 = vmul.f32 %v15993_v53, %v16009_v47  ;;  %v16016_v48 = vpop.f32.mrb[34].mxu0  ;;  %19388 = vst [vmem:[#allocation39_spill] sm:$0xff] %v16023_v63  ;;  %v19152_v36 = vlaneseq }
 0x372   : > { %v3804_v22 = vadd.f32 %v3803_v26, %v3802_v24  ;;  %v16021_v5 = vpop.f32.mrb[35].mxu0  ;;  %v3915_v31 = vadd.f32 %v3914_v2, %v3913_v45  ;;  %v3740_v7 = vmul.f32 %v16016_v48, %v16023_v63  ;;  %v3853_v59 = vmul.f32 %v3739_v4, %v3739_v4 }
 0x373   : > { %v3805_v50 = vsel %vm19171_vm8, %v3737_v1, 0.0  ;;  %v3851_v41 = vmul.f32 %v3737_v1, %v3737_v1  ;;  %v3738_v0 = vmul.f32 %v16001_v20, %v16021_v5  ;;  %v3809_v2 = vsel %vm19171_vm8, %v3739_v4, 0.0 }
 0x374   : > { %v3806_v28 = vadd.f32 %v3805_v50, %v3804_v22  ;;  %v3917_v53 = vadd.f32 %v3916_v54, %v3915_v31  ;;  %v3854_v20 = vmul.f32 %v3740_v7, %v3740_v7  ;;  %v3811_v22 = vsel %vm19171_vm8, %v3740_v7, 0.0 }
 0x375   : > { %v3918_v24 = vsel %vm19171_vm8, %v3851_v41, 0.0  ;;  %v3807_v26 = vsel %vm19171_vm8, %v3738_v0, 0.0  ;;  %v3852_v11 = vmul.f32 %v3738_v0, %v3738_v0  ;;  %v3922_v31 = vsel %vm19171_vm8, %v3853_v59, 0.0 }
 0x376   : > { %v3808_v45 = vadd.f32 %v3807_v26, %v3806_v28  ;;  %v3919_v1 = vadd.f32 %v3918_v24, %v3917_v53  ;;  %v3924_v63 = vsel %vm19171_vm8, %v3854_v20, 0.0  ;;  %v3940_v28 = vand.u32 127, %v19152_v36 }
 0x377   : > { %v3920_v18 = vsel %vm19171_vm8, %v3852_v11, 0.0  ;;  %v16042_v11 = vld [vmem:[%s19062_s3] sm:$0x1]  ;;  %v19151_v59 = vmov 0.0  }
 0x378   : > { %v3810_v34 = vadd.f32 %v3809_v2, %v3808_v45  ;;  %v3921_v50 = vadd.f32 %v3920_v18, %v3919_v1  ;;  %vm3941_vm10 = vcmp.lt.s32.totalorder %v3940_v28, 4  ;;  %v3932_v2 = vmul.f32 256.0, %v16042_v11 }
 0x37a   : > { %v3812_v54 = vadd.f32 %v3811_v22, %v3810_v34  ;;  %v3923_v41 = vadd.f32 %v3922_v31, %v3921_v50  ;;  %v16045_v34 = vsel %vm3941_vm10, 1.0, %v19151_v59  ;;  %v3937_v28 = vmul.f32 %v3932_v2, %v16042_v11 }
 0x37b   : > { %19389 = vst [vmem:[#allocation40_spill] sm:$0xff] %v16045_v34  ;;  %v16050_v50 = vsub.f32 1.0, %v16045_v34 }
 0x37c   : > { %v3813_v0 = vrot.slane %v3812_v54, 4  ;;  %v3925_v26 = vadd.f32 %v3924_v63, %v3923_v41  ;;  %v3934_v63 = vmul.f32 2.0, %v16042_v11 }
 0x37d   : > { %19390 = vst [vmem:[#allocation41_spill] sm:$0xff] %v16050_v50 }
 0x37e   : > { %v3814_v4 = vadd.f32 %v3813_v0, %v3812_v54  ;;  %v3926_v53 = vrot.slane %v3925_v26, 4 }
 0x380   : > { %v3815_v24 = vrot.slane %v3814_v4, 2  ;;  %v3927_v18 = vadd.f32 %v3926_v53, %v3925_v26 }
 0x382   : > { %v3816_v7 = vadd.f32 %v3815_v24, %v3814_v4  ;;  %v3928_v20 = vrot.slane %v3927_v18, 2 }
 0x384   : > { %v3817_v45 = vrot.slane %v3816_v7, 1  ;;  %v3929_v1 = vadd.f32 %v3928_v20, %v3927_v18 }
 0x386   : > { %v3818_v22 = vadd.f32 %v3817_v45, %v3816_v7  ;;  %v3930_v31 = vrot.slane %v3929_v1, 1 }
 0x388   : > { %v3933_v54 = vadd.f32 %v3932_v2, %v3818_v22  ;;  %v3935_v41 = vmul.f32 %v3934_v63, %v3818_v22  ;;  %v3931_v0 = vadd.f32 %v3930_v31, %v3929_v1  ;;  %v14552_v1 = vld [vmem:[%s15730_s23 + $0x18] sm:$0xff]   ;;  %v14553_v22 = vld [vmem:[%s15730_s23 + $0x20] sm:$0xff]  }
 0x389   : > { %12828 = vmatmul.mubr.msk.bf16.gmra.mrb[40].mxu0 %vm19171_vm8, %v14552_v1  ;;  %v6322_v31 = vrot.slane %v14552_v1, 1 }
 0x38a   : > { %v3952_v26 = vmul.f32 %v16050_v50, %v3933_v54  ;;  %v3945_v4 = vmul.f32 %v16045_v34, %v3933_v54  ;;  %v3936_v53 = vadd.f32 %v3935_v41, %v3931_v0  ;;  %v6324_v54 = vrot.slane %v14553_v22, 1  ;;  %12831 = vmatprep.mubr.msk.bf16.mxu0 %vm19171_vm8, %v14553_v22 }
 0x38b   : > { %v19391_v41 = vrot.slane %v15747_v62, 1 }
 0x38c   : > { %v3953_v24 = vsel %vm19165_vm11, %v3952_v26, 0.0  ;;  %v3947_v18 = vsel %vm19165_vm11, %v3945_v4, 0.0  ;;  %v3938_v7 = vadd.f32 %v3937_v28, %v3936_v53  ;;  %v16073_v28 = vsel %vm19173_vm2, %v6322_v31, %v6324_v54  ;;  %v11550_v26 = vld [vmem:[%s19065_s6 + $0x8] sm:$0xf]  ;;  %v14555_v53 = vld [vmem:[%s15730_s23 + $0x30] sm:$0xff]  }
 0x38d   : > { %3954 = vadd.xlane.f32.xlu1 %v3953_v24  ;;  %3948 = vadd.xlane.f32.xlu0 %v3947_v18  ;;  %v16068_v0 = vsel %vm19173_vm2, %v19391_v41, %v6322_v31  ;;  %19393 = vst [vmem:[#allocation43_spill] sm:$0xff] %v16073_v28  ;;  %v6680_v62 = vsel %vm19172_vm9, %v11550_v26, 0  ;;  %v14554_v4 = vld [vmem:[%s15730_s23 + $0x28] sm:$0xff]   ;;  %v6328_v18 = vrot.slane %v14555_v53, 1 }
 0x38e   : > { %v3957_v20 = vmul.f32 %v16045_v34, %v3938_v7  ;;  %v3962_v63 = vmul.f32 %v16050_v50, %v3938_v7  ;;  %19392 = vst [vmem:[#allocation42_spill] sm:$0xff] %v16068_v0  ;;  %12979 = vmatprep.mubr.msk.bf16.mxu1 %vm19171_vm8, %v16068_v0  ;;  %14477 = vmatprep.subr.msk.bf16.mxu1 %vm19172_vm9, %v11550_v26  ;;  %v6326_v24 = vrot.slane %v14554_v4, 1 }
 0x38f   : > { %12980 = vmatmul.mubr.msk.bf16.gmra.mrb[4].mxu1 %vm19171_vm8, %v16073_v28 }
 0x390   : > { %v3958_v45 = vsel %vm19165_vm11, %v3957_v20, 0.0  ;;  %v3963_v2 = vsel %vm19165_vm11, %v3962_v63, 0.0  ;;  %13012 = vmatpush3.bf16.msra.mxu1 %v6680_v62  ;;  %v16087_v7 = vsel %vm19173_vm2, %v6324_v54, %v6326_v24  ;;  %v16092_v20 = vsel %vm19173_vm2, %v6326_v24, %v6328_v18  ;;  %v14557_v63 = vld [vmem:[%s15730_s23 + $0x40] sm:$0xff]  }
 0x391   : > { %3959 = vadd.xlane.f32.xlu0 %v3958_v45  ;;  %12832 = vmatmul.mubr.msk.bf16.gmra.mrb[44].mxu0 %vm19171_vm8, %v14554_v4  ;;  %19394 = vst [vmem:[#allocation44_spill] sm:$0xff] %v16087_v7  ;;  %19395 = vst [vmem:[#allocation45_spill] sm:$0xff] %v16092_v20  ;;  %v14556_v45 = vld [vmem:[%s15730_s23 + $0x38] sm:$0xff]   ;;  %v6332_v22 = vrot.slane %v14557_v63, 1  ;;  %v14558_v4 = vld [vmem:[%s15730_s23 + $0x48] sm:$0xff]  }
 0x392   : > { %12835 = vmatprep.mubr.msk.bf16.mxu0 %vm19171_vm8, %v14555_v53  ;;  %12983 = vmatprep.mubr.msk.bf16.mxu1 %vm19171_vm8, %v16087_v7 }
 0x395   : > { %3964 = vadd.xlane.f32.xlu0 %v3963_v2  ;;  %v6330_v2 = vrot.slane %v14556_v45, 1 }
 0x397   : > { %12984 = vmatmul.mubr.msk.bf16.gmra.mrb[8].mxu1 %vm19171_vm8, %v16092_v20  ;;  %v16101_v31 = vsel %vm19173_vm2, %v6328_v18, %v6330_v2  ;;  %v16106_v41 = vsel %vm19173_vm2, %v6330_v2, %v6332_v22  ;;  %v6334_v18 = vrot.slane %v14558_v4, 1 }
 0x398   : > { %19396 = vst [vmem:[#allocation46_spill] sm:$0xff] %v16101_v31  ;;  %12987 = vmatprep.mubr.msk.bf16.mxu1 %vm19171_vm8, %v16101_v31  ;;  %19397 = vst [vmem:[#allocation47_spill] sm:$0xff] %v16106_v41 }
 0x399   : > { %12836 = vmatmul.mubr.msk.bf16.gmra.mrb[48].mxu0 %vm19171_vm8, %v14556_v45  ;;  %v16115_v36 = vsel %vm19173_vm2, %v6332_v22, %v6334_v18  ;;  %v14561_v22 = vld [vmem:[%s15730_s23 + $0x60] sm:$0xff]  }
 0x39a   : > { %12839 = vmatprep.mubr.msk.bf16.mxu0 %vm19171_vm8, %v14557_v63  ;;  %v14559_v63 = vld [vmem:[%s15730_s23 + $0x50] sm:$0xff]   ;;  %19398 = vst [vmem:[#allocation48_spill] sm:$0xff] %v16115_v36 }
 0x39b   : > { %v6336_v59 = vrot.slane %v14559_v63, 1 }
 0x39f   : > { %12988 = vmatmul.mubr.msk.bf16.gmra.mrb[12].mxu1 %vm19171_vm8, %v16106_v41 }
 0x3a0   : > { %12991 = vmatprep.mubr.msk.bf16.mxu1 %vm19171_vm8, %v16115_v36 }
 0x3a1   : > { %12840 = vmatmul.mubr.msk.bf16.gmra.mrb[52].mxu0 %vm19171_vm8, %v14558_v4  ;;  %v14560_v4 = vld [vmem:[%s15730_s23 + $0x58] sm:$0xff]  }
 0x3a2   : > { %12843 = vmatprep.mubr.msk.bf16.mxu0 %vm19171_vm8, %v14559_v63  ;;  %v6340_v63 = vrot.slane %v14561_v22, 1 }
 0x3a9   : > { %12844 = vmatmul.mubr.msk.bf16.gmra.mrb[56].mxu0 %vm19171_vm8, %v14560_v4 }
 0x3aa   : > { %12847 = vmatprep.mubr.msk.bf16.mxu0 %vm19171_vm8, %v14561_v22 }
 0x41a   : > { %v3949_v1 = vpop.xlane.xlu0 %3948  ;;  %v3955_v26 = vpop.xlane.xlu1 %3954 }
 0x41b   : > { %v3951_v54 = vmul.f32 0.0009765625, %v3949_v1  ;;  %v3956_v53 = vmul.f32 0.0009765625, %v3955_v26  ;;  %v16120_v26 = vsel %vm19173_vm2, %v6334_v18, %v6336_v59 }
 0x41c   : > { %19399 = vst [vmem:[#allocation49_spill] sm:$0xff] %v16120_v26  ;;  %12992 = vmatmul.mubr.msk.bf16.gmra.mrb[16].mxu1 %vm19171_vm8, %v16120_v26 }
 0x41d   : > { %v3967_v24 = vmul.f32 %v3951_v54, %v3951_v54  ;;  %v3971_v41 = vmul.f32 %v3956_v53, %v3956_v53 }
 0x41e   : > { %v3960_v62 = vpop.xlane.xlu0 %3959 }
 0x41f   : > { %v3961_v45 = vmul.f32 0.0009765625, %v3960_v62 }
 0x421   : > { %v3968_v1 = vsub.f32 %v3961_v45, %v3967_v24  ;;  %v6338_v45 = vrot.slane %v14560_v4, 1  ;;  %v3975_v4 = vmul.f32 %v16045_v34, %v3951_v54  ;;  %v3523_v54 = vld [vmem:[%s19063_s4] sm:$0x1] }
 0x422   : > { %v3965_v2 = vpop.xlane.xlu0 %3964 }
 0x423   : > { %v3969_v31 = vadd.f32 1e-05, %v3968_v1  ;;  %v3966_v20 = vmul.f32 0.0009765625, %v3965_v2  ;;  %v16129_v18 = vsel %vm19173_vm2, %v6336_v59, %v6338_v45  ;;  %v16134_v1 = vsel %vm19173_vm2, %v6338_v45, %v6340_v63 }
 0x424   : > { %19400 = vst [vmem:[#allocation50_spill] sm:$0xff] %v16129_v18  ;;  %12995 = vmatprep.mubr.msk.bf16.mxu1 %vm19171_vm8, %v16129_v18  ;;  %19401 = vst [vmem:[#allocation51_spill] sm:$0xff] %v16134_v1  ;;  %v3976_v59 = vmul.f32 %v3956_v53, %v16050_v50  ;;  %v19404_v53 = vlaneseq }
 0x425   : > { %v3972_v62 = vsub.f32 %v3966_v20, %v3971_v41  ;;  %14595 = vrsqrt.f32 %v3969_v31  ;;  %12996 = vmatmul.mubr.msk.bf16.gmra.mrb[20].mxu1 %vm19171_vm8, %v16134_v1  ;;  %v14562_v20 = vld [vmem:[%s15730_s23 + $0x68] sm:$0xff]   ;;  %v14563_v31 = vld [vmem:[%s15730_s23 + $0x70] sm:$0xff]  }
 0x426   : > { %12848 = vmatmul.mubr.msk.bf16.gmra.mrb[60].mxu0 %vm19171_vm8, %v14562_v20  ;;  %v6342_v41 = vrot.slane %v14562_v20, 1 }
 0x427   : > { %v3973_v24 = vadd.f32 1e-05, %v3972_v62  ;;  %v6344_v62 = vrot.slane %v14563_v31, 1  ;;  %12851 = vmatprep.mubr.msk.bf16.mxu0 %vm19171_vm8, %v14563_v31  ;;  %v3977_v31 = vadd.f32 %v3976_v59, %v3975_v4  ;;  %v3524_v4 = vld [vmem:[%s19064_s5] sm:$0x1] }
 0x429   : > { %14597 = vrsqrt.f32 %v3973_v24  ;;  %v16145_v24 = vsel %vm19173_vm2, %v6340_v63, %v6342_v41  ;;  %v16150_v45 = vsel %vm19173_vm2, %v6342_v41, %v6344_v62  ;;  %v16160_v63 = vshrl.u32 %v19404_v53, 7  ;;  %v16164_v41 = vld [vmem:[%s15730_s23 + $0x80] sm:$0xff]  }
 0x42a   : > { %19402 = vst [vmem:[#allocation52_spill] sm:$0xff] %v16145_v24  ;;  %12999 = vmatprep.mubr.msk.bf16.mxu1 %vm19171_vm8, %v16145_v24  ;;  %19403 = vst [vmem:[#allocation53_spill] sm:$0xff] %v16150_v45  ;;  %v14564_v24 = vld [vmem:[%s15730_s23 + $0x78] sm:$0xff]   ;;  %v3982_v53 = vsub.f32 %v16042_v11, %v3977_v31 }
 0x42b   : > { %19405 = vst [vmem:[#allocation54_spill] sm:$0xff] %v16160_v63  ;;  %19406 = vst [vmem:[#allocation55_spill] sm:$0xff] %v16164_v41 }
 0x42d   : > { %13000 = vmatmul.mubr.msk.bf16.gmra.mrb[24].mxu1 %vm19171_vm8, %v16150_v45 }
 0x42e   : > { %12852 = vmatmul.mubr.msk.bf16.gmra.mrb[64].mxu0 %vm19171_vm8, %v14564_v24 }
 0x42f   : > { %v14596_v2 = vpop.eup %14595  ;;  %12855 = vmatprep.mubr.msk.bf16.mxu0 %vm19171_vm8, %v16164_v41 }
 0x430   : > { %v3978_v20 = vmul.f32 %v14596_v2, %v16045_v34  ;;  %v6346_v2 = vrot.slane %v14564_v24, 1  ;;  %v16171_v34 = vsub.s32 0, %v16160_v63  ;;  %v4888_v24 = vld [vmem:[%s19065_s6] sm:$0xf] }
 0x431   : > { %14473 = vmatprep.subr.msk.bf16.mxu0 %vm19172_vm9, %v4888_v24 }
 0x432   : > { %19407 = vst [vmem:[#allocation56_spill] sm:$0xff] %v16171_v34 }
 0x433   : > { %v14598_v22 = vpop.eup %14597 }
 0x434   : > { %v3979_v1 = vmul.f32 %v14598_v22, %v16050_v50  ;;  %v19163_v22 = vrot.slane %v16164_v41, 1 }
 0x436   : > { %v3980_v18 = vadd.f32 %v3979_v1, %v3978_v20  ;;  %v16175_v1 = vsel %vm19173_vm2, %v6344_v62, %v6346_v2  ;;  %v14566_v62 = vld [vmem:[%s15730_s23 + $0x88] sm:$0xff]   ;;  %v14569_v20 = vld [vmem:[#allocation2] sm:$0xff]  }
 0x437   : > { %19408 = vst [vmem:[#allocation57_spill] sm:$0xff] %v16175_v1  ;;  %13003 = vmatprep.mubr.msk.bf16.mxu1 %vm19171_vm8, %v16175_v1  ;;  %12856 = vmatmul.mubr.msk.bf16.gmra.mrb[68].mxu0 %vm19171_vm8, %v14566_v62 }
 0x438   : > { %v3981_v26 = vmul.f32 %v3980_v18, %v3523_v54  ;;  %v16182_v18 = vsel %vm19173_vm2, %v6346_v2, %v19163_v22  ;;  %12861 = vmatprep.mubr.msk.bf16.mxu0 %vm19171_vm8, %v14569_v20 }
 0x439   : > { %19409 = vst [vmem:[#allocation58_spill] sm:$0xff] %v16182_v18  ;;  %13004 = vmatmul.mubr.msk.bf16.gmra.mrb[28].mxu1 %vm19171_vm8, %v16182_v18 }
 0x43a   : > { %v3983_v59 = vmul.f32 %v3982_v53, %v3981_v26  ;;  %v3988_v11 = vrot.slane %v3981_v26, %v16171_v34 }
 0x43c   : > { %v3984_v54 = vadd.f32 %v3983_v59, %v3524_v4  ;;  %v3989_v53 = vmul.f32 %v3988_v11, %v15778_v13  ;;  %v3990_v31 = vmul.f32 %v3988_v11, %v15788_v21  ;;  %v3991_v2 = vmul.f32 %v15776_v25, %v3988_v11 }
 0x43d   : > { %v3992_v26 = vmul.f32 %v15786_v27, %v3988_v11  ;;  %v3993_v22 = vmul.f32 %v3988_v11, %v15805_v38  ;;  %v3994_v59 = vmul.f32 %v3988_v11, %v15815_v60  ;;  %v3995_v4 = vmul.f32 %v15803_v42, %v3988_v11 }
 0x43e   : > { %v16203_v63 = vrot.slane %v3984_v54, %v16171_v34  ;;  %v3996_v62 = vmul.f32 %v15811_v43, %v3988_v11  ;;  %v3997_v13 = vmul.f32 %v3988_v11, %v15833_v30  ;;  %v3998_v24 = vmul.f32 %v3988_v11, %v15845_v51 }
 0x43f   : > { %v3999_v21 = vmul.f32 %v15830_v58, %v3988_v11  ;;  %v4000_v25 = vmul.f32 %v15840_v39, %v3988_v11  ;;  %v4001_v27 = vmul.f32 %v3988_v11, %v15863_v3  ;;  %v4002_v38 = vmul.f32 %v3988_v11, %v15875_v17 }
 0x440   : > { %v4003_v20 = vmul.f32 %v15861_v10, %v3988_v11  ;;  %v4004_v60 = vmul.f32 %v15870_v15, %v3988_v11  ;;  %v4005_v42 = vmul.f32 %v3988_v11, %v15893_v14  ;;  %v4006_v43 = vmul.f32 %v3988_v11, %v15903_v33 }
 0x441   : > { %v4007_v30 = vmul.f32 %v15891_v40, %v3988_v11  ;;  %v4008_v51 = vmul.f32 %v15898_v23, %v3988_v11  ;;  %v4009_v58 = vmul.f32 %v3988_v11, %v15921_v44  ;;  %v4010_v39 = vmul.f32 %v3988_v11, %v15933_v9 }
 0x442   : > { %v4011_v3 = vmul.f32 %v15919_v49, %v3988_v11  ;;  %v4012_v17 = vmul.f32 %v15928_v12, %v3988_v11  ;;  %v4013_v10 = vmul.f32 %v3988_v11, %v15951_v55  ;;  %v4014_v15 = vmul.f32 %v3988_v11, %v15963_v35 }
 0x443   : > { %v4015_v14 = vmul.f32 %v15949_v6, %v3988_v11  ;;  %v4016_v33 = vmul.f32 %v15958_v16, %v3988_v11  ;;  %v4017_v40 = vmul.f32 %v3988_v11, %v15981_v37  ;;  %v4018_v23 = vmul.f32 %v3988_v11, %v15991_v52  ;;  %v11589_v6 = vld [vmem:[%s19066_s7 + $0xc] sm:$0xf] }
 0x444   : > { %v4019_v44 = vmul.f32 %v15979_v19, %v3988_v11  ;;  %v4020_v9 = vmul.f32 %v15986_v29, %v3988_v11  ;;  %v4021_v49 = vmul.f32 %v3988_v11, %v16009_v47  ;;  %v4022_v12 = vmul.f32 %v3988_v11, %v16021_v5  ;;  %14478 = vmatprep.subr.msk.bf16.mxu1 %vm19172_vm9, %v11589_v6 }
 0x445   : > { %v4023_v55 = vmul.f32 %v16007_v8, %v3988_v11  ;;  %v4024_v35 = vmul.f32 %v16016_v48, %v3988_v11  ;;  %v16240_v37 = vadd.f32 %v16203_v63, %v3989_v53  ;;  %v16243_v16 = vadd.f32 %v16203_v63, %v3990_v31 }
 0x446   : > { %v16246_v19 = vadd.f32 %v16203_v63, %v3991_v2  ;;  %v16249_v47 = vadd.f32 %v16203_v63, %v3992_v26  ;;  %v16253_v29 = vadd.f32 %v16203_v63, %v3993_v22  ;;  %v16256_v52 = vadd.f32 %v16203_v63, %v3994_v59 }
 0x447   : > { %v16259_v8 = vadd.f32 %v16203_v63, %v3995_v4  ;;  %v16262_v48 = vadd.f32 %v16203_v63, %v3996_v62  ;;  %v16265_v5 = vadd.f32 %v16203_v63, %v3997_v13  ;;  %v16268_v11 = vadd.f32 %v16203_v63, %v3998_v24 }
 0x448   : > { %v16271_v54 = vadd.f32 %v16203_v63, %v3999_v21  ;;  %v16274_v22 = vadd.f32 %v16203_v63, %v4000_v25  ;;  %v16277_v53 = vadd.f32 %v16203_v63, %v4001_v27  ;;  %v16280_v31 = vadd.f32 %v16203_v63, %v4002_v38 }
 0x449   : > { %v16283_v2 = vadd.f32 %v16203_v63, %v4003_v20  ;;  %v16286_v26 = vadd.f32 %v16203_v63, %v4004_v60  ;;  %v16289_v59 = vadd.f32 %v16203_v63, %v4005_v42  ;;  %v16292_v4 = vadd.f32 %v16203_v63, %v4006_v43 }
 0x44a   : > { %v16295_v62 = vadd.f32 %v16203_v63, %v4007_v30  ;;  %v16298_v13 = vadd.f32 %v16203_v63, %v4008_v51  ;;  %v16301_v24 = vadd.f32 %v16203_v63, %v4009_v58  ;;  %v16304_v21 = vadd.f32 %v16203_v63, %v4010_v39 }
 0x44b   : > { %v16307_v25 = vadd.f32 %v16203_v63, %v4011_v3  ;;  %v16310_v27 = vadd.f32 %v16203_v63, %v4012_v17  ;;  %v16313_v38 = vadd.f32 %v16203_v63, %v4013_v10  ;;  %v16316_v20 = vadd.f32 %v16203_v63, %v4014_v15  ;;  %v4883_v15 = vld [vmem:[%s15730_s23 + $0x90] sm:$0xf] }
 0x44c   : > { %v16319_v60 = vadd.f32 %v16203_v63, %v4015_v14  ;;  %v16322_v42 = vadd.f32 %v16203_v63, %v4016_v33  ;;  %v16325_v43 = vadd.f32 %v16203_v63, %v4017_v40  ;;  %v16328_v30 = vadd.f32 %v16203_v63, %v4018_v23 }
 0x44d   : > { %v16331_v51 = vadd.f32 %v16203_v63, %v4019_v44  ;;  %v16334_v58 = vadd.f32 %v16203_v63, %v4020_v9  ;;  %v16337_v39 = vadd.f32 %v16203_v63, %v4021_v49  ;;  %v16340_v3 = vadd.f32 %v16203_v63, %v4022_v12 }
 0x44e   : > { %v16343_v17 = vadd.f32 %v16203_v63, %v4023_v55  ;;  %v16346_v10 = vadd.f32 %v16203_v63, %v4024_v35  ;;  %vm4067_vm12 = vcmp.gt.f32.partialorder %v16240_v37, 0.0  ;;  %vm4068_vm13 = vcmp.gt.f32.partialorder %v16243_v16, 0.0 }
 0x44f   : > { %vm4069_vm14 = vcmp.gt.f32.partialorder %v16246_v19, 0.0  ;;  %vm4070_vm15 = vcmp.gt.f32.partialorder %v16249_v47, 0.0  ;;  %vm4071_vm1 = vcmp.gt.f32.partialorder %v16253_v29, 0.0  ;;  %vm4072_vm10 = vcmp.gt.f32.partialorder %v16256_v52, 0.0 }
 0x450   : > { %19410 = vst [vmem:[#allocation59_spill] sm:$0xff] %v16343_v17  ;;  %vm4073_vm11 = vcmp.gt.f32.partialorder %v16259_v8, 0.0  ;;  %vm4074_vm6 = vcmp.gt.f32.partialorder %v16262_v48, 0.0  ;;  %vm4075_vm5 = vcmp.gt.f32.partialorder %v16265_v5, 0.0  ;;  %vm4076_vm4 = vcmp.gt.f32.partialorder %v16268_v11, 0.0 }
 0x451   : > { %v4103_v63 = vmul.f32 0.2, %v16240_v37  ;;  %v4104_v14 = vmul.f32 0.2, %v16243_v16  ;;  %vm4078_vm0 = vcmp.gt.f32.partialorder %v16274_v22, 0.0  ;;  %v16367_v44 = vcombine.low %v4883_v15, %v4883_v15 }
 0x452   : > { %v4105_v33 = vmul.f32 0.2, %v16246_v19  ;;  %v4106_v40 = vmul.f32 0.2, %v16249_v47  ;;  %v4107_v23 = vmul.f32 0.2, %v16253_v29 }
 0x453   : > { %19411 = vst [vmem:[#allocation60_spill] sm:$0xff] %v16367_v44  ;;  %vm4083_vm3 = vcmp.gt.f32.partialorder %v16289_v59, 0.0  ;;  %v4108_v9 = vmul.f32 0.2, %v16256_v52  ;;  %v4109_v49 = vmul.f32 0.2, %v16259_v8  ;;  %v16379_v55 = vsel %vm4067_vm12, %v16240_v37, %v4103_v63 }
 0x454   : > { %v4110_v12 = vmul.f32 0.2, %v16262_v48  ;;  %19412 = vst [vmem:[#allocation61_spill] sm:$0xff] %v16379_v55  ;;  %vm4087_vm7 = vcmp.gt.f32.partialorder %v16301_v24, 0.0  ;;  %v4111_v35 = vmul.f32 0.2, %v16265_v5  ;;  %v16391_v34 = vsel %vm4068_vm13, %v16243_v16, %v4104_v14 }
 0x455   : > { %v4112_v6 = vmul.f32 0.2, %v16268_v11  ;;  %v4113_v15 = vmul.f32 0.2, %v16271_v54  ;;  %19413 = vst [vmem:[#allocation62_spill] sm:$0xff] %v16391_v34  ;;  %vm4091_vm2 = vcmp.gt.f32.partialorder %v16313_v38, 0.0  ;;  %v16403_v18 = vsel %vm4069_vm14, %v16246_v19, %v4105_v33 }
 0x456   : > { %v4114_v37 = vmul.f32 0.2, %v16274_v22  ;;  %v4115_v63 = vmul.f32 0.2, %v16277_v53  ;;  %v4116_v50 = vmul.f32 0.2, %v16280_v31  ;;  %v4142_v45 = vsel %vm4070_vm15, %v16249_v47, %v4106_v40 }
 0x457   : > { %19414 = vst [vmem:[#allocation63_spill] sm:$0xff] %v16403_v18  ;;  %vm4095_vm9 = vcmp.gt.f32.partialorder %v16325_v43, 0.0  ;;  %v4117_v16 = vmul.f32 0.2, %v16283_v2  ;;  %v4118_v14 = vmul.f32 0.2, %v16286_v26  ;;  %v4143_v7 = vsel %vm4071_vm1, %v16253_v29, %v4107_v23 }
 0x458   : > { %v4119_v1 = vmul.f32 0.2, %v16289_v59  ;;  %vm4098_vm12 = vcmp.gt.f32.partialorder %v16334_v58, 0.0  ;;  %vm4099_vm8 = vcmp.gt.f32.partialorder %v16337_v39, 0.0  ;;  %v4120_v19 = vmul.f32 0.2, %v16292_v4 }
 0x459   : > { %v4121_v33 = vmul.f32 0.2, %v16295_v62  ;;  %v4122_v36 = vmul.f32 0.2, %v16298_v13  ;;  %vm4100_vm15 = vcmp.gt.f32.partialorder %v16340_v3, 0.0  ;;  %vm4101_vm14 = vcmp.gt.f32.partialorder %v16343_v17, 0.0 }
 0x45a   : > { %vm4102_vm13 = vcmp.gt.f32.partialorder %v16346_v10, 0.0  ;;  %v4123_v47 = vmul.f32 0.2, %v16301_v24  ;;  %v4124_v40 = vmul.f32 0.2, %v16304_v21  ;;  %v4144_v0 = vsel %vm4072_vm10, %v16256_v52, %v4108_v9 }
 0x45b   : > { %v4125_v28 = vmul.f32 0.2, %v16307_v25  ;;  %v4126_v41 = vmul.f32 0.2, %v16310_v27  ;;  %v4127_v29 = vmul.f32 0.2, %v16313_v38  ;;  %v4145_v44 = vsel %vm4073_vm11, %v16259_v8, %v4109_v49 }
 0x45c   : > { %v4128_v23 = vmul.f32 0.2, %v16316_v20  ;;  %v4129_v56 = vmul.f32 0.2, %v16319_v60  ;;  %v4130_v57 = vmul.f32 0.2, %v16322_v42  ;;  %v4146_v52 = vsel %vm4074_vm6, %v16262_v48, %v4110_v12 }
 0x45d   : > { %v4131_v18 = vmul.f32 0.2, %v16325_v43  ;;  %v4132_v9 = vmul.f32 0.2, %v16328_v30  ;;  %v4133_v46 = vmul.f32 0.2, %v16331_v51  ;;  %v4147_v8 = vsel %vm4075_vm5, %v16265_v5, %v4111_v35 }
 0x45e   : > { %v4134_v34 = vmul.f32 0.2, %v16334_v58  ;;  %v4135_v49 = vmul.f32 0.2, %v16337_v39  ;;  %v4136_v32 = vmul.f32 0.2, %v16340_v3  ;;  %v4148_v48 = vsel %vm4076_vm4, %v16268_v11, %v4112_v6 }
 0x45f   : > { %v4137_v55 = vmul.f32 0.2, %v16343_v17  ;;  %v4138_v12 = vmul.f32 0.2, %v16346_v10  ;;  %vm19415_vm6 = vcmp.gt.f32.partialorder %v16271_v54, 0.0  ;;  %v4150_v5 = vsel %vm4078_vm0, %v16274_v22, %v4114_v37  ;;  %v19440_v6 = vld [vmem:[#allocation8_spill] sm:$0xff] }
 0x460   : > { %v4149_v61 = vsel %vm19415_vm6, %v16271_v54, %v4113_v15  ;;  %vm19416_vm5 = vcmp.gt.f32.partialorder %v16277_v53, 0.0  ;;  %vm19417_vm11 = vcmp.gt.f32.partialorder %v16280_v31, 0.0  ;;  %vm19418_vm4 = vcmp.gt.f32.partialorder %v16283_v2, 0.0 }
 0x461   : > { %v4151_v35 = vsel %vm19416_vm5, %v16277_v53, %v4115_v63  ;;  %v4152_v17 = vsel %vm19417_vm11, %v16280_v31, %v4116_v50  ;;  %v4153_v11 = vsel %vm19418_vm4, %v16283_v2, %v4117_v16  ;;  %vm19419_vm1 = vcmp.gt.f32.partialorder %v16286_v26, 0.0  ;;  %v19442_v63 = vld [vmem:[#allocation11_spill] sm:$0xff] }
 0x462   : > { %v4154_v54 = vsel %vm19419_vm1, %v16286_v26, %v4118_v14  ;;  %v4155_v22 = vsel %vm4083_vm3, %v16289_v59, %v4119_v1  ;;  %vm19420_vm0 = vcmp.gt.f32.partialorder %v16292_v4, 0.0  ;;  %vm19421_vm10 = vcmp.gt.f32.partialorder %v16295_v62, 0.0 }
 0x463   : > { %v4156_v53 = vsel %vm19420_vm0, %v16292_v4, %v4120_v19  ;;  %v4157_v50 = vsel %vm19421_vm10, %v16295_v62, %v4121_v33  ;;  %vm19422_vm6 = vcmp.gt.f32.partialorder %v16298_v13, 0.0  ;;  %v4159_v2 = vsel %vm4087_vm7, %v16301_v24, %v4123_v47  ;;  %v19444_v19 = vld [vmem:[#allocation13_spill] sm:$0xff]  ;;  %v19445_v47 = vld [vmem:[#allocation14_spill] sm:$0xff] }
 0x464   : > { %v4158_v31 = vsel %vm19422_vm6, %v16298_v13, %v4122_v36  ;;  %vm19423_vm5 = vcmp.gt.f32.partialorder %v16304_v21, 0.0  ;;  %vm19424_vm3 = vcmp.gt.f32.partialorder %v16307_v25, 0.0  ;;  %vm19425_vm11 = vcmp.gt.f32.partialorder %v16310_v27, 0.0 }
 0x465   : > { %v4160_v1 = vsel %vm19423_vm5, %v16304_v21, %v4124_v40  ;;  %v4161_v26 = vsel %vm19424_vm3, %v16307_v25, %v4125_v28  ;;  %v4162_v59 = vsel %vm19425_vm11, %v16310_v27, %v4126_v41  ;;  %v4163_v36 = vsel %vm4091_vm2, %v16313_v38, %v4127_v29  ;;  %v19431_v21 = vld [vmem:[#allocation59_spill] sm:$0xff]  ;;  %v19433_v38 = vld [vmem:[#allocation61_spill] sm:$0xff] }
 0x466   : > { %vm19426_vm4 = vcmp.gt.f32.partialorder %v16316_v20, 0.0  ;;  %vm19427_vm7 = vcmp.gt.f32.partialorder %v16319_v60, 0.0  ;;  %vm19428_vm1 = vcmp.gt.f32.partialorder %v16322_v42, 0.0  ;;  %v4167_v41 = vsel %vm4095_vm9, %v16325_v43, %v4131_v18  ;;  %v19432_v27 = vld [vmem:[#allocation3_spill] sm:$0xff]  ;;  %v19436_v43 = vld [vmem:[#allocation4_spill] sm:$0xff] }
 0x467   : > { %v4164_v4 = vsel %vm19426_vm4, %v16316_v20, %v4128_v23  ;;  %v4165_v62 = vsel %vm19427_vm7, %v16319_v60, %v4129_v56  ;;  %v4166_v28 = vsel %vm19428_vm1, %v16322_v42, %v4130_v57  ;;  %vm19429_vm0 = vcmp.gt.f32.partialorder %v16328_v30, 0.0  ;;  %v19435_v60 = vld [vmem:[#allocation62_spill] sm:$0xff]  ;;  %v19446_v29 = vld [vmem:[#allocation15_spill] sm:$0xff] }
 0x468   : > { %v4168_v13 = vsel %vm19429_vm0, %v16328_v30, %v4132_v9  ;;  %vm19430_vm2 = vcmp.gt.f32.partialorder %v16331_v51, 0.0  ;;  %v4170_v56 = vsel %vm4098_vm12, %v16334_v58, %v4134_v34  ;;  %v4171_v57 = vsel %vm4099_vm8, %v16337_v39, %v4135_v49  ;;  %v19434_v34 = vld [vmem:[#allocation5_spill] sm:$0xff]  ;;  %v19437_v30 = vld [vmem:[#allocation63_spill] sm:$0xff]  ;;  %v19438_v58 = vld [vmem:[#allocation6_spill] sm:$0xff] }
 0x469   : > { %v4169_v24 = vsel %vm19430_vm2, %v16331_v51, %v4133_v46  ;;  %v4172_v18 = vsel %vm4100_vm15, %v16340_v3, %v4136_v32  ;;  %v4173_v25 = vsel %vm4101_vm14, %v19431_v21, %v4137_v55  ;;  %v4174_v46 = vsel %vm4102_vm13, %v16346_v10, %v4138_v12  ;;  %v19439_v32 = vld [vmem:[#allocation7_spill] sm:$0xff]  ;;  %v19441_v55 = vld [vmem:[#allocation9_spill] sm:$0xff]  ;;  %v19443_v10 = vld [vmem:[#allocation12_spill] sm:$0xff] }
 0x46a   : > { %v4217_v20 = vmul.f32 %v19433_v38, %v19432_v27  ;;  %v4218_v42 = vmul.f32 %v19435_v60, %v19434_v34  ;;  %v4219_v51 = vmul.f32 %v19437_v30, %v19436_v43  ;;  %v4220_v39 = vmul.f32 %v4142_v45, %v19438_v58  ;;  %v19447_v9 = vld [vmem:[#allocation16_spill] sm:$0xff]  ;;  %v19448_v12 = vld [vmem:[#allocation17_spill] sm:$0xff]  ;;  %v19449_v21 = vld [vmem:[#allocation18_spill] sm:$0xff] }
 0x46b   : > { %v4221_v3 = vmul.f32 %v4143_v7, %v19439_v32  ;;  %v4222_v15 = vmul.f32 %v4144_v0, %v19440_v6  ;;  %v4223_v37 = vmul.f32 %v4145_v44, %v19441_v55  ;;  %v4224_v16 = vmul.f32 %v4146_v52, %v19442_v63  ;;  %v19450_v38 = vld [vmem:[#allocation19_spill] sm:$0xff]  ;;  %v19451_v60 = vld [vmem:[#allocation20_spill] sm:$0xff]  ;;  %v19452_v30 = vld [vmem:[#allocation21_spill] sm:$0xff] }
 0x46c   : > { %v4225_v14 = vmul.f32 %v4147_v8, %v19443_v10  ;;  %v4226_v33 = vmul.f32 %v4148_v48, %v19444_v19  ;;  %v4227_v40 = vmul.f32 %v4149_v61, %v19445_v47  ;;  %v4228_v23 = vmul.f32 %v4150_v5, %v19446_v29  ;;  %v19453_v63 = vld [vmem:[#allocation22_spill] sm:$0xff]  ;;  %v19454_v10 = vld [vmem:[#allocation23_spill] sm:$0xff]  ;;  %v19455_v19 = vld [vmem:[#allocation24_spill] sm:$0xff] }
 0x46d   : > { %v4229_v49 = vmul.f32 %v4151_v35, %v19447_v9  ;;  %v4230_v45 = vmul.f32 %v4152_v17, %v19448_v12  ;;  %v4231_v7 = vmul.f32 %v4153_v11, %v19449_v21  ;;  %v4232_v0 = vmul.f32 %v4154_v54, %v19450_v38  ;;  %v19456_v47 = vld [vmem:[#allocation25_spill] sm:$0xff]  ;;  %v19457_v29 = vld [vmem:[#allocation26_spill] sm:$0xff]  ;;  %v19458_v9 = vld [vmem:[#allocation27_spill] sm:$0xff] }
 0x46e   : > { %v4233_v44 = vmul.f32 %v4155_v22, %v19451_v60  ;;  %v4234_v52 = vmul.f32 %v4156_v53, %v19452_v30  ;;  %v4235_v8 = vmul.f32 %v4157_v50, %v19453_v63  ;;  %v4236_v48 = vmul.f32 %v4158_v31, %v19454_v10  ;;  %v19459_v12 = vld [vmem:[#allocation28_spill] sm:$0xff]  ;;  %v19460_v21 = vld [vmem:[#allocation29_spill] sm:$0xff]  ;;  %v19461_v38 = vld [vmem:[#allocation30_spill] sm:$0xff] }
 0x46f   : > { %v4237_v61 = vmul.f32 %v4159_v2, %v19455_v19  ;;  %v4238_v5 = vmul.f32 %v4160_v1, %v19456_v47  ;;  %v4239_v35 = vmul.f32 %v4161_v26, %v19457_v29  ;;  %v4240_v17 = vmul.f32 %v4162_v59, %v19458_v9  ;;  %v19462_v60 = vld [vmem:[#allocation31_spill] sm:$0xff]  ;;  %v19463_v30 = vld [vmem:[#allocation32_spill] sm:$0xff]  ;;  %v19464_v63 = vld [vmem:[#allocation33_spill] sm:$0xff] }
 0x470   : > { %v4241_v11 = vmul.f32 %v4163_v36, %v19459_v12  ;;  %v4242_v54 = vmul.f32 %v4164_v4, %v19460_v21  ;;  %v4243_v22 = vmul.f32 %v4165_v62, %v19461_v38  ;;  %v4244_v53 = vmul.f32 %v4166_v28, %v19462_v60  ;;  %v19465_v10 = vld [vmem:[#allocation34_spill] sm:$0xff]  ;;  %v19466_v19 = vld [vmem:[#allocation35_spill] sm:$0xff]  ;;  %v19467_v47 = vld [vmem:[#allocation36_spill] sm:$0xff] }
 0x471   : > { %v4245_v50 = vmul.f32 %v4167_v41, %v19463_v30  ;;  %v4246_v31 = vmul.f32 %v4168_v13, %v19464_v63  ;;  %v4247_v2 = vmul.f32 %v4169_v24, %v19465_v10  ;;  %v4248_v1 = vmul.f32 %v4170_v56, %v19466_v19  ;;  %v19468_v29 = vld [vmem:[#allocation37_spill] sm:$0xff]  ;;  %v19469_v9 = vld [vmem:[#allocation38_spill] sm:$0xff]  ;;  %v19470_v12 = vld [vmem:[#allocation39_spill] sm:$0xff] }
 0x472   : > { %v4249_v26 = vmul.f32 %v4171_v57, %v19467_v47  ;;  %v4250_v59 = vmul.f32 %v4172_v18, %v19468_v29  ;;  %v4251_v36 = vmul.f32 %v4173_v25, %v19469_v9  ;;  %v4252_v4 = vmul.f32 %v4174_v46, %v19470_v12 }
 0x473   : > { %v11864_v21 = vpack.c.bf16 %v4217_v20, %v4217_v20  ;;  %v11865_v62 = vpack.c.bf16 %v4218_v42, %v4218_v42  ;;  %v11866_v38 = vpack.c.bf16 %v4219_v51, %v4219_v51  ;;  %v11867_v28 = vpack.c.bf16 %v4220_v39, %v4220_v39 }
 0x474   : > { %v11868_v60 = vpack.c.bf16 %v4221_v3, %v4221_v3  ;;  %v16576_v41 = vpack.c.bf16 %v4222_v15, %v4222_v15  ;;  %v16578_v13 = vpack.c.bf16 %v4223_v37, %v4223_v37  ;;  %v16580_v24 = vpack.c.bf16 %v4224_v16, %v4224_v16 }
 0x475   : > { %v16582_v56 = vpack.c.bf16 %v4225_v14, %v4225_v14  ;;  %v16584_v57 = vpack.c.bf16 %v4226_v33, %v4226_v33  ;;  %v16586_v18 = vpack.c.bf16 %v4227_v40, %v4227_v40  ;;  %v16588_v25 = vpack.c.bf16 %v4228_v23, %v4228_v23 }
 0x476   : > { %v16590_v46 = vpack.c.bf16 %v4229_v49, %v4229_v49  ;;  %vm4361_vm8 = vsmask.f32 1280  ;;  %vm4362_vm9 = vsmask.f32 5392  ;;  %v16592_v20 = vpack.c.bf16 %v4230_v45, %v4230_v45 }
 0x477   : > { %v16594_v42 = vpack.c.bf16 %v4231_v7, %v4231_v7  ;;  %v16596_v51 = vpack.c.bf16 %v4232_v0, %v4232_v0  ;;  %v16598_v39 = vpack.c.bf16 %v4233_v44, %v4233_v44  ;;  %v16600_v3 = vpack.c.bf16 %v4234_v52, %v4234_v52  ;;  %vm16643_vm12 = vmor %vm4361_vm8, %vm4362_vm9 }
 0x478   : > { %v16602_v15 = vpack.c.bf16 %v4235_v8, %v4235_v8  ;;  %v16604_v37 = vpack.c.bf16 %v4236_v48, %v4236_v48  ;;  %v16606_v16 = vpack.c.bf16 %v4237_v61, %v4237_v61  ;;  %v16608_v14 = vpack.c.bf16 %v4238_v5, %v4238_v5 }
 0x479   : > { %v16610_v33 = vpack.c.bf16 %v4239_v35, %v4239_v35  ;;  %v16612_v40 = vpack.c.bf16 %v4240_v17, %v4240_v17  ;;  %v16614_v23 = vpack.c.bf16 %v4241_v11, %v4241_v11  ;;  %v16616_v49 = vpack.c.bf16 %v4242_v54, %v4242_v54 }
 0x47a   : > { %v16618_v45 = vpack.c.bf16 %v4243_v22, %v4243_v22  ;;  %v16620_v7 = vpack.c.bf16 %v4244_v53, %v4244_v53  ;;  %v16622_v0 = vpack.c.bf16 %v4245_v50, %v4245_v50  ;;  %v16624_v44 = vpack.c.bf16 %v4246_v31, %v4246_v31 }
 0x47b   : > { %v16626_v52 = vpack.c.bf16 %v4247_v2, %v4247_v2  ;;  %v16628_v8 = vpack.c.bf16 %v4248_v1, %v4248_v1  ;;  %v16630_v48 = vpack.c.bf16 %v4249_v26, %v4249_v26  ;;  %v16632_v61 = vpack.c.bf16 %v4250_v59, %v4250_v59 }
 0x47c   : > { %v16634_v5 = vpack.c.bf16 %v4251_v36, %v4251_v36  ;;  %v16636_v35 = vpack.c.bf16 %v4252_v4, %v4252_v4  ;;  %v4365_v17 = vshrl.u32 %v11864_v21, 16  ;;  %v4368_v11 = vshll.u32 %v11864_v21, 16 }
 0x47d   : > { %v4374_v54 = vshrl.u32 %v11865_v62, 16  ;;  %v4377_v22 = vshll.u32 %v11865_v62, 16  ;;  %v4384_v53 = vshrl.u32 %v11866_v38, 16  ;;  %v4387_v31 = vshll.u32 %v11866_v38, 16 }
 0x47e   : > { %v4367_v50 = vrot.slane %v4365_v17, 6  ;;  %v4394_v12 = vshrl.u32 %v11867_v28, 16  ;;  %v4397_v2 = vshll.u32 %v11867_v28, 16  ;;  %v4370_v29 = vrot.slane %v4368_v11, 7 }
 0x47f   : > { %v4376_v1 = vrot.slane %v4374_v54, 6  ;;  %v4379_v9 = vrot.slane %v4377_v22, 7  ;;  %v4386_v26 = vrot.slane %v4384_v53, 6  ;;  %v4389_v47 = vrot.slane %v4387_v31, 7 }
 0x480   : > { %v4396_v59 = vrot.slane %v4394_v12, 6  ;;  %v4399_v19 = vrot.slane %v4397_v2, 7  ;;  %v4404_v36 = vshrl.u32 %v11868_v60, 16  ;;  %v16638_v63 = vor.u32 %v4370_v29, %v4367_v50 }
 0x481   : > { %v4380_v4 = vor.u32 %v4379_v9, %v4376_v1  ;;  %v4407_v10 = vshll.u32 %v11868_v60, 16  ;;  %v4414_v21 = vshrl.u32 %v16576_v41, 16  ;;  %v4390_v62 = vor.u32 %v4389_v47, %v4386_v26 }
 0x482   : > { %v4400_v28 = vor.u32 %v4399_v19, %v4396_v59  ;;  %v4406_v17 = vrot.slane %v4404_v36, 6  ;;  %v4417_v11 = vshll.u32 %v16576_v41, 16  ;;  %v4372_v12 = vrot.slane %v16638_v63, 4 }
 0x483   : > { %v4382_v54 = vrot.slane %v4380_v4, 4  ;;  %v4409_v29 = vrot.slane %v4407_v10, 7  ;;  %v4416_v22 = vrot.slane %v4414_v21, 6  ;;  %v4392_v9 = vrot.slane %v4390_v62, 4 }
 0x484   : > { %v4402_v60 = vrot.slane %v4400_v28, 4  ;;  %v4419_v53 = vrot.slane %v4417_v11, 7  ;;  %v4424_v50 = vshrl.u32 %v16578_v13, 16  ;;  %v4381_v31 = vsel %vm16643_vm12, %v4372_v12, %v4380_v4 }
 0x485   : > { %v4391_v47 = vsel %vm16643_vm12, %v4382_v54, %v4390_v62  ;;  %v4410_v19 = vor.u32 %v4409_v29, %v4406_v17  ;;  %v4427_v2 = vshll.u32 %v16578_v13, 16  ;;  %v4401_v41 = vsel %vm16643_vm12, %v4392_v9, %v4400_v28 }
 0x486   : > { %v4420_v1 = vor.u32 %v4419_v53, %v4416_v22  ;;  %v4426_v10 = vrot.slane %v4424_v50, 6  ;;  %v4434_v26 = vshrl.u32 %v16580_v24, 16  ;;  %vm19473_vm13 = vcmask 60416  }
 0x487   : > { %4766 = vst.msk [vmem:[#allocation2 + $0xc] sm:$0xf] %vm19473_vm13, %v4381_v31  ;;  %vm19474_vm14 = vmmov %vm19473_vm13  ;;  %v4411_v59 = vsel %vm16643_vm12, %v4402_v60, %v4410_v19  ;;  %v4412_v36 = vrot.slane %v4410_v19, 4  ;;  %v4429_v4 = vrot.slane %v4427_v2, 7  ;;  %v4437_v21 = vshll.u32 %v16580_v24, 16 }
 0x488   : > { %4767 = vst.msk [vmem:[#allocation2 + $0x10] sm:$0xf] %vm19474_vm14, %v4391_v47  ;;  %vm19475_vm15 = vmmov %vm19473_vm13  ;;  %v4422_v13 = vrot.slane %v4420_v1, 4  ;;  %v4436_v62 = vrot.slane %v4434_v26, 6  ;;  %v4444_v28 = vshrl.u32 %v16582_v56, 16  ;;  %v4447_v17 = vshll.u32 %v16582_v56, 16 }
 0x489   : > { %4768 = vst.msk [vmem:[#allocation2 + $0x14] sm:$0xf] %vm19475_vm15, %v4401_v41  ;;  %vm19476_vm10 = vmmov %vm19473_vm13  ;;  %v4421_v11 = vsel %vm16643_vm12, %v4412_v36, %v4420_v1  ;;  %v4430_v12 = vor.u32 %v4429_v4, %v4426_v10  ;;  %v4439_v54 = vrot.slane %v4437_v21, 7  ;;  %v4454_v29 = vshrl.u32 %v16584_v57, 16 }
 0x48a   : > { %4769 = vst.msk [vmem:[#allocation2 + $0x18] sm:$0xf] %vm19476_vm10, %v4411_v59  ;;  %v4446_v22 = vrot.slane %v4444_v28, 6  ;;  %v4449_v9 = vrot.slane %v4447_v17, 7  ;;  %v4457_v24 = vshll.u32 %v16584_v57, 16  ;;  %v4464_v60 = vshrl.u32 %v16586_v18, 16  ;;  %vm19477_vm6 = vmmov %vm19476_vm10 }
 0x48b   : > { %4770 = vst.msk [vmem:[#allocation2 + $0x1c] sm:$0xf] %vm19477_vm6, %v4421_v11  ;;  %v4431_v56 = vsel %vm16643_vm12, %v4422_v13, %v4430_v12  ;;  %v4432_v53 = vrot.slane %v4430_v12, 4  ;;  %v4440_v50 = vor.u32 %v4439_v54, %v4436_v62  ;;  %v4456_v31 = vrot.slane %v4454_v29, 6  ;;  %vm19478_vm5 = vmmov %vm19477_vm6 }
 0x48c   : > { %v4450_v47 = vor.u32 %v4449_v9, %v4446_v22  ;;  %v4459_v19 = vrot.slane %v4457_v24, 7  ;;  %v4466_v2 = vrot.slane %v4464_v60, 6  ;;  %v4467_v41 = vshll.u32 %v16586_v18, 16  ;;  %4771 = vst.msk [vmem:[#allocation2 + $0x20] sm:$0xf] %vm19478_vm5, %v4431_v56  ;;  %vm19479_vm3 = vmmov %vm19478_vm5 }
 0x48d   : > { %v4441_v57 = vsel %vm16643_vm12, %v4432_v53, %v4440_v50  ;;  %v4442_v1 = vrot.slane %v4440_v50, 4  ;;  %v4474_v10 = vshrl.u32 %v16588_v25, 16  ;;  %v4477_v26 = vshll.u32 %v16588_v25, 16  ;;  %vm19480_vm11 = vmmov %vm19479_vm3 }
 0x48e   : > { %v4452_v59 = vrot.slane %v4450_v47, 4  ;;  %v4460_v36 = vor.u32 %v4459_v19, %v4456_v31  ;;  %v4469_v4 = vrot.slane %v4467_v41, 7  ;;  %v4484_v21 = vshrl.u32 %v16590_v46, 16  ;;  %4772 = vst.msk [vmem:[#allocation2 + $0x24] sm:$0xf] %vm19479_vm3, %v4441_v57  ;;  %vm19481_vm4 = vmmov %vm19479_vm3 }
 0x48f   : > { %v4451_v18 = vsel %vm16643_vm12, %v4442_v1, %v4450_v47  ;;  %v4476_v13 = vrot.slane %v4474_v10, 6  ;;  %v4479_v62 = vrot.slane %v4477_v26, 7  ;;  %v4487_v28 = vshll.u32 %v16590_v46, 16  ;;  %vm19482_vm7 = vmmov %vm19479_vm3 }
 0x490   : > { %v4461_v17 = vsel %vm16643_vm12, %v4452_v59, %v4460_v36  ;;  %v4462_v11 = vrot.slane %v4460_v36, 4  ;;  %v4470_v12 = vor.u32 %v4469_v4, %v4466_v2  ;;  %v4486_v25 = vrot.slane %v4484_v21, 6  ;;  %4773 = vst.msk [vmem:[#allocation2 + $0x28] sm:$0xf] %vm19480_vm11, %v4451_v18  ;;  %vm19483_vm1 = vmmov %vm19479_vm3 }
 0x491   : > { %v4480_v54 = vor.u32 %v4479_v62, %v4476_v13  ;;  %v4489_v29 = vrot.slane %v4487_v28, 7  ;;  %v4494_v22 = vshrl.u32 %v16592_v20, 16  ;;  %v4497_v9 = vshll.u32 %v16592_v20, 16  ;;  %4774 = vst.msk [vmem:[#allocation2 + $0x2c] sm:$0xf] %vm19481_vm4, %v4461_v17  ;;  %vm19484_vm0 = vmmov %vm19483_vm1 }
 0x492   : > { %v4471_v24 = vsel %vm16643_vm12, %v4462_v11, %v4470_v12  ;;  %v4472_v46 = vrot.slane %v4470_v12, 4  ;;  %v4504_v60 = vshrl.u32 %v16594_v42, 16  ;;  %v4507_v56 = vshll.u32 %v16594_v42, 16  ;;  %vm19485_vm2 = vmmov %vm19484_vm0 }
 0x493   : > { %v4482_v53 = vrot.slane %v4480_v54, 4  ;;  %v4490_v50 = vor.u32 %v4489_v29, %v4486_v25  ;;  %v4496_v31 = vrot.slane %v4494_v22, 6  ;;  %v4499_v47 = vrot.slane %v4497_v9, 7  ;;  %4775 = vst.msk [vmem:[#allocation2 + $0x30] sm:$0xf] %vm19482_vm7, %v4471_v24  ;;  %vm19486_vm9 = vmmov %vm19484_vm0 }
 0x494   : > { %v4481_v19 = vsel %vm16643_vm12, %v4472_v46, %v4480_v54  ;;  %v4506_v20 = vrot.slane %v4504_v60, 6  ;;  %v4509_v2 = vrot.slane %v4507_v56, 7  ;;  %v4514_v41 = vshrl.u32 %v16596_v51, 16  ;;  %vm19487_vm13 = vmmov %vm19484_vm0 }
 0x495   : > { %v4491_v57 = vsel %vm16643_vm12, %v4482_v53, %v4490_v50  ;;  %v4492_v1 = vrot.slane %v4490_v50, 4  ;;  %v4500_v10 = vor.u32 %v4499_v47, %v4496_v31  ;;  %v4517_v42 = vshll.u32 %v16596_v51, 16  ;;  %4776 = vst.msk [vmem:[#allocation2 + $0x34] sm:$0xf] %vm19483_vm1, %v4481_v19  ;;  %vm19488_vm14 = vmmov %vm19484_vm0 }
 0x496   : > { %v4510_v26 = vor.u32 %v4509_v2, %v4506_v20  ;;  %v4516_v59 = vrot.slane %v4514_v41, 6  ;;  %v4524_v36 = vshrl.u32 %v16598_v39, 16  ;;  %v4527_v4 = vshll.u32 %v16598_v39, 16  ;;  %4777 = vst.msk [vmem:[#allocation2 + $0x38] sm:$0xf] %vm19484_vm0, %v4491_v57  ;;  %vm19489_vm15 = vmmov %vm19484_vm0 }
 0x497   : > { %v4501_v21 = vsel %vm16643_vm12, %v4492_v1, %v4500_v10  ;;  %v4502_v18 = vrot.slane %v4500_v10, 4  ;;  %v4519_v13 = vrot.slane %v4517_v42, 7  ;;  %v4534_v62 = vshrl.u32 %v16600_v3, 16  ;;  %vm19490_vm10 = vmmov %vm19484_vm0 }
 0x498   : > { %v4512_v28 = vrot.slane %v4510_v26, 4  ;;  %v4526_v17 = vrot.slane %v4524_v36, 6  ;;  %v4529_v51 = vrot.slane %v4527_v4, 7  ;;  %v4537_v11 = vshll.u32 %v16600_v3, 16  ;;  %4778 = vst.msk [vmem:[#allocation2 + $0x3c] sm:$0xf] %vm19485_vm2, %v4501_v21  ;;  %vm19491_vm6 = vmmov %vm19484_vm0 }
 0x499   : > { %v4511_v12 = vsel %vm16643_vm12, %v4502_v18, %v4510_v26  ;;  %v4520_v39 = vor.u32 %v4519_v13, %v4516_v59  ;;  %v4536_v25 = vrot.slane %v4534_v62, 6  ;;  %v4544_v54 = vshrl.u32 %v16602_v15, 16  ;;  %vm19492_vm5 = vmmov %vm19484_vm0 }
 0x49a   : > { %v4530_v29 = vor.u32 %v4529_v51, %v4526_v17  ;;  %v4539_v22 = vrot.slane %v4537_v11, 7  ;;  %v4547_v9 = vshll.u32 %v16602_v15, 16  ;;  %v4554_v24 = vshrl.u32 %v16604_v37, 16  ;;  %4779 = vst.msk [vmem:[#allocation2 + $0x40] sm:$0xf] %vm19486_vm9, %v4511_v12  ;;  %vm19493_vm3 = vmmov %vm19484_vm0 }
 0x49b   : > { %v4521_v3 = vsel %vm16643_vm12, %v4512_v28, %v4520_v39  ;;  %v4522_v46 = vrot.slane %v4520_v39, 4  ;;  %v4546_v60 = vrot.slane %v4544_v54, 6  ;;  %v4557_v56 = vshll.u32 %v16604_v37, 16  ;;  %vm19494_vm11 = vmmov %vm19484_vm0 }
 0x49c   : > { %v4532_v53 = vrot.slane %v4530_v29, 4  ;;  %v4540_v50 = vor.u32 %v4539_v22, %v4536_v25  ;;  %v4549_v31 = vrot.slane %v4547_v9, 7  ;;  %v4556_v47 = vrot.slane %v4554_v24, 6  ;;  %4780 = vst.msk [vmem:[#allocation2 + $0x44] sm:$0xf] %vm19487_vm13, %v4521_v3  ;;  %vm19495_vm4 = vmmov %vm19484_vm0 }
 0x49d   : > { %v4531_v15 = vsel %vm16643_vm12, %v4522_v46, %v4530_v29  ;;  %v4559_v19 = vrot.slane %v4557_v56, 7  ;;  %v4564_v20 = vshrl.u32 %v16606_v16, 16  ;;  %v4567_v2 = vshll.u32 %v16606_v16, 16  ;;  %vm19496_vm2 = vmmov %vm19484_vm0 }
 0x49e   : > { %v4541_v41 = vsel %vm16643_vm12, %v4532_v53, %v4540_v50  ;;  %v4542_v57 = vrot.slane %v4540_v50, 4  ;;  %v4550_v1 = vor.u32 %v4549_v31, %v4546_v60  ;;  %v4574_v37 = vshrl.u32 %v16608_v14, 16  ;;  %4781 = vst.msk [vmem:[#allocation2 + $0x48] sm:$0xf] %vm19488_vm14, %v4531_v15  ;;  %vm19497_vm9 = vmmov %vm19484_vm0 }
 0x49f   : > { %v4560_v10 = vor.u32 %v4559_v19, %v4556_v47  ;;  %v4566_v42 = vrot.slane %v4564_v20, 6  ;;  %v4569_v26 = vrot.slane %v4567_v2, 7  ;;  %v4577_v59 = vshll.u32 %v16608_v14, 16  ;;  %4782 = vst.msk [vmem:[#allocation2 + $0x4c] sm:$0xf] %vm19489_vm15, %v4541_v41  ;;  %vm19498_vm14 = vmmov %vm19484_vm0 }
 0x4a0   : > { %v4551_v36 = vsel %vm16643_vm12, %v4542_v57, %v4550_v1  ;;  %v4552_v16 = vrot.slane %v4550_v1, 4  ;;  %v4576_v4 = vrot.slane %v4574_v37, 6  ;;  %v4584_v21 = vshrl.u32 %v16610_v33, 16  ;;  %vm19499_vm15 = vmmov %vm19484_vm0 }
 0x4a1   : > { %v4562_v18 = vrot.slane %v4560_v10, 4  ;;  %v4570_v13 = vor.u32 %v4569_v26, %v4566_v42  ;;  %v4579_v62 = vrot.slane %v4577_v59, 7  ;;  %v4587_v28 = vshll.u32 %v16610_v33, 16  ;;  %4783 = vst.msk [vmem:[#allocation2 + $0x50] sm:$0xf] %vm19490_vm10, %v4551_v36  ;;  %vm19500_vm10 = vmmov %vm19484_vm0 }
 0x4a2   : > { %v4561_v17 = vsel %vm16643_vm12, %v4552_v16, %v4560_v10  ;;  %v4586_v14 = vrot.slane %v4584_v21, 6  ;;  %v4594_v51 = vshrl.u32 %v16612_v40, 16  ;;  %v4597_v11 = vshll.u32 %v16612_v40, 16 }
 0x4a3   : > { %v4571_v12 = vsel %vm16643_vm12, %v4562_v18, %v4570_v13  ;;  %v4572_v39 = vrot.slane %v4570_v13, 4  ;;  %v4580_v25 = vor.u32 %v4579_v62, %v4576_v4  ;;  %v4589_v54 = vrot.slane %v4587_v28, 7  ;;  %4784 = vst.msk [vmem:[#allocation2 + $0x54] sm:$0xf] %vm19491_vm6, %v4561_v17 }
 0x4a4   : > { %v4596_v29 = vrot.slane %v4594_v51, 6  ;;  %v4599_v33 = vrot.slane %v4597_v11, 7  ;;  %v4604_v22 = vshrl.u32 %v16614_v23, 16  ;;  %v4607_v9 = vshll.u32 %v16614_v23, 16  ;;  %4785 = vst.msk [vmem:[#allocation2 + $0x58] sm:$0xf] %vm19492_vm5, %v4571_v12  ;;  %vm19503_vm5 = vmmov %vm19484_vm0 }
 0x4a5   : > { %v4581_v24 = vsel %vm16643_vm12, %v4572_v39, %v4580_v25  ;;  %v4582_v40 = vrot.slane %v4580_v25, 4  ;;  %v4590_v3 = vor.u32 %v4589_v54, %v4586_v14  ;;  %v4614_v46 = vshrl.u32 %v16616_v49, 16 }
 0x4a6   : > { %v4600_v60 = vor.u32 %v4599_v33, %v4596_v29  ;;  %v4606_v56 = vrot.slane %v4604_v22, 6  ;;  %v4609_v53 = vrot.slane %v4607_v9, 7  ;;  %v4617_v50 = vshll.u32 %v16616_v49, 16  ;;  %4786 = vst.msk [vmem:[#allocation2 + $0x5c] sm:$0xf] %vm19493_vm3, %v4581_v24  ;;  %vm19504_vm3 = vmmov %vm19484_vm0 }
 0x4a7   : > { %v4591_v31 = vsel %vm16643_vm12, %v4582_v40, %v4590_v3  ;;  %v4592_v23 = vrot.slane %v4590_v3, 4  ;;  %v4616_v47 = vrot.slane %v4614_v46, 6  ;;  %v4624_v15 = vshrl.u32 %v16618_v45, 16 }
 0x4a8   : > { %v4602_v19 = vrot.slane %v4600_v60, 4  ;;  %v4610_v20 = vor.u32 %v4609_v53, %v4606_v56  ;;  %v4619_v2 = vrot.slane %v4617_v50, 7  ;;  %v4627_v41 = vshll.u32 %v16618_v45, 16  ;;  %4787 = vst.msk [vmem:[#allocation2 + $0x60] sm:$0xf] %vm19494_vm11, %v4591_v31  ;;  %vm19505_vm11 = vmmov %vm19484_vm0 }
 0x4a9   : > { %v4601_v57 = vsel %vm16643_vm12, %v4592_v23, %v4600_v60  ;;  %v4626_v49 = vrot.slane %v4624_v15, 6  ;;  %v4634_v1 = vshrl.u32 %v16620_v7, 16  ;;  %v4637_v37 = vshll.u32 %v16620_v7, 16 }
 0x4aa   : > { %v4611_v10 = vsel %vm16643_vm12, %v4602_v19, %v4610_v20  ;;  %v4612_v42 = vrot.slane %v4610_v20, 4  ;;  %v4620_v26 = vor.u32 %v4619_v2, %v4616_v47  ;;  %v4629_v59 = vrot.slane %v4627_v41, 7  ;;  %4788 = vst.msk [vmem:[#allocation2 + $0x64] sm:$0xf] %vm19495_vm4, %v4601_v57  ;;  %v4763_v2 = vld [vmem:[#allocation2 + $0x8] sm:$0xe]  ;;  %vm19509_vm4 = vmmov %vm19484_vm0 }
 0x4ab   : > { %vm4760_vm7 = vcmask 60417   ;;  %vm4761_vm1 = vsmask.f32 7942  ;;  %v4636_v45 = vrot.slane %v4634_v1, 6  ;;  %v4639_v36 = vrot.slane %v4637_v37, 7 }
 0x4ac   : > { %v4644_v16 = vshrl.u32 %v16622_v0, 16  ;;  %v4647_v4 = vshll.u32 %v16622_v0, 16  ;;  %4789 = vst.msk [vmem:[#allocation2 + $0x68] sm:$0xf] %vm19484_vm0, %v4611_v10  ;;  %v4621_v7 = vsel %vm16643_vm12, %v4612_v42, %v4620_v26  ;;  %v4622_v21 = vrot.slane %v4620_v26, 4  ;;  %vm16797_vm6 = vmand %vm4760_vm7, %vm4761_vm1 }
 0x4ad   : > { %v4630_v18 = vor.u32 %v4629_v59, %v4626_v49  ;;  %v4654_v13 = vshrl.u32 %v16624_v44, 16  ;;  %v4640_v62 = vor.u32 %v4639_v36, %v4636_v45  ;;  %v4657_v14 = vshll.u32 %v16624_v44, 16  ;;  %4790 = vst.msk [vmem:[#allocation2 + $0x6c] sm:$0xf] %vm19496_vm2, %v4621_v7  ;;  %v16904_v1 = vld [vmem:[%s19065_s6 + $0x4] sm:$0xf] }
 0x4ae   : > { %v4646_v28 = vrot.slane %v4644_v16, 6  ;;  %v4649_v17 = vrot.slane %v4647_v4, 7  ;;  %v4664_v12 = vshrl.u32 %v16626_v52, 16  ;;  %v4667_v29 = vshll.u32 %v16626_v52, 16 }
 0x4af   : > { %v4631_v51 = vsel %vm16643_vm12, %v4622_v21, %v4630_v18  ;;  %v4632_v0 = vrot.slane %v4630_v18, 4  ;;  %v4656_v11 = vrot.slane %v4654_v13, 6  ;;  %v4642_v39 = vrot.slane %v4640_v62, 4 }
 0x4b0   : > { %v4650_v25 = vor.u32 %v4649_v17, %v4646_v28  ;;  %v4659_v54 = vrot.slane %v4657_v14, 7  ;;  %4791 = vst.msk [vmem:[#allocation2 + $0x70] sm:$0xf] %vm19497_vm9, %v4631_v51  ;;  %v4666_v44 = vrot.slane %v4664_v12, 6  ;;  %v4674_v22 = vshrl.u32 %v16628_v8, 16  ;;  %v19508_v51 = vld [vmem:[#allocation60_spill] sm:$0xff] }
 0x4b1   : > { %v4641_v33 = vsel %vm16643_vm12, %v4632_v0, %v4640_v62  ;;  %v4677_v9 = vshll.u32 %v16628_v8, 16  ;;  %vm4801_vm13 = vcmask 58368   ;;  %v4669_v46 = vrot.slane %v4667_v29, 7  ;;  %v16815_v62 = vld [vmem:[%s15730_s23 + $0x88] sm:$0xff]  }
 0x4b2   : > { %v4651_v24 = vsel %vm16643_vm12, %v4642_v39, %v4650_v25  ;;  %v4652_v40 = vrot.slane %v4650_v25, 4  ;;  %v4660_v3 = vor.u32 %v4659_v54, %v4656_v11  ;;  %4792 = vst.msk [vmem:[#allocation2 + $0x74] sm:$0xf] %vm19498_vm14, %v4641_v33  ;;  %v4676_v52 = vrot.slane %v4674_v22, 6  ;;  %19506 = vst [vmem:[#allocation59_spill] sm:$0xff] %v16815_v62  ;;  %v19510_v12 = vld [vmem:[#allocation55_spill] sm:$0xff] }
 0x4b3   : > { %v4679_v60 = vrot.slane %v4677_v9, 7  ;;  %v4684_v56 = vshrl.u32 %v16630_v48, 16  ;;  %v4687_v53 = vshll.u32 %v16630_v48, 16  ;;  %4793 = vst.msk [vmem:[#allocation2 + $0x78] sm:$0xf] %vm19499_vm15, %v4651_v24  ;;  %v4670_v31 = vor.u32 %v4669_v46, %v4666_v44  ;;  %vm4802_vm0 = vmand %vm4801_vm13, %vm4361_vm8 }
 0x4b4   : > { %v4661_v8 = vsel %vm16643_vm12, %v4652_v40, %v4660_v3  ;;  %v4662_v50 = vrot.slane %v4660_v3, 4  ;;  %v4694_v23 = vshrl.u32 %v16632_v61, 16  ;;  %v4697_v20 = vshll.u32 %v16632_v61, 16  ;;  %v11511_v11 = vld [vmem:[%s19066_s7 + $0x4] sm:$0xf]  ;;  %vm19517_vm14 = vmmov %vm19504_vm3  ;;  %v16847_v40 = vld [vmem:[#allocation2 + $0x10] sm:$0xff]  }
 0x4b5   : > { %v4680_v47 = vor.u32 %v4679_v60, %v4676_v52  ;;  %v4686_v15 = vrot.slane %v4684_v56, 6  ;;  %v4689_v19 = vrot.slane %v4687_v53, 7  ;;  %4794 = vst.msk [vmem:[#allocation2 + $0x7c] sm:$0xf] %vm19500_vm10, %v4661_v8  ;;  %v4672_v41 = vrot.slane %v4670_v31, 4  ;;  %vm19520_vm13 = vmmov %vm19504_vm3  ;;  %v16853_v52 = vld [vmem:[#allocation2 + $0x18] sm:$0xff]  }
 0x4b6   : > { %v4671_v48 = vsel %vm16643_vm12, %v4662_v50, %v4670_v31  ;;  %v4696_v57 = vrot.slane %v4694_v23, 6  ;;  %v4704_v49 = vshrl.u32 %v16634_v5, 16  ;;  %v4699_v42 = vrot.slane %v4697_v20, 7  ;;  %v14632_v54 = vld [vmem:[%s19065_s6] sm:$0xf] }
 0x4b7   : > { %v4682_v37 = vrot.slane %v4680_v47, 4  ;;  %v4690_v10 = vor.u32 %v4689_v19, %v4686_v15  ;;  %v4707_v61 = vshll.u32 %v16634_v5, 16  ;;  %4795 = vst.msk [vmem:[#allocation2 + $0x80] sm:$0xf] %vm19503_vm5, %v4671_v48  ;;  %v4681_v26 = vsel %vm16643_vm12, %v4672_v41, %v4680_v47  ;;  %v4803_v33 = vld [vmem:[#allocation2 + $0x98] sm:$0x3] }
 0x4b8   : > { %v4706_v59 = vrot.slane %v4704_v49, 6  ;;  %v4714_v45 = vshrl.u32 %v16636_v35, 16  ;;  %v4717_v36 = vshll.u32 %v16636_v35, 16  ;;  %v4700_v7 = vor.u32 %v4699_v42, %v4696_v57  ;;  %4796 = vst.msk [vmem:[#allocation2 + $0x84] sm:$0xf] %vm19504_vm3, %v4681_v26  ;;  %v16857_v56 = vld [vmem:[#allocation2] sm:$0xff]  }
 0x4b9   : > { %v4691_v16 = vsel %vm16643_vm12, %v4682_v37, %v4690_v10  ;;  %v4692_v4 = vrot.slane %v4690_v10, 4  ;;  %v4709_v21 = vrot.slane %v4707_v61, 7  ;;  %v4764_v13 = vsel %vm16797_vm6, %v16638_v63, %v4763_v2  ;;  %19522 = vst [vmem:[#allocation55_spill] sm:$0xff] %v16857_v56  ;;  %v14634_v47 = vld [vmem:[%s19066_s7 + $0xc] sm:$0xf]  ;;  %v16876_v19 = vld [vmem:[#allocation2 + $0x20] sm:$0xff]  }
 0x4ba   : > { %v4716_v18 = vrot.slane %v4714_v45, 6  ;;  %v4719_v5 = vrot.slane %v4717_v36, 7  ;;  %4797 = vst.msk [vmem:[#allocation2 + $0x88] sm:$0xf] %vm19505_vm11, %v4691_v16  ;;  %v16818_v35 = vrot.slane %v16815_v62, 1  ;;  %v4702_v17 = vrot.slane %v4700_v7, 4 }
 0x4bb   : > { %v4701_v28 = vsel %vm16643_vm12, %v4692_v4, %v4700_v7  ;;  %v4710_v14 = vor.u32 %v4709_v21, %v4706_v59  ;;  %4765 = vst [vmem:[#allocation2 + $0x8] sm:$0xe] %v4764_v13  ;;  %v6352_v0 = vrot.slane %v19508_v51, 1  ;;  %v19511_v39 = vrot.slane %v19510_v12, 1  ;;  %v16882_v2 = vld [vmem:[%s19065_s6 + $0xc] sm:$0xf] }
 0x4bc   : > { %19507 = vst [vmem:[#allocation61_spill] sm:$0xff] %v16818_v35  ;;  %v4720_v63 = vor.u32 %v4719_v5, %v4716_v18  ;;  %4798 = vst.msk [vmem:[#allocation2 + $0x8c] sm:$0xf] %vm19509_vm4, %v4701_v28  ;;  %vm19512_vm7 = vcmask 1046528   ;;  %vm19514_vm1 = vcmask 1043456   ;;  %vm19515_vm2 = vcmask 64512  }
 0x4bd   : > { %v16831_v25 = vsel %vm19512_vm7, %v19511_v39, %v16818_v35  ;;  %v5360_v29 = vsel %vm19514_vm1, %v14632_v54, 0  ;;  %v4711_v44 = vsel %vm16643_vm12, %v4702_v17, %v4710_v14  ;;  %v4712_v22 = vrot.slane %v4710_v14, 4  ;;  %vm19516_vm9 = vmmov %vm19512_vm7  ;;  %v16889_v41 = vld [vmem:[#allocation2 + $0x28] sm:$0xff]   ;;  %v16911_v10 = vld [vmem:[#allocation2 + $0x30] sm:$0xff]  }
 0x4be   : > { %19513 = vst [vmem:[#allocation62_spill] sm:$0xff] %v16831_v25  ;;  %13007 = vmatprep.mubr.msk.bf16.mxu1 %vm19515_vm2, %v16831_v25  ;;  %v6353_v9 = vsel %vm19516_vm9, %v16818_v35, %v6352_v0  ;;  %12860 = vmatpush3.bf16.msra.mxu0 %v5360_v29  ;;  %v4722_v24 = vrot.slane %v4720_v63, 4  ;;  %4799 = vst.msk [vmem:[#allocation2 + $0x90] sm:$0xf] %vm19517_vm14, %v4711_v44  ;;  %v6588_v53 = vrot.slane %v16857_v56, 1  ;;  %v6591_v8 = vrot.slane %v16847_v40, 1 }
 0x4bf   : > { %vm19518_vm15 = vmmov %vm19515_vm2  ;;  %v4721_v3 = vsel %vm16643_vm12, %v4712_v22, %v4720_v63  ;;  %v6593_v50 = vrot.slane %v16853_v52, 1  ;;  %v6595_v57 = vrot.slane %v16876_v19, 1  ;;  %v6597_v49 = vrot.slane %v16889_v41, 1  ;;  %v16918_v61 = vld [vmem:[#allocation2 + $0x38] sm:$0xff]   ;;  %v16931_v36 = vld [vmem:[#allocation2 + $0x40] sm:$0xff]  }
 0x4c0   : > { %13008 = vmatmul.mubr.msk.bf16.gmra.mrb[32].mxu1 %vm19518_vm15, %v6353_v9  ;;  %vm19519_vm8 = vmmov %vm19514_vm1  ;;  %4800 = vst.msk [vmem:[#allocation2 + $0x94] sm:$0xf] %vm19520_vm13, %v4721_v3  ;;  %v4804_v46 = vsel %vm4802_vm0, %v4722_v24, %v4803_v33  ;;  %v6599_v26 = vrot.slane %v16911_v10, 1  ;;  %v6601_v59 = vrot.slane %v16918_v61, 1  ;;  %v16938_v4 = vld [vmem:[#allocation2 + $0x48] sm:$0xff]   ;;  %v6603_v7 = vrot.slane %v16931_v36, 1 }
 0x4c1   : > { %14474 = vmatprep.subr.msk.bf16.mxu0 %vm19519_vm8, %v11511_v11  ;;  %4805 = vst [vmem:[#allocation2 + $0x98] sm:$0x3] %v4804_v46  ;;  %vm19523_vm10 = vmmov %vm19515_vm2  ;;  %v6605_v21 = vrot.slane %v16938_v4, 1  ;;  %v16951_v5 = vld [vmem:[#allocation2 + $0x50] sm:$0xff]   ;;  %v16958_v28 = vld [vmem:[#allocation2 + $0x58] sm:$0xff]   ;;  %v17076_v34 = vshll.u32 %v16847_v40, 16 }
 0x4c2   : > { %v16855_v60 = vld [vmem:[#allocation2 + $0x8] sm:$0xff]   ;;  %vm19524_vm12 = vmmov %vm19515_vm2  ;;  %v6607_v17 = vrot.slane %v16951_v5, 1  ;;  %v6609_v14 = vrot.slane %v16958_v28, 1  ;;  %v14635_v12 = vld [vmem:[%s15730_s23] sm:$0xff]   ;;  %v17082_v58 = vshll.u32 %v16853_v52, 16  ;;  %v17108_v27 = vshll.u32 %v16918_v61, 16 }
 0x4c3   : > { %19521 = vst [vmem:[#allocation63_spill] sm:$0xff] %v16855_v60  ;;  %12862 = vmatmul.mubr.msk.bf16.vlgmr.msra.gmra.mrb[36].mxu0 %vm19523_vm10, %v16855_v60  ;;  %v6589_v38 = vrot.slane %v16855_v60, 1  ;;  %vm19525_vm6 = vmmov %vm19512_vm7  ;;  %v16972_v63 = vld [vmem:[#allocation2 + $0x68] sm:$0xff]   ;;  %v5548_v39 = vshll.u32 %v14635_v12, 16  ;;  %v16975_v54 = vld [vmem:[#allocation2 + $0x70] sm:$0xff]   ;;  %v17119_v43 = vshrl.u32 %v16931_v36, 16 }
 0x4c4   : > { %12865 = vmatprep.mubr.msk.bf16.mxu0 %vm19524_vm12, %v16847_v40  ;;  %vm19526_vm5 = vmmov %vm19525_vm6  ;;  %v16977_v29 = vld [vmem:[#allocation2 + $0x78] sm:$0xff]   ;;  %v16979_v33 = vld [vmem:[#allocation2 + $0x80] sm:$0xff]  }
 0x4c5   : > { %v6590_v31 = vsel %vm19525_vm6, %v6588_v53, %v6589_v38  ;;  %v16869_v23 = vsel %vm19526_vm5, %v6589_v38, %v6591_v8  ;;  %vm19528_vm3 = vmmov %vm19514_vm1  ;;  %v16966_v0 = vld [vmem:[#allocation2 + $0x90] sm:$0xf]  ;;  %v16984_v22 = vld [vmem:[#allocation2 + $0x88] sm:$0xff]   ;;  %v5550_v38 = vrot.slane %v5548_v39, 1 }
 0x4c6   : > { %19527 = vst [vmem:[#allocation64_spill] sm:$0xff] %v16869_v23  ;;  %v6916_v15 = vsel %vm19528_vm3, %v14634_v47, 0  ;;  %vm19529_vm11 = vmmov %vm19515_vm2  ;;  %v16988_v9 = vcombine.low %v16966_v0, %v16966_v0  ;;  %v16996_v3 = vld [vmem:[%s15730_s23 + $0x8] sm:$0xff]   ;;  %v6617_v47 = vrot.slane %v16977_v29, 1 }
 0x4c7   : > { %13013 = vmatprep.mubr.msk.bf16.mxu1 %vm19529_vm11, %v6590_v31  ;;  %vm19530_vm4 = vmmov %vm19514_vm1  ;;  %19568 = vst [vmem:[#allocation75_spill] sm:$0xff] %v16996_v3  ;;  %v19200_v46 = vshll.u32 %v16996_v3, 16  ;;  %v6615_v31 = vrot.slane %v16975_v54, 1 }
 0x4c8   : > { %v5731_v20 = vsel %vm19530_vm4, %v11511_v11, 0  ;;  %vm19531_vm7 = vmmov %vm19515_vm2  ;;  %v16970_v11 = vld [vmem:[#allocation2 + $0x60] sm:$0xff]   ;;  %19564 = vst [vmem:[#allocation73_spill] sm:$0xff] %v16988_v9 }
 0x4c9   : > { %13014 = vmatmul.mubr.msk.bf16.vlgmr.msra.gmra.mrb[0].mxu1 %vm19531_vm7, %v16869_v23  ;;  %vm19532_vm1 = vmmov %vm19526_vm5  ;;  %12898 = vmatpush3.bf16.msra.mxu0 %v5731_v20  ;;  %v6611_v53 = vrot.slane %v16970_v11, 1  ;;  %v17007_v20 = vrot.slane %v16984_v22, 1 }
 0x4ca   : > { %v16887_v48 = vsel %vm19532_vm1, %v6591_v8, %v6593_v50  ;;  %vm19534_vm0 = vmmov %vm19515_vm2  ;;  %13050 = vmatpush3.bf16.msra.mxu1 %v6916_v15  ;;  %v5546_v8 = vshrl.u32 %v14635_v12, 16  ;;  %v6619_v15 = vrot.slane %v16979_v33, 1 }
 0x4cb   : > { %19533 = vst [vmem:[#allocation65_spill] sm:$0xff] %v16887_v48  ;;  %13017 = vmatprep.mubr.msk.bf16.mxu1 %vm19534_vm0, %v16887_v48  ;;  %vm19535_vm2 = vmmov %vm19528_vm3 }
 0x4cc   : > { %14479 = vmatprep.subr.msk.bf16.mxu1 %vm19535_vm2, %v16882_v2  ;;  %vm19536_vm9 = vmmov %vm19534_vm0  ;;  %19570 = vst [vmem:[#allocation76_spill] sm:$0xff] %v17007_v20  ;;  %v5551_v39 = vor.u32 %v5550_v38, %v5546_v8  ;;  %v19590_v38 = vshrl.u32 %v16996_v3, 16  ;;  %v17134_v3 = vshll.u32 %v16958_v28, 16 }
 0x4cd   : > { %12866 = vmatmul.mubr.msk.bf16.gmra.mrb[40].mxu0 %vm19536_vm9, %v16853_v52  ;;  %vm19537_vm14 = vmmov %vm19534_vm0 }
 0x4ce   : > { %12869 = vmatprep.mubr.msk.bf16.mxu0 %vm19537_vm14, %v16876_v19  ;;  %vm19538_vm15 = vmmov %vm19535_vm2 }
 0x4cf   : > { %14475 = vmatprep.subr.msk.bf16.mxu0 %vm19538_vm15, %v16904_v1  ;;  %vm19539_vm8 = vmmov %vm19532_vm1 }
 0x4d0   : > { %v16909_v37 = vsel %vm19539_vm8, %v6593_v50, %v6595_v57  ;;  %vm19541_vm13 = vmmov %vm19534_vm0  ;;  %v6613_v50 = vrot.slane %v16972_v63, 1 }
 0x4d1   : > { %19540 = vst [vmem:[#allocation66_spill] sm:$0xff] %v16909_v37  ;;  %13018 = vmatmul.mubr.msk.bf16.gmra.mrb[4].mxu1 %vm19541_vm13, %v16909_v37  ;;  %vm19542_vm10 = vmmov %vm19532_vm1  ;;  %v17185_v37 = vshrl.u32 %v16984_v22, 16 }
 0x4d2   : > { %v16916_v42 = vsel %vm19542_vm10, %v6595_v57, %v6597_v49  ;;  %vm19544_vm12 = vmmov %vm19534_vm0  ;;  %v6623_v57 = vrot.slane %v16988_v9, 1  ;;  %v17137_v9 = vshrl.u32 %v16958_v28, 16 }
 0x4d3   : > { %19543 = vst [vmem:[#allocation67_spill] sm:$0xff] %v16916_v42  ;;  %13021 = vmatprep.mubr.msk.bf16.mxu1 %vm19544_vm12, %v16916_v42  ;;  %vm19545_vm6 = vmmov %vm19534_vm0  ;;  %v17182_v42 = vshll.u32 %v16984_v22, 16 }
 0x4d4   : > { %vm19546_vm5 = vmmov %vm19534_vm0 }
 0x4d5   : > { %12870 = vmatmul.mubr.msk.bf16.gmra.mrb[44].mxu0 %vm19545_vm6, %v16889_v41  ;;  %vm19547_vm3 = vmmov %vm19532_vm1 }
 0x4d6   : > { %12873 = vmatprep.mubr.msk.bf16.mxu0 %vm19546_vm5, %v16911_v10  ;;  %v16929_v45 = vsel %vm19547_vm3, %v6597_v49, %v6599_v26  ;;  %vm19549_vm11 = vmmov %vm19534_vm0  ;;  %v14637_v49 = vld [vmem:[%s15730_s23 + $0x10] sm:$0xff]  }
 0x4d7   : > { %19548 = vst [vmem:[#allocation68_spill] sm:$0xff] %v16929_v45  ;;  %vm19550_vm4 = vmmov %vm19532_vm1  ;;  %v17026_v30 = vshrl.u32 %v14637_v49, 16 }
 0x4d8   : > { %v16936_v16 = vsel %vm19550_vm4, %v6599_v26, %v6601_v59  ;;  %vm19552_vm7 = vmmov %vm19534_vm0  ;;  %v17011_v26 = vshll.u32 %v14637_v49, 16 }
 0x4d9   : > { %13022 = vmatmul.mubr.msk.bf16.gmra.mrb[8].mxu1 %vm19549_vm11, %v16929_v45  ;;  %19551 = vst [vmem:[#allocation69_spill] sm:$0xff] %v16936_v16  ;;  %vm19553_vm1 = vmmov %vm19534_vm0  ;;  %v7654_v45 = vrot.slane %v17076_v34, 2 }
 0x4da   : > { %13025 = vmatprep.mubr.msk.bf16.mxu1 %vm19552_vm7, %v16936_v16  ;;  %vm19554_vm2 = vmmov %vm19547_vm3  ;;  %19571 = vst [vmem:[#allocation77_spill] sm:$0xff] %v17011_v26  ;;  %v17176_v16 = vshrl.u32 %v16979_v33, 16 }
 0x4db   : > { %v16949_v18 = vsel %vm19554_vm2, %v6601_v59, %v6603_v7  ;;  %vm19556_vm9 = vmmov %vm19534_vm0  ;;  %v5554_v59 = vrot.slane %v19200_v46, 1  ;;  %19577 = vst [vmem:[#allocation80_spill] sm:$0xff] %v17026_v30 }
 0x4dc   : > { %19555 = vst [vmem:[#allocation70_spill] sm:$0xff] %v16949_v18  ;;  %vm19557_vm14 = vmmov %vm19554_vm2 }
 0x4dd   : > { %12874 = vmatmul.mubr.msk.bf16.gmra.mrb[48].mxu0 %vm19553_vm1, %v16918_v61  ;;  %v16956_v13 = vsel %vm19557_vm14, %v6603_v7, %v6605_v21  ;;  %vm19559_vm15 = vmmov %vm19534_vm0 }
 0x4de   : > { %12877 = vmatprep.mubr.msk.bf16.mxu0 %vm19534_vm0, %v16931_v36  ;;  %19558 = vst [vmem:[#allocation71_spill] sm:$0xff] %v16956_v13  ;;  %vm19560_vm8 = vmmov %vm19534_vm0 }
 0x4df   : > { %vm19561_vm13 = vmmov %vm19534_vm0 }
 0x4e0   : > { %vm19562_vm10 = vmmov %vm19554_vm2 }
 0x4e1   : > { %13026 = vmatmul.mubr.msk.bf16.gmra.mrb[12].mxu1 %vm19556_vm9, %v16949_v18  ;;  %v16982_v44 = vsel %vm19562_vm10, %v6605_v21, %v6607_v17  ;;  %vm19565_vm12 = vmmov %vm19534_vm0  ;;  %v14638_v21 = vld [vmem:[%s15730_s23 + $0x18] sm:$0xff]  }
 0x4e2   : > { %13029 = vmatprep.mubr.msk.bf16.mxu1 %vm19559_vm15, %v16956_v13  ;;  %19563 = vst [vmem:[#allocation72_spill] sm:$0xff] %v16982_v44  ;;  %vm19566_vm6 = vmmov %vm19554_vm2  ;;  %v17049_v8 = vshrl.u32 %v14638_v21, 16  ;;  %v19602_v13 = vshll.u32 %v16855_v60, 16 }
 0x4e3   : > { %v16993_v24 = vsel %vm19566_vm6, %v6607_v17, %v6609_v14  ;;  %vm19569_vm5 = vmmov %vm19534_vm0  ;;  %v17019_v17 = vshll.u32 %v14638_v21, 16 }
 0x4e4   : > { %19567 = vst [vmem:[#allocation74_spill] sm:$0xff] %v16993_v24  ;;  %vm19572_vm3 = vmmov %vm19534_vm0  ;;  %v7651_v18 = vrot.slane %v19602_v13, 2 }
 0x4e5   : > { %12878 = vmatmul.mubr.msk.bf16.gmra.mrb[52].mxu0 %vm19560_vm8, %v16938_v4  ;;  %19573 = vst [vmem:[#allocation78_spill] sm:$0xff] %v17019_v17  ;;  %vm19574_vm11 = vmmov %vm19534_vm0 }
 0x4e6   : > { %12881 = vmatprep.mubr.msk.bf16.mxu0 %vm19561_vm13, %v16951_v5  ;;  %vm19575_vm4 = vmmov %vm19554_vm2  ;;  %19588 = vst [vmem:[#allocation85_spill] sm:$0xff] %v17049_v8  ;;  %vm19594_vm13 = vsmask.f32 7424 }
 0x4e7   : > { %v17024_v12 = vsel %vm19575_vm4, %v6609_v14, %v6611_v53  ;;  %vm19578_vm7 = vmmov %vm19554_vm2  ;;  %vm19604_vm4 = vsmask.f32 6400 }
 0x4e8   : > { %19576 = vst [vmem:[#allocation79_spill] sm:$0xff] %v17024_v12  ;;  %v17029_v6 = vsel %vm19578_vm7, %v6611_v53, %v6613_v50  ;;  %vm19580_vm1 = vmmov %vm19554_vm2  ;;  %v19201_v53 = vrot.slane %v17011_v26, 1 }
 0x4e9   : > { %13030 = vmatmul.mubr.msk.bf16.gmra.mrb[16].mxu1 %vm19565_vm12, %v16982_v44  ;;  %19579 = vst [vmem:[#allocation81_spill] sm:$0xff] %v17029_v6  ;;  %v17032_v46 = vsel %vm19580_vm1, %v6613_v50, %v6615_v31  ;;  %vm19582_vm0 = vmmov %vm19580_vm1  ;;  %v17055_v50 = vor.u32 %v19590_v38, %v5554_v59  ;;  %v17094_v38 = vshll.u32 %v16889_v41, 16 }
 0x4ea   : > { %13033 = vmatprep.mubr.msk.bf16.mxu1 %vm19569_vm5, %v16993_v24  ;;  %19581 = vst [vmem:[#allocation82_spill] sm:$0xff] %v17032_v46  ;;  %v17035_v7 = vsel %vm19582_vm0, %v6615_v31, %v6617_v47  ;;  %vm19584_vm2 = vmmov %vm19582_vm0  ;;  %v17071_v21 = vor.u32 %v17026_v30, %v19201_v53  ;;  %v17091_v53 = vshrl.u32 %v16876_v19, 16  ;;  %v17097_v31 = vshrl.u32 %v16889_v41, 16 }
 0x4eb   : > { %19583 = vst [vmem:[#allocation83_spill] sm:$0xff] %v17035_v7  ;;  %v17038_v32 = vsel %vm19584_vm2, %v6617_v47, %v6619_v15  ;;  %vm19585_vm9 = vmmov %vm19582_vm0  ;;  %v14639_v47 = vld [vmem:[%s15730_s23 + $0x20] sm:$0xff]   ;;  %v17116_v41 = vshll.u32 %v16931_v36, 16  ;;  %v17128_v30 = vshll.u32 %v16951_v5, 16  ;;  %v17140_v36 = vshll.u32 %v16970_v11, 16 }
 0x4ec   : > { %v17042_v55 = vsel %vm19585_vm9, %v6619_v15, %v17007_v20  ;;  %vm19587_vm14 = vmmov %vm19582_vm0  ;;  %v17059_v15 = vshll.u32 %v14639_v47, 16  ;;  %v17061_v49 = vshrl.u32 %v14639_v47, 16  ;;  %v17079_v47 = vshrl.u32 %v16847_v40, 16  ;;  %19595 = vst [vmem:[#allocation88_spill] sm:$0xff] %v17094_v38 }
 0x4ed   : > { %12882 = vmatmul.mubr.msk.bf16.gmra.mrb[56].mxu0 %vm19572_vm3, %v16958_v28  ;;  %19586 = vst [vmem:[#allocation84_spill] sm:$0xff] %v17042_v55  ;;  %v17046_v14 = vsel %vm19587_vm14, %v17007_v20, %v6623_v57  ;;  %vm19589_vm15 = vmmov %vm19572_vm3  ;;  %v17066_v57 = vsel %vm19594_vm13, %v5551_v39, %v5554_v59  ;;  %v17085_v59 = vshrl.u32 %v16853_v52, 16  ;;  %v17088_v39 = vshll.u32 %v16876_v19, 16 }
 0x4ee   : > { %12885 = vmatprep.mubr.msk.bf16.mxu0 %vm19574_vm11, %v16970_v11  ;;  %19591 = vst [vmem:[#allocation86_spill] sm:$0xff] %v17059_v15  ;;  %19592 = vst [vmem:[#allocation87_spill] sm:$0xff] %v17061_v49  ;;  %v17102_v40 = vshll.u32 %v16911_v10, 16  ;;  %v17105_v52 = vshrl.u32 %v16911_v10, 16  ;;  %v17111_v19 = vshrl.u32 %v16918_v61, 16  ;;  %v17122_v20 = vshll.u32 %v16938_v4, 16 }
 0x4ef   : > { %vm19593_vm8 = vmmov %vm19572_vm3  ;;  %v17125_v10 = vshrl.u32 %v16938_v4, 16  ;;  %v17131_v61 = vshrl.u32 %v16951_v5, 16  ;;  %v17146_v4 = vshll.u32 %v16972_v63, 16  ;;  %v17154_v5 = vshll.u32 %v16975_v54, 16 }
 0x4f0   : > { %vm19596_vm10 = vmmov %vm19572_vm3  ;;  %19597 = vst [vmem:[#allocation89_spill] sm:$0xff] %v17111_v19  ;;  %v17157_v28 = vshrl.u32 %v16975_v54, 16  ;;  %v17160_v24 = vshll.u32 %v16977_v29, 16  ;;  %v7661_v13 = vrot.slane %v17091_v53, 1  ;;  %v7662_v25 = vrot.slane %v17088_v39, 2 }
 0x4f1   : > { %13034 = vmatmul.mubr.msk.bf16.gmra.mrb[20].mxu1 %vm19589_vm15, %v17024_v12  ;;  %vm19598_vm12 = vmmov %vm19572_vm3  ;;  %v17149_v12 = vshrl.u32 %v16972_v63, 16  ;;  %v7665_v35 = vrot.slane %v17097_v31, 1  ;;  %v7666_v51 = vrot.slane %v17094_v38, 2  ;;  %v7669_v56 = vrot.slane %v17105_v52, 1 }
 0x4f2   : > { %13037 = vmatprep.mubr.msk.bf16.mxu1 %vm19593_vm8, %v17029_v6  ;;  %v17143_v6 = vshrl.u32 %v16970_v11, 16  ;;  %vm19599_vm6 = vmmov %vm19572_vm3  ;;  %v19600_v11 = vshrl.u32 %v16855_v60, 16  ;;  %v7678_v38 = vrot.slane %v17116_v41, 2 }
 0x4f3   : > { %vm19601_vm5 = vmmov %vm19572_vm3 }
 0x4f4   : > { %v7650_v44 = vrot.slane %v19600_v11, 1  ;;  %v7657_v11 = vrot.slane %v17085_v59, 1  ;;  %vm19603_vm11 = vmmov %vm19572_vm3 }
 0x4f5   : > { %12886 = vmatmul.mubr.msk.bf16.gmra.mrb[60].mxu0 %vm19596_vm10, %v16972_v63  ;;  %v17167_v63 = vshrl.u32 %v16977_v29, 16  ;;  %vm19606_vm7 = vmmov %vm19604_vm4 }
 0x4f6   : > { %12889 = vmatprep.mubr.msk.bf16.mxu0 %vm19598_vm12, %v16975_v54  ;;  %v7653_v54 = vrot.slane %v17079_v47, 1  ;;  %v7652_v48 = vor.u32 %v7651_v18, %v7650_v44  ;;  %v7670_v18 = vrot.slane %v17102_v40, 2  ;;  %v7673_v44 = vrot.slane %v17111_v19, 1  ;;  %vm19608_vm1 = vmmov %vm19572_vm3 }
 0x4f7   : > { %vm19609_vm0 = vmmov %vm19604_vm4 }
 0x4f8   : > { %v7655_v23 = vor.u32 %v7654_v45, %v7653_v54  ;;  %v7667_v54 = vor.u32 %v7666_v51, %v7665_v35  ;;  %vm19611_vm2 = vmmov %vm19608_vm1 }
 0x4f9   : > { %13038 = vmatmul.mubr.msk.bf16.gmra.mrb[24].mxu1 %vm19599_vm6, %v17032_v46  ;;  %v17170_v46 = vshll.u32 %v16979_v33, 16  ;;  %vm19612_vm9 = vmmov %vm19609_vm0 }
 0x4fa   : > { %13041 = vmatprep.mubr.msk.bf16.mxu1 %vm19601_vm5, %v17035_v7  ;;  %v7658_v7 = vrot.slane %v17082_v58, 2  ;;  %v17199_v62 = vsel %vm19604_vm4, %v7652_v48, %v7655_v23  ;;  %vm19614_vm14 = vmmov %vm19609_vm0 }
 0x4fb   : > { %19605 = vst [vmem:[#allocation90_spill] sm:$0xff] %v17199_v62  ;;  %v7681_v62 = vrot.slane %v17125_v10, 1  ;;  %vm19616_vm15 = vmmov %vm19609_vm0 }
 0x4fc   : > { %v7659_v60 = vor.u32 %v7658_v7, %v7657_v11  ;;  %v7674_v7 = vrot.slane %v17108_v27, 2  ;;  %v7671_v11 = vor.u32 %v7670_v18, %v7669_v56  ;;  %v7685_v56 = vrot.slane %v17131_v61, 1  ;;  %vm19618_vm8 = vmmov %vm19609_vm0 }
 0x4fd   : > { %12890 = vmatmul.mubr.msk.bf16.gmra.mrb[64].mxu0 %vm19572_vm3, %v16977_v29  ;;  %v7663_v29 = vor.u32 %v7662_v25, %v7661_v13  ;;  %v7686_v18 = vrot.slane %v17128_v30, 2  ;;  %vm19620_vm13 = vmmov %vm19608_vm1 }
 0x4fe   : > { %12893 = vmatprep.mubr.msk.bf16.mxu0 %vm19603_vm11, %v16979_v33  ;;  %v17202_v45 = vsel %vm19606_vm7, %v7655_v23, %v7659_v60  ;;  %v7677_v33 = vrot.slane %v17119_v43, 1  ;;  %v7675_v48 = vor.u32 %v7674_v7, %v7673_v44  ;;  %v7682_v23 = vrot.slane %v17122_v20, 2  ;;  %vm19621_vm10 = vmmov %vm19609_vm0 }
 0x4ff   : > { %19607 = vst [vmem:[#allocation91_spill] sm:$0xff] %v17202_v45  ;;  %v17210_v19 = vsel %vm19609_vm0, %v7659_v60, %v7663_v29  ;;  %v17217_v35 = vsel %vm19612_vm9, %v7663_v29, %v7667_v54  ;;  %v17220_v51 = vsel %vm19614_vm14, %v7667_v54, %v7671_v11  ;;  %v7689_v44 = vrot.slane %v17137_v9, 1  ;;  %vm19623_vm12 = vmmov %vm19608_vm1  ;;  %v17384_v45 = vld [vmem:[%s15730_s23 + $0x50] sm:$0xff]  }
 0x500   : > { %19610 = vst [vmem:[#allocation92_spill] sm:$0xff] %v17210_v19  ;;  %19613 = vst [vmem:[#allocation93_spill] sm:$0xff] %v17217_v35  ;;  %v7679_v25 = vor.u32 %v7678_v38, %v7677_v33  ;;  %v17224_v60 = vsel %vm19616_vm15, %v7671_v11, %v7675_v48  ;;  %v7683_v13 = vor.u32 %v7682_v23, %v7681_v62  ;;  %v7690_v29 = vrot.slane %v17134_v3, 2 }
 0x501   : > { %13042 = vmatmul.mubr.msk.bf16.gmra.mrb[28].mxu1 %vm19608_vm1, %v17038_v32  ;;  %19615 = vst [vmem:[#allocation94_spill] sm:$0xff] %v17220_v51  ;;  %19617 = vst [vmem:[#allocation95_spill] sm:$0xff] %v17224_v60  ;;  %v7693_v35 = vrot.slane %v17143_v6, 1  ;;  %v7694_v54 = vrot.slane %v17140_v36, 2  ;;  %v7687_v62 = vor.u32 %v7686_v18, %v7685_v56  ;;  %v7697_v11 = vrot.slane %v17149_v12, 1 }
 0x502   : > { %13045 = vmatprep.mubr.msk.bf16.mxu1 %vm19611_vm2, %v17042_v55  ;;  %v17229_v7 = vsel %vm19618_vm8, %v7675_v48, %v7679_v25  ;;  %v17237_v38 = vsel %vm19621_vm10, %v7679_v25, %v7683_v13  ;;  %v7698_v33 = vrot.slane %v17146_v4, 2  ;;  %v7691_v48 = vor.u32 %v7690_v29, %v7689_v44  ;;  %vm19624_vm6 = vmmov %vm19609_vm0  ;;  %v19696_v55 = vld [vmem:[#allocation46_spill] sm:$0xff] }
 0x503   : > { %19619 = vst [vmem:[#allocation96_spill] sm:$0xff] %v17229_v7  ;;  %19622 = vst [vmem:[#allocation97_spill] sm:$0xff] %v17237_v38  ;;  %v7695_v23 = vor.u32 %v7694_v54, %v7693_v35  ;;  %v7701_v7 = vrot.slane %v17157_v28, 1  ;;  %v7702_v60 = vrot.slane %v17154_v5, 2  ;;  %v7705_v56 = vrot.slane %v17167_v63, 1 }
 0x504   : > { %v7699_v25 = vor.u32 %v7698_v33, %v7697_v11  ;;  %v7706_v18 = vrot.slane %v17160_v24, 2  ;;  %vm19626_vm5 = vmmov %vm19609_vm0  ;;  %v7709_v44 = vrot.slane %v17176_v16, 1  ;;  %v7710_v54 = vrot.slane %v17170_v46, 2 }
 0x505   : > { %12894 = vmatmul.mubr.msk.bf16.gmra.mrb[68].mxu0 %vm19620_vm13, %v16984_v22  ;;  %v17246_v22 = vsel %vm19624_vm6, %v7683_v13, %v7687_v62  ;;  %v17251_v38 = vsel %vm19626_vm5, %v7687_v62, %v7691_v48  ;;  %vm19628_vm3 = vmmov %vm19609_vm0  ;;  %v7703_v35 = vor.u32 %v7702_v60, %v7701_v7  ;;  %v7713_v11 = vrot.slane %v17185_v37, 1  ;;  %v17271_v60 = vld [vmem:[%s15730_s23 + $0x28] sm:$0xff]  }
 0x506   : > { %12899 = vmatprep.mubr.msk.bf16.mxu0 %vm19623_vm12, %v17066_v57  ;;  %19625 = vst [vmem:[#allocation98_spill] sm:$0xff] %v17246_v22  ;;  %19627 = vst [vmem:[#allocation99_spill] sm:$0xff] %v17251_v38  ;;  %v17254_v57 = vsel %vm19628_vm3, %v7691_v48, %v7695_v23  ;;  %v7707_v29 = vor.u32 %v7706_v18, %v7705_v56  ;;  %v19633_v62 = vrot.slane %v17011_v26, 1  ;;  %vm19634_vm7 = vsmask.f32 7424  ;;  %v19635_v48 = vld [vmem:[#allocation10_spill] sm:$0xff] }
 0x507   : > { %19629 = vst [vmem:[#allocation100_spill] sm:$0xff] %v17254_v57  ;;  %vm19630_vm11 = vmmov %vm19608_vm1  ;;  %v17277_v7 = vsel %vm19609_vm0, %v7699_v25, %v7703_v35  ;;  %v19639_v56 = vrot.slane %v17019_v17, 1  ;;  %vm19641_vm9 = vcmask 1043456   ;;  %v9342_v57 = vrot.slane %v17079_v47, 2  ;;  %v17436_v26 = vld [vmem:[%s15730_s23 + $0x60] sm:$0xff]  }
 0x508   : > { %vm19631_vm4 = vmmov %vm19609_vm0  ;;  %v5562_v33 = vsel %vm19634_vm7, %v17055_v50, %v19633_v62  ;;  %19636 = vst [vmem:[#allocation10_spill] sm:$0xff] %v17271_v60  ;;  %v6098_v50 = vsel %vm19641_vm9, %v16904_v1, 0  ;;  %v9343_v22 = vrot.slane %v17076_v34, 3 }
 0x509   : > { %13046 = vmatmul.mubr.msk.bf16.gmra.mrb[32].mxu1 %vm19630_vm11, %v17046_v14  ;;  %v17260_v13 = vsel %vm19631_vm4, %v7695_v23, %v7699_v25  ;;  %v17274_v14 = vshll.u32 %v17271_v60, 16  ;;  %19638 = vst [vmem:[#allocation103_spill] sm:$0xff] %v17277_v7  ;;  %v7714_v23 = vrot.slane %v17182_v42, 2  ;;  %vm19640_vm2 = vmmov %vm19634_vm7  ;;  %v5575_v25 = vrot.slane %v17059_v15, 1  ;;  %v17402_v15 = vld [vmem:[%s15730_s23 + $0x58] sm:$0xff]  }
 0x50a   : > { %19632 = vst [vmem:[#allocation101_spill] sm:$0xff] %v17260_v13  ;;  %13051 = vmatprep.mubr.msk.bf16.mxu1 %vm19608_vm1, %v19635_v48  ;;  %v5569_v18 = vsel %vm19640_vm2, %v17071_v21, %v19639_v56  ;;  %vm19642_vm14 = vmmov %vm19609_vm0  ;;  %v7711_v48 = vor.u32 %v7710_v54, %v7709_v44  ;;  %v19649_v21 = vmov %v19639_v56  ;;  %v17309_v54 = vld [vmem:[%s15730_s23 + $0x30] sm:$0xff]  }
 0x50b   : > { %19637 = vst [vmem:[#allocation102_spill] sm:$0xff] %v17274_v14  ;;  %v17287_v62 = vsel %vm19642_vm14, %v7703_v35, %v7707_v29  ;;  %v17289_v13 = vor.u32 %v7714_v23, %v7713_v11  ;;  %vm19645_vm15 = vmmov %vm19608_vm1  ;;  %v5572_v56 = vor.u32 %v17049_v8, %v19649_v21  ;;  %v5579_v44 = vor.u32 %v17061_v49, %v5575_v25  ;;  %v4843_v23 = vld [vmem:[#allocation2 + $0x94] sm:$0xf] }
 0x50c   : > { %19643 = vst [vmem:[#allocation104_spill] sm:$0xff] %v17287_v62  ;;  %vm19646_vm8 = vmmov %vm19609_vm0  ;;  %v17312_v11 = vshll.u32 %v17309_v54, 16  ;;  %v17328_v21 = vshrl.u32 %v17309_v54, 16  ;;  %v17360_v62 = vld [vmem:[%s15730_s23 + $0x48] sm:$0xff]   ;;  %v9362_v49 = vrot.slane %v17108_v27, 3 }
 0x50d   : > { %19644 = vst [vmem:[#allocation105_spill] sm:$0xff] %v17289_v13  ;;  %12900 = vmatmul.mubr.msk.bf16.vlgmr.msra.gmra.mrb[36].mxu0 %vm19645_vm15, %v5562_v33  ;;  %v17294_v7 = vsel %vm19646_vm8, %v7707_v29, %v7711_v48  ;;  %vm19648_vm13 = vmmov %vm19608_vm1  ;;  %v5582_v29 = vrot.slane %v17274_v14, 1  ;;  %v17317_v33 = vld [vmem:[%s19066_s7 + $0x10] sm:$0xf]  ;;  %v9346_v14 = vrot.slane %v17082_v58, 3  ;;  %vm19687_vm15 = vcmask 1045504  }
 0x50e   : > { %19647 = vst [vmem:[#allocation106_spill] sm:$0xff] %v17294_v7  ;;  %12903 = vmatprep.mubr.msk.bf16.mxu0 %vm19648_vm13, %v5569_v18  ;;  %12936 = vmatpush3.bf16.msra.mxu0 %v6098_v50  ;;  %vm19650_vm10 = vmmov %vm19609_vm0  ;;  %v19655_v18 = vld [vmem:[#allocation42_spill] sm:$0xff] }
 0x50f   : > { %v17302_v1 = vsel %vm19650_vm10, %v7711_v48, %v17289_v13  ;;  %vm19652_vm12 = vmmov %vm19641_vm9  ;;  %19653 = vst [vmem:[#allocation108_spill] sm:$0xff] %v17309_v54  ;;  %v19659_v48 = vld [vmem:[#allocation43_spill] sm:$0xff]  ;;  %v17331_v13 = vld [vmem:[%s15730_s23 + $0x38] sm:$0xff]   ;;  %vm19693_vm10 = vsmask.f32 5376 }
 0x510   : > { %19651 = vst [vmem:[#allocation107_spill] sm:$0xff] %v17302_v1  ;;  %v7112_v35 = vsel %vm19652_vm12, %v16882_v2, 0  ;;  %19654 = vst [vmem:[#allocation109_spill] sm:$0xff] %v17312_v11  ;;  %v17322_v2 = vshrl.u32 %v17271_v60, 16  ;;  %v17334_v1 = vshll.u32 %v17331_v13, 16  ;;  %v17348_v60 = vld [vmem:[%s15730_s23 + $0x40] sm:$0xff]  }
 0x511   : > { %vm19656_vm6 = vmmov %vm19608_vm1  ;;  %19661 = vst [vmem:[#allocation43_spill] sm:$0xff] %v17328_v21  ;;  %v17351_v7 = vshll.u32 %v17348_v60, 16  ;;  %v17370_v38 = vshrl.u32 %v17348_v60, 16 }
 0x512   : > { %13052 = vmatmul.mubr.msk.bf16.vlgmr.msra.gmra.mrb[0].mxu1 %vm19656_vm6, %v19655_v18  ;;  %19657 = vst [vmem:[#allocation42_spill] sm:$0xff] %v17322_v2  ;;  %vm19658_vm5 = vmmov %vm19640_vm2  ;;  %v5586_v54 = vor.u32 %v17322_v2, %v5582_v29 }
 0x513   : > { %v5576_v50 = vsel %vm19658_vm5, %v5572_v56, %v5575_v25  ;;  %vm19660_vm3 = vmmov %vm19608_vm1  ;;  %13088 = vmatpush3.bf16.msra.mxu1 %v7112_v35  ;;  %19662 = vst [vmem:[#allocation110_spill] sm:$0xff] %v17331_v13  ;;  %v17340_v25 = vcombine.low %v16966_v0, %v4843_v23  ;;  %v5589_v56 = vrot.slane %v17312_v11, 1  ;;  %v17343_v35 = vld [vmem:[#allocation2 + $0x98] sm:$0xf]  ;;  %v17357_v23 = vshrl.u32 %v17331_v13, 16  ;;  %v19677_v13 = vld [vmem:[#allocation44_spill] sm:$0xff] }
 0x514   : > { %13055 = vmatprep.mubr.msk.bf16.mxu1 %vm19660_vm3, %v19659_v48  ;;  %19663 = vst [vmem:[#allocation111_spill] sm:$0xff] %v17334_v1  ;;  %vm19664_vm11 = vmmov %vm19640_vm2  ;;  %v4845_v48 = vld [vmem:[#allocation2 + $0x9c] sm:$0xf]  ;;  %v5603_v19 = vrot.slane %v17351_v7, 1 }
 0x515   : > { %v5583_v18 = vsel %vm19664_vm11, %v5579_v44, %v5582_v29  ;;  %vm19665_vm4 = vmmov %vm19641_vm9  ;;  %19666 = vst [vmem:[#allocation112_spill] sm:$0xff] %v17340_v25  ;;  %v5593_v0 = vor.u32 %v17328_v21, %v5589_v56  ;;  %v5596_v44 = vrot.slane %v17334_v1, 1  ;;  %v17366_v29 = vcombine.low %v17343_v35, %v4845_v48  ;;  %v19681_v1 = vld [vmem:[#allocation45_spill] sm:$0xff] }
 0x516   : > { %14480 = vmatprep.subr.msk.bf16.mxu1 %vm19665_vm4, %v17317_v33  ;;  %19667 = vst [vmem:[#allocation113_spill] sm:$0xff] %v17343_v35  ;;  %vm19668_vm7 = vmmov %vm19608_vm1  ;;  %v5590_v51 = vsel %vm19640_vm2, %v5586_v54, %v5589_v56  ;;  %v17381_v48 = vshrl.u32 %v17360_v62, 16  ;;  %v9344_v56 = vor.u32 %v9343_v22, %v9342_v57  ;;  %v9345_v21 = vrot.slane %v17085_v59, 2 }
 0x517   : > { %12904 = vmatmul.mubr.msk.bf16.gmra.mrb[40].mxu0 %vm19668_vm7, %v5576_v50  ;;  %19669 = vst [vmem:[#allocation114_spill] sm:$0xff] %v17348_v60  ;;  %19670 = vst [vmem:[#allocation115_spill] sm:$0xff] %v17351_v7  ;;  %v17363_v50 = vshll.u32 %v17360_v62, 16  ;;  %v17387_v60 = vshll.u32 %v17384_v45, 16  ;;  %v19261_v54 = vrot.slane %v17366_v29, 2  ;;  %v5600_v7 = vor.u32 %v17357_v23, %v5596_v44 }
 0x518   : > { %12907 = vmatprep.mubr.msk.bf16.mxu0 %vm19608_vm1, %v5583_v18  ;;  %19671 = vst [vmem:[#allocation116_spill] sm:$0xff] %v17357_v23  ;;  %19672 = vst [vmem:[#allocation117_spill] sm:$0xff] %v17360_v62  ;;  %v17373_v18 = vrot.slane %v17340_v25, 2  ;;  %v5607_v2 = vor.u32 %v17370_v38, %v5603_v19  ;;  %v9349_v57 = vrot.slane %v17091_v53, 2  ;;  %v19692_v23 = vld [vmem:[#allocation88_spill] sm:$0xff] }
 0x519   : > { %19673 = vst [vmem:[#allocation118_spill] sm:$0xff] %v17363_v50  ;;  %19674 = vst [vmem:[#allocation119_spill] sm:$0xff] %v17366_v29  ;;  %v5610_v62 = vrot.slane %v17363_v50, 1  ;;  %v9353_v50 = vrot.slane %v17097_v31, 2 }
 0x51a   : > { %19675 = vst [vmem:[#allocation120_spill] sm:$0xff] %v17370_v38  ;;  %19676 = vst [vmem:[#allocation121_spill] sm:$0xff] %v17373_v18  ;;  %v17411_v22 = vsel %vm19687_vm15, %v17373_v18, %v19261_v54  ;;  %v17420_v38 = vshrl.u32 %v17402_v15, 16  ;;  %v9354_v54 = vrot.slane %v19692_v23, 3  ;;  %v9358_v18 = vrot.slane %v17102_v40, 3 }
 0x51b   : > { %vm19678_vm0 = vmmov %vm19608_vm1  ;;  %19679 = vst [vmem:[#allocation44_spill] sm:$0xff] %v17384_v45 }
 0x51c   : > { %13056 = vmatmul.mubr.msk.bf16.gmra.mrb[4].mxu1 %vm19678_vm0, %v19677_v13  ;;  %19680 = vst [vmem:[#allocation122_spill] sm:$0xff] %v17387_v60  ;;  %vm19682_vm9 = vmmov %vm19678_vm0  ;;  %v17393_v13 = vshrl.u32 %v17384_v45, 16  ;;  %v9350_v45 = vrot.slane %v17088_v39, 3  ;;  %v9355_v17 = vor.u32 %v9354_v54, %v9353_v50  ;;  %v19703_v50 = vld [vmem:[#allocation47_spill] sm:$0xff] }
 0x51d   : > { %13059 = vmatprep.mubr.msk.bf16.mxu1 %vm19682_vm9, %v19681_v1  ;;  %vm19683_vm14 = vmmov %vm19640_vm2  ;;  %19685 = vst [vmem:[#allocation123_spill] sm:$0xff] %v17402_v15  ;;  %v17405_v1 = vshll.u32 %v17402_v15, 16  ;;  %v9366_v15 = vrot.slane %v17116_v41, 3 }
 0x51e   : > { %v5597_v11 = vsel %vm19683_vm14, %v5593_v0, %v5596_v44  ;;  %19684 = vst [vmem:[#allocation45_spill] sm:$0xff] %v17393_v13  ;;  %19688 = vst [vmem:[#allocation125_spill] sm:$0xff] %v17411_v22  ;;  %v5617_v0 = vrot.slane %v17387_v60, 1  ;;  %v9347_v44 = vor.u32 %v9346_v14, %v9345_v21  ;;  %v9357_v22 = vrot.slane %v17105_v52, 2  ;;  %v19695_v21 = vld [vmem:[#allocation89_spill] sm:$0xff] }
 0x51f   : > { %19686 = vst [vmem:[#allocation124_spill] sm:$0xff] %v17405_v1  ;;  %vm19689_vm8 = vmmov %vm19678_vm0  ;;  %v9351_v14 = vor.u32 %v9350_v45, %v9349_v57  ;;  %v9361_v60 = vrot.slane %v19695_v21, 2  ;;  %v5624_v54 = vrot.slane %v17405_v1, 1  ;;  %v9393_v1 = vrot.slane %v17167_v63, 2 }
 0x520   : > { %12908 = vmatmul.mubr.msk.bf16.gmra.mrb[44].mxu0 %vm19689_vm8, %v5590_v51  ;;  %vm19690_vm13 = vmmov %vm19678_vm0  ;;  %19691 = vst [vmem:[#allocation126_spill] sm:$0xff] %v17420_v38  ;;  %v17426_v51 = vsel %vm19693_vm10, %v9344_v56, %v9347_v44  ;;  %v9359_v8 = vor.u32 %v9358_v18, %v9357_v22  ;;  %v17439_v56 = vshll.u32 %v17436_v26, 16  ;;  %v5614_v18 = vor.u32 %v17381_v48, %v5610_v62 }
 0x521   : > { %12911 = vmatprep.mubr.msk.bf16.mxu0 %vm19690_vm13, %v5597_v11  ;;  %19694 = vst [vmem:[#allocation88_spill] sm:$0xff] %v17426_v51  ;;  %v9365_v11 = vrot.slane %v17119_v43, 2  ;;  %vm19697_vm12 = vmmov %vm19678_vm0  ;;  %v9363_v57 = vor.u32 %v9362_v49, %v9361_v60  ;;  %v9369_v49 = vrot.slane %v17125_v10, 2  ;;  %v17460_v60 = vshrl.u32 %v17436_v26, 16 }
 0x522   : > { %vm19698_vm6 = vmmov %vm19640_vm2  ;;  %19699 = vst [vmem:[#allocation89_spill] sm:$0xff] %v17436_v26  ;;  %v9385_v51 = vrot.slane %v17149_v12, 2 }
 0x523   : > { %v5604_v35 = vsel %vm19698_vm6, %v5600_v7, %v5603_v19  ;;  %19700 = vst [vmem:[#allocation46_spill] sm:$0xff] %v17439_v56  ;;  %vm19701_vm5 = vmmov %vm19693_vm10 }
 0x524   : > { %13060 = vmatmul.mubr.msk.bf16.gmra.mrb[8].mxu1 %vm19697_vm12, %v19696_v55  ;;  %v17442_v45 = vsel %vm19701_vm5, %v9347_v44, %v9351_v14  ;;  %vm19704_vm3 = vmmov %vm19678_vm0  ;;  %v9367_v44 = vor.u32 %v9366_v15, %v9365_v11  ;;  %v9378_v15 = vrot.slane %v17134_v3, 3 }
 0x525   : > { %19702 = vst [vmem:[#allocation127_spill] sm:$0xff] %v17442_v45  ;;  %13063 = vmatprep.mubr.msk.bf16.mxu1 %vm19704_vm3, %v19703_v50  ;;  %vm19705_vm11 = vmmov %vm19701_vm5  ;;  %v9370_v50 = vrot.slane %v17122_v20, 3  ;;  %v9373_v45 = vrot.slane %v17131_v61, 2 }
 0x526   : > { %v17449_v55 = vsel %vm19705_vm11, %v9351_v14, %v9355_v17  ;;  %vm19707_vm4 = vmmov %vm19701_vm5  ;;  %v9374_v14 = vrot.slane %v17128_v30, 3 }
 0x527   : > { %19706 = vst [vmem:[#allocation47_spill] sm:$0xff] %v17449_v55  ;;  %v17452_v19 = vsel %vm19707_vm4, %v9355_v17, %v9359_v8  ;;  %vm19709_vm7 = vmmov %vm19640_vm2  ;;  %v5621_v17 = vor.u32 %v17393_v13, %v5617_v0  ;;  %v9371_v11 = vor.u32 %v9370_v50, %v9369_v49  ;;  %v9390_v49 = vrot.slane %v17154_v5, 3 }
 0x528   : > { %19708 = vst [vmem:[#allocation128_spill] sm:$0xff] %v17452_v19  ;;  %v5611_v7 = vsel %vm19709_vm7, %v5607_v2, %v5610_v62  ;;  %vm19710_vm1 = vmmov %vm19707_vm4  ;;  %12912 = vmatmul.mubr.msk.bf16.gmra.mrb[48].mxu0 %vm19678_vm0, %v5604_v35  ;;  %v5631_v2 = vrot.slane %v17439_v56, 1  ;;  %v9381_v19 = vrot.slane %v17143_v6, 2  ;;  %v9382_v35 = vrot.slane %v17140_v36, 3 }
 0x529   : > { %v17456_v22 = vsel %vm19710_vm1, %v9359_v8, %v9363_v57  ;;  %vm19712_vm2 = vmmov %vm19710_vm1  ;;  %v9377_v8 = vrot.slane %v17137_v9, 2 }
 0x52a   : > { %19711 = vst [vmem:[#allocation129_spill] sm:$0xff] %v17456_v22  ;;  %v17468_v62 = vsel %vm19712_vm2, %v9363_v57, %v9367_v44  ;;  %vm19714_vm9 = vmmov %vm19678_vm0  ;;  %v9375_v22 = vor.u32 %v9374_v14, %v9373_v45  ;;  %v9386_v57 = vrot.slane %v17146_v4, 3  ;;  %v19719_v45 = vld [vmem:[#allocation48_spill] sm:$0xff]  ;;  %v5628_v14 = vor.u32 %v17420_v38, %v5624_v54 }
 0x52b   : > { %19713 = vst [vmem:[#allocation130_spill] sm:$0xff] %v17468_v62  ;;  %12915 = vmatprep.mubr.msk.bf16.mxu0 %vm19714_vm9, %v5611_v7  ;;  %v9379_v55 = vor.u32 %v9378_v15, %v9377_v8  ;;  %vm19715_vm14 = vmmov %vm19710_vm1  ;;  %v9389_v7 = vrot.slane %v17157_v28, 2  ;;  %v17491_v8 = vld [vmem:[%s15730_s23 + $0x68] sm:$0xff]   ;;  %v9394_v38 = vrot.slane %v17160_v24, 3 }
 0x52c   : > { %v17479_v62 = vsel %vm19715_vm14, %v9367_v44, %v9371_v11  ;;  %vm19717_vm15 = vmmov %vm19710_vm1  ;;  %19722 = vst [vmem:[#allocation48_spill] sm:$0xff] %v17491_v8  ;;  %v17494_v15 = vshll.u32 %v17491_v8, 16  ;;  %v9387_v56 = vor.u32 %v9386_v57, %v9385_v51  ;;  %v17507_v13 = vshrl.u32 %v17491_v8, 16 }
 0x52d   : > { %19716 = vst [vmem:[#allocation131_spill] sm:$0xff] %v17479_v62  ;;  %v17482_v26 = vsel %vm19717_vm15, %v9371_v11, %v9375_v22  ;;  %vm19720_vm8 = vmmov %vm19678_vm0  ;;  %v19726_v11 = vld [vmem:[#allocation49_spill] sm:$0xff]  ;;  %v19286_v62 = vshrl.u32 %v17340_v25, 16  ;;  %v9397_v51 = vrot.slane %v17176_v16, 2  ;;  %v9398_v57 = vrot.slane %v17170_v46, 3 }
 0x52e   : > { %19718 = vst [vmem:[#allocation132_spill] sm:$0xff] %v17482_v26  ;;  %13064 = vmatmul.mubr.msk.bf16.gmra.mrb[12].mxu1 %vm19720_vm8, %v19719_v45  ;;  %vm19721_vm13 = vmmov %vm19698_vm6  ;;  %v5625_v26 = vsel %vm19698_vm6, %v5621_v17, %v5624_v54  ;;  %v9383_v45 = vor.u32 %v9382_v35, %v9381_v19  ;;  %v5635_v19 = vor.u32 %v17460_v60, %v5631_v2 }
 0x52f   : > { %v5618_v50 = vsel %vm19721_vm13, %v5614_v18, %v5617_v0  ;;  %19723 = vst [vmem:[#allocation133_spill] sm:$0xff] %v17494_v15  ;;  %vm19724_vm10 = vmmov %vm19710_vm1  ;;  %v19287_v0 = vshll.u32 %v17340_v25, 16  ;;  %v9391_v18 = vor.u32 %v9390_v49, %v9389_v7  ;;  %v9395_v35 = vor.u32 %v9394_v38, %v9393_v1 }
 0x530   : > { %v17497_v44 = vsel %vm19724_vm10, %v9375_v22, %v9379_v55  ;;  %vm19727_vm12 = vmmov %vm19678_vm0  ;;  %19728 = vst [vmem:[#allocation49_spill] sm:$0xff] %v17507_v13  ;;  %v17509_v22 = vld [vmem:[#allocation2 + $0xa0] ss:$0 sps:$4 sm:$0xff]   ;;  %v9401_v7 = vrot.slane %v17185_v37, 2  ;;  %v9402_v49 = vrot.slane %v17182_v42, 3  ;;  %v9410_v1 = vshrl.u32 %v17366_v29, 16 }
 0x531   : > { %19725 = vst [vmem:[#allocation134_spill] sm:$0xff] %v17497_v44  ;;  %13067 = vmatprep.mubr.msk.bf16.mxu1 %vm19727_vm12, %v19726_v11  ;;  %vm19729_vm5 = vmmov %vm19710_vm1  ;;  %v9406_v38 = vrot.slane %v19287_v0, 3  ;;  %v19738_v44 = vld [vmem:[#allocation50_spill] sm:$0xff]  ;;  %v19745_v0 = vld [vmem:[#allocation51_spill] sm:$0xff] }
 0x532   : > { %v17512_v11 = vsel %vm19729_vm5, %v9379_v55, %v9383_v45  ;;  %vm19731_vm3 = vmmov %vm19710_vm1  ;;  %v5638_v55 = vrot.slane %v17494_v15, 1  ;;  %v9412_v15 = vrot.slane %v9410_v1, 2 }
 0x533   : > { %19730 = vst [vmem:[#allocation135_spill] sm:$0xff] %v17512_v11  ;;  %v17515_v54 = vsel %vm19731_vm3, %v9383_v45, %v9387_v56  ;;  %vm19733_vm11 = vmmov %vm19678_vm0  ;;  %v17531_v45 = vsel %vm19710_vm1, %v9391_v18, %v9395_v35  ;;  %v9422_v11 = vshll.u32 %v17509_v22, 16 }
 0x534   : > { %19732 = vst [vmem:[#allocation136_spill] sm:$0xff] %v17515_v54  ;;  %12916 = vmatmul.mubr.msk.bf16.gmra.mrb[52].mxu0 %vm19733_vm11, %v5618_v50  ;;  %vm19734_vm4 = vmmov %vm19710_vm1  ;;  %v9405_v50 = vrot.slane %v19286_v62, 2  ;;  %v9419_v54 = vshrl.u32 %v17509_v22, 16  ;;  %v17542_v62 = vld [vmem:[%s15730_s23 + $0x70] sm:$0xff]  }
 0x535   : > { %v17521_v17 = vsel %vm19734_vm4, %v9387_v56, %v9391_v18  ;;  %vm19736_vm7 = vmmov %vm19678_vm0  ;;  %19737 = vst [vmem:[#allocation138_spill] sm:$0xff] %v17531_v45  ;;  %v9399_v56 = vor.u32 %v9398_v57, %v9397_v51  ;;  %v17545_v18 = vshll.u32 %v17542_v62, 16  ;;  %v17548_v51 = vshrl.u32 %v17542_v62, 16  ;;  %v17557_v45 = vld [vmem:[%s15730_s23 + $0x78] sm:$0xff]  }
 0x536   : > { %19735 = vst [vmem:[#allocation137_spill] sm:$0xff] %v17521_v17  ;;  %12919 = vmatprep.mubr.msk.bf16.mxu0 %vm19736_vm7, %v5625_v26  ;;  %v9403_v26 = vor.u32 %v9402_v49, %v9401_v7  ;;  %v9413_v17 = vshll.u32 %v17366_v29, 16  ;;  %13068 = vmatmul.mubr.msk.bf16.gmra.mrb[16].mxu1 %vm19678_vm0, %v19738_v44  ;;  %19739 = vst [vmem:[#allocation50_spill] sm:$0xff] %v17542_v62  ;;  %v9407_v7 = vor.u32 %v9406_v38, %v9405_v50 }
 0x537   : > { %19740 = vst [vmem:[#allocation139_spill] sm:$0xff] %v17545_v18  ;;  %19741 = vst [vmem:[#allocation140_spill] sm:$0xff] %v17548_v51  ;;  %v17560_v44 = vshll.u32 %v17557_v45, 16 }
 0x538   : > { %vm19742_vm2 = vmmov %vm19710_vm1  ;;  %19747 = vst [vmem:[#allocation51_spill] sm:$0xff] %v17557_v45  ;;  %v9415_v50 = vrot.slane %v9413_v17, 3 }
 0x539   : > { %v17551_v57 = vsel %vm19742_vm2, %v9395_v35, %v9399_v56  ;;  %vm19744_vm9 = vmmov %vm19698_vm6  ;;  %19748 = vst [vmem:[#allocation142_spill] sm:$0xff] %v17560_v44 }
 0x53a   : > { %19743 = vst [vmem:[#allocation141_spill] sm:$0xff] %v17551_v57  ;;  %v5632_v49 = vsel %vm19744_vm9, %v5628_v14, %v5631_v2  ;;  %vm19746_vm14 = vmmov %vm19678_vm0  ;;  %v9421_v2 = vrot.slane %v9419_v54, 2  ;;  %v9424_v14 = vrot.slane %v9422_v11, 3  ;;  %v9416_v38 = vor.u32 %v9415_v50, %v9412_v15  ;;  %v19760_v54 = vld [vmem:[#allocation52_spill] sm:$0xff]  ;;  %v17584_v15 = vld [vmem:[%s15730_s23 + $0x80] sm:$0xff]  }
 0x53b   : > { %13071 = vmatprep.mubr.msk.bf16.mxu1 %vm19746_vm14, %v19745_v0  ;;  %vm19749_vm15 = vmmov %vm19710_vm1  ;;  %v5645_v0 = vrot.slane %v17545_v18, 1  ;;  %19762 = vst [vmem:[#allocation52_spill] sm:$0xff] %v17584_v15  ;;  %v17597_v50 = vshrl.u32 %v17584_v15, 16 }
 0x53c   : > { %v17563_v8 = vsel %vm19749_vm15, %v9399_v56, %v9403_v26  ;;  %vm19751_vm8 = vmmov %vm19698_vm6  ;;  %v5642_v56 = vor.u32 %v17507_v13, %v5638_v55  ;;  %v9425_v1 = vor.u32 %v9424_v14, %v9421_v2  ;;  %v19770_v2 = vld [vmem:[#allocation59_spill] sm:$0xff]  ;;  %vm19782_vm15 = vcmask 1044480  }
 0x53d   : > { %19750 = vst [vmem:[#allocation143_spill] sm:$0xff] %v17563_v8  ;;  %v5639_v62 = vsel %vm19751_vm8, %v5635_v19, %v5638_v55  ;;  %vm19752_vm13 = vmmov %vm19710_vm1  ;;  %v5649_v19 = vor.u32 %v17548_v51, %v5645_v0  ;;  %v5652_v8 = vrot.slane %v17560_v44, 1  ;;  %v19765_v55 = vld [vmem:[#allocation53_spill] sm:$0xff]  ;;  %v17600_v14 = vshll.u32 %v19770_v2, 16 }
 0x53e   : > { %v17567_v35 = vsel %vm19752_vm13, %v9403_v26, %v9407_v7  ;;  %vm19754_vm10 = vmmov %vm19678_vm0  ;;  %19769 = vst [vmem:[#allocation148_spill] sm:$0xff] %v17597_v50 }
 0x53f   : > { %19753 = vst [vmem:[#allocation144_spill] sm:$0xff] %v17567_v35  ;;  %12920 = vmatmul.mubr.msk.bf16.gmra.mrb[56].mxu0 %vm19754_vm10, %v5632_v49  ;;  %vm19755_vm12 = vmmov %vm19678_vm0  ;;  %v19774_v35 = vld [vmem:[#allocation57_spill] sm:$0xff] }
 0x540   : > { %12923 = vmatprep.mubr.msk.bf16.mxu0 %vm19755_vm12, %v5639_v62  ;;  %vm19756_vm6 = vmmov %vm19710_vm1  ;;  %v17587_v62 = vshll.u32 %v17584_v15, 16  ;;  %19771 = vst [vmem:[#allocation59_spill] sm:$0xff] %v17600_v14  ;;  %vm19788_vm12 = vcmask 1046528  }
 0x541   : > { %v17576_v26 = vsel %vm19756_vm6, %v9407_v7, %v9416_v38  ;;  %vm19758_vm5 = vmmov %vm19710_vm1  ;;  %v17593_v7 = vshrl.u32 %v17557_v45, 16 }
 0x542   : > { %19757 = vst [vmem:[#allocation145_spill] sm:$0xff] %v17576_v26  ;;  %v17579_v11 = vsel %vm19758_vm5, %v9416_v38, %v9425_v1  ;;  %vm19761_vm3 = vmmov %vm19678_vm0  ;;  %v4884_v38 = vld [vmem:[%s15730_s23 + $0x94] sm:$0xf]  ;;  %v5659_v1 = vrot.slane %v17587_v62, 1  ;;  %v10007_v26 = vrot.slane %v17509_v22, 3 }
 0x543   : > { %19759 = vst [vmem:[#allocation146_spill] sm:$0xff] %v17579_v11  ;;  %13072 = vmatmul.mubr.msk.bf16.gmra.mrb[20].mxu1 %vm19761_vm3, %v19760_v54  ;;  %19763 = vst [vmem:[#allocation147_spill] sm:$0xff] %v17587_v62  ;;  %v19296_v11 = vrot.slane %v17366_v29, 3 }
 0x544   : > { %vm19764_vm11 = vmmov %vm19751_vm8  ;;  %19767 = vst [vmem:[#allocation53_spill] sm:$0xff] %v17593_v7 }
 0x545   : > { %v5646_v17 = vsel %vm19764_vm11, %v5642_v56, %v5645_v0  ;;  %vm19766_vm4 = vmmov %vm19678_vm0  ;;  %v5656_v0 = vor.u32 %v17593_v7, %v5652_v8  ;;  %v14652_v56 = vld [vmem:[%s15730_s23 + $0x90] sm:$0xf]  ;;  %v17627_v45 = vsel %vm19782_vm15, %v19296_v11, %v10007_v26  ;;  %v19789_v11 = vld [vmem:[#allocation62_spill] sm:$0xff] }
 0x546   : > { %13075 = vmatprep.mubr.msk.bf16.mxu1 %vm19766_vm4, %v19765_v55  ;;  %vm19768_vm7 = vmmov %vm19751_vm8  ;;  %v17608_v54 = vcombine.low %v14652_v56, %v4884_v38  ;;  %v5666_v55 = vrot.slane %v17600_v14, 1  ;;  %v17621_v38 = vshrl.u32 %v19770_v2, 16  ;;  %v19781_v56 = vld [vmem:[#allocation60_spill] sm:$0xff]  ;;  %v17632_v14 = vld [vmem:[%s15730_s23 + $0x98] sm:$0xf] }
 0x547   : > { %v5653_v49 = vsel %vm19768_vm7, %v5649_v19, %v5652_v8  ;;  %vm19772_vm1 = vmmov %vm19678_vm0  ;;  %v5663_v19 = vor.u32 %v17597_v50, %v5659_v1  ;;  %v19778_v8 = vld [vmem:[#allocation58_spill] sm:$0xff]  ;;  %v5672_v15 = vshll.u32 %v19781_v56, 16  ;;  %v17640_v26 = vcombine.low %v17632_v14, %v17632_v14  ;;  %v19787_v56 = vld [vmem:[#allocation61_spill] sm:$0xff] }
 0x548   : > { %12924 = vmatmul.mubr.msk.bf16.gmra.mrb[60].mxu0 %vm19772_vm1, %v5646_v17  ;;  %19773 = vst [vmem:[#allocation149_spill] sm:$0xff] %v17608_v54  ;;  %vm19775_vm2 = vmmov %vm19678_vm0  ;;  %v19776_v17 = vld [vmem:[#allocation55_spill] sm:$0xff]  ;;  %v5670_v2 = vor.u32 %v17621_v38, %v5666_v55 }
 0x549   : > { %12927 = vmatprep.mubr.msk.bf16.mxu0 %vm19678_vm0, %v5653_v49  ;;  %v5915_v57 = vshll.u32 %v19776_v17, 16  ;;  %vm19777_vm9 = vmmov %vm19768_vm7  ;;  %19780 = vst [vmem:[#allocation57_spill] sm:$0xff] %v17621_v38 }
 0x54a   : > { %v5660_v49 = vsel %vm19777_vm9, %v5656_v0, %v5659_v1  ;;  %vm19779_vm14 = vmmov %vm19678_vm0  ;;  %19783 = vst [vmem:[#allocation55_spill] sm:$0xff] %v17627_v45  ;;  %v5913_v1 = vshrl.u32 %v19776_v17, 16 }
 0x54b   : > { %13076 = vmatmul.mubr.msk.bf16.gmra.mrb[24].mxu1 %vm19775_vm2, %v19774_v35  ;;  %vm19784_vm8 = vmmov %vm19768_vm7  ;;  %v6905_v35 = vrot.slane %v17608_v54, 1  ;;  %v5917_v0 = vrot.slane %v5915_v57, 1 }
 0x54c   : > { %13079 = vmatprep.mubr.msk.bf16.mxu1 %vm19779_vm14, %v19778_v8  ;;  %v5667_v22 = vsel %vm19784_vm8, %v5663_v19, %v5666_v55  ;;  %vm19785_vm13 = vmmov %vm19678_vm0  ;;  %v5674_v8 = vrot.slane %v5672_v15, 1  ;;  %v6907_v15 = vrot.slane %v17640_v26, 1 }
 0x54d   : > { %vm19786_vm10 = vmmov %vm19678_vm0  ;;  %v6906_v19 = vsel %vm19788_vm12, %v19787_v56, %v6905_v35  ;;  %v5918_v45 = vor.u32 %v5917_v0, %v5913_v1 }
 0x54e   : > { %vm19790_vm6 = vmmov %vm19678_vm0 }
 0x54f   : > { %vm19793_vm5 = vmmov %vm19768_vm7 }
 0x550   : > { %12928 = vmatmul.mubr.msk.bf16.gmra.mrb[64].mxu0 %vm19785_vm13, %v5660_v49  ;;  %v19791_v49 = vld [vmem:[#allocation63_spill] sm:$0xff]  ;;  %v5675_v57 = vsel %vm19793_vm5, %v5670_v2, %v5674_v8  ;;  %vm19794_vm3 = vmmov %vm19678_vm0  ;;  %v19800_v2 = vld [vmem:[#allocation64_spill] sm:$0xff]  ;;  %v5935_v8 = vrot.slane %v17082_v58, 1  ;;  %vm19806_vm13 = vcmask 1043456  }
 0x551   : > { %12931 = vmatprep.mubr.msk.bf16.mxu0 %vm19786_vm10, %v5667_v22  ;;  %v19792_v29 = vshll.u32 %v19791_v49, 16  ;;  %vm19795_vm11 = vmmov %vm19678_vm0  ;;  %v5928_v22 = vrot.slane %v17076_v34, 1  ;;  %v19799_v1 = vshrl.u32 %v19791_v49, 16  ;;  %v7471_v56 = vsel %vm19806_vm13, %v17317_v33, 0  ;;  %v19807_v58 = vld [vmem:[#allocation65_spill] sm:$0xff] }
 0x552   : > { %vm19796_vm4 = vmmov %vm19793_vm5 }
 0x553   : > { %13080 = vmatmul.mubr.msk.bf16.gmra.mrb[28].mxu1 %vm19790_vm6, %v19789_v11  ;;  %v5921_v17 = vrot.slane %v19792_v29, 1  ;;  %vm19797_vm7 = vmmov %vm19678_vm0  ;;  %v5932_v29 = vor.u32 %v17079_v47, %v5928_v22  ;;  %v5939_v47 = vor.u32 %v17085_v59, %v5935_v8 }
 0x554   : > { %13083 = vmatprep.mubr.msk.bf16.mxu1 %vm19794_vm3, %v6906_v19  ;;  %vm19798_vm1 = vmmov %vm19788_vm12  ;;  %v17674_v19 = vld [vmem:[%s19065_s6 + $0x10] sm:$0xf] }
 0x555   : > { %v5922_v55 = vsel %vm19796_vm4, %v5918_v45, %v5921_v17  ;;  %v6908_v11 = vsel %vm19798_vm1, %v6905_v35, %v6907_v15  ;;  %v5925_v0 = vor.u32 %v19799_v1, %v5921_v17  ;;  %vm19801_vm2 = vmmov %vm19678_vm0  ;;  %v5942_v35 = vrot.slane %v17088_v39, 1  ;;  %v19809_v17 = vld [vmem:[#allocation66_spill] sm:$0xff]  ;;  %v19816_v15 = vld [vmem:[#allocation67_spill] sm:$0xff] }
 0x556   : > { %vm19802_vm9 = vmmov %vm19796_vm4  ;;  %v5949_v39 = vrot.slane %v19692_v23, 1  ;;  %v5970_v1 = vrot.slane %v17116_v41, 1 }
 0x557   : > { %v5929_v45 = vsel %vm19802_vm9, %v5925_v0, %v5928_v22  ;;  %vm19803_vm14 = vmmov %vm19678_vm0  ;;  %v5946_v49 = vor.u32 %v17091_v53, %v5942_v35  ;;  %v5963_v22 = vrot.slane %v17108_v27, 1  ;;  %v19824_v0 = vld [vmem:[#allocation69_spill] sm:$0xff]  ;;  %v5977_v27 = vrot.slane %v17122_v20, 1 }
 0x558   : > { %12932 = vmatmul.mubr.msk.bf16.gmra.mrb[68].mxu0 %vm19795_vm11, %v5675_v57  ;;  %vm19804_vm15 = vmmov %vm19796_vm4  ;;  %v5956_v57 = vrot.slane %v17102_v40, 1  ;;  %v5953_v53 = vor.u32 %v17097_v31, %v5949_v39  ;;  %v5991_v20 = vrot.slane %v17134_v3, 1  ;;  %v6005_v3 = vrot.slane %v17146_v4, 1 }
 0x559   : > { %12937 = vmatprep.mubr.msk.bf16.mxu0 %vm19797_vm7, %v5922_v55  ;;  %v5936_v34 = vsel %vm19804_vm15, %v5932_v29, %v5935_v8  ;;  %vm19805_vm8 = vmmov %vm19678_vm0  ;;  %v19818_v55 = vld [vmem:[#allocation68_spill] sm:$0xff]  ;;  %v5967_v31 = vor.u32 %v19695_v21, %v5963_v22  ;;  %v19826_v29 = vld [vmem:[#allocation70_spill] sm:$0xff]  ;;  %v5984_v8 = vrot.slane %v17128_v30, 1  ;;  %v5981_v21 = vor.u32 %v17125_v10, %v5977_v27 }
 0x55a   : > { %vm19808_vm10 = vmmov %vm19678_vm0  ;;  %v5960_v23 = vor.u32 %v17105_v52, %v5956_v57  ;;  %v5974_v52 = vor.u32 %v17119_v43, %v5970_v1  ;;  %v5995_v10 = vor.u32 %v17137_v9, %v5991_v20  ;;  %v6009_v9 = vor.u32 %v17149_v12, %v6005_v3 }
 0x55b   : > { %13084 = vmatmul.mubr.msk.bf16.gmra.mrb[32].mxu1 %vm19678_vm0, %v6908_v11  ;;  %vm19810_vm12 = vmmov %vm19678_vm0  ;;  %v5988_v43 = vor.u32 %v17131_v61, %v5984_v8  ;;  %v6019_v4 = vrot.slane %v17160_v24, 1  ;;  %v6033_v24 = vrot.slane %v17182_v42, 1 }
 0x55c   : > { %13089 = vmatprep.mubr.msk.bf16.mxu1 %vm19801_vm2, %v19800_v2  ;;  %vm19811_vm6 = vmmov %vm19806_vm13 }
 0x55d   : > { %vm19812_vm5 = vmmov %vm19796_vm4  ;;  %v6023_v12 = vor.u32 %v17167_v63, %v6019_v4  ;;  %v7101_v63 = vrot.slane %v17340_v25, 1 }
 0x55e   : > { %v5943_v59 = vsel %vm19812_vm5, %v5939_v47, %v5942_v35  ;;  %vm19813_vm3 = vmmov %vm19678_vm0  ;;  %v19839_v47 = vld [vmem:[#allocation74_spill] sm:$0xff] }
 0x55f   : > { %vm19814_vm11 = vmmov %vm19796_vm4 }
 0x560   : > { %12938 = vmatmul.mubr.msk.bf16.vlgmr.msra.gmra.mrb[36].mxu0 %vm19803_vm14, %v5929_v45  ;;  %v5950_v33 = vsel %vm19814_vm11, %v5946_v49, %v5949_v39  ;;  %vm19815_vm4 = vmmov %vm19678_vm0  ;;  %v19832_v45 = vld [vmem:[#allocation71_spill] sm:$0xff]  ;;  %v19847_v39 = vld [vmem:[#allocation81_spill] sm:$0xff] }
 0x561   : > { %12941 = vmatprep.mubr.msk.bf16.mxu0 %vm19805_vm8, %v5936_v34  ;;  %vm19817_vm7 = vmmov %vm19678_vm0  ;;  %v19834_v34 = vld [vmem:[#allocation72_spill] sm:$0xff] }
 0x562   : > { %vm19819_vm1 = vmmov %vm19678_vm0 }
 0x563   : > { %13090 = vmatmul.mubr.msk.bf16.vlgmr.msra.gmra.mrb[0].mxu1 %vm19808_vm10, %v19807_v58  ;;  %vm19820_vm0 = vmmov %vm19812_vm5  ;;  %v19841_v58 = vld [vmem:[#allocation79_spill] sm:$0xff] }
 0x564   : > { %13093 = vmatprep.mubr.msk.bf16.mxu1 %vm19810_vm12, %v19809_v17  ;;  %13126 = vmatpush3.bf16.msra.mxu1 %v7471_v56  ;;  %v5957_v11 = vsel %vm19820_vm0, %v5953_v53, %v5956_v57  ;;  %vm19821_vm2 = vmmov %vm19819_vm1  ;;  %v5998_v56 = vrot.slane %v17140_v36, 1  ;;  %v6012_v17 = vrot.slane %v17154_v5, 1  ;;  %v6026_v57 = vrot.slane %v17170_v46, 1  ;;  %v19855_v53 = vld [vmem:[#allocation83_spill] sm:$0xff] }
 0x565   : > { %14481 = vmatprep.subr.msk.bf16.mxu1 %vm19811_vm6, %v17674_v19  ;;  %vm19822_vm9 = vmmov %vm19820_vm0 }
 0x566   : > { %v5964_v40 = vsel %vm19822_vm9, %v5960_v23, %v5963_v22  ;;  %vm19823_vm14 = vmmov %vm19819_vm1  ;;  %v6002_v61 = vor.u32 %v17143_v6, %v5998_v56  ;;  %v6016_v6 = vor.u32 %v17157_v28, %v6012_v17  ;;  %v6030_v28 = vor.u32 %v17176_v16, %v6026_v57  ;;  %v19859_v23 = vld [vmem:[#allocation73_spill] sm:$0xff]  ;;  %v19863_v22 = vld [vmem:[#allocation75_spill] sm:$0xff] }
 0x567   : > { %vm19825_vm15 = vmmov %vm19819_vm1 }
 0x568   : > { %12942 = vmatmul.mubr.msk.bf16.gmra.mrb[40].mxu0 %vm19813_vm3, %v5943_v59  ;;  %vm19827_vm8 = vmmov %vm19819_vm1  ;;  %v19849_v59 = vld [vmem:[#allocation82_spill] sm:$0xff] }
 0x569   : > { %12945 = vmatprep.mubr.msk.bf16.mxu0 %vm19815_vm4, %v5950_v33  ;;  %vm19828_vm13 = vmmov %vm19820_vm0 }
 0x56a   : > { %v5971_v2 = vsel %vm19828_vm13, %v5967_v31, %v5970_v1  ;;  %vm19829_vm10 = vmmov %vm19819_vm1  ;;  %v19866_v1 = vld [vmem:[#allocation80_spill] sm:$0xff]  ;;  %v19867_v31 = vld [vmem:[#allocation77_spill] sm:$0xff] }
 0x56b   : > { %13094 = vmatmul.mubr.msk.bf16.gmra.mrb[4].mxu1 %vm19817_vm7, %v19816_v15  ;;  %vm19830_vm12 = vmmov %vm19820_vm0  ;;  %v7334_v42 = vrot.slane %v19866_v1, 1 }
 0x56c   : > { %13097 = vmatprep.mubr.msk.bf16.mxu1 %vm19819_vm1, %v19818_v55  ;;  %v5978_v41 = vsel %vm19830_vm12, %v5974_v52, %v5977_v27  ;;  %vm19831_vm6 = vmmov %vm19819_vm1  ;;  %v6039_v55 = vshll.u32 %v19859_v23, 16  ;;  %v6037_v52 = vor.u32 %v17185_v37, %v6033_v24  ;;  %v19868_v27 = vld [vmem:[#allocation113_spill] sm:$0xff] }
 0x56d   : > { %vm19833_vm5 = vmmov %vm19819_vm1  ;;  %v19876_v37 = vld [vmem:[#allocation85_spill] sm:$0xff] }
 0x56e   : > { %vm19835_vm3 = vmmov %vm19819_vm1 }
 0x56f   : > { %vm19836_vm11 = vmmov %vm19820_vm0 }
 0x570   : > { %12946 = vmatmul.mubr.msk.bf16.gmra.mrb[44].mxu0 %vm19821_vm2, %v5957_v11  ;;  %v5985_v35 = vsel %vm19836_vm11, %v5981_v21, %v5984_v8  ;;  %vm19837_vm4 = vmmov %vm19819_vm1  ;;  %v19864_v11 = vshrl.u32 %v19863_v22, 16  ;;  %v19871_v8 = vld [vmem:[#allocation76_spill] sm:$0xff] }
 0x571   : > { %12949 = vmatprep.mubr.msk.bf16.mxu0 %vm19823_vm14, %v5964_v40  ;;  %vm19838_vm7 = vmmov %vm19820_vm0  ;;  %v19865_v40 = vshll.u32 %v19863_v22, 16 }
 0x572   : > { %v5992_v30 = vsel %vm19838_vm7, %v5988_v43, %v5991_v20  ;;  %vm19840_vm0 = vmmov %vm19819_vm1  ;;  %v7331_v16 = vrot.slane %v19864_v11, 1 }
 0x573   : > { %13098 = vmatmul.mubr.msk.bf16.gmra.mrb[8].mxu1 %vm19825_vm15, %v19824_v0  ;;  %vm19842_vm2 = vmmov %vm19840_vm0  ;;  %v7335_v0 = vrot.slane %v19867_v31, 2 }
 0x574   : > { %13101 = vmatprep.mubr.msk.bf16.mxu1 %vm19827_vm8, %v19826_v29  ;;  %vm19843_vm9 = vmmov %vm19838_vm7  ;;  %v6041_v29 = vrot.slane %v6039_v55, 1  ;;  %v19894_v55 = vld [vmem:[#allocation116_spill] sm:$0xff] }
 0x575   : > { %v5999_v49 = vsel %vm19843_vm9, %v5995_v10, %v5998_v56  ;;  %vm19844_vm14 = vmmov %vm19840_vm0  ;;  %v7336_v43 = vor.u32 %v7335_v0, %v7334_v42 }
 0x576   : > { %vm19845_vm15 = vmmov %vm19838_vm7 }
 0x577   : > { %v6006_v36 = vsel %vm19845_vm15, %v6002_v61, %v6005_v3  ;;  %vm19846_vm8 = vmmov %vm19840_vm0 }
 0x578   : > { %12950 = vmatmul.mubr.msk.bf16.gmra.mrb[48].mxu0 %vm19829_vm10, %v5971_v2  ;;  %vm19848_vm13 = vmmov %vm19840_vm0  ;;  %v17771_v2 = vcombine.low %v19868_v27, %v19868_v27  ;;  %v7362_v27 = vrot.slane %v17381_v48, 1 }
 0x579   : > { %12953 = vmatprep.mubr.msk.bf16.mxu0 %vm19831_vm6, %v5978_v41  ;;  %vm19850_vm10 = vmmov %vm19840_vm0  ;;  %v19869_v41 = vld [vmem:[#allocation84_spill] sm:$0xff] }
 0x57a   : > { %vm19851_vm12 = vmmov %vm19838_vm7  ;;  %v7103_v20 = vrot.slane %v17771_v2, 1 }
 0x57b   : > { %13102 = vmatmul.mubr.msk.bf16.gmra.mrb[12].mxu1 %vm19833_vm5, %v19832_v45  ;;  %v6013_v33 = vsel %vm19851_vm12, %v6009_v9, %v6012_v17  ;;  %vm19852_vm6 = vmmov %vm19840_vm0 }
 0x57c   : > { %13105 = vmatprep.mubr.msk.bf16.mxu1 %vm19835_vm3, %v19834_v34  ;;  %vm19853_vm5 = vmmov %vm19838_vm7 }
 0x57d   : > { %v6020_v5 = vsel %vm19853_vm5, %v6016_v6, %v6019_v4  ;;  %vm19854_vm3 = vmmov %vm19840_vm0 }
 0x57e   : > { %vm19856_vm11 = vmmov %vm19840_vm0 }
 0x57f   : > { %vm19858_vm7 = vmmov %vm19853_vm5 }
 0x580   : > { %12954 = vmatmul.mubr.msk.bf16.gmra.mrb[52].mxu0 %vm19837_vm4, %v5985_v35  ;;  %vm19857_vm4 = vmmov %vm19840_vm0  ;;  %v6027_v15 = vsel %vm19858_vm7, %v6023_v12, %v6026_v57  ;;  %v7338_v35 = vrot.slane %v19876_v37, 1  ;;  %v19889_v57 = vld [vmem:[#allocation43_spill] sm:$0xff] }
 0x581   : > { %12957 = vmatprep.mubr.msk.bf16.mxu0 %vm19819_vm1, %v5992_v30  ;;  %vm19860_vm1 = vmmov %vm19840_vm0  ;;  %v19877_v30 = vld [vmem:[#allocation78_spill] sm:$0xff]  ;;  %v7350_v12 = vrot.slane %v19889_v57, 1 }
 0x582   : > { %vm19870_vm9 = vmmov %vm19860_vm1  ;;  %v7339_v56 = vrot.slane %v19877_v30, 2 }
 0x583   : > { %13106 = vmatmul.mubr.msk.bf16.gmra.mrb[16].mxu1 %vm19840_vm0, %v19839_v47  ;;  %vm19861_vm0 = vmmov %vm19853_vm5  ;;  %v19879_v47 = vld [vmem:[#allocation87_spill] sm:$0xff] }
 0x584   : > { %13109 = vmatprep.mubr.msk.bf16.mxu1 %vm19842_vm2, %v19841_v58  ;;  %v6034_v46 = vsel %vm19861_vm0, %v6030_v28, %v6033_v24  ;;  %vm19862_vm2 = vmmov %vm19860_vm1  ;;  %v7342_v61 = vrot.slane %v19879_v47, 1  ;;  %v19880_v58 = vld [vmem:[#allocation86_spill] sm:$0xff]  ;;  %v17800_v24 = vld [vmem:[%s19066_s7 + $0x14] sm:$0xf] }
 0x585   : > { %vm19873_vm15 = vmmov %vm19860_vm1  ;;  %v7343_v3 = vrot.slane %v19880_v58, 2 }
 0x586   : > { %vm19883_vm5 = vmmov %vm19860_vm1 }
 0x587   : > { %v7344_v17 = vor.u32 %v7343_v3, %v7342_v61  ;;  %vm19891_vm7 = vmmov %vm19860_vm1  ;;  %v19909_v61 = vld [vmem:[#allocation126_spill] sm:$0xff] }
 0x588   : > { %12958 = vmatmul.mubr.msk.bf16.gmra.mrb[56].mxu0 %vm19844_vm14, %v5999_v49  ;;  %vm19872_vm14 = vcmask 1046528   ;;  %v7370_v3 = vrot.slane %v19909_v61, 1 }
 0x589   : > { %12961 = vmatprep.mubr.msk.bf16.mxu0 %vm19846_vm8, %v6006_v36  ;;  %v7102_v21 = vsel %vm19872_vm14, %v19871_v8, %v7101_v63  ;;  %vm19874_vm8 = vmmov %vm19861_vm0  ;;  %v7340_v36 = vor.u32 %v7339_v56, %v7338_v35 }
 0x58a   : > { %v6042_v34 = vsel %vm19874_vm8, %v6037_v52, %v6041_v29  ;;  %vm19881_vm12 = vmmov %vm19872_vm14 }
 0x58b   : > { %13110 = vmatmul.mubr.msk.bf16.gmra.mrb[20].mxu1 %vm19848_vm13, %v19847_v39  ;;  %vm19875_vm13 = vmmov %vm19860_vm1  ;;  %v7104_v49 = vsel %vm19881_vm12, %v7101_v63, %v7103_v20  ;;  %v19885_v39 = vld [vmem:[#allocation42_spill] sm:$0xff]  ;;  %v19895_v63 = vld [vmem:[#allocation111_spill] sm:$0xff] }
 0x58c   : > { %13113 = vmatprep.mubr.msk.bf16.mxu1 %vm19850_vm10, %v19849_v59  ;;  %vm19878_vm10 = vsmask.f32 6400  ;;  %v7346_v6 = vrot.slane %v19885_v39, 1  ;;  %v19886_v59 = vld [vmem:[#allocation102_spill] sm:$0xff]  ;;  %v7355_v22 = vrot.slane %v19895_v63, 2  ;;  %vm19899_vm14 = vmmov %vm19860_vm1 }
 0x58d   : > { %v7347_v4 = vrot.slane %v19886_v59, 2  ;;  %vm19907_vm12 = vmmov %vm19860_vm1 }
 0x590   : > { %12962 = vmatmul.mubr.msk.bf16.gmra.mrb[60].mxu0 %vm19852_vm6, %v6013_v33  ;;  %vm19882_vm6 = vmmov %vm19860_vm1 }
 0x591   : > { %12965 = vmatprep.mubr.msk.bf16.mxu0 %vm19854_vm3, %v6020_v5  ;;  %vm19884_vm3 = vmmov %vm19878_vm10 }
 0x592   : > { %v7341_v9 = vsel %vm19884_vm3, %v7336_v43, %v7340_v36 }
 0x593   : > { %13114 = vmatmul.mubr.msk.bf16.gmra.mrb[24].mxu1 %vm19856_vm11, %v19855_v53  ;;  %vm19887_vm11 = vmmov %vm19884_vm3  ;;  %v19890_v53 = vld [vmem:[#allocation109_spill] sm:$0xff] }
 0x594   : > { %13117 = vmatprep.mubr.msk.bf16.mxu1 %vm19857_vm4, %v17038_v32  ;;  %v7332_v32 = vrot.slane %v19865_v40, 2  ;;  %v7345_v33 = vsel %vm19887_vm11, %v7340_v36, %v7344_v17  ;;  %vm19888_vm4 = vcmask 1043456   ;;  %v7351_v28 = vrot.slane %v19890_v53, 2  ;;  %vm19914_vm11 = vmmov %vm19860_vm1 }
 0x595   : > { %v7790_v5 = vsel %vm19888_vm4, %v17674_v19, 0  ;;  %vm19892_vm0 = vmmov %vm19888_vm4 }
 0x596   : > { %v7333_v45 = vor.u32 %v7332_v32, %v7331_v16  ;;  %v7352_v23 = vor.u32 %v7351_v28, %v7350_v12  ;;  %v19897_v16 = vld [vmem:[#allocation120_spill] sm:$0xff]  ;;  %v19898_v32 = vld [vmem:[#allocation115_spill] sm:$0xff]  ;;  %v7378_v28 = vrot.slane %v17507_v13, 1 }
 0x597   : > { %v7358_v40 = vrot.slane %v19897_v16, 1  ;;  %v7359_v42 = vrot.slane %v19898_v32, 2 }
 0x598   : > { %12966 = vmatmul.mubr.msk.bf16.gmra.mrb[64].mxu0 %vm19860_vm1, %v6027_v15  ;;  %v7337_v10 = vsel %vm19878_vm10, %v7333_v45, %v7336_v43  ;;  %v7348_v15 = vor.u32 %v7347_v4, %v7346_v6  ;;  %v19904_v45 = vld [vmem:[#allocation45_spill] sm:$0xff]  ;;  %vm19906_vm10 = vmmov %vm19860_vm1  ;;  %v19912_v6 = vld [vmem:[#allocation46_spill] sm:$0xff] }
 0x599   : > { %12969 = vmatprep.mubr.msk.bf16.mxu0 %vm19862_vm2, %v6034_v46  ;;  %vm19893_vm2 = vmmov %vm19884_vm3  ;;  %v7354_v46 = vrot.slane %v19894_v55, 1  ;;  %v7360_v52 = vor.u32 %v7359_v42, %v7358_v40  ;;  %v7366_v43 = vrot.slane %v19904_v45, 1  ;;  %v7375_v4 = vrot.slane %v19912_v6, 2 }
 0x59a   : > { %v7349_v19 = vsel %vm19893_vm2, %v7344_v17, %v7348_v15  ;;  %vm19901_vm8 = vmmov %vm19893_vm2 }
 0x59b   : > { %13118 = vmatmul.mubr.msk.bf16.gmra.mrb[28].mxu1 %vm19870_vm9, %v19869_v41  ;;  %vm19896_vm9 = vmmov %vm19893_vm2  ;;  %v7356_v0 = vor.u32 %v7355_v22, %v7354_v46  ;;  %v19902_v41 = vld [vmem:[#allocation118_spill] sm:$0xff]  ;;  %v7382_v46 = vrot.slane %v17548_v51, 1  ;;  %v7383_v22 = vrot.slane %v17545_v18, 2 }
 0x59c   : > { %13121 = vmatprep.mubr.msk.bf16.mxu1 %vm19873_vm15, %v7102_v21  ;;  %v7353_v11 = vsel %vm19896_vm9, %v7348_v15, %v7352_v23  ;;  %vm19900_vm15 = vmmov %vm19860_vm1  ;;  %v7363_v8 = vrot.slane %v19902_v41, 2  ;;  %v19916_v15 = vld [vmem:[#allocation133_spill] sm:$0xff]  ;;  %v18227_v18 = vld [vmem:[#allocation2 + $0x80] sm:$0xff]  }
 0x59d   : > { %v7357_v29 = vsel %vm19901_vm8, %v7352_v23, %v7356_v0  ;;  %vm19913_vm3 = vmmov %vm19860_vm1  ;;  %v7379_v23 = vrot.slane %v19916_v15, 2  ;;  %v7384_v40 = vor.u32 %v7383_v22, %v7382_v46 }
 0x59e   : > { %v7364_v35 = vor.u32 %v7363_v8, %v7362_v27  ;;  %vm19915_vm4 = vmmov %vm19893_vm2  ;;  %v7390_v27 = vrot.slane %v17597_v50, 1  ;;  %v7391_v8 = vrot.slane %v17587_v62, 2  ;;  %v18195_v62 = vld [vmem:[#allocation2 + $0x60] sm:$0xff]   ;;  %v18208_v50 = vld [vmem:[#allocation2 + $0x68] sm:$0xff]  }
 0x59f   : > { %vm19919_vm9 = vmmov %vm19893_vm2 }
 0x5a0   : > { %12970 = vmatmul.mubr.msk.bf16.gmra.mrb[68].mxu0 %vm19875_vm13, %v6042_v34  ;;  %vm19903_vm13 = vmmov %vm19893_vm2  ;;  %v19905_v34 = vld [vmem:[#allocation122_spill] sm:$0xff] }
 0x5a1   : > { %v7361_v21 = vsel %vm19903_vm13, %v7356_v0, %v7360_v52  ;;  %v7367_v20 = vrot.slane %v19905_v34, 2  ;;  %v7386_v0 = vrot.slane %v17593_v7, 1  ;;  %vm19922_vm8 = vmmov %vm19893_vm2  ;;  %v18224_v7 = vld [vmem:[#allocation2 + $0x78] sm:$0xff]  }
 0x5a2   : > { %vm19924_vm13 = vmmov %vm19893_vm2 }
 0x5a3   : > { %13122 = vmatmul.mubr.msk.bf16.gmra.mrb[32].mxu1 %vm19882_vm6, %v7104_v49  ;;  %v7368_v56 = vor.u32 %v7367_v20, %v7366_v43  ;;  %vm19908_vm6 = vmmov %vm19893_vm2  ;;  %v19910_v49 = vld [vmem:[#allocation124_spill] sm:$0xff]  ;;  %v7392_v43 = vor.u32 %v7391_v8, %v7390_v27  ;;  %v19300_v20 = vshrl.u32 %v17608_v54, 16  ;;  %v19941_v8 = vld [vmem:[#allocation93_spill] sm:$0xff] }
 0x5a4   : > { %13127 = vmatprep.mubr.msk.bf16.mxu1 %vm19883_vm5, %v7337_v10  ;;  %v7365_v10 = vsel %vm19908_vm6, %v7360_v52, %v7364_v35  ;;  %v7371_v36 = vrot.slane %v19910_v49, 2  ;;  %vm19911_vm5 = vmmov %vm19893_vm2  ;;  %v7387_v52 = vrot.slane %v17560_v44, 2  ;;  %v19938_v27 = vld [vmem:[#allocation92_spill] sm:$0xff] }
 0x5a5   : > { %v7369_v17 = vsel %vm19911_vm5, %v7364_v35, %v7368_v56  ;;  %v19299_v35 = vshll.u32 %v17608_v54, 16  ;;  %vm19927_vm6 = vmmov %vm19893_vm2  ;;  %v18211_v44 = vld [vmem:[#allocation2 + $0x70] sm:$0xff]  }
 0x5a6   : > { %vm19928_vm5 = vmmov %vm19893_vm2 }
 0x5ab   : > { %13128 = vmatmul.mubr.msk.bf16.vlgmr.msra.gmra.mrb[0].mxu1 %vm19891_vm7, %v7341_v9  ;;  %v7374_v9 = vrot.slane %v17460_v60, 1  ;;  %vm19917_vm7 = vmmov %vm19893_vm2 }
 0x5ac   : > { %13131 = vmatprep.mubr.msk.bf16.mxu1 %vm19860_vm1, %v7345_v33  ;;  %13164 = vmatpush3.bf16.msra.mxu1 %v7790_v5  ;;  %v7372_v33 = vor.u32 %v7371_v36, %v7370_v3  ;;  %v19923_v3 = vld [vmem:[#allocation59_spill] sm:$0xff] }
 0x5ad   : > { %14482 = vmatprep.subr.msk.bf16.mxu1 %vm19892_vm0, %v17800_v24  ;;  %v7376_v5 = vor.u32 %v7375_v4, %v7374_v9  ;;  %vm19918_vm0 = vmmov %vm19860_vm1  ;;  %v7395_v36 = vrot.slane %v19923_v3, 2  ;;  %v7401_v9 = vrot.slane %v19300_v20, 1  ;;  %v7404_v4 = vrot.slane %v19299_v35, 2  ;;  %v18179_v3 = vld [vmem:[#allocation2 + $0x50] sm:$0xff]  }
 0x5ae   : > { %v7373_v12 = vsel %vm19915_vm4, %v7368_v56, %v7372_v33  ;;  %vm19931_vm4 = vmmov %vm19893_vm2 }
 0x5b3   : > { %13132 = vmatmul.mubr.msk.bf16.gmra.mrb[4].mxu1 %vm19899_vm14, %v7349_v19  ;;  %v7377_v19 = vsel %vm19917_vm7, %v7372_v33, %v7376_v5  ;;  %vm19920_vm14 = vmmov %vm19918_vm0 }
 0x5b4   : > { %13135 = vmatprep.mubr.msk.bf16.mxu1 %vm19900_vm15, %v7353_v11  ;;  %v7380_v11 = vor.u32 %v7379_v23, %v7378_v28  ;;  %vm19921_vm15 = vmmov %vm19918_vm0  ;;  %v7405_v28 = vor.u32 %v7404_v4, %v7401_v9  ;;  %v19957_v9 = vld [vmem:[#allocation101_spill] sm:$0xff]  ;;  %v19959_v4 = vld [vmem:[#allocation103_spill] sm:$0xff] }
 0x5b5   : > { %vm19932_vm7 = vmmov %vm19918_vm0 }
 0x5b6   : > { %v7381_v42 = vsel %vm19893_vm2, %v7376_v5, %v7380_v11  ;;  %v7408_v5 = vshrl.u32 %v17640_v26, 16 }
 0x5bb   : > { %13136 = vmatmul.mubr.msk.bf16.gmra.mrb[8].mxu1 %vm19906_vm10, %v7357_v29  ;;  %v7385_v29 = vsel %vm19919_vm9, %v7380_v11, %v7384_v40  ;;  %vm19925_vm10 = vmmov %vm19918_vm0 }
 0x5bc   : > { %13139 = vmatprep.mubr.msk.bf16.mxu1 %vm19907_vm12, %v7361_v21  ;;  %v7388_v21 = vor.u32 %v7387_v52, %v7386_v0  ;;  %vm19926_vm12 = vmmov %vm19918_vm0  ;;  %v11668_v52 = vld [vmem:[%s19065_s6 + $0x14] sm:$0xf] }
 0x5be   : > { %v7389_v56 = vsel %vm19922_vm8, %v7384_v40, %v7388_v21 }
 0x5c3   : > { %13140 = vmatmul.mubr.msk.bf16.gmra.mrb[12].mxu1 %vm19913_vm3, %v7365_v10  ;;  %v7394_v10 = vrot.slane %v17621_v38, 1  ;;  %vm19929_vm3 = vmmov %vm19918_vm0  ;;  %v18192_v38 = vld [vmem:[#allocation2 + $0x58] sm:$0xff]  }
 0x5c4   : > { %13143 = vmatprep.mubr.msk.bf16.mxu1 %vm19914_vm11, %v7369_v17  ;;  %v7393_v17 = vsel %vm19924_vm13, %v7388_v21, %v7392_v43  ;;  %vm19930_vm11 = vmmov %vm19918_vm0  ;;  %v19943_v21 = vld [vmem:[#allocation94_spill] sm:$0xff] }
 0x5c5   : > { %v7396_v33 = vor.u32 %v7395_v36, %v7394_v10  ;;  %v19951_v10 = vld [vmem:[#allocation98_spill] sm:$0xff]  ;;  %v19953_v36 = vld [vmem:[#allocation99_spill] sm:$0xff] }
 0x5c6   : > { %20095 = vst [vmem:[#allocation98_spill] sm:$0xff] %v18208_v50  ;;  %20096 = vst [vmem:[#allocation99_spill] sm:$0xff] %v18211_v44 }
 0x5c7   : > { %v7397_v23 = vsel %vm19927_vm6, %v7392_v43, %v7396_v33  ;;  %v7406_v22 = vsel %vm19928_vm5, %v7396_v33, %v7405_v28  ;;  %v19947_v43 = vld [vmem:[#allocation96_spill] sm:$0xff] }
 0x5c8   : > { %v19961_v33 = vld [vmem:[#allocation104_spill] sm:$0xff]  ;;  %20089 = vst [vmem:[#allocation96_spill] sm:$0xff] %v18192_v38 }
 0x5cb   : > { %13144 = vmatmul.mubr.msk.bf16.gmra.mrb[16].mxu1 %vm19860_vm1, %v7373_v12  ;;  %v7411_v12 = vshll.u32 %v17640_v26, 16  ;;  %vm19934_vm1 = vmmov %vm19918_vm0 }
 0x5cc   : > { %13147 = vmatprep.mubr.msk.bf16.mxu1 %vm19918_vm0, %v7377_v19  ;;  %v7410_v19 = vrot.slane %v7408_v5, 1  ;;  %vm19935_vm0 = vcmask 1043456   ;;  %vm19937_vm2 = vmmov %vm19934_vm1  ;;  %v19963_v5 = vshrl.u32 %v17340_v25, 16 }
 0x5cd   : > { %v7413_v46 = vrot.slane %v7411_v12, 2  ;;  %v8101_v0 = vsel %vm19935_vm0, %v17800_v24, 0  ;;  %vm19939_vm9 = vmmov %vm19934_vm1  ;;  %v19945_v24 = vld [vmem:[#allocation95_spill] sm:$0xff] }
 0x5ce   : > { %vm19944_vm8 = vmmov %vm19934_vm1  ;;  %v7720_v12 = vrot.slane %v19963_v5, 1  ;;  %20084 = vst [vmem:[#allocation95_spill] sm:$0xff] %v18179_v3 }
 0x5cf   : > { %v7414_v11 = vor.u32 %v7413_v46, %v7410_v19  ;;  %vm19946_vm13 = vmmov %vm19934_vm1  ;;  %v19965_v19 = vld [vmem:[#allocation106_spill] sm:$0xff]  ;;  %v7727_v46 = vshrl.u32 %v17771_v2, 16 }
 0x5d0   : > { %vm19952_vm6 = vmmov %vm19934_vm1 }
 0x5d1   : > { %v7415_v40 = vsel %vm19931_vm4, %v7405_v28, %v7414_v11  ;;  %vm19954_vm5 = vmmov %vm19934_vm1  ;;  %v19964_v28 = vshll.u32 %v17340_v25, 16 }
 0x5d2   : > { %vm19960_vm4 = vmmov %vm19934_vm1 }
 0x5d3   : > { %13148 = vmatmul.mubr.msk.bf16.gmra.mrb[20].mxu1 %vm19920_vm14, %v7381_v42  ;;  %v19933_v42 = vld [vmem:[#allocation90_spill] sm:$0xff]  ;;  %vm19940_vm14 = vmmov %vm19935_vm0 }
 0x5d4   : > { %13151 = vmatprep.mubr.msk.bf16.mxu1 %vm19921_vm15, %v7385_v29  ;;  %v19936_v29 = vld [vmem:[#allocation91_spill] sm:$0xff]  ;;  %vm19942_vm15 = vmmov %vm19934_vm1 }
 0x5d5   : > { %vm19967_vm0 = vmmov %vm19934_vm1 }
 0x5db   : > { %13152 = vmatmul.mubr.msk.bf16.gmra.mrb[24].mxu1 %vm19925_vm10, %v7389_v56  ;;  %vm19948_vm10 = vmmov %vm19934_vm1  ;;  %v19949_v56 = vld [vmem:[#allocation97_spill] sm:$0xff] }
 0x5dc   : > { %13155 = vmatprep.mubr.msk.bf16.mxu1 %vm19926_vm12, %v7393_v17  ;;  %vm19950_vm12 = vmmov %vm19934_vm1  ;;  %v19955_v17 = vld [vmem:[#allocation100_spill] sm:$0xff]  ;;  %20090 = vst [vmem:[#allocation97_spill] sm:$0xff] %v18195_v62 }
 0x5dd   : > { %20101 = vst [vmem:[#allocation100_spill] sm:$0xff] %v18224_v7 }
 0x5e3   : > { %13156 = vmatmul.mubr.msk.bf16.gmra.mrb[28].mxu1 %vm19929_vm3, %v7397_v23  ;;  %vm19956_vm3 = vmmov %vm19934_vm1  ;;  %v7723_v23 = vrot.slane %v19964_v28, 2  ;;  %v17935_v28 = vld [vmem:[%s15730_s23 + $0x20] sm:$0xff]  }
 0x5e4   : > { %13159 = vmatprep.mubr.msk.bf16.mxu1 %vm19930_vm11, %v7406_v22  ;;  %vm19958_vm11 = vmmov %vm19934_vm1  ;;  %v7730_v22 = vshll.u32 %v17771_v2, 16  ;;  %19981 = vst [vmem:[#allocation65_spill] sm:$0xff] %v17935_v28 }
 0x5e5   : > { %v7724_v11 = vor.u32 %v7723_v23, %v7720_v12  ;;  %v8014_v23 = vrot.slane %v17935_v28, 2 }
 0x5eb   : > { %13160 = vmatmul.mubr.msk.bf16.gmra.mrb[32].mxu1 %vm19932_vm7, %v7415_v40  ;;  %vm19962_vm7 = vmmov %vm19934_vm1  ;;  %v7729_v40 = vrot.slane %v7727_v46, 1 }
 0x5ec   : > { %13165 = vmatprep.mubr.msk.bf16.mxu1 %vm19934_vm1, %v19933_v42  ;;  %v7732_v42 = vrot.slane %v7730_v22, 2 }
 0x5f3   : > { %13166 = vmatmul.mubr.msk.bf16.vlgmr.msra.gmra.mrb[0].mxu1 %vm19937_vm2, %v19936_v29  ;;  %v19968_v29 = vld [vmem:[#allocation105_spill] sm:$0xff]  ;;  %vm19969_vm2 = vsmask.f32 6400 }
 0x5f4   : > { %13169 = vmatprep.mubr.msk.bf16.mxu1 %vm19939_vm9, %v19938_v27  ;;  %13202 = vmatpush3.bf16.msra.mxu1 %v8101_v0  ;;  %v19966_v0 = vld [vmem:[#allocation107_spill] sm:$0xff]  ;;  %v7725_v27 = vsel %vm19969_vm2, %v19968_v29, %v7724_v11  ;;  %vm19970_vm9 = vmmov %vm19967_vm0  ;;  %v19990_v29 = vld [vmem:[#allocation10_spill] sm:$0xff] }
 0x5f5   : > { %14483 = vmatprep.subr.msk.bf16.mxu1 %vm19940_vm14, %v11668_v52  ;;  %vm19972_vm14 = vcmask 1045504  }
 0x5fb   : > { %13170 = vmatmul.mubr.msk.bf16.gmra.mrb[4].mxu1 %vm19942_vm15, %v19941_v8  ;;  %v14653_v8 = vld [vmem:[%s15730_s23 + $0x8] sm:$0xff]   ;;  %vm19974_vm15 = vmmov %vm19969_vm2 }
 0x5fc   : > { %13173 = vmatprep.mubr.msk.bf16.mxu1 %vm19944_vm8, %v19943_v21  ;;  %v8009_v21 = vrot.slane %v14653_v8, 2  ;;  %vm19976_vm8 = vmmov %vm19967_vm0  ;;  %v19992_v8 = vld [vmem:[#allocation108_spill] sm:$0xff] }
 0x603   : > { %13174 = vmatmul.mubr.msk.bf16.gmra.mrb[8].mxu1 %vm19946_vm13, %v19945_v24  ;;  %v17915_v24 = vld [vmem:[%s15730_s23 + $0x10] sm:$0xff]   ;;  %vm19978_vm13 = vmmov %vm19967_vm0 }
 0x604   : > { %13177 = vmatprep.mubr.msk.bf16.mxu1 %vm19948_vm10, %v19947_v43  ;;  %19971 = vst [vmem:[#allocation58_spill] sm:$0xff] %v17915_v24  ;;  %v8010_v43 = vrot.slane %v17915_v24, 2  ;;  %vm19982_vm10 = vmmov %vm19972_vm14 }
 0x60b   : > { %13178 = vmatmul.mubr.msk.bf16.gmra.mrb[12].mxu1 %vm19950_vm12, %v19949_v56  ;;  %v7733_v56 = vor.u32 %v7732_v42, %v7729_v40  ;;  %vm19983_vm12 = vmmov %vm19982_vm10  ;;  %v17950_v40 = vld [vmem:[%s19066_s7 + $0x18] sm:$0xf] }
 0x60c   : > { %13181 = vmatprep.mubr.msk.bf16.mxu1 %vm19952_vm6, %v19951_v10  ;;  %v8011_v10 = vsel %vm19972_vm14, %v8009_v21, %v8010_v43  ;;  %vm19984_vm6 = vcmask 1043456   ;;  %v8018_v21 = vrot.slane %v19992_v8, 2  ;;  %vm20007_vm14 = vmmov %vm19967_vm0 }
 0x60d   : > { %v8372_v22 = vsel %vm19984_vm6, %v11668_v52, 0 }
 0x613   : > { %13182 = vmatmul.mubr.msk.bf16.gmra.mrb[16].mxu1 %vm19954_vm5, %v19953_v36  ;;  %vm19987_vm5 = vmmov %vm19967_vm0 }
 0x614   : > { %13185 = vmatprep.mubr.msk.bf16.mxu1 %vm19956_vm3, %v19955_v17  ;;  %v7734_v17 = vsel %vm19974_vm15, %v7724_v11, %v7733_v56  ;;  %vm19989_vm3 = vmmov %vm19967_vm0 }
 0x615   : > { %vm20009_vm15 = vmmov %vm19967_vm0 }
 0x61b   : > { %13186 = vmatmul.mubr.msk.bf16.gmra.mrb[20].mxu1 %vm19958_vm11, %v19957_v9  ;;  %vm19993_vm11 = vmmov %vm19984_vm6 }
 0x61c   : > { %13189 = vmatprep.mubr.msk.bf16.mxu1 %vm19960_vm4, %v19959_v4  ;;  %vm19994_vm4 = vmmov %vm19982_vm10 }
 0x61d   : > { %vm20003_vm2 = vmmov %vm19994_vm4 }
 0x61e   : > { %vm20023_vm6 = vmmov %vm20003_vm2 }
 0x623   : > { %13190 = vmatmul.mubr.msk.bf16.gmra.mrb[24].mxu1 %vm19962_vm7, %v19961_v33  ;;  %v17929_v33 = vld [vmem:[%s15730_s23 + $0x18] sm:$0xff]   ;;  %vm19995_vm7 = vmmov %vm19994_vm4 }
 0x624   : > { %13193 = vmatprep.mubr.msk.bf16.mxu1 %vm19934_vm1, %v19965_v19  ;;  %19979 = vst [vmem:[#allocation63_spill] sm:$0xff] %v17929_v33  ;;  %v8012_v5 = vrot.slane %v17929_v33, 2  ;;  %vm19998_vm1 = vmmov %vm19967_vm0  ;;  %v18119_v33 = vld [vmem:[#allocation2 + $0x18] sm:$0xff]  }
 0x625   : > { %20063 = vst [vmem:[#allocation126_spill] sm:$0xff] %v18119_v33 }
 0x626   : > { %v17939_v19 = vsel %vm19982_vm10, %v8010_v43, %v8012_v5  ;;  %v17942_v46 = vsel %vm19983_vm12, %v8012_v5, %v8014_v23  ;;  %vm20017_vm10 = vmmov %vm19967_vm0 }
 0x627   : > { %vm20019_vm12 = vmmov %vm19967_vm0 }
 0x62b   : > { %13194 = vmatmul.mubr.msk.bf16.gmra.mrb[28].mxu1 %vm19967_vm0, %v19966_v0 }
 0x62c   : > { %13197 = vmatprep.mubr.msk.bf16.mxu1 %vm19970_vm9, %v7725_v27  ;;  %v8016_v27 = vrot.slane %v19990_v29, 2  ;;  %vm20004_vm9 = vmmov %vm20003_vm2 }
 0x62e   : > { %v17967_v43 = vsel %vm19994_vm4, %v8014_v23, %v8016_v27  ;;  %v17970_v56 = vsel %vm19995_vm7, %v8016_v27, %v8018_v21  ;;  %v20002_v23 = vld [vmem:[#allocation114_spill] sm:$0xff]  ;;  %vm20033_vm4 = vmmov %vm20003_vm2 }
 0x62f   : > { %v8022_v35 = vrot.slane %v20002_v23, 2  ;;  %vm20034_vm7 = vmmov %vm20003_vm2 }
 0x633   : > { %v17919_v36 = vpop.f32.mrb[36].mxu0  ;;  %13198 = vmatmul.mubr.msk.bf16.gmra.mrb[32].mxu1 %vm19976_vm8, %v7734_v17  ;;  %vm20013_vm8 = vmmov %vm20003_vm2 }
 0x634   : > { %19973 = vst [vmem:[#allocation60_spill] sm:$0xff] %v17919_v36  ;;  %v17922_v9 = vpop.f32.mrb[37].mxu0  ;;  %13203 = vmatprep.mubr.msk.bf16.mxu1 %vm19978_vm13, %v8011_v10  ;;  %vm20014_vm13 = vmmov %vm20003_vm2 }
 0x635   : > { %19975 = vst [vmem:[#allocation61_spill] sm:$0xff] %v17922_v9  ;;  %v17925_v4 = vpop.f32.mrb[38].mxu0 }
 0x636   : > { %19977 = vst [vmem:[#allocation62_spill] sm:$0xff] %v17925_v4  ;;  %v17932_v12 = vpop.f32.mrb[39].mxu0 }
 0x637   : > { %19980 = vst [vmem:[#allocation64_spill] sm:$0xff] %v17932_v12 }
 0x63b   : > { %v17945_v11 = vpop.f32.mrb[40].mxu0  ;;  %13204 = vmatmul.mubr.msk.bf16.vlgmr.msra.gmra.mrb[0].mxu1 %vm19987_vm5, %v17939_v19  ;;  %vm20024_vm5 = vmmov %vm20003_vm2 }
 0x63c   : > { %19985 = vst [vmem:[#allocation66_spill] sm:$0xff] %v17945_v11  ;;  %v17952_v42 = vpop.f32.mrb[41].mxu0  ;;  %13207 = vmatprep.mubr.msk.bf16.mxu1 %vm19989_vm3, %v17942_v46  ;;  %13240 = vmatpush3.bf16.msra.mxu1 %v8372_v22  ;;  %v20000_v22 = vld [vmem:[#allocation110_spill] sm:$0xff]  ;;  %vm20027_vm3 = vmmov %vm19967_vm0 }
 0x63d   : > { %19986 = vst [vmem:[#allocation67_spill] sm:$0xff] %v17952_v42  ;;  %v17956_v0 = vpop.f32.mrb[42].mxu0  ;;  %14484 = vmatprep.subr.msk.bf16.mxu1 %vm19993_vm11, %v17950_v40  ;;  %v8020_v29 = vrot.slane %v20000_v22, 2  ;;  %v20010_v22 = vld [vmem:[#allocation117_spill] sm:$0xff]  ;;  %vm20029_vm11 = vmmov %vm19967_vm0 }
 0x63e   : > { %19988 = vst [vmem:[#allocation68_spill] sm:$0xff] %v17956_v0  ;;  %v17961_v52 = vpop.f32.mrb[43].mxu0  ;;  %v8024_v23 = vrot.slane %v20010_v22, 2  ;;  %v20020_v22 = vld [vmem:[#allocation123_spill] sm:$0xff] }
 0x63f   : > { %19991 = vst [vmem:[#allocation69_spill] sm:$0xff] %v17961_v52  ;;  %v17987_v27 = vsel %vm20003_vm2, %v8018_v21, %v8020_v29  ;;  %v17990_v20 = vsel %vm20004_vm9, %v8020_v29, %v8022_v35  ;;  %v20012_v21 = vld [vmem:[#allocation44_spill] sm:$0xff]  ;;  %vm20042_vm9 = vmmov %vm20003_vm2 }
 0x640   : > { %v8026_v52 = vrot.slane %v20012_v21, 2  ;;  %v18007_v29 = vsel %vm20013_vm8, %v8022_v35, %v8024_v23  ;;  %v8028_v21 = vrot.slane %v20020_v22, 2  ;;  %v20022_v35 = vld [vmem:[#allocation89_spill] sm:$0xff]  ;;  %v20030_v22 = vld [vmem:[#allocation48_spill] sm:$0xff]  ;;  %vm20050_vm8 = vmmov %vm20003_vm2 }
 0x641   : > { %v8030_v42 = vrot.slane %v20022_v35, 2  ;;  %v8032_v35 = vrot.slane %v20030_v22, 2  ;;  %v20039_v22 = vld [vmem:[#allocation51_spill] sm:$0xff] }
 0x643   : > { %v17972_v10 = vpop.f32.mrb[44].mxu0  ;;  %13208 = vmatmul.mubr.msk.bf16.gmra.mrb[4].mxu1 %vm19998_vm1, %v17967_v43  ;;  %vm20037_vm1 = vmmov %vm19967_vm0 }
 0x644   : > { %19996 = vst [vmem:[#allocation70_spill] sm:$0xff] %v17972_v10  ;;  %v17974_v17 = vpop.f32.mrb[45].mxu0  ;;  %13211 = vmatprep.mubr.msk.bf16.mxu1 %vm19967_vm0, %v17970_v56 }
 0x645   : > { %19997 = vst [vmem:[#allocation71_spill] sm:$0xff] %v17974_v17  ;;  %v17978_v5 = vpop.f32.mrb[46].mxu0 }
 0x646   : > { %19999 = vst [vmem:[#allocation72_spill] sm:$0xff] %v17978_v5  ;;  %v17983_v8 = vpop.f32.mrb[47].mxu0 }
 0x647   : > { %20001 = vst [vmem:[#allocation74_spill] sm:$0xff] %v17983_v8 }
 0x64b   : > { %v17992_v17 = vpop.f32.mrb[48].mxu0  ;;  %13212 = vmatmul.mubr.msk.bf16.gmra.mrb[8].mxu1 %vm20007_vm14, %v17987_v27  ;;  %vm20045_vm14 = vmmov %vm19967_vm0 }
 0x64c   : > { %20005 = vst [vmem:[#allocation79_spill] sm:$0xff] %v17992_v17  ;;  %v17994_v10 = vpop.f32.mrb[49].mxu0  ;;  %13215 = vmatprep.mubr.msk.bf16.mxu1 %vm20009_vm15, %v17990_v20  ;;  %v18010_v17 = vsel %vm20014_vm13, %v8024_v23, %v8026_v52  ;;  %v18027_v23 = vsel %vm20023_vm6, %v8026_v52, %v8028_v21  ;;  %v20032_v52 = vld [vmem:[#allocation50_spill] sm:$0xff]  ;;  %vm20047_vm15 = vmmov %vm19967_vm0 }
 0x64d   : > { %20006 = vst [vmem:[#allocation81_spill] sm:$0xff] %v17994_v10  ;;  %v17998_v5 = vpop.f32.mrb[50].mxu0  ;;  %v8034_v12 = vrot.slane %v20032_v52, 2  ;;  %v8036_v52 = vrot.slane %v20039_v22, 2  ;;  %v18083_v22 = vld [vmem:[%s15730_s23 + $0x88] sm:$0xff]   ;;  %vm20051_vm13 = vmmov %vm20003_vm2 }
 0x64e   : > { %20008 = vst [vmem:[#allocation82_spill] sm:$0xff] %v17998_v5  ;;  %v18003_v8 = vpop.f32.mrb[51].mxu0  ;;  %20048 = vst [vmem:[#allocation116_spill] sm:$0xff] %v18083_v22 }
 0x64f   : > { %20011 = vst [vmem:[#allocation83_spill] sm:$0xff] %v18003_v8  ;;  %v18067_v9 = vsel %vm20003_vm2, %v8034_v12, %v8036_v52  ;;  %vm20059_vm6 = vmmov %vm20003_vm2 }
 0x653   : > { %v18012_v10 = vpop.f32.mrb[52].mxu0  ;;  %13216 = vmatmul.mubr.msk.bf16.gmra.mrb[12].mxu1 %vm20017_vm10, %v18007_v29  ;;  %vm20054_vm10 = vmmov %vm19967_vm0 }
 0x654   : > { %20015 = vst [vmem:[#allocation73_spill] sm:$0xff] %v18012_v10  ;;  %v18014_v0 = vpop.f32.mrb[53].mxu0  ;;  %13219 = vmatprep.mubr.msk.bf16.mxu1 %vm20019_vm12, %v18010_v17  ;;  %v18030_v10 = vsel %vm20024_vm5, %v8028_v21, %v8030_v42  ;;  %v18047_v21 = vsel %vm20033_vm4, %v8030_v42, %v8032_v35  ;;  %vm20056_vm12 = vmmov %vm19967_vm0  ;;  %vm20065_vm4 = vcmask 1043456  }
 0x655   : > { %20016 = vst [vmem:[#allocation75_spill] sm:$0xff] %v18014_v0  ;;  %v18018_v5 = vpop.f32.mrb[54].mxu0  ;;  %vm20060_vm5 = vmmov %vm19967_vm0 }
 0x656   : > { %20018 = vst [vmem:[#allocation80_spill] sm:$0xff] %v18018_v5  ;;  %v18023_v8 = vpop.f32.mrb[55].mxu0 }
 0x657   : > { %20021 = vst [vmem:[#allocation77_spill] sm:$0xff] %v18023_v8 }
 0x65b   : > { %v18032_v0 = vpop.f32.mrb[56].mxu0  ;;  %13220 = vmatmul.mubr.msk.bf16.gmra.mrb[16].mxu1 %vm20027_vm3, %v18027_v23  ;;  %vm20061_vm3 = vmmov %vm20003_vm2 }
 0x65c   : > { %20025 = vst [vmem:[#allocation113_spill] sm:$0xff] %v18032_v0  ;;  %v18034_v11 = vpop.f32.mrb[57].mxu0  ;;  %13223 = vmatprep.mubr.msk.bf16.mxu1 %vm20029_vm11, %v18030_v10  ;;  %v18050_v0 = vsel %vm20034_vm7, %v8032_v35, %v8034_v12  ;;  %v8040_v12 = vrot.slane %v18083_v22, 2  ;;  %v14658_v22 = vld [vmem:[#allocation2 + $0x8] sm:$0xff]   ;;  %vm20062_vm11 = vmmov %vm19967_vm0 }
 0x65d   : > { %20026 = vst [vmem:[#allocation84_spill] sm:$0xff] %v18034_v11  ;;  %v18038_v5 = vpop.f32.mrb[58].mxu0  ;;  %v8280_v28 = vrot.slane %v14658_v22, 2  ;;  %vm20066_vm7 = vmmov %vm20003_vm2 }
 0x65e   : > { %20028 = vst [vmem:[#allocation76_spill] sm:$0xff] %v18038_v5  ;;  %v18043_v8 = vpop.f32.mrb[59].mxu0 }
 0x65f   : > { %20031 = vst [vmem:[#allocation85_spill] sm:$0xff] %v18043_v8  ;;  %v20041_v8 = vld [vmem:[#allocation52_spill] sm:$0xff] }
 0x660   : > { %v8038_v35 = vrot.slane %v20041_v8, 2 }
 0x663   : > { %v18052_v11 = vpop.f32.mrb[60].mxu0  ;;  %13224 = vmatmul.mubr.msk.bf16.gmra.mrb[20].mxu1 %vm20037_vm1, %v18047_v21  ;;  %vm20067_vm1 = vmmov %vm19967_vm0 }
 0x664   : > { %20035 = vst [vmem:[#allocation78_spill] sm:$0xff] %v18052_v11  ;;  %v18054_v4 = vpop.f32.mrb[61].mxu0  ;;  %13227 = vmatprep.mubr.msk.bf16.mxu1 %vm19967_vm0, %v18050_v0  ;;  %v18070_v11 = vsel %vm20042_vm9, %v8036_v52, %v8038_v35  ;;  %v18089_v52 = vrot.slane %v17608_v54, 2  ;;  %vm20068_vm0 = vmmov %vm20003_vm2  ;;  %v18176_v54 = vld [vmem:[#allocation2 + $0x48] sm:$0xff]  }
 0x665   : > { %20036 = vst [vmem:[#allocation87_spill] sm:$0xff] %v18054_v4  ;;  %v18058_v5 = vpop.f32.mrb[62].mxu0  ;;  %vm20069_vm2 = vmmov %vm20067_vm1 }
 0x666   : > { %20038 = vst [vmem:[#allocation86_spill] sm:$0xff] %v18058_v5  ;;  %v18063_v42 = vpop.f32.mrb[63].mxu0  ;;  %vm20070_vm9 = vmmov %vm20065_vm4 }
 0x667   : > { %20040 = vst [vmem:[#allocation42_spill] sm:$0xff] %v18063_v42  ;;  %20083 = vst [vmem:[#allocation94_spill] sm:$0xff] %v18176_v54 }
 0x66b   : > { %v18072_v4 = vpop.f32.mrb[64].mxu0  ;;  %13228 = vmatmul.mubr.msk.bf16.gmra.mrb[24].mxu1 %vm20045_vm14, %v18067_v9  ;;  %vm20073_vm14 = vmmov %vm20068_vm0 }
 0x66c   : > { %20043 = vst [vmem:[#allocation102_spill] sm:$0xff] %v18072_v4  ;;  %v18074_v36 = vpop.f32.mrb[65].mxu0  ;;  %13231 = vmatprep.mubr.msk.bf16.mxu1 %vm20047_vm15, %v18070_v11  ;;  %v18092_v4 = vsel %vm20050_vm8, %v8038_v35, %v8040_v12  ;;  %vm20074_vm15 = vmmov %vm20067_vm1 }
 0x66d   : > { %20044 = vst [vmem:[#allocation43_spill] sm:$0xff] %v18074_v36  ;;  %v18078_v5 = vpop.f32.mrb[66].mxu0  ;;  %v18096_v36 = vsel %vm20051_vm13, %v8040_v12, %v18089_v52  ;;  %v18111_v12 = vld [vmem:[#allocation2 + $0x10] sm:$0xff]   ;;  %vm20075_vm8 = vmmov %vm20068_vm0 }
 0x66e   : > { %20046 = vst [vmem:[#allocation109_spill] sm:$0xff] %v18078_v5  ;;  %v18086_v8 = vpop.f32.mrb[67].mxu0  ;;  %20058 = vst [vmem:[#allocation122_spill] sm:$0xff] %v18111_v12 }
 0x66f   : > { %20049 = vst [vmem:[#allocation111_spill] sm:$0xff] %v18086_v8  ;;  %v8044_v8 = vrot.slane %v17640_v26, 2  ;;  %v8283_v26 = vrot.slane %v18119_v33, 2  ;;  %vm20076_vm13 = vmmov %vm20067_vm1  ;;  %v18163_v33 = vld [vmem:[#allocation2 + $0x40] sm:$0xff]  }
 0x670   : > { %20078 = vst [vmem:[#allocation93_spill] sm:$0xff] %v18163_v33 }
 0x673   : > { %v18098_v5 = vpop.f32.mrb[68].mxu0  ;;  %13232 = vmatmul.mubr.msk.bf16.gmra.mrb[28].mxu1 %vm20054_vm10, %v18092_v4  ;;  %vm20079_vm10 = vmmov %vm20068_vm0 }
 0x674   : > { %20052 = vst [vmem:[#allocation120_spill] sm:$0xff] %v18098_v5  ;;  %v18100_v42 = vpop.f32.mrb[69].mxu0  ;;  %13235 = vmatprep.mubr.msk.bf16.mxu1 %vm20056_vm12, %v18096_v36  ;;  %v8281_v5 = vrot.slane %v18111_v12, 2  ;;  %v8608_v12 = vsel %vm20065_vm4, %v17950_v40, 0  ;;  %v18144_v40 = vld [vmem:[#allocation2 + $0x28] sm:$0xff]   ;;  %vm20080_vm12 = vmmov %vm20067_vm1 }
 0x675   : > { %20053 = vst [vmem:[#allocation115_spill] sm:$0xff] %v18100_v42  ;;  %v18104_v25 = vpop.f32.mrb[70].mxu0  ;;  %v8045_v42 = vsel %vm20059_vm6, %v18089_v52, %v8044_v8  ;;  %20071 = vst [vmem:[#allocation90_spill] sm:$0xff] %v18144_v40 }
 0x676   : > { %20055 = vst [vmem:[#allocation118_spill] sm:$0xff] %v18104_v25  ;;  %v18109_v35 = vpop.f32.mrb[71].mxu0  ;;  %v8282_v25 = vsel %vm20061_vm3, %v8280_v28, %v8281_v5  ;;  %v18128_v24 = vsel %vm20066_vm7, %v8281_v5, %v8283_v26  ;;  %v18133_v28 = vld [vmem:[%s19065_s6 + $0x18] sm:$0xf]  ;;  %v8287_v5 = vrot.slane %v18144_v40, 2  ;;  %vm20081_vm6 = vmmov %vm20068_vm0 }
 0x677   : > { %20057 = vst [vmem:[#allocation45_spill] sm:$0xff] %v18109_v35  ;;  %v18122_v35 = vld [vmem:[#allocation2 + $0x20] sm:$0xff]   ;;  %vm20085_vm3 = vmmov %vm20068_vm0 }
 0x678   : > { %20064 = vst [vmem:[#allocation124_spill] sm:$0xff] %v18122_v35  ;;  %v8285_v22 = vrot.slane %v18122_v35, 2  ;;  %vm20087_vm4 = vmmov %vm20068_vm0 }
 0x679   : > { %vm20088_vm7 = vmmov %vm20067_vm1 }
 0x67a   : > { %v18151_v35 = vsel %vm20073_vm14, %v8285_v22, %v8287_v5 }
 0x67b   : > { %13236 = vmatmul.mubr.msk.bf16.gmra.mrb[32].mxu1 %vm20060_vm5, %v8045_v42  ;;  %v18147_v42 = vld [vmem:[#allocation2 + $0x30] sm:$0xff]   ;;  %vm20082_vm5 = vmmov %vm20067_vm1 }
 0x67c   : > { %13241 = vmatprep.mubr.msk.bf16.mxu1 %vm20062_vm11, %v8282_v25  ;;  %v18138_v25 = vsel %vm20068_vm0, %v8283_v26, %v8285_v22  ;;  %20072 = vst [vmem:[#allocation91_spill] sm:$0xff] %v18147_v42  ;;  %v8289_v8 = vrot.slane %v18147_v42, 2  ;;  %v8293_v42 = vrot.slane %v18163_v33, 2  ;;  %v8297_v33 = vrot.slane %v18179_v3, 2  ;;  %vm20086_vm11 = vmmov %vm20067_vm1 }
 0x67d   : > { %v8301_v3 = vrot.slane %v18195_v62, 2  ;;  %v8305_v62 = vrot.slane %v18211_v44, 2  ;;  %v8309_v44 = vrot.slane %v18227_v18, 2 }
 0x67e   : > { %v18156_v26 = vsel %vm20075_vm8, %v8287_v5, %v8289_v8 }
 0x683   : > { %13242 = vmatmul.mubr.msk.bf16.vlgmr.msra.gmra.mrb[0].mxu1 %vm20067_vm1, %v18128_v24  ;;  %vm20091_vm1 = vmmov %vm20068_vm0 }
 0x684   : > { %13245 = vmatprep.mubr.msk.bf16.mxu1 %vm20069_vm2, %v18138_v25  ;;  %13278 = vmatpush3.bf16.msra.mxu1 %v8608_v12  ;;  %v18160_v12 = vld [vmem:[#allocation2 + $0x38] sm:$0xff]   ;;  %vm20092_vm0 = vmmov %vm20069_vm2 }
 0x685   : > { %14485 = vmatprep.subr.msk.bf16.mxu1 %vm20070_vm9, %v18133_v28  ;;  %20077 = vst [vmem:[#allocation92_spill] sm:$0xff] %v18160_v12  ;;  %v8291_v40 = vrot.slane %v18160_v12, 2  ;;  %v8295_v12 = vrot.slane %v18176_v54, 2  ;;  %v8299_v54 = vrot.slane %v18192_v38, 2  ;;  %vm20093_vm2 = vmmov %vm20091_vm1  ;;  %v8303_v38 = vrot.slane %v18208_v50, 2 }
 0x686   : > { %vm20094_vm9 = vmmov %vm20092_vm0  ;;  %v8307_v50 = vrot.slane %v18224_v7, 2  ;;  %v20108_v7 = vld [vmem:[#allocation121_spill] sm:$0xff] }
 0x687   : > { %v18167_v22 = vsel %vm20079_vm10, %v8289_v8, %v8291_v40  ;;  %v18172_v5 = vsel %vm20081_vm6, %v8291_v40, %v8293_v42  ;;  %v18183_v8 = vsel %vm20085_vm3, %v8293_v42, %v8295_v12  ;;  %v18188_v40 = vsel %vm20087_vm4, %v8295_v12, %v8297_v33  ;;  %vm20097_vm14 = vmmov %vm20091_vm1 }
 0x688   : > { %v18199_v42 = vsel %vm20091_vm1, %v8297_v33, %v8299_v54  ;;  %v18204_v12 = vsel %vm20093_vm2, %v8299_v54, %v8301_v3  ;;  %v18215_v33 = vsel %vm20097_vm14, %v8301_v3, %v8303_v38  ;;  %vm20099_vm8 = vmmov %vm20091_vm1 }
 0x689   : > { %v18220_v54 = vsel %vm20099_vm8, %v8303_v38, %v8305_v62  ;;  %vm20102_vm10 = vmmov %vm20091_vm1  ;;  %v18234_v38 = vld [vmem:[#allocation2 + $0x88] sm:$0xff]  }
 0x68a   : > { %v8308_v3 = vsel %vm20102_vm10, %v8305_v62, %v8307_v50  ;;  %vm20104_vm6 = vmmov %vm20091_vm1  ;;  %v8311_v15 = vrot.slane %v18234_v38, 2  ;;  %v8315_v62 = vrot.slane %v17771_v2, 2 }
 0x68b   : > { %13246 = vmatmul.mubr.msk.bf16.gmra.mrb[4].mxu1 %vm20074_vm15, %v18151_v35  ;;  %vm20098_vm15 = vmmov %vm20092_vm0  ;;  %v8310_v51 = vsel %vm20104_vm6, %v8307_v50, %v8309_v44 }
 0x68c   : > { %13249 = vmatprep.mubr.msk.bf16.mxu1 %vm20076_vm13, %v18156_v26  ;;  %vm20100_vm13 = vmmov %vm20092_vm0  ;;  %v8316_v50 = vsel %vm20091_vm1, %v20108_v7, %v8315_v62 }
 0x68d   : > { %vm20106_vm3 = vmmov %vm20091_vm1 }
 0x68e   : > { %v8312_v13 = vsel %vm20106_vm3, %v8309_v44, %v8311_v15  ;;  %vm20109_vm4 = vmmov %vm20091_vm1 }
 0x68f   : > { %v8314_v6 = vsel %vm20109_vm4, %v8311_v15, %v20108_v7  ;;  %vm20111_vm2 = vmmov %vm20092_vm0  ;;  %v11749_v15 = vld [vmem:[%s19066_s7 + $0x1c] sm:$0xf] }
 0x690   : > { %vm20113_vm14 = vmmov %vm20092_vm0  ;;  %v4886_v7 = vld [vmem:[%s15730_s23 + $0x9c] sm:$0xf] }
 0x691   : > { %vm20117_vm10 = vmmov %vm20092_vm0  ;;  %v18280_v2 = vcombine.low %v17632_v14, %v4886_v7  ;;  %v20173_v7 = vld [vmem:[#allocation49_spill] sm:$0xff] }
 0x692   : > { %vm20119_vm6 = vmmov %vm20092_vm0 }
 0x693   : > { %13250 = vmatmul.mubr.msk.bf16.gmra.mrb[8].mxu1 %vm20080_vm12, %v18167_v22  ;;  %vm20103_vm12 = vmmov %vm20092_vm0 }
 0x694   : > { %13253 = vmatprep.mubr.msk.bf16.mxu1 %vm20082_vm5, %v18172_v5  ;;  %vm20105_vm5 = vmmov %vm20092_vm0 }
 0x695   : > { %vm20121_vm3 = vmmov %vm20092_vm0 }
 0x696   : > { %vm20123_vm4 = vmmov %vm20092_vm0 }
 0x697   : > { %vm20125_vm1 = vmmov %vm20092_vm0 }
 0x69b   : > { %13254 = vmatmul.mubr.msk.bf16.gmra.mrb[12].mxu1 %vm20086_vm11, %v18183_v8  ;;  %vm20107_vm11 = vmmov %vm20092_vm0 }
 0x69c   : > { %13257 = vmatprep.mubr.msk.bf16.mxu1 %vm20088_vm7, %v18188_v40  ;;  %vm20110_vm7 = vmmov %vm20092_vm0 }
 0x6a3   : > { %13258 = vmatmul.mubr.msk.bf16.gmra.mrb[16].mxu1 %vm20092_vm0, %v18199_v42 }
 0x6a4   : > { %13261 = vmatprep.mubr.msk.bf16.mxu1 %vm20094_vm9, %v18204_v12  ;;  %vm20112_vm9 = vcmask 1043456  }
 0x6a5   : > { %v8804_v44 = vsel %vm20112_vm9, %v18133_v28, 0  ;;  %vm20115_vm8 = vmmov %vm20112_vm9  ;;  %vm20127_vm9 = vcmask 1045504   ;;  %v9042_v28 = vrot.slane %v19894_v55, 2  ;;  %v9046_v55 = vrot.slane %v19897_v16, 2 }
 0x6a6   : > { %v9055_v16 = vrot.slane %v19905_v34, 3 }
 0x6ab   : > { %13262 = vmatmul.mubr.msk.bf16.gmra.mrb[20].mxu1 %vm20098_vm15, %v18215_v33  ;;  %vm20114_vm15 = vmmov %vm20092_vm0 }
 0x6ac   : > { %13265 = vmatprep.mubr.msk.bf16.mxu1 %vm20100_vm13, %v18220_v54  ;;  %vm20116_vm13 = vmmov %vm20092_vm0 }
 0x6b3   : > { %13266 = vmatmul.mubr.msk.bf16.gmra.mrb[24].mxu1 %vm20103_vm12, %v8308_v3  ;;  %vm20118_vm12 = vmmov %vm20092_vm0 }
 0x6b4   : > { %13269 = vmatprep.mubr.msk.bf16.mxu1 %vm20105_vm5, %v8310_v51  ;;  %vm20120_vm5 = vmmov %vm20092_vm0 }
 0x6bb   : > { %13270 = vmatmul.mubr.msk.bf16.gmra.mrb[28].mxu1 %vm20107_vm11, %v8312_v13  ;;  %vm20122_vm11 = vmmov %vm20092_vm0 }
 0x6bc   : > { %13273 = vmatprep.mubr.msk.bf16.mxu1 %vm20110_vm7, %v8314_v6  ;;  %vm20124_vm7 = vmmov %vm20092_vm0 }
 0x6c3   : > { %13274 = vmatmul.mubr.msk.bf16.gmra.mrb[32].mxu1 %vm20092_vm0, %v8316_v50 }
 0x6c4   : > { %13279 = vmatprep.mubr.msk.bf16.mxu1 %vm20111_vm2, %v17939_v19  ;;  %vm20126_vm2 = vmmov %vm20092_vm0  ;;  %v18288_v19 = vld [vmem:[%s15730_s23 + $0xa0] ss:$0 sps:$4 sm:$0xff]  }
 0x6c5   : > { %v8599_v14 = vrot.slane %v18288_v19, 2 }
 0x6cb   : > { %13280 = vmatmul.mubr.msk.bf16.vlgmr.msra.gmra.mrb[0].mxu1 %vm20113_vm14, %v17942_v46  ;;  %vm20128_vm14 = vmmov %vm20092_vm0 }
 0x6cc   : > { %13283 = vmatprep.mubr.msk.bf16.mxu1 %vm20114_vm15, %v17967_v43  ;;  %13316 = vmatpush3.bf16.msra.mxu1 %v8804_v44  ;;  %vm20129_vm15 = vmmov %vm20092_vm0  ;;  %v9027_v43 = vrot.slane %v19877_v30, 3  ;;  %v20152_v30 = vld [vmem:[#allocation119_spill] sm:$0xff]  ;;  %v9062_v44 = vrot.slane %v17460_v60, 2 }
 0x6cd   : > { %14486 = vmatprep.subr.msk.bf16.mxu1 %vm20115_vm8, %v11749_v15  ;;  %vm20130_vm8 = vmmov %vm20127_vm9 }
 0x6d3   : > { %13284 = vmatmul.mubr.msk.bf16.gmra.mrb[4].mxu1 %vm20116_vm13, %v17970_v56  ;;  %vm20131_vm13 = vmmov %vm20092_vm0  ;;  %v20149_v56 = vld [vmem:[#allocation125_spill] sm:$0xff] }
 0x6d4   : > { %13287 = vmatprep.mubr.msk.bf16.mxu1 %vm20117_vm10, %v17987_v27  ;;  %vm20132_vm10 = vmmov %vm20092_vm0  ;;  %v14675_v27 = vld [vmem:[#allocation2 + $0xa0] ss:$0 sps:$4 sm:$0xff]  }
 0x6db   : > { %13288 = vmatmul.mubr.msk.bf16.gmra.mrb[8].mxu1 %vm20118_vm12, %v17990_v20  ;;  %v8597_v20 = vrot.slane %v18280_v2, 2  ;;  %vm20133_vm12 = vcmask 1043456  }
 0x6dc   : > { %13291 = vmatprep.mubr.msk.bf16.mxu1 %vm20119_vm6, %v18007_v29  ;;  %vm20134_vm6 = vmmov %vm20092_vm0  ;;  %v8795_v29 = vrot.slane %v14675_v27, 2 }
 0x6dd   : > { %v8598_v46 = vsel %vm20127_vm9, %v18089_v52, %v8597_v20  ;;  %vm20142_vm9 = vmmov %vm20092_vm0 }
 0x6e3   : > { %13292 = vmatmul.mubr.msk.bf16.gmra.mrb[12].mxu1 %vm20120_vm5, %v18010_v17  ;;  %vm20135_vm5 = vmmov %vm20092_vm0 }
 0x6e4   : > { %13295 = vmatprep.mubr.msk.bf16.mxu1 %vm20121_vm3, %v18027_v23  ;;  %vm20136_vm3 = vmmov %vm20133_vm12  ;;  %v20153_v23 = vrot.slane %v20152_v30, 2 }
 0x6eb   : > { %13296 = vmatmul.mubr.msk.bf16.gmra.mrb[16].mxu1 %vm20122_vm11, %v18030_v10  ;;  %vm20137_vm11 = vmmov %vm20092_vm0 }
 0x6ec   : > { %13299 = vmatprep.mubr.msk.bf16.mxu1 %vm20123_vm4, %v18047_v21  ;;  %vm20138_vm4 = vmmov %vm20092_vm0 }
 0x6f3   : > { %13300 = vmatmul.mubr.msk.bf16.gmra.mrb[20].mxu1 %vm20124_vm7, %v18050_v0  ;;  %vm20139_vm7 = vmmov %vm20092_vm0  ;;  %v9026_v0 = vrot.slane %v19876_v37, 2  ;;  %v9035_v37 = vrot.slane %v19886_v59, 3 }
 0x6f4   : > { %13303 = vmatprep.mubr.msk.bf16.mxu1 %vm20125_vm1, %v18067_v9  ;;  %v8600_v9 = vsel %vm20130_vm8, %v8597_v20, %v8599_v14  ;;  %vm20140_vm1 = vmmov %vm20092_vm0  ;;  %v9066_v20 = vrot.slane %v20173_v7, 2  ;;  %v20218_v7 = vld [vmem:[#allocation131_spill] sm:$0xff] }
 0x6f5   : > { %vm20145_vm8 = vmmov %vm20092_vm0  ;;  %v9028_v17 = vor.u32 %v9027_v43, %v9026_v0  ;;  %v20181_v0 = vld [vmem:[#allocation53_spill] sm:$0xff] }
 0x6f6   : > { %v9074_v43 = vrot.slane %v20181_v0, 2 }
 0x6fb   : > { %13304 = vmatmul.mubr.msk.bf16.gmra.mrb[24].mxu1 %vm20092_vm0, %v18070_v11  ;;  %v11748_v11 = vld [vmem:[%s19065_s6 + $0x1c] sm:$0xf] }
 0x6fc   : > { %13307 = vmatprep.mubr.msk.bf16.mxu1 %vm20126_vm2, %v18092_v4  ;;  %v9163_v4 = vsel %vm20133_vm12, %v11749_v15, 0  ;;  %vm20141_vm2 = vmmov %vm20092_vm0  ;;  %v20171_v15 = vld [vmem:[#allocation46_spill] sm:$0xff] }
 0x6fd   : > { %vm20148_vm12 = vmmov %vm20092_vm0 }
 0x703   : > { %13308 = vmatmul.mubr.msk.bf16.gmra.mrb[28].mxu1 %vm20128_vm14, %v18096_v36  ;;  %vm20143_vm14 = vmmov %vm20092_vm0  ;;  %v9024_v36 = vrot.slane %v19867_v31, 3  ;;  %v9034_v31 = vrot.slane %v19885_v39, 2 }
 0x704   : > { %13311 = vmatprep.mubr.msk.bf16.mxu1 %vm20129_vm15, %v8598_v46  ;;  %vm20144_vm15 = vmmov %vm20092_vm0  ;;  %v20174_v46 = vld [vmem:[#allocation133_spill] sm:$0xff] }
 0x705   : > { %v9036_v52 = vor.u32 %v9035_v37, %v9034_v31 }
 0x70b   : > { %13312 = vmatmul.mubr.msk.bf16.gmra.mrb[32].mxu1 %vm20131_vm13, %v8600_v9  ;;  %vm20146_vm13 = vmmov %vm20092_vm0 }
 0x70c   : > { %13317 = vmatprep.mubr.msk.bf16.mxu1 %vm20132_vm10, %v18128_v24  ;;  %vm20147_vm10 = vmmov %vm20092_vm0  ;;  %v9023_v24 = vrot.slane %v19866_v1, 2 }
 0x70e   : > { %v9025_v10 = vor.u32 %v9024_v36, %v9023_v24  ;;  %v20179_v24 = vld [vmem:[#allocation139_spill] sm:$0xff] }
 0x70f   : > { %v9071_v60 = vrot.slane %v20179_v24, 3  ;;  %v20235_v24 = vld [vmem:[#allocation144_spill] sm:$0xff] }
 0x713   : > { %13318 = vmatmul.mubr.msk.bf16.vlgmr.msra.gmra.mrb[0].mxu1 %vm20134_vm6, %v18138_v25  ;;  %vm20150_vm6 = vmmov %vm20092_vm0  ;;  %v9043_v25 = vrot.slane %v19895_v63, 3  ;;  %v9047_v63 = vrot.slane %v19898_v32, 3 }
 0x714   : > { %13321 = vmatprep.mubr.msk.bf16.mxu1 %vm20135_vm5, %v18151_v35  ;;  %13354 = vmatpush3.bf16.msra.mxu1 %v9163_v4  ;;  %vm20151_vm5 = vsmask.f32 5376  ;;  %v9039_v35 = vrot.slane %v19890_v53, 3  ;;  %v20178_v4 = vld [vmem:[#allocation140_spill] sm:$0xff] }
 0x715   : > { %14487 = vmatprep.subr.msk.bf16.mxu1 %vm20136_vm3, %v11748_v11  ;;  %v9029_v1 = vsel %vm20151_vm5, %v9025_v10, %v9028_v17  ;;  %vm20154_vm3 = vcmask 1045504   ;;  %v9044_v53 = vor.u32 %v9043_v25, %v9042_v28  ;;  %v20194_v28 = vld [vmem:[#allocation149_spill] sm:$0xff] }
 0x716   : > { %v20195_v25 = vshrl.u32 %v20194_v28, 16 }
 0x71b   : > { %13322 = vmatmul.mubr.msk.bf16.gmra.mrb[4].mxu1 %vm20137_vm11, %v18156_v26  ;;  %vm20155_vm11 = vmmov %vm20092_vm0  ;;  %v18357_v26 = vld [vmem:[%s19066_s7 + $0x20] sm:$0xf] }
 0x71c   : > { %13325 = vmatprep.mubr.msk.bf16.mxu1 %vm20138_vm4, %v18167_v22  ;;  %vm20156_vm4 = vmmov %vm20092_vm0 }
 0x723   : > { %13326 = vmatmul.mubr.msk.bf16.gmra.mrb[8].mxu1 %vm20139_vm7, %v18172_v5  ;;  %vm20157_vm7 = vmmov %vm20151_vm5 }
 0x724   : > { %13329 = vmatprep.mubr.msk.bf16.mxu1 %vm20140_vm1, %v18183_v8  ;;  %vm20158_vm1 = vmmov %vm20151_vm5  ;;  %v9050_v8 = vrot.slane %v17381_v48, 2  ;;  %v9059_v48 = vrot.slane %v19910_v49, 3 }
 0x725   : > { %vm20168_vm5 = vmmov %vm20141_vm2 }
 0x72b   : > { %13330 = vmatmul.mubr.msk.bf16.gmra.mrb[12].mxu1 %vm20092_vm0, %v18188_v40  ;;  %vm20159_vm0 = vcmask 1043456   ;;  %v9051_v40 = vrot.slane %v19902_v41, 3 }
 0x72c   : > { %13333 = vmatprep.mubr.msk.bf16.mxu1 %vm20141_vm2, %v18199_v42  ;;  %v9482_v59 = vsel %vm20159_vm0, %v11748_v11, 0  ;;  %v9048_v42 = vor.u32 %v9047_v63, %v9046_v55  ;;  %v9070_v11 = vrot.slane %v20178_v4, 2  ;;  %v20231_v4 = vld [vmem:[#allocation141_spill] sm:$0xff] }
 0x733   : > { %13334 = vmatmul.mubr.msk.bf16.gmra.mrb[16].mxu1 %vm20142_vm9, %v18204_v12  ;;  %vm20160_vm9 = vmmov %vm20141_vm2  ;;  %v9052_v12 = vor.u32 %v9051_v40, %v9050_v8  ;;  %v9100_v40 = vshrl.u32 %v18288_v19, 16 }
 0x734   : > { %13337 = vmatprep.mubr.msk.bf16.mxu1 %vm20143_vm14, %v18215_v33  ;;  %vm20161_vm14 = vmmov %vm20159_vm0 }
 0x73b   : > { %13338 = vmatmul.mubr.msk.bf16.gmra.mrb[20].mxu1 %vm20144_vm15, %v18220_v54  ;;  %vm20162_vm15 = vmmov %vm20158_vm1  ;;  %v9054_v54 = vrot.slane %v19904_v45, 2  ;;  %v9063_v45 = vrot.slane %v20171_v15, 3  ;;  %v20209_v15 = vld [vmem:[#allocation47_spill] sm:$0xff] }
 0x73c   : > { %13341 = vmatprep.mubr.msk.bf16.mxu1 %vm20145_vm8, %v8308_v3  ;;  %vm20163_vm8 = vmmov %vm20158_vm1  ;;  %v9058_v3 = vrot.slane %v19909_v61, 2  ;;  %v9067_v61 = vrot.slane %v20174_v46, 3  ;;  %v20222_v46 = vld [vmem:[#allocation134_spill] sm:$0xff] }
 0x73d   : > { %v9056_v41 = vor.u32 %v9055_v16, %v9054_v54  ;;  %v9064_v49 = vor.u32 %v9063_v45, %v9062_v44  ;;  %v9102_v54 = vrot.slane %v9100_v40, 2  ;;  %v20207_v44 = vld [vmem:[#allocation127_spill] sm:$0xff]  ;;  %v20212_v45 = vld [vmem:[#allocation128_spill] sm:$0xff] }
 0x73e   : > { %v9060_v62 = vor.u32 %v9059_v48, %v9058_v3  ;;  %v9068_v14 = vor.u32 %v9067_v61, %v9066_v20  ;;  %v20220_v20 = vld [vmem:[#allocation132_spill] sm:$0xff]  ;;  %v20224_v61 = vld [vmem:[#allocation135_spill] sm:$0xff] }
 0x743   : > { %13342 = vmatmul.mubr.msk.bf16.gmra.mrb[24].mxu1 %vm20146_vm13, %v8310_v51  ;;  %v9030_v51 = vrot.slane %v19879_v47, 2  ;;  %vm20164_vm13 = vmmov %vm20141_vm2 }
 0x744   : > { %13345 = vmatprep.mubr.msk.bf16.mxu1 %vm20147_vm10, %v8312_v13  ;;  %v9031_v13 = vrot.slane %v19880_v58, 3  ;;  %v9038_v58 = vrot.slane %v19889_v57, 2  ;;  %vm20165_vm10 = vmmov %vm20141_vm2 }
 0x746   : > { %v9032_v21 = vor.u32 %v9031_v13, %v9030_v51  ;;  %v9040_v57 = vor.u32 %v9039_v35, %v9038_v58  ;;  %v20186_v51 = vld [vmem:[#allocation148_spill] sm:$0xff]  ;;  %v9091_v35 = vshrl.u32 %v18280_v2, 16 }
 0x747   : > { %v9078_v13 = vrot.slane %v20186_v51, 2  ;;  %v14676_v51 = vld [vmem:[%s15730_s23 + $0x28] sm:$0xff]  }
 0x748   : > { %v9033_v47 = vsel %vm20157_vm7, %v9028_v17, %v9032_v21  ;;  %v9037_v39 = vsel %vm20158_vm1, %v9032_v21, %v9036_v52  ;;  %v9041_v22 = vsel %vm20162_vm15, %v9036_v52, %v9040_v57  ;;  %v9045_v5 = vsel %vm20163_vm8, %v9040_v57, %v9044_v53  ;;  %vm20175_vm7 = vmmov %vm20141_vm2  ;;  %v20190_v21 = vld [vmem:[#allocation59_spill] sm:$0xff] }
 0x749   : > { %v9072_v17 = vor.u32 %v9071_v60, %v9070_v11  ;;  %v9083_v52 = vrot.slane %v20190_v21, 3  ;;  %v9086_v57 = vrot.slane %v20195_v25, 2  ;;  %v9093_v63 = vrot.slane %v9091_v35, 2  ;;  %v20233_v11 = vld [vmem:[#allocation143_spill] sm:$0xff]  ;;  %v20237_v60 = vld [vmem:[#allocation145_spill] sm:$0xff] }
 0x74a   : > { %v14678_v21 = vld [vmem:[%s15730_s23 + $0x38] sm:$0xff]   ;;  %v14679_v35 = vld [vmem:[%s15730_s23 + $0x40] sm:$0xff]  }
 0x74b   : > { %13346 = vmatmul.mubr.msk.bf16.gmra.mrb[28].mxu1 %vm20148_vm12, %v8314_v6  ;;  %v8796_v6 = vsel %vm20154_vm3, %v20153_v23, %v8795_v29  ;;  %vm20166_vm12 = vmmov %vm20158_vm1  ;;  %v20189_v23 = vld [vmem:[#allocation57_spill] sm:$0xff] }
 0x74c   : > { %13349 = vmatprep.mubr.msk.bf16.mxu1 %vm20150_vm6, %v20149_v56  ;;  %v9049_v33 = vsel %vm20166_vm12, %v9044_v53, %v9048_v42  ;;  %vm20167_vm6 = vmmov %vm20158_vm1  ;;  %v20182_v56 = vld [vmem:[#allocation142_spill] sm:$0xff]  ;;  %v20196_v53 = vshll.u32 %v20194_v28, 16 }
 0x74d   : > { %v9053_v32 = vsel %vm20167_vm6, %v9048_v42, %v9052_v12  ;;  %vm20169_vm3 = vmmov %vm20141_vm2  ;;  %v9075_v10 = vrot.slane %v20182_v56, 3  ;;  %v9103_v42 = vshll.u32 %v18288_v19, 16 }
 0x74f   : > { %v9076_v27 = vor.u32 %v9075_v10, %v9074_v43  ;;  %v9105_v16 = vrot.slane %v9103_v42, 3  ;;  %v20240_v43 = vld [vmem:[#allocation63_spill] sm:$0xff] }
 0x750   : > { %v9702_v56 = vrot.slane %v20240_v43, 3  ;;  %v14683_v42 = vld [vmem:[%s15730_s23 + $0x60] sm:$0xff]  }
 0x751   : > { %v9106_v3 = vor.u32 %v9105_v16, %v9102_v54  ;;  %v20284_v43 = vld [vmem:[#allocation90_spill] sm:$0xff] }
 0x753   : > { %13350 = vmatmul.mubr.msk.bf16.gmra.mrb[32].mxu1 %vm20155_vm11, %v8796_v6  ;;  %vm20170_vm11 = vmmov %vm20158_vm1  ;;  %v9082_v6 = vrot.slane %v20189_v23, 2  ;;  %v14677_v23 = vld [vmem:[%s15730_s23 + $0x30] sm:$0xff]  }
 0x754   : > { %13355 = vmatprep.mubr.msk.bf16.mxu1 %vm20156_vm4, %v9029_v1  ;;  %v9057_v50 = vsel %vm20170_vm11, %v9052_v12, %v9056_v41  ;;  %vm20172_vm4 = vmmov %vm20158_vm1  ;;  %v20187_v1 = vld [vmem:[#allocation147_spill] sm:$0xff] }
 0x755   : > { %v9061_v34 = vsel %vm20172_vm4, %v9056_v41, %v9060_v62  ;;  %vm20176_vm1 = vmmov %vm20141_vm2  ;;  %v9079_v31 = vrot.slane %v20187_v1, 3  ;;  %v9084_v58 = vor.u32 %v9083_v52, %v9082_v6  ;;  %v20204_v41 = vld [vmem:[#allocation88_spill] sm:$0xff]  ;;  %v9708_v6 = vrot.slane %v14677_v23, 3  ;;  %v20295_v23 = vld [vmem:[#allocation94_spill] sm:$0xff] }
 0x756   : > { %vm20177_vm0 = vmmov %vm20172_vm4  ;;  %v9710_v52 = vrot.slane %v14678_v21, 3 }
 0x757   : > { %v9065_v9 = vsel %vm20177_vm0, %v9060_v62, %v9064_v49  ;;  %vm20185_vm15 = vmmov %vm20177_vm0 }
 0x758   : > { %v9073_v29 = vsel %vm20185_vm15, %v9068_v14, %v9072_v17  ;;  %vm20188_vm8 = vmmov %vm20177_vm0 }
 0x759   : > { %v9077_v37 = vsel %vm20188_vm8, %v9072_v17, %v9076_v27  ;;  %vm20193_vm12 = vmmov %vm20177_vm0  ;;  %v20242_v17 = vld [vmem:[#allocation146_spill] sm:$0xff] }
 0x75a   : > { %vm20197_vm6 = vmmov %vm20177_vm0 }
 0x75b   : > { %13356 = vmatmul.mubr.msk.bf16.vlgmr.msra.gmra.mrb[0].mxu1 %vm20141_vm2, %v9033_v47  ;;  %vm20180_vm2 = vmmov %vm20177_vm0  ;;  %v9080_v47 = vor.u32 %v9079_v31, %v9078_v13  ;;  %v9706_v13 = vrot.slane %v14676_v51, 3 }
 0x75c   : > { %13359 = vmatprep.mubr.msk.bf16.mxu1 %vm20160_vm9, %v9037_v39  ;;  %13392 = vmatpush3.bf16.msra.mxu1 %v9482_v59  ;;  %v9069_v36 = vsel %vm20180_vm2, %v9064_v49, %v9068_v14  ;;  %vm20183_vm9 = vmmov %vm20176_vm1  ;;  %v9094_v39 = vshll.u32 %v18280_v2, 16  ;;  %v20226_v49 = vld [vmem:[#allocation136_spill] sm:$0xff]  ;;  %v20228_v14 = vld [vmem:[#allocation137_spill] sm:$0xff] }
 0x75d   : > { %14488 = vmatprep.subr.msk.bf16.mxu1 %vm20161_vm14, %v18357_v26  ;;  %vm20184_vm14 = vmmov %vm20176_vm1  ;;  %v9081_v59 = vsel %vm20193_vm12, %v9076_v27, %v9080_v47  ;;  %v9085_v55 = vsel %vm20197_vm6, %v9080_v47, %v9084_v58  ;;  %v20245_v27 = vld [vmem:[#allocation65_spill] sm:$0xff] }
 0x75e   : > { %vm20200_vm11 = vmmov %vm20177_vm0 }
 0x75f   : > { %vm20201_vm4 = vmmov %vm20177_vm0 }
 0x760   : > { %vm20203_vm2 = vmmov %vm20176_vm1 }
 0x761   : > { %vm20208_vm15 = vmmov %vm20176_vm1 }
 0x762   : > { %vm20210_vm8 = vmmov %vm20176_vm1 }
 0x763   : > { %13360 = vmatmul.mubr.msk.bf16.gmra.mrb[4].mxu1 %vm20164_vm13, %v9041_v22  ;;  %vm20191_vm13 = vmmov %vm20176_vm1  ;;  %v9087_v22 = vrot.slane %v20196_v53, 3 }
 0x764   : > { %13363 = vmatprep.mubr.msk.bf16.mxu1 %vm20165_vm10, %v9045_v5  ;;  %vm20192_vm10 = vmmov %vm20176_vm1  ;;  %v9096_v5 = vrot.slane %v9094_v39, 3  ;;  %v9712_v39 = vrot.slane %v14679_v35, 3  ;;  %v20301_v35 = vld [vmem:[#allocation96_spill] sm:$0xff] }
 0x765   : > { %v9088_v8 = vor.u32 %v9087_v22, %v9086_v57  ;;  %vm20215_vm12 = vmmov %vm20176_vm1  ;;  %v14681_v22 = vld [vmem:[%s15730_s23 + $0x50] sm:$0xff]  }
 0x766   : > { %v9097_v12 = vor.u32 %v9096_v5, %v9093_v63  ;;  %vm20217_vm6 = vmmov %vm20176_vm1  ;;  %v14682_v63 = vld [vmem:[%s15730_s23 + $0x58] sm:$0xff]  }
 0x767   : > { %v9718_v5 = vrot.slane %v14682_v63, 3 }
 0x768   : > { %v9107_v48 = vsel %vm20177_vm0, %v9097_v12, %v9106_v3  ;;  %vm20230_vm0 = vmmov %vm20176_vm1  ;;  %v14685_v3 = vld [vmem:[%s15730_s23 + $0x70] sm:$0xff]  }
 0x76b   : > { %13364 = vmatmul.mubr.msk.bf16.gmra.mrb[8].mxu1 %vm20168_vm5, %v9049_v33  ;;  %vm20198_vm5 = vmmov %vm20176_vm1  ;;  %v9089_v33 = vsel %vm20200_vm11, %v9084_v58, %v9088_v8 }
 0x76c   : > { %13367 = vmatprep.mubr.msk.bf16.mxu1 %vm20169_vm3, %v9053_v32  ;;  %vm20199_vm3 = vmmov %vm20176_vm1  ;;  %v9098_v32 = vsel %vm20201_vm4, %v9088_v8, %v9097_v12  ;;  %v9720_v12 = vrot.slane %v14683_v42, 3  ;;  %v20311_v42 = vld [vmem:[#allocation100_spill] sm:$0xff] }
 0x76d   : > { %vm20223_vm11 = vmmov %vm20176_vm1 }
 0x76e   : > { %vm20225_vm4 = vmmov %vm20176_vm1 }
 0x773   : > { %13368 = vmatmul.mubr.msk.bf16.gmra.mrb[12].mxu1 %vm20175_vm7, %v9057_v50  ;;  %vm20202_vm7 = vmmov %vm20176_vm1  ;;  %v11786_v50 = vld [vmem:[%s19065_s6 + $0x20] sm:$0xf] }
 0x774   : > { %13371 = vmatprep.mubr.msk.bf16.mxu1 %vm20176_vm1, %v9061_v34  ;;  %v20214_v34 = vld [vmem:[#allocation129_spill] sm:$0xff] }
 0x77b   : > { %13372 = vmatmul.mubr.msk.bf16.gmra.mrb[16].mxu1 %vm20183_vm9, %v9065_v9  ;;  %vm20205_vm9 = vmmov %vm20176_vm1  ;;  %v20229_v9 = vld [vmem:[#allocation138_spill] sm:$0xff] }
 0x77c   : > { %13375 = vmatprep.mubr.msk.bf16.mxu1 %vm20184_vm14, %v9069_v36  ;;  %vm20206_vm14 = vcmask 1043456   ;;  %v20239_v36 = vld [vmem:[#allocation58_spill] sm:$0xff] }
 0x77d   : > { %v9793_v62 = vsel %vm20206_vm14, %v18357_v26, 0  ;;  %v20216_v26 = vld [vmem:[#allocation130_spill] sm:$0xff]  ;;  %v9701_v0 = vrot.slane %v20239_v36, 3 }
 0x783   : > { %13376 = vmatmul.mubr.msk.bf16.gmra.mrb[20].mxu1 %vm20191_vm13, %v9073_v29  ;;  %vm20211_vm13 = vmmov %vm20206_vm14  ;;  %v9704_v29 = vrot.slane %v20245_v27, 3 }
 0x784   : > { %13379 = vmatprep.mubr.msk.bf16.mxu1 %vm20192_vm10, %v9077_v37  ;;  %vm20213_vm10 = vmmov %vm20176_vm1 }
 0x785   : > { %vm20236_vm14 = vmmov %vm20230_vm0 }
 0x78b   : > { %13380 = vmatmul.mubr.msk.bf16.gmra.mrb[24].mxu1 %vm20198_vm5, %v9081_v59  ;;  %vm20219_vm5 = vmmov %vm20176_vm1  ;;  %v14680_v59 = vld [vmem:[%s15730_s23 + $0x48] sm:$0xff]  }
 0x78c   : > { %13383 = vmatprep.mubr.msk.bf16.mxu1 %vm20199_vm3, %v9085_v55  ;;  %vm20221_vm3 = vmmov %vm20176_vm1  ;;  %v9714_v25 = vrot.slane %v14680_v59, 3  ;;  %v9716_v55 = vrot.slane %v14681_v22, 3  ;;  %v20307_v22 = vld [vmem:[#allocation98_spill] sm:$0xff] }
 0x793   : > { %13384 = vmatmul.mubr.msk.bf16.gmra.mrb[28].mxu1 %vm20202_vm7, %v9089_v33  ;;  %vm20227_vm7 = vmmov %vm20176_vm1  ;;  %v14684_v33 = vld [vmem:[%s15730_s23 + $0x68] sm:$0xff]  }
 0x794   : > { %13387 = vmatprep.mubr.msk.bf16.mxu1 %vm20176_vm1, %v9098_v32  ;;  %v9722_v54 = vrot.slane %v14684_v33, 3 }
 0x79b   : > { %13388 = vmatmul.mubr.msk.bf16.gmra.mrb[32].mxu1 %vm20203_vm2, %v9107_v48  ;;  %vm20232_vm2 = vmmov %vm20230_vm0  ;;  %v9724_v48 = vrot.slane %v14685_v3, 3 }
 0x79c   : > { %13393 = vmatprep.mubr.msk.bf16.mxu1 %vm20205_vm9, %v20204_v41  ;;  %vm20234_vm9 = vmmov %vm20230_vm0  ;;  %v14686_v41 = vld [vmem:[%s15730_s23 + $0x78] sm:$0xff]  }
 0x7a3   : > { %13394 = vmatmul.mubr.msk.bf16.vlgmr.msra.gmra.mrb[0].mxu1 %vm20208_vm15, %v20207_v44  ;;  %vm20238_vm15 = vmmov %vm20230_vm0 }
 0x7a4   : > { %13397 = vmatprep.mubr.msk.bf16.mxu1 %vm20210_vm8, %v20209_v15  ;;  %13430 = vmatpush3.bf16.msra.mxu1 %v9793_v62  ;;  %vm20241_vm8 = vcmask 1044480   ;;  %v9726_v62 = vrot.slane %v14686_v41, 3  ;;  %v14687_v15 = vld [vmem:[%s15730_s23 + $0x80] sm:$0xff]   ;;  %v20320_v41 = vld [vmem:[#allocation112_spill] sm:$0xff]  ;;  %s521_s23 = scalar_lea.vmem %s19073_s14, %s14491_s30 }
 0x7a5   : > { %14489 = vmatprep.subr.msk.bf16.mxu1 %vm20211_vm13, %v11786_v50  ;;  %v9703_v10 = vsel %vm20241_vm8, %v9701_v0, %v9702_v56  ;;  %vm20243_vm13 = vmmov %vm20230_vm0 }
 0x7ab   : > { %13398 = vmatmul.mubr.msk.bf16.gmra.mrb[4].mxu1 %vm20213_vm10, %v20212_v45  ;;  %vm20244_vm10 = vmmov %vm20230_vm0  ;;  %v9728_v45 = vrot.slane %v14687_v15, 3 }
 0x7ac   : > { %13401 = vmatprep.mubr.msk.bf16.mxu1 %vm20215_vm12, %v20214_v34  ;;  %vm20246_vm12 = vmmov %vm20241_vm8  ;;  %v20269_v34 = vld [vmem:[#allocation116_spill] sm:$0xff] }
 0x7ad   : > { %v9705_v1 = vsel %vm20246_vm12, %v9702_v56, %v9704_v29  ;;  %vm20261_vm12 = vmmov %vm20230_vm0  ;;  %v9977_v56 = vrot.slane %v20284_v43, 3 }
 0x7b3   : > { %13402 = vmatmul.mubr.msk.bf16.gmra.mrb[8].mxu1 %vm20217_vm6, %v20216_v26  ;;  %vm20247_vm6 = vmmov %vm20241_vm8  ;;  %v9730_v26 = vrot.slane %v20269_v34, 3 }
 0x7b4   : > { %13405 = vmatprep.mubr.msk.bf16.mxu1 %vm20219_vm5, %v20218_v7  ;;  %v9707_v31 = vsel %vm20247_vm6, %v9704_v29, %v9706_v13  ;;  %vm20248_vm5 = vcmask 1043456   ;;  %v20289_v29 = vld [vmem:[#allocation92_spill] sm:$0xff] }
 0x7b5   : > { %v10064_v37 = vsel %vm20248_vm5, %v11786_v50, 0  ;;  %v9981_v51 = vrot.slane %v20289_v29, 3 }
 0x7bb   : > { %13406 = vmatmul.mubr.msk.bf16.gmra.mrb[12].mxu1 %vm20221_vm3, %v20220_v20  ;;  %vm20249_vm3 = vmmov %vm20230_vm0 }
 0x7bc   : > { %13409 = vmatprep.mubr.msk.bf16.mxu1 %vm20223_vm11, %v20222_v46  ;;  %vm20250_vm11 = vmmov %vm20230_vm0  ;;  %v9732_v46 = vrot.slane %v20194_v28, 3  ;;  %v20283_v28 = vld [vmem:[#allocation124_spill] sm:$0xff] }
 0x7bd   : > { %v9975_v0 = vrot.slane %v20283_v28, 3 }
 0x7c3   : > { %13410 = vmatmul.mubr.msk.bf16.gmra.mrb[16].mxu1 %vm20225_vm4, %v20224_v61  ;;  %vm20251_vm4 = vmmov %vm20247_vm6  ;;  %v9734_v61 = vrot.slane %v18280_v2, 3 }
 0x7c4   : > { %13413 = vmatprep.mubr.msk.bf16.mxu1 %vm20227_vm7, %v20226_v49  ;;  %v9709_v47 = vsel %vm20251_vm4, %v9706_v13, %v9708_v6  ;;  %vm20252_vm7 = vmmov %vm20251_vm4 }
 0x7c5   : > { %v9711_v58 = vsel %vm20252_vm7, %v9708_v6, %v9710_v52  ;;  %v9985_v6 = vrot.slane %v20295_v23, 3 }
 0x7cb   : > { %13414 = vmatmul.mubr.msk.bf16.gmra.mrb[20].mxu1 %vm20176_vm1, %v20228_v14  ;;  %vm20253_vm1 = vmmov %vm20230_vm0 }
 0x7cc   : > { %13417 = vmatprep.mubr.msk.bf16.mxu1 %vm20230_vm0, %v20229_v9  ;;  %v9736_v9 = vrot.slane %v18288_v19, 3 }
 0x7d3   : > { %13418 = vmatmul.mubr.msk.bf16.gmra.mrb[24].mxu1 %vm20232_vm2, %v20231_v4  ;;  %vm20254_vm2 = vmmov %vm20251_vm4  ;;  %v20277_v4 = vld [vmem:[#allocation122_spill] sm:$0xff] }
 0x7d4   : > { %13421 = vmatprep.mubr.msk.bf16.mxu1 %vm20234_vm9, %v20233_v11  ;;  %v9713_v57 = vsel %vm20254_vm2, %v9710_v52, %v9712_v39  ;;  %vm20255_vm9 = vmmov %vm20254_vm2  ;;  %v9729_v7 = vsel %vm20254_vm2, %v9726_v62, %v9728_v45  ;;  %v9972_v11 = vrot.slane %v20277_v4, 3  ;;  %v20332_v4 = vld [vmem:[#allocation3_spill] sm:$0xff] }
 0x7d5   : > { %v9715_v53 = vsel %vm20255_vm9, %v9712_v39, %v9714_v25  ;;  %vm20258_vm8 = vmmov %vm20254_vm2  ;;  %v9989_v39 = vrot.slane %v20301_v35, 3 }
 0x7d6   : > { %v9717_v8 = vsel %vm20258_vm8, %v9714_v25, %v9716_v55  ;;  %vm20262_vm6 = vmmov %vm20254_vm2 }
 0x7d7   : > { %v9721_v16 = vsel %vm20262_vm6, %v9718_v5, %v9720_v12  ;;  %vm20263_vm5 = vmmov %vm20254_vm2 }
 0x7d8   : > { %v9723_v32 = vsel %vm20263_vm5, %v9720_v12, %v9722_v54  ;;  %vm20266_vm4 = vmmov %vm20254_vm2  ;;  %v9997_v12 = vrot.slane %v20311_v42, 3 }
 0x7d9   : > { %v9725_v50 = vsel %vm20266_vm4, %v9722_v54, %v9724_v48  ;;  %vm20267_vm7 = vmmov %vm20254_vm2 }
 0x7da   : > { %v9727_v44 = vsel %vm20267_vm7, %v9724_v48, %v9726_v62  ;;  %vm20270_vm9 = vmmov %vm20254_vm2  ;;  %v10003_v62 = vrot.slane %v20320_v41, 3 }
 0x7db   : > { %13422 = vmatmul.mubr.msk.bf16.gmra.mrb[28].mxu1 %vm20236_vm14, %v20235_v24  ;;  %vm20256_vm14 = vmmov %vm20230_vm0  ;;  %v9731_v20 = vsel %vm20270_vm9, %v9728_v45, %v9730_v26  ;;  %v20278_v24 = vld [vmem:[#allocation126_spill] sm:$0xff]  ;;  %v20328_v45 = vld [vmem:[#allocation60_spill] sm:$0xff] }
 0x7dc   : > { %13425 = vmatprep.mubr.msk.bf16.mxu1 %vm20238_vm15, %v20237_v60  ;;  %vm20257_vm15 = vmmov %vm20230_vm0  ;;  %v9973_v60 = vrot.slane %v20278_v24, 3  ;;  %v20333_v24 = vld [vmem:[#allocation64_spill] sm:$0xff] }
 0x7dd   : > { %vm20273_vm8 = vmmov %vm20254_vm2 }
 0x7de   : > { %v9733_v49 = vsel %vm20273_vm8, %v9730_v26, %v9732_v46  ;;  %vm20279_vm6 = vmmov %vm20254_vm2 }
 0x7df   : > { %v9737_v36 = vsel %vm20279_vm6, %v9734_v61, %v9736_v9  ;;  %vm20280_vm5 = vmmov %vm20230_vm0 }
 0x7e0   : > { %vm20285_vm4 = vmmov %vm20254_vm2 }
 0x7e1   : > { %vm20286_vm7 = vmmov %vm20230_vm0 }
 0x7e2   : > { %vm20291_vm9 = vmmov %vm20230_vm0 }
 0x7e3   : > { %13426 = vmatmul.mubr.msk.bf16.gmra.mrb[32].mxu1 %vm20243_vm13, %v20242_v17  ;;  %vm20259_vm13 = vmmov %vm20254_vm2  ;;  %v20288_v17 = vld [vmem:[#allocation91_spill] sm:$0xff] }
 0x7e4   : > { %13431 = vmatprep.mubr.msk.bf16.mxu1 %vm20244_vm10, %v9703_v10  ;;  %v9719_v40 = vsel %vm20259_vm13, %v9716_v55, %v9718_v5  ;;  %vm20260_vm10 = vmmov %vm20230_vm0  ;;  %v9976_v10 = vsel %vm20285_vm4, %v9973_v60, %v9975_v0  ;;  %v9979_v27 = vrot.slane %v20288_v17, 3  ;;  %v9993_v55 = vrot.slane %v20307_v22, 3  ;;  %v20345_v22 = vld [vmem:[#allocation9_spill] sm:$0xff] }
 0x7e5   : > { %vm20274_vm13 = vmmov %vm20254_vm2 }
 0x7e6   : > { %v9735_v14 = vsel %vm20274_vm13, %v9732_v46, %v9734_v61  ;;  %vm20297_vm13 = vmmov %vm20230_vm0  ;;  %v20330_v61 = vld [vmem:[#allocation4_spill] sm:$0xff] }
 0x7eb   : > { %13432 = vmatmul.mubr.msk.bf16.vlgmr.msra.gmra.mrb[0].mxu1 %vm20249_vm3, %v9705_v1  ;;  %vm20264_vm3 = vmmov %vm20230_vm0 }
 0x7ec   : > { %13435 = vmatprep.mubr.msk.bf16.mxu1 %vm20250_vm11, %v9707_v31  ;;  %13468 = vmatpush3.bf16.msra.mxu1 %v10064_v37  ;;  %vm20265_vm11 = vmmov %vm20230_vm0  ;;  %v20294_v31 = vld [vmem:[#allocation93_spill] sm:$0xff] }
 0x7ed   : > { %v9983_v37 = vrot.slane %v20294_v31, 3 }
 0x7f3   : > { %13436 = vmatmul.mubr.msk.bf16.gmra.mrb[4].mxu1 %vm20253_vm1, %v9709_v47  ;;  %vm20268_vm1 = vmmov %vm20230_vm0  ;;  %v20300_v47 = vld [vmem:[#allocation95_spill] sm:$0xff] }
 0x7f4   : > { %13439 = vmatprep.mubr.msk.bf16.mxu1 %vm20230_vm0, %v9711_v58  ;;  %v9987_v58 = vrot.slane %v20300_v47, 3 }
 0x7fb   : > { %13440 = vmatmul.mubr.msk.bf16.gmra.mrb[8].mxu1 %vm20256_vm14, %v9713_v57  ;;  %vm20271_vm14 = vmmov %vm20230_vm0  ;;  %v20306_v57 = vld [vmem:[#allocation97_spill] sm:$0xff] }
 0x7fc   : > { %13443 = vmatprep.mubr.msk.bf16.mxu1 %vm20257_vm15, %v9715_v53  ;;  %vm20272_vm15 = vmmov %vm20230_vm0  ;;  %v9991_v53 = vrot.slane %v20306_v57, 3 }
 0x803   : > { %13444 = vmatmul.mubr.msk.bf16.gmra.mrb[12].mxu1 %vm20260_vm10, %v9717_v8  ;;  %vm20275_vm10 = vmmov %vm20230_vm0  ;;  %v20310_v8 = vld [vmem:[#allocation99_spill] sm:$0xff] }
 0x804   : > { %13447 = vmatprep.mubr.msk.bf16.mxu1 %vm20261_vm12, %v9719_v40  ;;  %vm20276_vm12 = vmmov %vm20230_vm0  ;;  %v9995_v40 = vrot.slane %v20310_v8, 3  ;;  %v20347_v8 = vld [vmem:[#allocation69_spill] sm:$0xff] }
 0x80b   : > { %13448 = vmatmul.mubr.msk.bf16.gmra.mrb[16].mxu1 %vm20264_vm3, %v9721_v16  ;;  %vm20281_vm3 = vmmov %vm20254_vm2  ;;  %v9999_v16 = vrot.slane %v18227_v18, 3 }
 0x80c   : > { %13451 = vmatprep.mubr.msk.bf16.mxu1 %vm20265_vm11, %v9723_v32  ;;  %v9974_v2 = vsel %vm20281_vm3, %v9972_v11, %v9973_v60  ;;  %vm20282_vm11 = vmmov %vm20230_vm0  ;;  %v10001_v32 = vrot.slane %v18234_v38, 3  ;;  %v20326_v38 = vld [vmem:[#allocation55_spill] sm:$0xff] }
 0x813   : > { %13452 = vmatmul.mubr.msk.bf16.gmra.mrb[20].mxu1 %vm20268_vm1, %v9725_v50  ;;  %vm20287_vm1 = vmmov %vm20254_vm2 }
 0x814   : > { %13455 = vmatprep.mubr.msk.bf16.mxu1 %vm20230_vm0, %v9727_v44  ;;  %v9978_v19 = vsel %vm20287_vm1, %v9975_v0, %v9977_v56  ;;  %vm20290_vm2 = vmmov %vm20287_vm1  ;;  %v9994_v5 = vsel %vm20287_vm1, %v9991_v53, %v9993_v55  ;;  %v20323_v44 = vrot.slane %v20152_v30, 3  ;;  %v20331_v30 = vld [vmem:[#allocation62_spill] sm:$0xff]  ;;  %v20335_v0 = vld [vmem:[#allocation5_spill] sm:$0xff] }
 0x815   : > { %v9980_v13 = vsel %vm20290_vm2, %v9977_v56, %v9979_v27  ;;  %vm20296_vm8 = vmmov %vm20287_vm1 }
 0x816   : > { %v9984_v21 = vsel %vm20296_vm8, %v9981_v51, %v9983_v37  ;;  %vm20302_vm6 = vmmov %vm20287_vm1 }
 0x817   : > { %v9988_v59 = vsel %vm20302_vm6, %v9985_v6, %v9987_v58  ;;  %vm20304_vm3 = vmmov %vm20287_vm1 }
 0x818   : > { %v9990_v25 = vsel %vm20304_vm3, %v9987_v58, %v9989_v39  ;;  %vm20308_vm4 = vmmov %vm20287_vm1 }
 0x819   : > { %v9992_v63 = vsel %vm20308_vm4, %v9989_v39, %v9991_v53  ;;  %vm20312_vm2 = vmmov %vm20287_vm1 }
 0x81a   : > { %v9996_v33 = vsel %vm20312_vm2, %v9993_v55, %v9995_v40  ;;  %vm20316_vm8 = vmmov %vm20287_vm1 }
 0x81b   : > { %13456 = vmatmul.mubr.msk.bf16.gmra.mrb[24].mxu1 %vm20271_vm14, %v9729_v7  ;;  %vm20292_vm14 = vmmov %vm20287_vm1  ;;  %v10000_v3 = vsel %vm20316_vm8, %v9997_v12, %v9999_v16  ;;  %v20329_v7 = vld [vmem:[#allocation61_spill] sm:$0xff] }
 0x81c   : > { %13459 = vmatprep.mubr.msk.bf16.mxu1 %vm20272_vm15, %v9731_v20  ;;  %v9982_v1 = vsel %vm20292_vm14, %v9979_v27, %v9981_v51  ;;  %vm20293_vm15 = vmmov %vm20230_vm0 }
 0x81d   : > { %vm20314_vm14 = vmmov %vm20287_vm1 }
 0x81e   : > { %v9998_v54 = vsel %vm20314_vm14, %v9995_v40, %v9997_v12  ;;  %vm20321_vm6 = vmmov %vm20287_vm1 }
 0x81f   : > { %v10004_v50 = vsel %vm20321_vm6, %v10001_v32, %v10003_v62  ;;  %vm20324_vm3 = vmmov %vm20287_vm1 }
 0x820   : > { %v10006_v18 = vsel %vm20324_vm3, %v10003_v62, %v20323_v44  ;;  %vm20327_vm4 = vmmov %vm20230_vm0  ;;  %v20351_v62 = vld [vmem:[#allocation11_spill] sm:$0xff] }
 0x821   : > { %vm20339_vm2 = vmmov %vm20230_vm0 }
 0x822   : > { %vm20342_vm14 = vmmov %vm20230_vm0 }
 0x823   : > { %13460 = vmatmul.mubr.msk.bf16.gmra.mrb[28].mxu1 %vm20275_vm10, %v9733_v49  ;;  %vm20298_vm10 = vmmov %vm20287_vm1 }
 0x824   : > { %13463 = vmatprep.mubr.msk.bf16.mxu1 %vm20276_vm12, %v9735_v14  ;;  %v9986_v52 = vsel %vm20298_vm10, %v9983_v37, %v9985_v6  ;;  %vm20299_vm12 = vmmov %vm20230_vm0 }
 0x825   : > { %vm20318_vm10 = vmmov %vm20287_vm1 }
 0x826   : > { %v10002_v48 = vsel %vm20318_vm10, %v9999_v16, %v10001_v32  ;;  %vm20337_vm1 = vmmov %vm20230_vm0  ;;  %v20350_v32 = vld [vmem:[#allocation8_spill] sm:$0xff] }
 0x827   : > { %vm20348_vm8 = vmmov %vm20230_vm0 }
 0x828   : > { %vm20352_vm10 = vmmov %vm20230_vm0 }
 0x829   : > { %vm20355_vm6 = vmmov %vm20230_vm0 }
 0x82a   : > { %vm20359_vm3 = vmmov %vm20230_vm0 }
 0x82b   : > { %13464 = vmatmul.mubr.msk.bf16.gmra.mrb[32].mxu1 %vm20280_vm5, %v9737_v36  ;;  %vm20303_vm5 = vmmov %vm20230_vm0 }
 0x82c   : > { %13469 = vmatprep.mubr.msk.bf16.mxu1 %vm20282_vm11, %v9974_v2  ;;  %vm20305_vm11 = vmmov %vm20230_vm0  ;;  %v20334_v2 = vld [vmem:[#allocation6_spill] sm:$0xff] }
 0x833   : > { %13470 = vmatmul.mubr.msk.bf16.vlgmr.msra.gmra.mrb[0].mxu1 %vm20286_vm7, %v9976_v10  ;;  %vm20309_vm7 = vmmov %vm20230_vm0 }
 0x834   : > { %13473 = vmatprep.mubr.msk.bf16.mxu1 %vm20230_vm0, %v9978_v19 }
 0x83b   : > { %13474 = vmatmul.mubr.msk.bf16.gmra.mrb[4].mxu1 %vm20291_vm9, %v9980_v13  ;;  %vm20313_vm9 = vmmov %vm20230_vm0  ;;  %v20338_v13 = vld [vmem:[#allocation66_spill] sm:$0xff] }
 0x83c   : > { %13477 = vmatprep.mubr.msk.bf16.mxu1 %vm20293_vm15, %v9982_v1  ;;  %vm20315_vm15 = vmmov %vm20230_vm0 }
 0x843   : > { %13478 = vmatmul.mubr.msk.bf16.gmra.mrb[8].mxu1 %vm20297_vm13, %v9984_v21  ;;  %vm20317_vm13 = vmmov %vm20230_vm0  ;;  %v20341_v21 = vld [vmem:[#allocation67_spill] sm:$0xff] }
 0x844   : > { %13481 = vmatprep.mubr.msk.bf16.mxu1 %vm20299_vm12, %v9986_v52  ;;  %vm20319_vm12 = vmmov %vm20230_vm0 }
 0x84b   : > { %13482 = vmatmul.mubr.msk.bf16.gmra.mrb[12].mxu1 %vm20303_vm5, %v9988_v59  ;;  %vm20322_vm5 = vmmov %vm20230_vm0  ;;  %v20343_v59 = vld [vmem:[#allocation68_spill] sm:$0xff] }
 0x84c   : > { %13485 = vmatprep.mubr.msk.bf16.mxu1 %vm20305_vm11, %v9990_v25  ;;  %vm20325_vm11 = vmmov %vm20230_vm0 }
 0x853   : > { %13486 = vmatmul.mubr.msk.bf16.gmra.mrb[16].mxu1 %vm20309_vm7, %v9992_v63  ;;  %vm20336_vm7 = vmmov %vm20230_vm0  ;;  %v20346_v63 = vld [vmem:[#allocation7_spill] sm:$0xff] }
 0x854   : > { %13489 = vmatprep.mubr.msk.bf16.mxu1 %vm20230_vm0, %v9994_v5 }
 0x85b   : > { %13490 = vmatmul.mubr.msk.bf16.gmra.mrb[20].mxu1 %vm20313_vm9, %v9996_v33  ;;  %vm20340_vm9 = vmmov %vm20230_vm0 }
 0x85c   : > { %13493 = vmatprep.mubr.msk.bf16.mxu1 %vm20315_vm15, %v9998_v54  ;;  %vm20344_vm15 = vmmov %vm20230_vm0 }
 0x863   : > { %13494 = vmatmul.mubr.msk.bf16.gmra.mrb[24].mxu1 %vm20317_vm13, %v10000_v3  ;;  %vm20349_vm13 = vmmov %vm20230_vm0 }
 0x864   : > { %13497 = vmatprep.mubr.msk.bf16.mxu1 %vm20319_vm12, %v10002_v48  ;;  %vm20353_vm12 = vmmov %vm20230_vm0 }
 0x86b   : > { %13498 = vmatmul.mubr.msk.bf16.gmra.mrb[28].mxu1 %vm20322_vm5, %v10004_v50  ;;  %vm20357_vm5 = vmmov %vm20230_vm0 }
 0x86c   : > { %13501 = vmatprep.mubr.msk.bf16.mxu1 %vm20325_vm11, %v10006_v18  ;;  %vm20362_vm11 = vmmov %vm20230_vm0 }
 0x873   : > { %13502 = vmatmul.mubr.msk.bf16.gmra.mrb[32].mxu1 %vm20327_vm4, %v20326_v38  ;;  %vm20364_vm4 = vmmov %vm20230_vm0 }
 0x906   : > { %v13471_v15 = vpop.f32.mrb[0].mxu1 }
 0x907   : > { %v18575_v34 = vadd.f32 %v13471_v15, %v20328_v45  ;;  %v10100_v26 = vpop.f32.mrb[1].mxu1 }
 0x908   : > { %v18578_v20 = vadd.f32 %v10100_v26, %v20329_v7  ;;  %v13472_v46 = vpop.f32.mrb[2].mxu1 }
 0x909   : > { %v10284_v49 = vmul.f32 %v18575_v34, %v20330_v61  ;;  %v18583_v14 = vadd.f32 %v13472_v46, %v20331_v30  ;;  %v10103_v9 = vpop.f32.mrb[3].mxu1  ;;  %v20354_v46 = vld [vmem:[#allocation70_spill] sm:$0xff] }
 0x90a   : > { %v10282_v11 = vmul.f32 %v18578_v20, %v20332_v4  ;;  %v18588_v60 = vadd.f32 %v10103_v9, %v20333_v24  ;;  %v20356_v9 = vld [vmem:[#allocation71_spill] sm:$0xff] }
 0x90b   : > { %v10285_v28 = vmul.f32 %v18583_v14, %v20334_v2  ;;  %v10397_v56 = vmul.f32 %v10284_v49, %v10284_v49  ;;  %v10321_v29 = vsel %vm20230_vm0, %v10284_v49, 0.0 }
 0x90c   : > { %v10395_v36 = vmul.f32 %v10282_v11, %v10282_v11  ;;  %v10283_v43 = vmul.f32 %v18588_v60, %v20335_v0  ;;  %v10318_v10 = vsel %vm20336_vm7, %v10282_v11, 0.0  ;;  %vm20366_vm7 = vmmov %vm20230_vm0 }
 0x90d   : > { %v10398_v23 = vmul.f32 %v10285_v28, %v10285_v28  ;;  %v10434_v58 = vsel %vm20342_vm14, %v10397_v56, 0.0  ;;  %v10323_v53 = vsel %vm20344_vm15, %v10285_v28, 0.0  ;;  %v20358_v28 = vld [vmem:[#allocation72_spill] sm:$0xff]  ;;  %vm20374_vm14 = vmmov %vm20230_vm0 }
 0x90e   : > { %v10319_v19 = vsel %vm20337_vm1, %v10283_v43, 0.0  ;;  %v10396_v17 = vmul.f32 %v10283_v43, %v10283_v43  ;;  %v13475_v27 = vpop.f32.mrb[4].mxu1  ;;  %v10431_v37 = vsel %vm20339_vm2, %v10395_v36, 0.0  ;;  %vm20368_vm1 = vmmov %vm20230_vm0 }
 0x90f   : > { %v10320_v51 = vadd.f32 %v10319_v19, %v10318_v10  ;;  %v18598_v1 = vadd.f32 %v13475_v27, %v20338_v13  ;;  %v10116_v31 = vpop.f32.mrb[5].mxu1  ;;  %v10436_v33 = vsel %vm20348_vm8, %v10398_v23, 0.0  ;;  %v20360_v19 = vld [vmem:[#allocation12_spill] sm:$0xff]  ;;  %v20361_v27 = vld [vmem:[#allocation74_spill] sm:$0xff]  ;;  %vm20370_vm2 = vmmov %vm20230_vm0 }
 0x910   : > { %v10432_v6 = vsel %vm20340_vm9, %v10396_v17, 0.0  ;;  %v18603_v52 = vadd.f32 %v10116_v31, %v20341_v21  ;;  %v13476_v47 = vpop.f32.mrb[6].mxu1  ;;  %v20363_v13 = vld [vmem:[#allocation14_spill] sm:$0xff]  ;;  %vm20371_vm9 = vmmov %vm20230_vm0 }
 0x911   : > { %v10322_v35 = vadd.f32 %v10321_v29, %v10320_v51  ;;  %v10433_v39 = vadd.f32 %v10432_v6, %v10431_v37  ;;  %v18607_v25 = vadd.f32 %v13476_v47, %v20343_v59  ;;  %v10119_v57 = vpop.f32.mrb[7].mxu1  ;;  %v10288_v55 = vmul.f32 %v18598_v1, %v20345_v22  ;;  %v20365_v47 = vld [vmem:[#allocation13_spill] sm:$0xff]  ;;  %v20367_v59 = vld [vmem:[#allocation15_spill] sm:$0xff]  ;;  %vm20377_vm15 = vmmov %vm20230_vm0 }
 0x912   : > { %v10286_v5 = vmul.f32 %v18603_v52, %v20346_v63  ;;  %v18615_v40 = vadd.f32 %v10119_v57, %v20347_v8  ;;  %vm20379_vm8 = vmmov %vm20230_vm0 }
 0x913   : > { %v10435_v42 = vadd.f32 %v10434_v58, %v10433_v39  ;;  %v10324_v12 = vadd.f32 %v10323_v53, %v10322_v35  ;;  %v10289_v50 = vmul.f32 %v18607_v25, %v20351_v62  ;;  %v10401_v44 = vmul.f32 %v10288_v55, %v10288_v55 }
 0x914   : > { %v10325_v54 = vsel %vm20349_vm13, %v10286_v5, 0.0  ;;  %v10399_v16 = vmul.f32 %v10286_v5, %v10286_v5  ;;  %v10287_v3 = vmul.f32 %v18615_v40, %v20350_v32  ;;  %v10329_v30 = vsel %vm20355_vm6, %v10288_v55, 0.0  ;;  %vm20381_vm13 = vmmov %vm20230_vm0 }
 0x915   : > { %v10326_v48 = vadd.f32 %v10325_v54, %v10324_v12  ;;  %v10437_v41 = vadd.f32 %v10436_v33, %v10435_v42  ;;  %v10402_v24 = vmul.f32 %v10289_v50, %v10289_v50  ;;  %v10331_v56 = vsel %vm20359_vm3, %v10289_v50, 0.0  ;;  %v20369_v12 = vld [vmem:[#allocation79_spill] sm:$0xff]  ;;  %vm20386_vm6 = vmmov %vm20230_vm0 }
 0x916   : > { %v10438_v18 = vsel %vm20352_vm10, %v10399_v16, 0.0  ;;  %v10327_v38 = vsel %vm20353_vm12, %v10287_v3, 0.0  ;;  %v13479_v15 = vpop.f32.mrb[8].mxu1  ;;  %v10400_v7 = vmul.f32 %v10287_v3, %v10287_v3  ;;  %v10442_v51 = vsel %vm20362_vm11, %v10401_v44, 0.0  ;;  %vm20383_vm10 = vmmov %vm20230_vm0 }
 0x917   : > { %v10439_v45 = vadd.f32 %v10438_v18, %v10437_v41  ;;  %v10328_v26 = vadd.f32 %v10327_v38, %v10326_v48  ;;  %v18626_v61 = vadd.f32 %v13479_v15, %v20354_v46  ;;  %v10132_v49 = vpop.f32.mrb[9].mxu1  ;;  %v10444_v35 = vsel %vm20366_vm7, %v10402_v24, 0.0  ;;  %v20372_v48 = vld [vmem:[#allocation81_spill] sm:$0xff]  ;;  %v20373_v18 = vld [vmem:[#allocation82_spill] sm:$0xff]  ;;  %vm20384_vm12 = vmmov %vm20230_vm0 }
 0x918   : > { %v18630_v4 = vadd.f32 %v10132_v49, %v20356_v9  ;;  %v13480_v11 = vpop.f32.mrb[10].mxu1  ;;  %v10440_v2 = vsel %vm20357_vm5, %v10400_v7, 0.0  ;;  %v20375_v7 = vld [vmem:[#allocation16_spill] sm:$0xff]  ;;  %v20376_v49 = vld [vmem:[#allocation83_spill] sm:$0xff]  ;;  %vm20387_vm5 = vmmov %vm20230_vm0 }
 0x919   : > { %v10330_v36 = vadd.f32 %v10329_v30, %v10328_v26  ;;  %v18634_v0 = vadd.f32 %v13480_v11, %v20358_v28  ;;  %v10135_v43 = vpop.f32.mrb[11].mxu1  ;;  %v10441_v10 = vadd.f32 %v10440_v2, %v10439_v45  ;;  %v10292_v31 = vmul.f32 %v18626_v61, %v20363_v13  ;;  %v20378_v11 = vld [vmem:[#allocation18_spill] sm:$0xff]  ;;  %vm20390_vm3 = vmmov %vm20230_vm0 }
 0x91a   : > { %v10290_v17 = vmul.f32 %v18630_v4, %v20360_v19  ;;  %v18640_v29 = vadd.f32 %v10135_v43, %v20361_v27  ;;  %v20382_v27 = vld [vmem:[#allocation19_spill] sm:$0xff]  ;;  %vm20393_vm11 = vmmov %vm20230_vm0 }
 0x91b   : > { %v10332_v37 = vadd.f32 %v10331_v56, %v10330_v36  ;;  %v10443_v23 = vadd.f32 %v10442_v51, %v10441_v10  ;;  %v10293_v57 = vmul.f32 %v18634_v0, %v20367_v59  ;;  %v10405_v8 = vmul.f32 %v10292_v31, %v10292_v31  ;;  %v20380_v56 = vld [vmem:[#allocation17_spill] sm:$0xff]  ;;  %vm20397_vm7 = vmmov %vm20230_vm0 }
 0x91c   : > { %v10333_v6 = vsel %vm20364_vm4, %v10290_v17, 0.0  ;;  %v10403_v21 = vmul.f32 %v10290_v17, %v10290_v17  ;;  %v10291_v58 = vmul.f32 %v18640_v29, %v20365_v47  ;;  %v10337_v16 = vsel %vm20370_vm2, %v10292_v31, 0.0  ;;  %vm20395_vm4 = vmmov %vm20230_vm0 }
 0x91d   : > { %v10334_v39 = vadd.f32 %v10333_v6, %v10332_v37  ;;  %v10445_v53 = vadd.f32 %v10444_v35, %v10443_v23  ;;  %v10406_v50 = vmul.f32 %v10293_v57, %v10293_v57  ;;  %v10339_v45 = vsel %vm20374_vm14, %v10293_v57, 0.0  ;;  %vm20401_vm2 = vmmov %vm20230_vm0 }
 0x91e   : > { %v10446_v22 = vsel %vm20368_vm1, %v10403_v21, 0.0  ;;  %v10335_v55 = vsel %vm20230_vm0, %v10291_v58, 0.0  ;;  %v10404_v63 = vmul.f32 %v10291_v58, %v10291_v58  ;;  %v13483_v5 = vpop.f32.mrb[12].mxu1  ;;  %v10450_v9 = vsel %vm20377_vm15, %v10405_v8, 0.0  ;;  %v20385_v58 = vld [vmem:[#allocation73_spill] sm:$0xff]  ;;  %vm20399_vm1 = vmmov %vm20230_vm0 }
 0x91f   : > { %v10336_v42 = vadd.f32 %v10335_v55, %v10334_v39  ;;  %v18654_v33 = vadd.f32 %v13483_v5, %v20369_v12  ;;  %v10148_v54 = vpop.f32.mrb[13].mxu1  ;;  %v10447_v32 = vadd.f32 %v10446_v22, %v10445_v53  ;;  %v10452_v19 = vsel %vm20381_vm13, %v10406_v50, 0.0  ;;  %v20388_v22 = vld [vmem:[#allocation75_spill] sm:$0xff]  ;;  %vm20405_vm14 = vmmov %vm20230_vm0 }
 0x920   : > { %v10448_v3 = vsel %vm20371_vm9, %v10404_v63, 0.0  ;;  %v18659_v41 = vadd.f32 %v10148_v54, %v20372_v48  ;;  %v13484_v62 = vpop.f32.mrb[14].mxu1  ;;  %vm20402_vm9 = vmmov %vm20230_vm0 }
 0x921   : > { %v10338_v44 = vadd.f32 %v10337_v16, %v10336_v42  ;;  %v18662_v38 = vadd.f32 %v13484_v62, %v20373_v18  ;;  %v10151_v15 = vpop.f32.mrb[15].mxu1  ;;  %v10449_v26 = vadd.f32 %v10448_v3, %v10447_v32  ;;  %v10296_v24 = vmul.f32 %v18654_v33, %v20378_v11  ;;  %v20389_v42 = vld [vmem:[#allocation80_spill] sm:$0xff]  ;;  %v20392_v62 = vld [vmem:[#allocation77_spill] sm:$0xff]  ;;  %v20394_v18 = vld [vmem:[#allocation22_spill] sm:$0xff] }
 0x922   : > { %v10294_v46 = vmul.f32 %v18659_v41, %v20375_v7  ;;  %v18668_v30 = vadd.f32 %v10151_v15, %v20376_v49  ;;  %v20391_v3 = vld [vmem:[#allocation20_spill] sm:$0xff]  ;;  %v20396_v49 = vld [vmem:[#allocation21_spill] sm:$0xff]  ;;  %vm20408_vm15 = vmmov %vm20230_vm0 }
 0x923   : > { %v10340_v36 = vadd.f32 %v10339_v45, %v10338_v44  ;;  %v10451_v2 = vadd.f32 %v10450_v9, %v10449_v26  ;;  %v10297_v51 = vmul.f32 %v18662_v38, %v20382_v27  ;;  %v10409_v21 = vmul.f32 %v10296_v24, %v10296_v24  ;;  %vm20412_vm13 = vmmov %vm20230_vm0 }
 0x924   : > { %v10341_v28 = vsel %vm20379_vm8, %v10294_v46, 0.0  ;;  %v10407_v43 = vmul.f32 %v10294_v46, %v10294_v46  ;;  %v10295_v10 = vmul.f32 %v18668_v30, %v20380_v56  ;;  %v10345_v59 = vsel %vm20386_vm6, %v10296_v24, 0.0  ;;  %vm20410_vm8 = vmmov %vm20230_vm0 }
 0x925   : > { %v10342_v17 = vadd.f32 %v10341_v28, %v10340_v36  ;;  %v10453_v13 = vadd.f32 %v10452_v19, %v10451_v2  ;;  %v10410_v5 = vmul.f32 %v10297_v51, %v10297_v51  ;;  %v10347_v16 = vsel %vm20390_vm3, %v10297_v51, 0.0  ;;  %v20398_v36 = vld [vmem:[#allocation23_spill] sm:$0xff]  ;;  %v20400_v51 = vld [vmem:[#allocation113_spill] sm:$0xff]  ;;  %vm20417_vm6 = vmmov %vm20230_vm0 }
 0x926   : > { %v10454_v31 = vsel %vm20383_vm10, %v10407_v43, 0.0  ;;  %v10343_v37 = vsel %vm20384_vm12, %v10295_v10, 0.0  ;;  %v10408_v23 = vmul.f32 %v10295_v10, %v10295_v10  ;;  %v13487_v6 = vpop.f32.mrb[16].mxu1  ;;  %v10458_v44 = vsel %vm20393_vm11, %v10409_v21, 0.0  ;;  %v20403_v21 = vld [vmem:[#allocation84_spill] sm:$0xff]  ;;  %vm20414_vm10 = vmmov %vm20230_vm0 }
 0x927   : > { %v10344_v47 = vadd.f32 %v10343_v37, %v10342_v17  ;;  %v18682_v35 = vadd.f32 %v13487_v6, %v20385_v58  ;;  %v10164_v39 = vpop.f32.mrb[17].mxu1  ;;  %v10455_v57 = vadd.f32 %v10454_v31, %v10453_v13  ;;  %v10460_v11 = vsel %vm20397_vm7, %v10410_v5, 0.0  ;;  %vm20415_vm12 = vmmov %vm20230_vm0 }
 0x928   : > { %v10456_v53 = vsel %vm20387_vm5, %v10408_v23, 0.0  ;;  %v18687_v55 = vadd.f32 %v10164_v39, %v20388_v22  ;;  %v13488_v63 = vpop.f32.mrb[18].mxu1  ;;  %vm20418_vm5 = vmmov %vm20230_vm0 }
 0x929   : > { %v10346_v8 = vadd.f32 %v10345_v59, %v10344_v47  ;;  %v18690_v12 = vadd.f32 %v13488_v63, %v20389_v42  ;;  %v10167_v54 = vpop.f32.mrb[19].mxu1  ;;  %v10457_v32 = vadd.f32 %v10456_v53, %v10455_v57  ;;  %v10300_v15 = vmul.f32 %v18682_v35, %v20394_v18  ;;  %v20404_v57 = vld [vmem:[#allocation76_spill] sm:$0xff]  ;;  %vm20421_vm3 = vmmov %vm20230_vm0 }
 0x92a   : > { %v10298_v48 = vmul.f32 %v18687_v55, %v20391_v3  ;;  %v18696_v50 = vadd.f32 %v10167_v54, %v20392_v62  ;;  %v20407_v54 = vld [vmem:[#allocation85_spill] sm:$0xff]  ;;  %v20409_v3 = vld [vmem:[#allocation26_spill] sm:$0xff]  ;;  %vm20424_vm11 = vmmov %vm20230_vm0 }
 0x92b   : > { %v10348_v45 = vadd.f32 %v10347_v16, %v10346_v8  ;;  %v10459_v26 = vadd.f32 %v10458_v44, %v10457_v32  ;;  %v10301_v2 = vmul.f32 %v18690_v12, %v20398_v36  ;;  %v10413_v17 = vmul.f32 %v10300_v15, %v10300_v15  ;;  %v20406_v8 = vld [vmem:[#allocation24_spill] sm:$0xff]  ;;  %vm20428_vm7 = vmmov %vm20230_vm0 }
 0x92c   : > { %v10349_v7 = vsel %vm20395_vm4, %v10298_v48, 0.0  ;;  %v10411_v46 = vmul.f32 %v10298_v48, %v10298_v48  ;;  %v10299_v9 = vmul.f32 %v18696_v50, %v20396_v49  ;;  %v10353_v37 = vsel %vm20401_vm2, %v10300_v15, 0.0  ;;  %v20413_v49 = vld [vmem:[#allocation27_spill] sm:$0xff]  ;;  %vm20426_vm4 = vmmov %vm20230_vm0 }
 0x92d   : > { %v10350_v24 = vadd.f32 %v10349_v7, %v10348_v45  ;;  %v10461_v28 = vadd.f32 %v10460_v11, %v10459_v26  ;;  %v10414_v39 = vmul.f32 %v10301_v2, %v10301_v2  ;;  %v10355_v63 = vsel %vm20405_vm14, %v10301_v2, 0.0  ;;  %v20411_v45 = vld [vmem:[#allocation25_spill] sm:$0xff]  ;;  %vm20432_vm2 = vmmov %vm20230_vm0 }
 0x92e   : > { %v10462_v43 = vsel %vm20399_vm1, %v10411_v46, 0.0  ;;  %v10351_v56 = vsel %vm20230_vm0, %v10299_v9, 0.0  ;;  %v10412_v10 = vmul.f32 %v10299_v9, %v10299_v9  ;;  %v13491_v19 = vpop.f32.mrb[20].mxu1  ;;  %v10466_v32 = vsel %vm20408_vm15, %v10413_v17, 0.0  ;;  %vm20430_vm1 = vmmov %vm20230_vm0 }
 0x92f   : > { %v10352_v27 = vadd.f32 %v10351_v56, %v10350_v24  ;;  %v18710_v13 = vadd.f32 %v13491_v19, %v20400_v51  ;;  %v10180_v31 = vpop.f32.mrb[21].mxu1  ;;  %v10463_v23 = vadd.f32 %v10462_v43, %v10461_v28  ;;  %v10468_v7 = vsel %vm20412_vm13, %v10414_v39, 0.0  ;;  %v20420_v39 = vld [vmem:[#allocation86_spill] sm:$0xff]  ;;  %vm20436_vm14 = vmmov %vm20230_vm0 }
 0x930   : > { %v10464_v6 = vsel %vm20402_vm9, %v10412_v10, 0.0  ;;  %v18715_v47 = vadd.f32 %v10180_v31, %v20403_v21  ;;  %v13492_v58 = vpop.f32.mrb[22].mxu1  ;;  %v20416_v10 = vld [vmem:[#allocation78_spill] sm:$0xff]  ;;  %vm20433_vm9 = vmmov %vm20230_vm0 }
 0x931   : > { %v10354_v59 = vadd.f32 %v10353_v37, %v10352_v27  ;;  %v18718_v53 = vadd.f32 %v13492_v58, %v20404_v57  ;;  %v10183_v22 = vpop.f32.mrb[23].mxu1  ;;  %v10465_v5 = vadd.f32 %v10464_v6, %v10463_v23  ;;  %v10304_v48 = vmul.f32 %v18710_v13, %v20409_v3  ;;  %v20419_v37 = vld [vmem:[#allocation87_spill] sm:$0xff]  ;;  %v20425_v3 = vld [vmem:[#allocation30_spill] sm:$0xff]  ;;  %vm20439_vm15 = vmmov %vm20230_vm0 }
 0x932   : > { %v10302_v42 = vmul.f32 %v18715_v47, %v20406_v8  ;;  %v18724_v16 = vadd.f32 %v10183_v22, %v20407_v54  ;;  %vm20443_vm13 = vmmov %vm20230_vm0 }
 0x933   : > { %v10356_v62 = vadd.f32 %v10355_v63, %v10354_v59  ;;  %v10467_v44 = vadd.f32 %v10466_v32, %v10465_v5  ;;  %v10305_v9 = vmul.f32 %v18718_v53, %v20413_v49  ;;  %v10417_v43 = vmul.f32 %v10304_v48, %v10304_v48  ;;  %v20422_v5 = vld [vmem:[#allocation28_spill] sm:$0xff]  ;;  %v20429_v49 = vld [vmem:[#allocation31_spill] sm:$0xff] }
 0x934   : > { %v10357_v18 = vsel %vm20410_vm8, %v10302_v42, 0.0  ;;  %v10415_v15 = vmul.f32 %v10302_v42, %v10302_v42  ;;  %v10303_v26 = vmul.f32 %v18724_v16, %v20411_v45  ;;  %v10361_v27 = vsel %vm20417_vm6, %v10304_v48, 0.0  ;;  %v20423_v42 = vld [vmem:[#allocation42_spill] sm:$0xff]  ;;  %v20427_v45 = vld [vmem:[#allocation29_spill] sm:$0xff]  ;;  %vm20441_vm8 = vmmov %vm20230_vm0 }
 0x935   : > { %v10358_v46 = vadd.f32 %v10357_v18, %v10356_v62  ;;  %v10469_v11 = vadd.f32 %v10468_v7, %v10467_v44  ;;  %v10418_v21 = vmul.f32 %v10305_v9, %v10305_v9  ;;  %v10363_v22 = vsel %vm20421_vm3, %v10305_v9, 0.0  ;;  %vm20448_vm6 = vmmov %vm20230_vm0 }
 0x936   : > { %v10470_v24 = vsel %vm20414_vm10, %v10415_v15, 0.0  ;;  %v10359_v36 = vsel %vm20415_vm12, %v10303_v26, 0.0  ;;  %v10416_v2 = vmul.f32 %v10303_v26, %v10303_v26  ;;  %v13495_v28 = vpop.f32.mrb[24].mxu1  ;;  %v10474_v32 = vsel %vm20424_vm11, %v10417_v43, 0.0  ;;  %vm20445_vm10 = vmmov %vm20230_vm0 }
 0x937   : > { %v10360_v56 = vadd.f32 %v10359_v36, %v10358_v46  ;;  %v18738_v19 = vadd.f32 %v13495_v28, %v20416_v10  ;;  %v10196_v17 = vpop.f32.mrb[25].mxu1  ;;  %v10471_v51 = vadd.f32 %v10470_v24, %v10469_v11  ;;  %v10476_v7 = vsel %vm20428_vm7, %v10418_v21, 0.0  ;;  %v20431_v10 = vld [vmem:[#allocation102_spill] sm:$0xff]  ;;  %vm20446_vm12 = vmmov %vm20230_vm0 }
 0x938   : > { %v10472_v31 = vsel %vm20418_vm5, %v10416_v2, 0.0  ;;  %v18743_v23 = vadd.f32 %v10196_v17, %v20419_v37  ;;  %v13496_v6 = vpop.f32.mrb[26].mxu1  ;;  %vm20449_vm5 = vmmov %vm20230_vm0 }
 0x939   : > { %v10362_v58 = vadd.f32 %v10361_v27, %v10360_v56  ;;  %v18746_v59 = vadd.f32 %v13496_v6, %v20420_v39  ;;  %v10199_v57 = vpop.f32.mrb[27].mxu1  ;;  %v10473_v63 = vadd.f32 %v10472_v31, %v10471_v51  ;;  %v10308_v48 = vmul.f32 %v18738_v19, %v20425_v3  ;;  %v20434_v6 = vld [vmem:[#allocation43_spill] sm:$0xff]  ;;  %vm20452_vm3 = vmmov %vm20230_vm0 }
 0x93a   : > { %v10306_v8 = vmul.f32 %v18743_v23, %v20422_v5  ;;  %v18752_v54 = vadd.f32 %v10199_v57, %v20423_v42  ;;  %vm20455_vm11 = vmmov %vm20230_vm0 }
 0x93b   : > { %v10364_v62 = vadd.f32 %v10363_v22, %v10362_v58  ;;  %v10475_v44 = vadd.f32 %v10474_v32, %v10473_v63  ;;  %v10309_v9 = vmul.f32 %v18746_v59, %v20429_v49  ;;  %v10421_v43 = vmul.f32 %v10308_v48, %v10308_v48  ;;  %v20435_v22 = vld [vmem:[#allocation109_spill] sm:$0xff]  ;;  %v20437_v32 = vld [vmem:[#allocation32_spill] sm:$0xff]  ;;  %vm20459_vm7 = vmmov %vm20230_vm0 }
 0x93c   : > { %v10365_v18 = vsel %vm20426_vm4, %v10306_v8, 0.0  ;;  %v10419_v15 = vmul.f32 %v10306_v8, %v10306_v8  ;;  %v10307_v26 = vmul.f32 %v18752_v54, %v20427_v45  ;;  %v10369_v51 = vsel %vm20432_vm2, %v10308_v48, 0.0  ;;  %v20438_v48 = vld [vmem:[#allocation111_spill] sm:$0xff]  ;;  %v20442_v49 = vld [vmem:[#allocation33_spill] sm:$0xff]  ;;  %vm20457_vm4 = vmmov %vm20230_vm0 }
 0x93d   : > { %v10366_v46 = vadd.f32 %v10365_v18, %v10364_v62  ;;  %v10477_v11 = vadd.f32 %v10476_v7, %v10475_v44  ;;  %v10422_v39 = vmul.f32 %v10309_v9, %v10309_v9  ;;  %v10371_v8 = vsel %vm20436_vm14, %v10309_v9, 0.0  ;;  %v20440_v18 = vld [vmem:[#allocation34_spill] sm:$0xff]  ;;  %vm20462_vm2 = vmmov %vm20230_vm0 }
 0x93e   : > { %v10478_v24 = vsel %vm20430_vm1, %v10419_v15, 0.0  ;;  %v10367_v36 = vsel %vm20230_vm0, %v10307_v26, 0.0  ;;  %v10420_v2 = vmul.f32 %v10307_v26, %v10307_v26  ;;  %v13499_v28 = vpop.f32.mrb[28].mxu1  ;;  %v10482_v44 = vsel %vm20439_vm15, %v10421_v43, 0.0  ;;  %vm20461_vm1 = vmmov %vm20230_vm0 }
 0x93f   : > { %v10368_v56 = vadd.f32 %v10367_v36, %v10366_v46  ;;  %v18766_v17 = vadd.f32 %v13499_v28, %v20431_v10  ;;  %v10212_v27 = vpop.f32.mrb[29].mxu1  ;;  %v10479_v31 = vadd.f32 %v10478_v24, %v10477_v11  ;;  %v10484_v11 = vsel %vm20443_vm13, %v10422_v39, 0.0  ;;  %v20444_v36 = vld [vmem:[#allocation35_spill] sm:$0xff]  ;;  %vm20464_vm14 = vmmov %vm20230_vm0 }
 0x940   : > { %v10480_v37 = vsel %vm20433_vm9, %v10420_v2, 0.0  ;;  %v18771_v21 = vadd.f32 %v10212_v27, %v20434_v6  ;;  %v13500_v58 = vpop.f32.mrb[30].mxu1  ;;  %vm20463_vm9 = vmmov %vm20230_vm0  ;;  %vm20469_vm13 = vcmask 57344  }
 0x941   : > { %v10370_v57 = vadd.f32 %v10369_v51, %v10368_v56  ;;  %v18774_v63 = vadd.f32 %v13500_v58, %v20435_v22  ;;  %v10215_v5 = vpop.f32.mrb[31].mxu1  ;;  %v10481_v42 = vadd.f32 %v10480_v37, %v10479_v31  ;;  %v10312_v15 = vmul.f32 %v18766_v17, %v20440_v18  ;;  %v20447_v37 = vld [vmem:[#allocation120_spill] sm:$0xff]  ;;  %vm20465_vm15 = vmmov %vm20230_vm0 }
 0x942   : > { %v10310_v3 = vmul.f32 %v18771_v21, %v20437_v32  ;;  %v18780_v62 = vadd.f32 %v10215_v5, %v20438_v48  ;;  %v20450_v5 = vld [vmem:[#allocation115_spill] sm:$0xff]  ;;  %v20451_v48 = vld [vmem:[#allocation118_spill] sm:$0xff] }
 0x943   : > { %v10372_v45 = vadd.f32 %v10371_v8, %v10370_v57  ;;  %v10483_v26 = vadd.f32 %v10482_v44, %v10481_v42  ;;  %v10313_v2 = vmul.f32 %v18774_v63, %v20444_v36  ;;  %v10425_v51 = vmul.f32 %v10312_v15, %v10312_v15 }
 0x944   : > { %v10373_v7 = vsel %vm20441_vm8, %v10310_v3, 0.0  ;;  %v10423_v46 = vmul.f32 %v10310_v3, %v10310_v3  ;;  %v10311_v9 = vmul.f32 %v18780_v62, %v20442_v49  ;;  %v10377_v57 = vsel %vm20448_vm6, %v10312_v15, 0.0  ;;  %v20454_v15 = vld [vmem:[#allocation45_spill] sm:$0xff]  ;;  %vm20466_vm8 = vmmov %vm20230_vm0 }
 0x945   : > { %v10374_v24 = vadd.f32 %v10373_v7, %v10372_v45  ;;  %v10485_v28 = vadd.f32 %v10484_v11, %v10483_v26  ;;  %v10426_v32 = vmul.f32 %v10313_v2, %v10313_v2  ;;  %v10379_v45 = vsel %vm20452_vm3, %v10313_v2, 0.0  ;;  %v20453_v7 = vld [vmem:[#allocation36_spill] sm:$0xff]  ;;  %v20456_v11 = vld [vmem:[#allocation38_spill] sm:$0xff] }
 0x946   : > { %v10486_v43 = vsel %vm20445_vm10, %v10423_v46, 0.0  ;;  %v10375_v56 = vsel %vm20446_vm12, %v10311_v9, 0.0  ;;  %v10424_v10 = vmul.f32 %v10311_v9, %v10311_v9  ;;  %v13503_v27 = vpop.f32.mrb[32].mxu1  ;;  %v10490_v9 = vsel %vm20455_vm11, %v10425_v51, 0.0  ;;  %vm20470_vm10 = vmmov %vm20469_vm13 }
 0x947   : > { %v10376_v31 = vadd.f32 %v10375_v56, %v10374_v24  ;;  %v18794_v6 = vadd.f32 %v13503_v27, %v20447_v37  ;;  %v10228_v58 = vpop.f32.mrb[33].mxu1  ;;  %v10487_v39 = vadd.f32 %v10486_v43, %v10485_v28  ;;  %v10492_v27 = vsel %vm20459_vm7, %v10426_v32, 0.0  ;;  %v20460_v37 = vld [vmem:[#allocation39_spill] sm:$0xff]  ;;  %vm20471_vm12 = vmmov %vm20470_vm10 }
 0x948   : > { %v10488_v22 = vsel %vm20449_vm5, %v10424_v10, 0.0  ;;  %v18799_v8 = vadd.f32 %v10228_v58, %v20450_v5  ;;  %v13504_v42 = vpop.f32.mrb[34].mxu1  ;;  %v20458_v10 = vld [vmem:[#allocation37_spill] sm:$0xff]  ;;  %vm20472_vm6 = vmmov %vm20470_vm10 }
 0x949   : > { %v10378_v3 = vadd.f32 %v10377_v57, %v10376_v31  ;;  %v18802_v44 = vadd.f32 %v13504_v42, %v20451_v48  ;;  %v10231_v18 = vpop.f32.mrb[35].mxu1  ;;  %v10489_v26 = vadd.f32 %v10488_v22, %v10487_v39  ;;  %v10316_v24 = vmul.f32 %v18794_v6, %v20456_v11  ;;  %vm20473_vm5 = vmmov %vm20230_vm0 }
 0x94a   : > { %v10314_v46 = vmul.f32 %v18799_v8, %v20453_v7  ;;  %v18808_v49 = vadd.f32 %v10231_v18, %v20454_v15 }
 0x94b   : > { %v10380_v36 = vadd.f32 %v10379_v45, %v10378_v3  ;;  %v10491_v28 = vadd.f32 %v10490_v9, %v10489_v26  ;;  %v10317_v58 = vmul.f32 %v18802_v44, %v20460_v37  ;;  %v10429_v5 = vmul.f32 %v10316_v24, %v10316_v24 }
 0x94c   : > { %v10381_v43 = vsel %vm20457_vm4, %v10314_v46, 0.0  ;;  %v10427_v56 = vmul.f32 %v10314_v46, %v10314_v46  ;;  %v10315_v2 = vmul.f32 %v18808_v49, %v20458_v10  ;;  %v10385_v3 = vsel %vm20462_vm2, %v10316_v24, 0.0  ;;  %v10279_v24 = vld [vmem:[%s19067_s8] sm:$0x1] }
 0x94d   : > { %v10382_v31 = vadd.f32 %v10381_v43, %v10380_v36  ;;  %v10493_v57 = vadd.f32 %v10492_v27, %v10491_v28  ;;  %v10430_v45 = vmul.f32 %v10317_v58, %v10317_v58  ;;  %v10387_v32 = vsel %vm20464_vm14, %v10317_v58, 0.0 }
 0x94e   : > { %v10494_v51 = vsel %vm20461_vm1, %v10427_v56, 0.0  ;;  %v10383_v39 = vsel %vm20230_vm0, %v10315_v2, 0.0  ;;  %v10428_v22 = vmul.f32 %v10315_v2, %v10315_v2  ;;  %v10498_v46 = vsel %vm20465_vm15, %v10429_v5, 0.0  ;;  %vm20475_vm15 = vmmov %vm20473_vm5 }
 0x94f   : > { %v10384_v42 = vadd.f32 %v10383_v39, %v10382_v31  ;;  %v10495_v48 = vadd.f32 %v10494_v51, %v10493_v57  ;;  %v10500_v11 = vsel %vm20466_vm8, %v10430_v45, 0.0  ;;  %v10508_v58 = vmul.f32 256.0, %v10279_v24  ;;  %vm18919_vm8 = vmpackc.low %vm20475_vm15, %vm20475_vm15 }
 0x950   : > { %v10496_v18 = vsel %vm20463_vm9, %v10428_v22, 0.0  ;;  %v10510_v57 = vmul.f32 2.0, %v10279_v24 }
 0x951   : > { %v10386_v26 = vadd.f32 %v10385_v3, %v10384_v42  ;;  %v10497_v7 = vadd.f32 %v10496_v18, %v10495_v48  ;;  %v10513_v48 = vmul.f32 %v10508_v58, %v10279_v24  ;;  %v20467_v18 = vld [vmem:[#allocation41_spill] sm:$0xff] }
 0x953   : > { %v10388_v15 = vadd.f32 %v10387_v32, %v10386_v26  ;;  %v10499_v9 = vadd.f32 %v10498_v46, %v10497_v7  ;;  %v20468_v26 = vld [vmem:[#allocation40_spill] sm:$0xff] }
 0x955   : > { %v10389_v36 = vrot.slane %v10388_v15, 4  ;;  %v10501_v28 = vadd.f32 %v10500_v11, %v10499_v9 }
 0x957   : > { %v10390_v43 = vadd.f32 %v10389_v36, %v10388_v15  ;;  %v10502_v56 = vrot.slane %v10501_v28, 4 }
 0x959   : > { %v10391_v10 = vrot.slane %v10390_v43, 2  ;;  %v10503_v2 = vadd.f32 %v10502_v56, %v10501_v28  ;;  %v10744_v56 = vld [vmem:[%s19071_s12] sm:$0x1f] }
 0x95b   : > { %v10392_v27 = vadd.f32 %v10391_v10, %v10390_v43  ;;  %v10504_v31 = vrot.slane %v10503_v2, 2 }
 0x95d   : > { %v10393_v37 = vrot.slane %v10392_v27, 1  ;;  %v10505_v51 = vadd.f32 %v10504_v31, %v10503_v2 }
 0x95f   : > { %v10394_v39 = vadd.f32 %v10393_v37, %v10392_v27  ;;  %v10506_v22 = vrot.slane %v10505_v51, 1 }
 0x961   : > { %v10509_v5 = vadd.f32 %v10508_v58, %v10394_v39  ;;  %v10511_v42 = vmul.f32 %v10510_v57, %v10394_v39  ;;  %v10507_v3 = vadd.f32 %v10506_v22, %v10505_v51  ;;  %v18843_v57 = vld [vmem:[%s19070_s11] sm:$0x1f] }
 0x962   : > { %12454 = vmatprep.mubr.msk.f32.mxu0 %vm20473_vm5, %v18843_v57 }
 0x963   : > { %v10520_v45 = vmul.f32 %v10509_v5, %v20467_v18  ;;  %v10515_v32 = vmul.f32 %v20468_v26, %v10509_v5  ;;  %v10512_v7 = vadd.f32 %v10511_v42, %v10507_v3 }
 0x965   : > { %v10521_v46 = vsel %vm20469_vm13, %v10520_v45, 0.0  ;;  %v10516_v15 = vsel %vm20470_vm10, %v10515_v32, 0.0  ;;  %v10514_v9 = vadd.f32 %v10513_v48, %v10512_v7 }
 0x966   : > { %10522 = vadd.xlane.f32.xlu0 %v10521_v46  ;;  %10517 = vadd.xlane.f32.xlu1 %v10516_v15 }
 0x967   : > { %v10530_v11 = vmul.f32 %v10514_v9, %v20467_v18  ;;  %v10525_v36 = vmul.f32 %v20468_v26, %v10514_v9 }
 0x969   : > { %v10531_v28 = vsel %vm20471_vm12, %v10530_v11, 0.0  ;;  %v10526_v43 = vsel %vm20472_vm6, %v10525_v36, 0.0 }
 0x96a   : > { %10532 = vadd.xlane.f32.xlu0 %v10531_v28  ;;  %10527 = vadd.xlane.f32.xlu1 %v10526_v43  ;;  %v10280_v28 = vld [vmem:[%s19068_s9] sm:$0x1] }
 0x97b   : > { %10747 = vperm.xlu1 %14507, %v10744_v56  }
 0x9f3   : > { %v10523_v10 = vpop.xlane.xlu0 %10522  ;;  %v10518_v2 = vpop.xlane.xlu1 %10517 }
 0x9f4   : > { %v10524_v27 = vmul.f32 0.0009765625, %v10523_v10  ;;  %v10519_v31 = vmul.f32 0.0009765625, %v10518_v2 }
 0x9f6   : > { %v10539_v51 = vmul.f32 %v10524_v27, %v10524_v27  ;;  %v10535_v39 = vmul.f32 %v10519_v31, %v10519_v31  ;;  %v10544_v9 = vmul.f32 %v10524_v27, %v20467_v18  ;;  %v10543_v11 = vmul.f32 %v20468_v26, %v10519_v31 }
 0x9f7   : > { %v10533_v37 = vpop.xlane.xlu0 %10532  ;;  %v10528_v58 = vpop.xlane.xlu1 %10527 }
 0x9f8   : > { %v10534_v22 = vmul.f32 0.0009765625, %v10533_v37  ;;  %v10529_v5 = vmul.f32 0.0009765625, %v10528_v58  ;;  %v10545_v43 = vadd.f32 %v10544_v9, %v10543_v11  ;;  %v10281_v37 = vld [vmem:[%s19069_s10] sm:$0x1] }
 0x9fa   : > { %v10540_v42 = vsub.f32 %v10534_v22, %v10539_v51  ;;  %v10536_v3 = vsub.f32 %v10529_v5, %v10535_v39  ;;  %v10550_v10 = vsub.f32 %v10279_v24, %v10545_v43  ;;  %v20474_v51 = vld [vmem:[#allocation56_spill] sm:$0xff] }
 0x9fc   : > { %v10541_v48 = vadd.f32 1e-05, %v10540_v42  ;;  %v10537_v45 = vadd.f32 1e-05, %v10536_v3 }
 0x9fe   : > { %14599 = vrsqrt.f32 %v10541_v48 }
 0x9ff   : > { %14601 = vrsqrt.f32 %v10537_v45 }
 0xa08   : > { %v14600_v32 = vpop.eup %14599 }
 0xa09   : > { %v14602_v7 = vpop.eup %14601  ;;  %v10547_v46 = vmul.f32 %v14600_v32, %v20467_v18 }
 0xa0a   : > { %v10546_v15 = vmul.f32 %v14602_v7, %v20468_v26 }
 0xa0c   : > { %v10548_v36 = vadd.f32 %v10547_v46, %v10546_v15 }
 0xa0e   : > { %v10549_v56 = vmul.f32 %v10548_v36, %v10280_v28 }
 0xa10   : > { %v10551_v2 = vmul.f32 %v10550_v10, %v10549_v56  ;;  %v18858_v39 = vrot.slane %v10549_v56, %v20474_v51 }
 0xa12   : > { %v10552_v58 = vadd.f32 %v10551_v2, %v10281_v37  ;;  %v10589_v26 = vmul.f32 %v18799_v8, %v18858_v39  ;;  %v10590_v27 = vmul.f32 %v18808_v49, %v18858_v39  ;;  %v10591_v24 = vmul.f32 %v18794_v6, %v18858_v39 }
 0xa13   : > { %v10592_v31 = vmul.f32 %v18802_v44, %v18858_v39  ;;  %v10557_v8 = vmul.f32 %v18578_v20, %v18858_v39  ;;  %v10558_v49 = vmul.f32 %v18588_v60, %v18858_v39  ;;  %v10573_v6 = vmul.f32 %v18687_v55, %v18858_v39 }
 0xa14   : > { %v18861_v18 = vrot.slane %v10552_v58, %v20474_v51  ;;  %v10574_v44 = vmul.f32 %v18696_v50, %v18858_v39  ;;  %v10559_v48 = vmul.f32 %v18575_v34, %v18858_v39  ;;  %v10560_v45 = vmul.f32 %v18583_v14, %v18858_v39 }
 0xa15   : > { %v10575_v20 = vmul.f32 %v18682_v35, %v18858_v39  ;;  %v10576_v60 = vmul.f32 %v18690_v12, %v18858_v39  ;;  %v10577_v34 = vmul.f32 %v18715_v47, %v18858_v39  ;;  %v10578_v14 = vmul.f32 %v18724_v16, %v18858_v39 }
 0xa16   : > { %v10631_v22 = vadd.f32 %v18861_v18, %v10589_v26  ;;  %v10632_v5 = vadd.f32 %v18861_v18, %v10590_v27  ;;  %v10633_v42 = vadd.f32 %v18861_v18, %v10591_v24  ;;  %v10634_v3 = vadd.f32 %v18861_v18, %v10592_v31 }
 0xa17   : > { %v10599_v32 = vadd.f32 %v18861_v18, %v10557_v8  ;;  %v10600_v7 = vadd.f32 %v18861_v18, %v10558_v49  ;;  %v10615_v55 = vadd.f32 %v18861_v18, %v10573_v6  ;;  %v10616_v50 = vadd.f32 %v18861_v18, %v10574_v44 }
 0xa18   : > { %v10601_v46 = vadd.f32 %v18861_v18, %v10559_v48  ;;  %v10602_v15 = vadd.f32 %v18861_v18, %v10560_v45  ;;  %v10617_v9 = vadd.f32 %v18861_v18, %v10575_v20  ;;  %v10618_v35 = vadd.f32 %v18861_v18, %v10576_v60 }
 0xa19   : > { %v10619_v12 = vadd.f32 %v18861_v18, %v10577_v34  ;;  %vm10635_vm3 = vcmp.gt.f32.partialorder %v10599_v32, 0.0  ;;  %v10671_v11 = vmul.f32 0.2, %v10599_v32  ;;  %v10672_v36 = vmul.f32 0.2, %v10600_v7 }
 0xa1a   : > { %vm10636_vm11 = vcmp.gt.f32.partialorder %v10600_v7, 0.0  ;;  %vm10651_vm4 = vcmp.gt.f32.partialorder %v10615_v55, 0.0  ;;  %vm10652_vm7 = vcmp.gt.f32.partialorder %v10616_v50, 0.0  ;;  %v10687_v47 = vmul.f32 0.2, %v10615_v55 }
 0xa1b   : > { %vm10667_vm1 = vcmp.gt.f32.partialorder %v10631_v22, 0.0  ;;  %vm10668_vm0 = vcmp.gt.f32.partialorder %v10632_v5, 0.0  ;;  %vm10669_vm2 = vcmp.gt.f32.partialorder %v10633_v42, 0.0  ;;  %v10688_v16 = vmul.f32 0.2, %v10616_v50 }
 0xa1c   : > { %v10620_v28 = vadd.f32 %v18861_v18, %v10578_v14  ;;  %v10703_v43 = vmul.f32 0.2, %v10631_v22  ;;  %v10704_v56 = vmul.f32 0.2, %v10632_v5  ;;  %v10705_v10 = vmul.f32 0.2, %v10633_v42 }
 0xa1d   : > { %vm10670_vm9 = vcmp.gt.f32.partialorder %v10634_v3, 0.0  ;;  %v10706_v2 = vmul.f32 0.2, %v10634_v3  ;;  %v10707_v37 = vsel %vm10635_vm3, %v10599_v32, %v10671_v11  ;;  %v10708_v58 = vsel %vm10636_vm11, %v10600_v7, %v10672_v36 }
 0xa1e   : > { %vm10653_vm14 = vcmp.gt.f32.partialorder %v10617_v9, 0.0  ;;  %v10689_v51 = vmul.f32 0.2, %v10617_v9  ;;  %v10690_v26 = vmul.f32 0.2, %v10618_v35  ;;  %v10723_v27 = vsel %vm10651_vm4, %v10615_v55, %v10687_v47 }
 0xa1f   : > { %v10724_v24 = vsel %vm10652_vm7, %v10616_v50, %v10688_v16  ;;  %v18909_v31 = vsel %vm10667_vm1, %v10631_v22, %v10703_v43  ;;  %v18912_v8 = vsel %vm10668_vm0, %v10632_v5, %v10704_v56  ;;  %v18915_v49 = vsel %vm10669_vm2, %v10633_v42, %v10705_v10 }
 0xa20   : > { %vm10654_vm13 = vcmp.gt.f32.partialorder %v10618_v35, 0.0  ;;  %v18923_v44 = vsel %vm10670_vm9, %v10634_v3, %v10706_v2  ;;  %v13516_v48 = vpack.c.bf16 %v10724_v24, %v10723_v27  ;;  %v13519_v45 = vpack.c.bf16 %v10708_v58, %v10707_v37 }
 0xa21   : > { %v10561_v22 = vmul.f32 %v18603_v52, %v18858_v39  ;;  %vm10637_vm10 = vcmp.gt.f32.partialorder %v10601_v46, 0.0  ;;  %vm10638_vm12 = vcmp.gt.f32.partialorder %v10602_v15, 0.0  ;;  %v10673_v5 = vmul.f32 0.2, %v10601_v46 }
 0xa22   : > { %v10674_v32 = vmul.f32 0.2, %v10602_v15  ;;  %13518 = vmatprep.subr.msk.bf16.mxu0 %vm18919_vm8, %v13516_v48  ;;  %v13565_v42 = vpack.c.bf16 %v18912_v8, %v18909_v31  ;;  %v13569_v7 = vpack.c.bf16 %v18923_v44, %v18915_v49  ;;  %v10691_v3 = vmul.f32 0.2, %v10619_v12 }
 0xa23   : > { %v10692_v20 = vmul.f32 0.2, %v10620_v28  ;;  %13521 = vmatpush3.bf16.xpose.msk.msra.mxu0 %vm18919_vm8, %v13519_v45  ;;  %v10725_v52 = vsel %vm10653_vm14, %v10617_v9, %v10689_v51  ;;  %v10726_v60 = vsel %vm10654_vm13, %v10618_v35, %v10690_v26  ;;  %v10562_v55 = vmul.f32 %v18615_v40, %v18858_v39 }
 0xa24   : > { %vm10655_vm6 = vcmp.gt.f32.partialorder %v10619_v12, 0.0  ;;  %vm10656_vm5 = vcmp.gt.f32.partialorder %v10620_v28, 0.0  ;;  %v13522_v50 = vpack.c.bf16 %v10726_v60, %v10725_v52  ;;  %v10579_v34 = vmul.f32 %v18710_v13, %v18858_v39 }
 0xa25   : > { %v10580_v14 = vmul.f32 %v18718_v53, %v18858_v39  ;;  %v10603_v11 = vadd.f32 %v18861_v18, %v10561_v22  ;;  %v10604_v36 = vadd.f32 %v18861_v18, %v10562_v55  ;;  %v10709_v9 = vsel %vm10637_vm10, %v10601_v46, %v10673_v5 }
 0xa26   : > { %v10710_v35 = vsel %vm10638_vm12, %v10602_v15, %v10674_v32  ;;  %13524 = vmatprep.subr.msk.bf16.mxu0 %vm18919_vm8, %v13522_v50  ;;  %v10621_v40 = vadd.f32 %v18861_v18, %v10579_v34  ;;  %v10727_v16 = vsel %vm10655_vm6, %v10619_v12, %v10691_v3  ;;  %v10728_v13 = vsel %vm10656_vm5, %v10620_v28, %v10692_v20 }
 0xa27   : > { %v10622_v47 = vadd.f32 %v18861_v18, %v10580_v14  ;;  %v13525_v43 = vpack.c.bf16 %v10710_v35, %v10709_v9  ;;  %v10675_v56 = vmul.f32 0.2, %v10603_v11  ;;  %v10676_v53 = vmul.f32 0.2, %v10604_v36 }
 0xa28   : > { %v13528_v10 = vpack.c.bf16 %v10728_v13, %v10727_v16  ;;  %vm10639_vm3 = vcmp.gt.f32.partialorder %v10603_v11, 0.0  ;;  %vm10640_vm11 = vcmp.gt.f32.partialorder %v10604_v36, 0.0  ;;  %v10693_v2 = vmul.f32 0.2, %v10621_v40 }
 0xa29   : > { %v10694_v37 = vmul.f32 0.2, %v10622_v47  ;;  %v10563_v46 = vmul.f32 %v18598_v1, %v18858_v39  ;;  %v10564_v15 = vmul.f32 %v18607_v25, %v18858_v39  ;;  %vm10657_vm4 = vcmp.gt.f32.partialorder %v10621_v40, 0.0 }
 0xa2a   : > { %vm10658_vm7 = vcmp.gt.f32.partialorder %v10622_v47, 0.0  ;;  %v10581_v12 = vmul.f32 %v18743_v23, %v18858_v39  ;;  %v10582_v28 = vmul.f32 %v18752_v54, %v18858_v39  ;;  %v10711_v26 = vsel %vm10639_vm3, %v10603_v11, %v10675_v56 }
 0xa2b   : > { %13527 = vmatpush3.bf16.xpose.msk.msra.mxu0 %vm18919_vm8, %v13525_v43  ;;  %v10605_v58 = vadd.f32 %v18861_v18, %v10563_v46  ;;  %v10606_v51 = vadd.f32 %v18861_v18, %v10564_v15  ;;  %v10712_v1 = vsel %vm10640_vm11, %v10604_v36, %v10676_v53  ;;  %v10729_v24 = vsel %vm10657_vm4, %v10621_v40, %v10693_v2 }
 0xa2c   : > { %13530 = vmatprep.subr.msk.bf16.mxu0 %vm18919_vm8, %v13528_v10  ;;  %v10623_v27 = vadd.f32 %v18861_v18, %v10581_v12  ;;  %v10624_v25 = vadd.f32 %v18861_v18, %v10582_v28  ;;  %v10730_v48 = vsel %vm10658_vm7, %v10622_v47, %v10694_v37  ;;  %v13531_v45 = vpack.c.bf16 %v10712_v1, %v10711_v26 }
 0xa2d   : > { %v10677_v22 = vmul.f32 0.2, %v10605_v58  ;;  %v10678_v5 = vmul.f32 0.2, %v10606_v51  ;;  %v13534_v32 = vpack.c.bf16 %v10730_v48, %v10729_v24  ;;  %vm10641_vm1 = vcmp.gt.f32.partialorder %v10605_v58, 0.0 }
 0xa2e   : > { %vm10642_vm0 = vcmp.gt.f32.partialorder %v10606_v51, 0.0  ;;  %v10695_v23 = vmul.f32 0.2, %v10623_v27  ;;  %v10696_v54 = vmul.f32 0.2, %v10624_v25  ;;  %v10565_v3 = vmul.f32 %v18630_v4, %v18858_v39 }
 0xa2f   : > { %v10566_v20 = vmul.f32 %v18640_v29, %v18858_v39  ;;  %vm10659_vm2 = vcmp.gt.f32.partialorder %v10623_v27, 0.0  ;;  %vm10660_vm9 = vcmp.gt.f32.partialorder %v10624_v25, 0.0  ;;  %v10583_v52 = vmul.f32 %v18738_v19, %v18858_v39 }
 0xa30   : > { %v10584_v60 = vmul.f32 %v18746_v59, %v18858_v39  ;;  %v10607_v55 = vadd.f32 %v18861_v18, %v10565_v3  ;;  %v10713_v34 = vsel %vm10641_vm1, %v10605_v58, %v10677_v22  ;;  %v10714_v4 = vsel %vm10642_vm0, %v10606_v51, %v10678_v5 }
 0xa31   : > { %v10608_v50 = vadd.f32 %v18861_v18, %v10566_v20  ;;  %v10625_v14 = vadd.f32 %v18861_v18, %v10583_v52  ;;  %v10731_v11 = vsel %vm10659_vm2, %v10623_v27, %v10695_v23  ;;  %v10732_v36 = vsel %vm10660_vm9, %v10624_v25, %v10696_v54 }
 0xa32   : > { %v10626_v29 = vadd.f32 %v18861_v18, %v10584_v60  ;;  %v13537_v9 = vpack.c.bf16 %v10714_v4, %v10713_v34  ;;  %v10679_v35 = vmul.f32 0.2, %v10607_v55  ;;  %v13540_v47 = vpack.c.bf16 %v10732_v36, %v10731_v11 }
 0xa33   : > { %13533 = vmatpush3.bf16.xpose.msk.msra.mxu0 %vm18919_vm8, %v13531_v45  ;;  %v10680_v40 = vmul.f32 0.2, %v10608_v50  ;;  %vm10643_vm14 = vcmp.gt.f32.partialorder %v10607_v55, 0.0  ;;  %vm10644_vm15 = vcmp.gt.f32.partialorder %v10608_v50, 0.0  ;;  %v10697_v19 = vmul.f32 0.2, %v10625_v14 }
 0xa34   : > { %13536 = vmatprep.subr.msk.bf16.mxu0 %vm18919_vm8, %v13534_v32  ;;  %v10698_v59 = vmul.f32 0.2, %v10626_v29  ;;  %v10567_v16 = vmul.f32 %v18626_v61, %v18858_v39  ;;  %v10568_v13 = vmul.f32 %v18634_v0, %v18858_v39  ;;  %vm10661_vm13 = vcmp.gt.f32.partialorder %v10625_v14, 0.0 }
 0xa35   : > { %vm10662_vm10 = vcmp.gt.f32.partialorder %v10626_v29, 0.0  ;;  %v10585_v43 = vmul.f32 %v18771_v21, %v18858_v39  ;;  %v10586_v56 = vmul.f32 %v18780_v62, %v18858_v39  ;;  %v10715_v2 = vsel %vm10643_vm14, %v10607_v55, %v10679_v35 }
 0xa36   : > { %v10609_v53 = vadd.f32 %v18861_v18, %v10567_v16  ;;  %v10610_v10 = vadd.f32 %v18861_v18, %v10568_v13  ;;  %v10716_v61 = vsel %vm10644_vm15, %v10608_v50, %v10680_v40  ;;  %v10733_v46 = vsel %vm10661_vm13, %v10625_v14, %v10697_v19 }
 0xa37   : > { %v10627_v37 = vadd.f32 %v18861_v18, %v10585_v43  ;;  %v10628_v0 = vadd.f32 %v18861_v18, %v10586_v56  ;;  %v10734_v15 = vsel %vm10662_vm10, %v10626_v29, %v10698_v59  ;;  %v13543_v12 = vpack.c.bf16 %v10716_v61, %v10715_v2 }
 0xa38   : > { %v10681_v28 = vmul.f32 0.2, %v10609_v53  ;;  %v10682_v58 = vmul.f32 0.2, %v10610_v10  ;;  %v13546_v51 = vpack.c.bf16 %v10734_v15, %v10733_v46  ;;  %vm10645_vm12 = vcmp.gt.f32.partialorder %v10609_v53, 0.0 }
 0xa39   : > { %vm10646_vm6 = vcmp.gt.f32.partialorder %v10610_v10, 0.0  ;;  %v10699_v21 = vmul.f32 0.2, %v10627_v37  ;;  %v10700_v62 = vmul.f32 0.2, %v10628_v0  ;;  %v10569_v26 = vmul.f32 %v18659_v41, %v18858_v39 }
 0xa3a   : > { %v10570_v1 = vmul.f32 %v18668_v30, %v18858_v39  ;;  %vm10663_vm5 = vcmp.gt.f32.partialorder %v10627_v37, 0.0  ;;  %vm10664_vm3 = vcmp.gt.f32.partialorder %v10628_v0, 0.0  ;;  %v10587_v27 = vmul.f32 %v18766_v17, %v18858_v39 }
 0xa3b   : > { %13539 = vmatpush3.bf16.xpose.msk.msra.mxu0 %vm18919_vm8, %v13537_v9  ;;  %v10588_v25 = vmul.f32 %v18774_v63, %v18858_v39  ;;  %v10611_v24 = vadd.f32 %v18861_v18, %v10569_v26  ;;  %v10717_v45 = vsel %vm10645_vm12, %v10609_v53, %v10681_v28  ;;  %v10718_v41 = vsel %vm10646_vm6, %v10610_v10, %v10682_v58 }
 0xa3c   : > { %13542 = vmatprep.subr.msk.bf16.mxu0 %vm18919_vm8, %v13540_v47  ;;  %v10612_v48 = vadd.f32 %v18861_v18, %v10570_v1  ;;  %v10629_v22 = vadd.f32 %v18861_v18, %v10587_v27  ;;  %v10735_v5 = vsel %vm10663_vm5, %v10627_v37, %v10699_v21  ;;  %v10736_v32 = vsel %vm10664_vm3, %v10628_v0, %v10700_v62  ;;  %v10748_v47 = vpop.permute.xlu1 %10747  ;;  %v20481_v21 = vld [vmem:[#allocation54_spill] sm:$0xff] }
 0xa3d   : > { %v10630_v30 = vadd.f32 %v18861_v18, %v10588_v25  ;;  %v13549_v23 = vpack.c.bf16 %v10718_v41, %v10717_v45  ;;  %v10683_v54 = vmul.f32 0.2, %v10611_v24  ;;  %v13552_v20 = vpack.c.bf16 %v10736_v32, %v10735_v5 }
 0xa3e   : > { %v10684_v3 = vmul.f32 0.2, %v10612_v48  ;;  %vm10647_vm11 = vcmp.gt.f32.partialorder %v10611_v24, 0.0  ;;  %vm10648_vm4 = vcmp.gt.f32.partialorder %v10612_v48, 0.0  ;;  %v10701_v17 = vmul.f32 0.2, %v10629_v22 }
 0xa3f   : > { %v10702_v63 = vmul.f32 0.2, %v10630_v30  ;;  %v10571_v52 = vmul.f32 %v18654_v33, %v18858_v39  ;;  %v10572_v60 = vmul.f32 %v18662_v38, %v18858_v39  ;;  %vm10665_vm7 = vcmp.gt.f32.partialorder %v10629_v22, 0.0 }
 0xa40   : > { %vm10666_vm1 = vcmp.gt.f32.partialorder %v10630_v30, 0.0  ;;  %v10719_v34 = vsel %vm10647_vm11, %v10611_v24, %v10683_v54  ;;  %v10720_v4 = vsel %vm10648_vm4, %v10612_v48, %v10684_v3  ;;  %v10737_v14 = vsel %vm10665_vm7, %v10629_v22, %v10701_v17 }
 0xa41   : > { %v10613_v55 = vadd.f32 %v18861_v18, %v10571_v52  ;;  %v10614_v50 = vadd.f32 %v18861_v18, %v10572_v60  ;;  %v10738_v29 = vsel %vm10666_vm1, %v10630_v30, %v10702_v63  ;;  %v13555_v11 = vpack.c.bf16 %v10720_v4, %v10719_v34 }
 0xa42   : > { %v13558_v33 = vpack.c.bf16 %v10738_v29, %v10737_v14  ;;  %v14698_v35 = vmov 0.0|0.0   ;;  %vm20478_vm9 = vcmask 64512   ;;  %vm14699_vm14 = vmmov 0  }
 0xa43   : > { %13545 = vmatpush3.bf16.xpose.msk.msra.mxu0 %vm18919_vm8, %v13543_v12  ;;  %v10685_v36 = vmul.f32 0.2, %v10613_v55  ;;  %v10686_v9 = vmul.f32 0.2, %v10614_v50  ;;  %vm10649_vm0 = vcmp.gt.f32.partialorder %v10613_v55, 0.0  ;;  %vm10650_vm2 = vcmp.gt.f32.partialorder %v10614_v50, 0.0  ;;  %vm20480_vm15 = vmmov %vm20478_vm9 }
 0xa44   : > { %13548 = vmatprep.subr.msk.bf16.mxu0 %vm18919_vm8, %v13546_v51  ;;  %v20479_v40 = vmov 0.0   ;;  %v14700_v28 = vmov 1966171168   ;;  %v20482_v48 = vlaneseq }
 0xa45   : > { %v10721_v38 = vsel %vm10649_vm0, %v10613_v55, %v10685_v36  ;;  %v10722_v39 = vsel %vm10650_vm2, %v10614_v50, %v10686_v9  ;;  %v11033_v58 = vunpack.c.l.s4 %v14700_v28 }
 0xa46   : > { %v13561_v18 = vpack.c.bf16 %v10722_v39, %v10721_v38  ;;  %vm11057_vm13 = vcmp.lt.s32.totalorder %v20482_v48, 288 }
 0xa47   : > { %v11034_v51 = vunpack.c.0.s8 %v11033_v58 }
 0xa49   : > { %v11037_v62 = vsub.s32 %v11034_v51, %v20481_v21 }
 0xa4b   : > { %13551 = vmatpush3.bf16.xpose.msk.msra.mxu0 %vm18919_vm8, %v13549_v23 }
 0xa4c   : > { %13554 = vmatprep.subr.msk.bf16.mxu0 %vm18919_vm8, %v13552_v20 }
 0xa53   : > { %13557 = vmatpush3.bf16.xpose.msk.msra.mxu0 %vm18919_vm8, %v13555_v11 }
 0xa54   : > { %13560 = vmatprep.subr.msk.bf16.mxu0 %vm18919_vm8, %v13558_v33 }
 0xa5b   : > { %13563 = vmatpush3.bf16.xpose.msk.msra.mxu0 %vm18919_vm8, %v13561_v18 }
 0xa5c   : > { %13564 = vmatprep.subr.bf16.mxu0 %v14698_v35 }
 0xa62   : > { %12455 = vmatmul.mubr.msk.f32.vlgmr.msra.gmra.mrb[72].mxu0 %vm20478_vm9, %v18843_v57 }
 0xa63   : > { %13567 = vmatpush3.bf16.xpose.msk.msra.mxu0 %vm18919_vm8, %v13565_v42  ;;  %13513 = vmatprep.mubr.msk.f32.mxu0 %vm14699_vm14, %v20479_v40 }
 0xa64   : > { %13568 = vmatprep.subr.bf16.mxu0 %v14698_v35 }
 0xa6b   : > { %13571 = vmatpush3.bf16.xpose.msk.msra.mxu0 %vm18919_vm8, %v13569_v7  ;;  %vm11007_vm8 = vcmask 257024  }
 0xa72   : > { %13514 = vmatmul.mubr.msk.f32.vlgmr.msra.gmra.mrb[74].mxu0 %vm20480_vm15, %v18843_v57 }
 0xb35   : > { %v10927_v19 = vpop.f32.mrb[72].mxu0 }
 0xb36   : > { %v10928_v31 = vadd.f32 %v10927_v19, %v10748_v47  ;;  %v10929_v8 = vpop.f32.mrb[73].mxu0 }
 0xb37   : > { %v10930_v59 = vadd.f32 %v10929_v8, %v10748_v47 }
 0xb38   : > { %v11009_v42 = vsub.f32 0.0, %v10928_v31 }
 0xb39   : > { %v11004_v16 = vcombine.low %v10928_v31, %v10930_v59  ;;  %v11010_v13 = vsub.f32 0.0, %v10930_v59 }
 0xb3a   : > { %v11012_v49 = vmul.f32 1.442695, %v11009_v42 }
 0xb3b   : > { %11006 = vst [vmem:[%s521_s23] sm:$0xff] %v11004_v16  ;;  %v11014_v6 = vmul.f32 1.442695, %v11010_v13 }
 0xb3c   : > { %14603 = vpow2.f32 %v11012_v49 }
 0xb3d   : > { %14605 = vpow2.f32 %v11014_v6 }
 0xb45   : > { %v10998_v44 = vpop.f32.mrb[74].mxu0 }
 0xb46   : > { %v14604_v57 = vpop.eup %14603  ;;  %v10999_v7 = vadd.f32 %v10998_v44, %v10748_v47  ;;  %v13515_v43 = vpop.f32.mrb[75].mxu0 }
 0xb47   : > { %v14606_v56 = vpop.eup %14605  ;;  %v11018_v53 = vadd.f32 1.0, %v14604_v57 }
 0xb48   : > { %v11019_v10 = vadd.f32 1.0, %v14606_v56  ;;  %11008 = vst.msk [vmem:[%s521_s23 + $0x8] sm:$0xf] %vm11007_vm8, %v10999_v7  ;;  %v11011_v2 = vsub.f32 0.0, %v10999_v7 }
 0xb49   : > { %14607 = vrcp.f32 %v11018_v53 }
 0xb4a   : > { %14609 = vrcp.f32 %v11019_v10  ;;  %v11016_v61 = vmul.f32 1.442695, %v11011_v2 }
 0xb4c   : > { %14611 = vpow2.f32 %v11016_v61 }
 0xb53   : > { %v14608_v37 = vpop.eup %14607 }
 0xb54   : > { %v14610_v0 = vpop.eup %14609 }
 0xb55   : > { %v11030_v46 = vcombine.high %v14608_v37, %v14610_v0 }
 0xb56   : > { %v14612_v15 = vpop.eup %14611 }
 0xb57   : > { %v11020_v12 = vadd.f32 1.0, %v14612_v15  ;;  %v11038_v27 = vrot.slane %v11030_v46, %v11037_v62 }
 0xb59   : > { %14613 = vrcp.f32 %v11020_v12 }
 0xb63   : > { %v14614_v26 = vpop.eup %14613 }
 0xb64   : > { %v11031_v1 = vcombine.high %v14614_v26, %v14614_v26 }
 0xb66   : > { %v11045_v25 = vrot.slane %v11031_v1, %v11037_v62 }
 0xb68   : > { %v11046_v24 = vcombine.low %v11038_v27, %v11045_v25 }
 0xb6a   : > { %v11053_v45 = vrot.slane %v11046_v24, %v11037_v62 }
 0xb6c   : > { %11059 = vst.msk [vmem:[%s525_s22] sm:$0x7] %vm11057_vm13, %v11053_v45 }
 0xb6d PF: > { %s26_s18 = sadd.s32 1, %s14694_s18  }
 0xb6e   : > { %p23_p4 = scmp.ge.s32.totalorder %s26_s18, 4  }
 0xb70   :  { %25 = sbr.rel (!%p23_p4) target bundleno = 1 (0x1), region = 145 }

</bundles_post_ra>
